<compile_context>
chip_gen: v6e
topology: v6e:2x2x1
jax: 0.10.0
libtpu: 0.0.40
codegen_flags: <defaults>
</compile_context>

<pallas_src>
import functools

import jax
import jax.numpy as jnp
from jax import lax
from jax.experimental import pallas as pl
from jax.experimental.pallas import tpu as pltpu


def _round_up(a, b):
    return -(-a // b) * b


def _vmem_budget_bytes():
    """Per-generation VMEM budget (leave headroom for Mosaic internal scratch)."""
    try:
        info = pltpu.get_tpu_info()
        cap = getattr(info, "vmem_capacity_bytes", None)
        if cap:
            return int(cap * 0.7)
    except Exception:
        pass
    return 44 * 1024 * 1024  # safe even on v7x (64 MiB VMEM per TensorCore)


def _step_vmem_bytes(TD, D, H, W, Cin, Cout, HB, itemsize, has_residual):
    """Per-grid-step VMEM footprint, including (sublane, 128-lane) physical tiling,
    double-buffered blocks, the f32 accumulator and live tap-window temporaries."""
    sub = {4: 8, 2: 16, 1: 32}.get(itemsize, 8)

    def tile2(second_minor, minor, isz):
        return _round_up(second_minor, sub if isz == itemsize else 8) * _round_up(minor, 128) * isz

    Dp, Hp, Wp = D + 2, H + 2, W + 2
    b = 0
    b += 2 * Dp * Hp * tile2(Wp, Cin, itemsize)            # full padded volume (dbl-buffered)
    b += 2 * 27 * tile2(Cin, Cout, itemsize)               # weights
    b += 2 * tile2(1, Cout, 4)                             # bias (f32)
    b += 2 * TD * H * tile2(W, Cout, itemsize)             # output block
    if has_residual:
        b += 2 * TD * H * tile2(W, Cout, itemsize)         # residual block
    M = HB * W
    b += 4 * tile2(M, Cin, itemsize)                       # live tap windows / lhs
    b += 3 * tile2(M, Cout, 4)                             # f32 accumulator + dot result + epilogue
    return b


def _select_tiles(D, H, W, Cin, Cout, itemsize, has_residual, budget, m_target=2048):
    # H sub-chunk: largest divisor of H with HB*W <= m_target (bounds matmul M).
    hb_cands = [h for h in range(1, H + 1) if H % h == 0]
    fits_m = [h for h in hb_cands if h * W <= m_target]
    HB = max(fits_m) if fits_m else 1
    # Depth tile: largest divisor of D (prefer >= 2 grid steps for pipelining /
    # megacore) whose per-step footprint fits the budget.
    td_cands = sorted([d for d in range(1, D + 1) if D % d == 0], reverse=True)
    preferred = [d for d in td_cands if D // d >= 2] or td_cands
    for TD in preferred + td_cands:
        if _step_vmem_bytes(TD, D, H, W, Cin, Cout, HB, itemsize, has_residual) <= budget:
            return TD, HB
    return 1, HB


def _conv_bn_relu_kernel(x_ref, w_ref, bias_ref, *rest,
                         TD, H, W, HB, Cin, Cout, has_residual):
    """One (batch, depth-tile) step of 3x3x3 conv (stride=1, SAME) with BN scale
    pre-folded into the weights, + bias [+ residual] + ReLU.

    x_ref:    (1, D+2, H+2, W+2, Cin)  full padded volume for this batch element
                                        (index_map constant in t -> fetched once per n)
    w_ref:    (3, 3, 3, Cin, Cout)     BN-scale-folded weights
    bias_ref: (1, Cout)                fused BN bias (f32)
    res_ref:  (1, TD, H, W, Cout)      residual tile (only when has_residual)
    o_ref:    (1, TD, H, W, Cout)      output tile
    """
    if has_residual:
        res_ref, o_ref = rest
    else:
        res_ref = None
        (o_ref,) = rest

    t = pl.program_id(1)
    n_hc = H // HB

    def row_body(d, carry):
        # Padded-depth index of the kd=0 tap for output depth row (t*TD + d).
        base = t * TD + d
        for hc in range(n_hc):
            h0 = hc * HB
            # Per-tap matmul accumulation (no im2col concat); f32 accumulator is a
            # value (register / compiler-managed), M = HB*W rows per matmul.
            acc = jnp.zeros((HB * W, Cout), dtype=jnp.float32)
            for kd in range(3):
                for kh in range(3):
                    for kw in range(3):
                        win = x_ref[0, pl.ds(base + kd, 1),
                                    h0 + kh:h0 + kh + HB,
                                    kw:kw + W, :]
                        acc = acc + jnp.dot(
                            win.reshape(HB * W, Cin), w_ref[kd, kh, kw],
                            preferred_element_type=jnp.float32)
            # Epilogue: fused BN bias, optional residual, ReLU.
            y = acc + bias_ref[...]
            if has_residual:
                r = res_ref[0, pl.ds(d, 1), h0:h0 + HB, :, :]
                y = y + r.reshape(HB * W, Cout).astype(jnp.float32)
            y = jnp.maximum(y, 0.0)
            o_ref[0, pl.ds(d, 1), h0:h0 + HB, :, :] = (
                y.reshape(1, HB, W, Cout).astype(o_ref.dtype))
        return carry

    lax.fori_loop(0, TD, row_body, 0)


def conv3x3x3_bn_relu(x, w, scale, bias, residual=None):
    """3x3x3 conv (stride=1, padding=1, no bias) + fused eval-BN + optional residual + ReLU.

    x:          (N, D, H, W, Cin)
    w:          (3, 3, 3, Cin, Cout)
    scale/bias: (Cout,)   fused BN affine
    residual:   optional (N, D, H, W, Cout)
    """
    N, D, H, W, Cin = x.shape
    Cout = w.shape[-1]
    has_residual = residual is not None
    itemsize = x.dtype.itemsize

    budget = _vmem_budget_bytes()
    TD, HB = _select_tiles(D, H, W, Cin, Cout, itemsize, has_residual, budget)
    nT = D // TD

    # SAME padding for the 3x3x3 kernel (one HBM pass; see TODO about in-kernel halos).
    x_pad = jnp.pad(x, ((0, 0), (1, 1), (1, 1), (1, 1), (0, 0)))
    Dp, Hp, Wp = D + 2, H + 2, W + 2

    # Fold the BN scale into the conv weights (per output channel).
    w_f = (w * scale.reshape(1, 1, 1, 1, Cout)).astype(w.dtype)
    bias2 = bias.reshape(1, Cout).astype(jnp.float32)

    in_specs = [
        # Full padded volume per batch element; block index constant across the
        # depth-tile axis -> fetched once per n, kept resident (no re-DMA, no
        # VMEM->VMEM slab assembly).
        pl.BlockSpec((1, Dp, Hp, Wp, Cin), lambda n, t: (n, 0, 0, 0, 0)),
        pl.BlockSpec((3, 3, 3, Cin, Cout), lambda n, t: (0, 0, 0, 0, 0)),
        pl.BlockSpec((1, Cout), lambda n, t: (0, 0)),
    ]
    args = [x_pad, w_f, bias2]
    if has_residual:
        in_specs.append(pl.BlockSpec((1, TD, H, W, Cout), lambda n, t: (n, t, 0, 0, 0)))
        args.append(residual)

    kernel = functools.partial(
        _conv_bn_relu_kernel, TD=TD, H=H, W=W, HB=HB, Cin=Cin, Cout=Cout,
        has_residual=has_residual)

    need = _step_vmem_bytes(TD, D, H, W, Cin, Cout, HB, itemsize, has_residual)
    vmem_limit = int(min(budget, max(need + (2 << 20), 32 << 20)))

    flops = 2 * N * D * H * W * 27 * Cin * Cout + 3 * N * D * H * W * Cout
    bytes_accessed = (
        N * Dp * Hp * Wp * Cin * itemsize
        + int(w_f.size) * w_f.dtype.itemsize
        + int(bias2.size) * 4
        + N * D * H * W * Cout * itemsize * (2 if has_residual else 1))

    return pl.pallas_call(
        kernel,
        out_shape=jax.ShapeDtypeStruct((N, D, H, W, Cout), x.dtype),
        grid=(N, nT),
        in_specs=in_specs,
        out_specs=pl.BlockSpec((1, TD, H, W, Cout), lambda n, t: (n, t, 0, 0, 0)),
        compiler_params=pltpu.CompilerParams(
            dimension_semantics=("parallel", "parallel"),
            vmem_limit_bytes=vmem_limit),
        cost_estimate=pl.CostEstimate(
            flops=int(flops), transcendentals=0, bytes_accessed=int(bytes_accessed)),
    )(*args)


def basic_block_forward(x, params):
    """BasicBlock forward (stride=1, downsample=None) in NDHWC layout."""
    w1, s1, b1, w2, s2, b2 = params
    # out = relu(bn1(conv1(x)))         -- no residual, no zeros tensor materialized
    out = conv3x3x3_bn_relu(x, w1, s1, b1)
    # out = relu(bn2(conv2(out)) + x)   -- residual fused into the epilogue
    out = conv3x3x3_bn_relu(out, w2, s2, b2, residual=x)
    return out
    # TODO(synk): stride=2 / channel-changing downsample variants are not implemented
    #             (the module under test uses stride=1, downsample=None).


def _fuse_bn(gamma, beta, running_mean, running_var, eps=1e-5):
    scale = gamma / jnp.sqrt(running_var + eps)
    bias = beta - running_mean * scale
    return scale, bias


def _reference_forward(x, params):
    """Pure-JAX reference (lax.conv_general_dilated) for validation."""
    w1, s1, b1, w2, s2, b2 = params

    def conv(inp, w):
        return lax.conv_general_dilated(
            inp, w, window_strides=(1, 1, 1), padding="SAME",
            dimension_numbers=("NDHWC", "DHWIO", "NDHWC"),
        )

    out = jnp.maximum(conv(x, w1) * s1 + b1, 0.0)
    out = jnp.maximum(conv(out, w2) * s2 + b2 + x, 0.0)
    return out


if __name__ == "__main__":
    key = jax.random.PRNGKey(0)
    k_x, k_w1, k_w2, k_bn1, k_bn2 = jax.random.split(key, 5)

    # Small shapes: batch=2, in_planes=planes=8, spatial D=H=W=16 (stride=1, no downsample).
    N, D, H, W = 2, 16, 16, 16
    in_planes = planes = 8

    x = jax.random.normal(k_x, (N, D, H, W, in_planes), dtype=jnp.float32)

    w1 = jax.random.normal(k_w1, (3, 3, 3, in_planes, planes), jnp.float32) * ((in_planes * 27) ** -0.5)
    w2 = jax.random.normal(k_w2, (3, 3, 3, planes, planes), jnp.float32) * ((planes * 27) ** -0.5)

    def bn_params(k, c):
        kg, kb, km, kv = jax.random.split(k, 4)
        gamma = 1.0 + 0.1 * jax.random.normal(kg, (c,), jnp.float32)
        beta = 0.1 * jax.random.normal(kb, (c,), jnp.float32)
        mean = 0.1 * jax.random.normal(km, (c,), jnp.float32)
        var = 1.0 + 0.1 * jax.nn.softplus(jax.random.normal(kv, (c,), jnp.float32))
        return _fuse_bn(gamma, beta, mean, var)

    s1, b1 = bn_params(k_bn1, planes)
    s2, b2 = bn_params(k_bn2, planes)
    params = (w1, s1, b1, w2, s2, b2)

    out = basic_block_forward(x, params)
    out = jax.block_until_ready(out)

    ref = _reference_forward(x, params)
    assert out.shape == (N, D, H, W, planes)
    assert jnp.allclose(out, ref, rtol=2e-4, atol=2e-4), "mismatch vs JAX reference"

    print("KERNEL_OK")
</pallas_src>

<mosaic_0001>
module attributes {stable_mosaic.version = 11 : i64} {
  func.func @_conv_bn_relu_kernel(%arg0: i32, %arg1: i32, %arg2: memref<1x18x18x18x8xf32, #tpu.memory_space<vmem>>, %arg3: memref<3x3x3x8x8xf32, #tpu.memory_space<vmem>>, %arg4: memref<1x8xf32, #tpu.memory_space<vmem>>, %arg5: memref<1x8x16x16x8xf32, #tpu.memory_space<vmem>>) attributes {dimension_semantics = [#tpu.dimension_semantics<parallel>, #tpu.dimension_semantics<parallel>], iteration_bounds = array<i64: 2, 2>, scalar_prefetch = 0 : i64, scratch_operands = 0 : i64, tpu.core_type = #tpu.core_type<tc>, window_params = [{transform_indices = @transform_0, window_bounds = array<i64: 1, 18, 18, 18, 8>}, {pipeline_mode = #tpu.pipeline_mode<synchronous>, transform_indices = @transform_1, window_bounds = array<i64: 3, 3, 3, 8, 8>}, {pipeline_mode = #tpu.pipeline_mode<synchronous>, transform_indices = @transform_2, window_bounds = array<i64: 1, 8>}, {transform_indices = @transform_3, window_bounds = array<i64: 1, 8, 16, 16, 8>}]} {
    %c0_i32 = arith.constant 0 : i32
    %c8_i32 = arith.constant 8 : i32
    %0 = arith.addi %c0_i32, %c8_i32 : i32
    %c1_i32 = arith.constant 1 : i32
    scf.for %arg6 = %c0_i32 to %0 step %c1_i32  : i32 {
      %c8_i32_1 = arith.constant 8 : i32
      %1 = arith.muli %arg1, %c8_i32_1 : i32
      %2 = arith.addi %1, %arg6 : i32
      %cst = arith.constant 0.000000e+00 : f32
      %3 = vector.broadcast %cst : f32 to vector<256x8xf32>
      %c0_i32_2 = arith.constant 0 : i32
      %4 = arith.addi %2, %c0_i32_2 : i32
      %c0 = arith.constant 0 : index
      %5 = arith.index_cast %4 : i32 to index
      %c0_3 = arith.constant 0 : index
      %c0_4 = arith.constant 0 : index
      %c0_5 = arith.constant 0 : index
      %6 = vector.load %arg2[%c0, %5, %c0_3, %c0_4, %c0_5] : memref<1x18x18x18x8xf32, #tpu.memory_space<vmem>>, vector<1x1x16x16x8xf32>
      %7 = vector.shape_cast %6 : vector<1x1x16x16x8xf32> to vector<1x16x16x8xf32>
      %8 = vector.shape_cast %7 : vector<1x16x16x8xf32> to vector<256x8xf32>
      %c0_6 = arith.constant 0 : index
      %c0_7 = arith.constant 0 : index
      %c0_8 = arith.constant 0 : index
      %c0_9 = arith.constant 0 : index
      %c0_10 = arith.constant 0 : index
      %9 = vector.load %arg3[%c0_6, %c0_7, %c0_8, %c0_9, %c0_10] : memref<3x3x3x8x8xf32, #tpu.memory_space<vmem>>, vector<1x1x1x8x8xf32>
      %10 = vector.shape_cast %9 : vector<1x1x1x8x8xf32> to vector<8x8xf32>
      %cst_11 = arith.constant dense<0.000000e+00> : vector<256x8xf32>
      %11 = tpu.matmul %8, %10, %cst_11 {dimension_numbers = #tpu.dot_dimension_numbers<[1], [0], [0], [1], [0, 0, 1, 1], [], []>} : vector<256x8xf32>, vector<8x8xf32>, vector<256x8xf32> -> vector<256x8xf32>
      %12 = arith.addf %3, %11 : vector<256x8xf32>
      %c0_i32_12 = arith.constant 0 : i32
      %13 = arith.addi %2, %c0_i32_12 : i32
      %c0_13 = arith.constant 0 : index
      %14 = arith.index_cast %13 : i32 to index
      %c0_14 = arith.constant 0 : index
      %c1 = arith.constant 1 : index
      %c0_15 = arith.constant 0 : index
      %15 = vector.load %arg2[%c0_13, %14, %c0_14, %c1, %c0_15] : memref<1x18x18x18x8xf32, #tpu.memory_space<vmem>>, vector<1x1x16x16x8xf32>
      %16 = vector.shape_cast %15 : vector<1x1x16x16x8xf32> to vector<1x16x16x8xf32>
      %17 = vector.shape_cast %16 : vector<1x16x16x8xf32> to vector<256x8xf32>
      %c0_16 = arith.constant 0 : index
      %c0_17 = arith.constant 0 : index
      %c1_18 = arith.constant 1 : index
      %c0_19 = arith.constant 0 : index
      %c0_20 = arith.constant 0 : index
      %18 = vector.load %arg3[%c0_16, %c0_17, %c1_18, %c0_19, %c0_20] : memref<3x3x3x8x8xf32, #tpu.memory_space<vmem>>, vector<1x1x1x8x8xf32>
      %19 = vector.shape_cast %18 : vector<1x1x1x8x8xf32> to vector<8x8xf32>
      %cst_21 = arith.constant dense<0.000000e+00> : vector<256x8xf32>
      %20 = tpu.matmul %17, %19, %cst_21 {dimension_numbers = #tpu.dot_dimension_numbers<[1], [0], [0], [1], [0, 0, 1, 1], [], []>} : vector<256x8xf32>, vector<8x8xf32>, vector<256x8xf32> -> vector<256x8xf32>
      %21 = arith.addf %12, %20 : vector<256x8xf32>
      %c0_i32_22 = arith.constant 0 : i32
      %22 = arith.addi %2, %c0_i32_22 : i32
      %c0_23 = arith.constant 0 : index
      %23 = arith.index_cast %22 : i32 to index
      %c0_24 = arith.constant 0 : index
      %c2 = arith.constant 2 : index
      %c0_25 = arith.constant 0 : index
      %24 = vector.load %arg2[%c0_23, %23, %c0_24, %c2, %c0_25] : memref<1x18x18x18x8xf32, #tpu.memory_space<vmem>>, vector<1x1x16x16x8xf32>
      %25 = vector.shape_cast %24 : vector<1x1x16x16x8xf32> to vector<1x16x16x8xf32>
      %26 = vector.shape_cast %25 : vector<1x16x16x8xf32> to vector<256x8xf32>
      %c0_26 = arith.constant 0 : index
      %c0_27 = arith.constant 0 : index
      %c2_28 = arith.constant 2 : index
      %c0_29 = arith.constant 0 : index
      %c0_30 = arith.constant 0 : index
      %27 = vector.load %arg3[%c0_26, %c0_27, %c2_28, %c0_29, %c0_30] : memref<3x3x3x8x8xf32, #tpu.memory_space<vmem>>, vector<1x1x1x8x8xf32>
      %28 = vector.shape_cast %27 : vector<1x1x1x8x8xf32> to vector<8x8xf32>
      %cst_31 = arith.constant dense<0.000000e+00> : vector<256x8xf32>
      %29 = tpu.matmul %26, %28, %cst_31 {dimension_numbers = #tpu.dot_dimension_numbers<[1], [0], [0], [1], [0, 0, 1, 1], [], []>} : vector<256x8xf32>, vector<8x8xf32>, vector<256x8xf32> -> vector<256x8xf32>
      %30 = arith.addf %21, %29 : vector<256x8xf32>
      %c0_i32_32 = arith.constant 0 : i32
      %31 = arith.addi %2, %c0_i32_32 : i32
      %c0_33 = arith.constant 0 : index
      %32 = arith.index_cast %31 : i32 to index
      %c1_34 = arith.constant 1 : index
      %c0_35 = arith.constant 0 : index
      %c0_36 = arith.constant 0 : index
      %33 = vector.load %arg2[%c0_33, %32, %c1_34, %c0_35, %c0_36] : memref<1x18x18x18x8xf32, #tpu.memory_space<vmem>>, vector<1x1x16x16x8xf32>
      %34 = vector.shape_cast %33 : vector<1x1x16x16x8xf32> to vector<1x16x16x8xf32>
      %35 = vector.shape_cast %34 : vector<1x16x16x8xf32> to vector<256x8xf32>
      %c0_37 = arith.constant 0 : index
      %c1_38 = arith.constant 1 : index
      %c0_39 = arith.constant 0 : index
      %c0_40 = arith.constant 0 : index
      %c0_41 = arith.constant 0 : index
      %36 = vector.load %arg3[%c0_37, %c1_38, %c0_39, %c0_40, %c0_41] : memref<3x3x3x8x8xf32, #tpu.memory_space<vmem>>, vector<1x1x1x8x8xf32>
      %37 = vector.shape_cast %36 : vector<1x1x1x8x8xf32> to vector<8x8xf32>
      %cst_42 = arith.constant dense<0.000000e+00> : vector<256x8xf32>
      %38 = tpu.matmul %35, %37, %cst_42 {dimension_numbers = #tpu.dot_dimension_numbers<[1], [0], [0], [1], [0, 0, 1, 1], [], []>} : vector<256x8xf32>, vector<8x8xf32>, vector<256x8xf32> -> vector<256x8xf32>
      %39 = arith.addf %30, %38 : vector<256x8xf32>
      %c0_i32_43 = arith.constant 0 : i32
      %40 = arith.addi %2, %c0_i32_43 : i32
      %c0_44 = arith.constant 0 : index
      %41 = arith.index_cast %40 : i32 to index
      %c1_45 = arith.constant 1 : index
      %c1_46 = arith.constant 1 : index
      %c0_47 = arith.constant 0 : index
      %42 = vector.load %arg2[%c0_44, %41, %c1_45, %c1_46, %c0_47] : memref<1x18x18x18x8xf32, #tpu.memory_space<vmem>>, vector<1x1x16x16x8xf32>
      %43 = vector.shape_cast %42 : vector<1x1x16x16x8xf32> to vector<1x16x16x8xf32>
      %44 = vector.shape_cast %43 : vector<1x16x16x8xf32> to vector<256x8xf32>
      %c0_48 = arith.constant 0 : index
      %c1_49 = arith.constant 1 : index
      %c1_50 = arith.constant 1 : index
      %c0_51 = arith.constant 0 : index
      %c0_52 = arith.constant 0 : index
      %45 = vector.load %arg3[%c0_48, %c1_49, %c1_50, %c0_51, %c0_52] : memref<3x3x3x8x8xf32, #tpu.memory_space<vmem>>, vector<1x1x1x8x8xf32>
      %46 = vector.shape_cast %45 : vector<1x1x1x8x8xf32> to vector<8x8xf32>
      %cst_53 = arith.constant dense<0.000000e+00> : vector<256x8xf32>
      %47 = tpu.matmul %44, %46, %cst_53 {dimension_numbers = #tpu.dot_dimension_numbers<[1], [0], [0], [1], [0, 0, 1, 1], [], []>} : vector<256x8xf32>, vector<8x8xf32>, vector<256x8xf32> -> vector<256x8xf32>
      %48 = arith.addf %39, %47 : vector<256x8xf32>
      %c0_i32_54 = arith.constant 0 : i32
      %49 = arith.addi %2, %c0_i32_54 : i32
      %c0_55 = arith.constant 0 : index
      %50 = arith.index_cast %49 : i32 to index
      %c1_56 = arith.constant 1 : index
      %c2_57 = arith.constant 2 : index
      %c0_58 = arith.constant 0 : index
      %51 = vector.load %arg2[%c0_55, %50, %c1_56, %c2_57, %c0_58] : memref<1x18x18x18x8xf32, #tpu.memory_space<vmem>>, vector<1x1x16x16x8xf32>
      %52 = vector.shape_cast %51 : vector<1x1x16x16x8xf32> to vector<1x16x16x8xf32>
      %53 = vector.shape_cast %52 : vector<1x16x16x8xf32> to vector<256x8xf32>
      %c0_59 = arith.constant 0 : index
      %c1_60 = arith.constant 1 : index
      %c2_61 = arith.constant 2 : index
      %c0_62 = arith.constant 0 : index
      %c0_63 = arith.constant 0 : index
      %54 = vector.load %arg3[%c0_59, %c1_60, %c2_61, %c0_62, %c0_63] : memref<3x3x3x8x8xf32, #tpu.memory_space<vmem>>, vector<1x1x1x8x8xf32>
      %55 = vector.shape_cast %54 : vector<1x1x1x8x8xf32> to vector<8x8xf32>
      %cst_64 = arith.constant dense<0.000000e+00> : vector<256x8xf32>
      %56 = tpu.matmul %53, %55, %cst_64 {dimension_numbers = #tpu.dot_dimension_numbers<[1], [0], [0], [1], [0, 0, 1, 1], [], []>} : vector<256x8xf32>, vector<8x8xf32>, vector<256x8xf32> -> vector<256x8xf32>
      %57 = arith.addf %48, %56 : vector<256x8xf32>
      %c0_i32_65 = arith.constant 0 : i32
      %58 = arith.addi %2, %c0_i32_65 : i32
      %c0_66 = arith.constant 0 : index
      %59 = arith.index_cast %58 : i32 to index
      %c2_67 = arith.constant 2 : index
      %c0_68 = arith.constant 0 : index
      %c0_69 = arith.constant 0 : index
      %60 = vector.load %arg2[%c0_66, %59, %c2_67, %c0_68, %c0_69] : memref<1x18x18x18x8xf32, #tpu.memory_space<vmem>>, vector<1x1x16x16x8xf32>
      %61 = vector.shape_cast %60 : vector<1x1x16x16x8xf32> to vector<1x16x16x8xf32>
      %62 = vector.shape_cast %61 : vector<1x16x16x8xf32> to vector<256x8xf32>
      %c0_70 = arith.constant 0 : index
      %c2_71 = arith.constant 2 : index
      %c0_72 = arith.constant 0 : index
      %c0_73 = arith.constant 0 : index
      %c0_74 = arith.constant 0 : index
      %63 = vector.load %arg3[%c0_70, %c2_71, %c0_72, %c0_73, %c0_74] : memref<3x3x3x8x8xf32, #tpu.memory_space<vmem>>, vector<1x1x1x8x8xf32>
      %64 = vector.shape_cast %63 : vector<1x1x1x8x8xf32> to vector<8x8xf32>
      %cst_75 = arith.constant dense<0.000000e+00> : vector<256x8xf32>
      %65 = tpu.matmul %62, %64, %cst_75 {dimension_numbers = #tpu.dot_dimension_numbers<[1], [0], [0], [1], [0, 0, 1, 1], [], []>} : vector<256x8xf32>, vector<8x8xf32>, vector<256x8xf32> -> vector<256x8xf32>
      %66 = arith.addf %57, %65 : vector<256x8xf32>
      %c0_i32_76 = arith.constant 0 : i32
      %67 = arith.addi %2, %c0_i32_76 : i32
      %c0_77 = arith.constant 0 : index
      %68 = arith.index_cast %67 : i32 to index
      %c2_78 = arith.constant 2 : index
      %c1_79 = arith.constant 1 : index
      %c0_80 = arith.constant 0 : index
      %69 = vector.load %arg2[%c0_77, %68, %c2_78, %c1_79, %c0_80] : memref<1x18x18x18x8xf32, #tpu.memory_space<vmem>>, vector<1x1x16x16x8xf32>
      %70 = vector.shape_cast %69 : vector<1x1x16x16x8xf32> to vector<1x16x16x8xf32>
      %71 = vector.shape_cast %70 : vector<1x16x16x8xf32> to vector<256x8xf32>
      %c0_81 = arith.constant 0 : index
      %c2_82 = arith.constant 2 : index
      %c1_83 = arith.constant 1 : index
      %c0_84 = arith.constant 0 : index
      %c0_85 = arith.constant 0 : index
      %72 = vector.load %arg3[%c0_81, %c2_82, %c1_83, %c0_84, %c0_85] : memref<3x3x3x8x8xf32, #tpu.memory_space<vmem>>, vector<1x1x1x8x8xf32>
      %73 = vector.shape_cast %72 : vector<1x1x1x8x8xf32> to vector<8x8xf32>
      %cst_86 = arith.constant dense<0.000000e+00> : vector<256x8xf32>
      %74 = tpu.matmul %71, %73, %cst_86 {dimension_numbers = #tpu.dot_dimension_numbers<[1], [0], [0], [1], [0, 0, 1, 1], [], []>} : vector<256x8xf32>, vector<8x8xf32>, vector<256x8xf32> -> vector<256x8xf32>
      %75 = arith.addf %66, %74 : vector<256x8xf32>
      %c0_i32_87 = arith.constant 0 : i32
      %76 = arith.addi %2, %c0_i32_87 : i32
      %c0_88 = arith.constant 0 : index
      %77 = arith.index_cast %76 : i32 to index
      %c2_89 = arith.constant 2 : index
      %c2_90 = arith.constant 2 : index
      %c0_91 = arith.constant 0 : index
      %78 = vector.load %arg2[%c0_88, %77, %c2_89, %c2_90, %c0_91] : memref<1x18x18x18x8xf32, #tpu.memory_space<vmem>>, vector<1x1x16x16x8xf32>
      %79 = vector.shape_cast %78 : vector<1x1x16x16x8xf32> to vector<1x16x16x8xf32>
      %80 = vector.shape_cast %79 : vector<1x16x16x8xf32> to vector<256x8xf32>
      %c0_92 = arith.constant 0 : index
      %c2_93 = arith.constant 2 : index
      %c2_94 = arith.constant 2 : index
      %c0_95 = arith.constant 0 : index
      %c0_96 = arith.constant 0 : index
      %81 = vector.load %arg3[%c0_92, %c2_93, %c2_94, %c0_95, %c0_96] : memref<3x3x3x8x8xf32, #tpu.memory_space<vmem>>, vector<1x1x1x8x8xf32>
      %82 = vector.shape_cast %81 : vector<1x1x1x8x8xf32> to vector<8x8xf32>
      %cst_97 = arith.constant dense<0.000000e+00> : vector<256x8xf32>
      %83 = tpu.matmul %80, %82, %cst_97 {dimension_numbers = #tpu.dot_dimension_numbers<[1], [0], [0], [1], [0, 0, 1, 1], [], []>} : vector<256x8xf32>, vector<8x8xf32>, vector<256x8xf32> -> vector<256x8xf32>
      %84 = arith.addf %75, %83 : vector<256x8xf32>
      %c1_i32_98 = arith.constant 1 : i32
      %85 = arith.addi %2, %c1_i32_98 : i32
      %c0_99 = arith.constant 0 : index
      %86 = arith.index_cast %85 : i32 to index
      %c0_100 = arith.constant 0 : index
      %c0_101 = arith.constant 0 : index
      %c0_102 = arith.constant 0 : index
      %87 = vector.load %arg2[%c0_99, %86, %c0_100, %c0_101, %c0_102] : memref<1x18x18x18x8xf32, #tpu.memory_space<vmem>>, vector<1x1x16x16x8xf32>
      %88 = vector.shape_cast %87 : vector<1x1x16x16x8xf32> to vector<1x16x16x8xf32>
      %89 = vector.shape_cast %88 : vector<1x16x16x8xf32> to vector<256x8xf32>
      %c1_103 = arith.constant 1 : index
      %c0_104 = arith.constant 0 : index
      %c0_105 = arith.constant 0 : index
      %c0_106 = arith.constant 0 : index
      %c0_107 = arith.constant 0 : index
      %90 = vector.load %arg3[%c1_103, %c0_104, %c0_105, %c0_106, %c0_107] : memref<3x3x3x8x8xf32, #tpu.memory_space<vmem>>, vector<1x1x1x8x8xf32>
      %91 = vector.shape_cast %90 : vector<1x1x1x8x8xf32> to vector<8x8xf32>
      %cst_108 = arith.constant dense<0.000000e+00> : vector<256x8xf32>
      %92 = tpu.matmul %89, %91, %cst_108 {dimension_numbers = #tpu.dot_dimension_numbers<[1], [0], [0], [1], [0, 0, 1, 1], [], []>} : vector<256x8xf32>, vector<8x8xf32>, vector<256x8xf32> -> vector<256x8xf32>
      %93 = arith.addf %84, %92 : vector<256x8xf32>
      %c1_i32_109 = arith.constant 1 : i32
      %94 = arith.addi %2, %c1_i32_109 : i32
      %c0_110 = arith.constant 0 : index
      %95 = arith.index_cast %94 : i32 to index
      %c0_111 = arith.constant 0 : index
      %c1_112 = arith.constant 1 : index
      %c0_113 = arith.constant 0 : index
      %96 = vector.load %arg2[%c0_110, %95, %c0_111, %c1_112, %c0_113] : memref<1x18x18x18x8xf32, #tpu.memory_space<vmem>>, vector<1x1x16x16x8xf32>
      %97 = vector.shape_cast %96 : vector<1x1x16x16x8xf32> to vector<1x16x16x8xf32>
      %98 = vector.shape_cast %97 : vector<1x16x16x8xf32> to vector<256x8xf32>
      %c1_114 = arith.constant 1 : index
      %c0_115 = arith.constant 0 : index
      %c1_116 = arith.constant 1 : index
      %c0_117 = arith.constant 0 : index
      %c0_118 = arith.constant 0 : index
      %99 = vector.load %arg3[%c1_114, %c0_115, %c1_116, %c0_117, %c0_118] : memref<3x3x3x8x8xf32, #tpu.memory_space<vmem>>, vector<1x1x1x8x8xf32>
      %100 = vector.shape_cast %99 : vector<1x1x1x8x8xf32> to vector<8x8xf32>
      %cst_119 = arith.constant dense<0.000000e+00> : vector<256x8xf32>
      %101 = tpu.matmul %98, %100, %cst_119 {dimension_numbers = #tpu.dot_dimension_numbers<[1], [0], [0], [1], [0, 0, 1, 1], [], []>} : vector<256x8xf32>, vector<8x8xf32>, vector<256x8xf32> -> vector<256x8xf32>
      %102 = arith.addf %93, %101 : vector<256x8xf32>
      %c1_i32_120 = arith.constant 1 : i32
      %103 = arith.addi %2, %c1_i32_120 : i32
      %c0_121 = arith.constant 0 : index
      %104 = arith.index_cast %103 : i32 to index
      %c0_122 = arith.constant 0 : index
      %c2_123 = arith.constant 2 : index
      %c0_124 = arith.constant 0 : index
      %105 = vector.load %arg2[%c0_121, %104, %c0_122, %c2_123, %c0_124] : memref<1x18x18x18x8xf32, #tpu.memory_space<vmem>>, vector<1x1x16x16x8xf32>
      %106 = vector.shape_cast %105 : vector<1x1x16x16x8xf32> to vector<1x16x16x8xf32>
      %107 = vector.shape_cast %106 : vector<1x16x16x8xf32> to vector<256x8xf32>
      %c1_125 = arith.constant 1 : index
      %c0_126 = arith.constant 0 : index
      %c2_127 = arith.constant 2 : index
      %c0_128 = arith.constant 0 : index
      %c0_129 = arith.constant 0 : index
      %108 = vector.load %arg3[%c1_125, %c0_126, %c2_127, %c0_128, %c0_129] : memref<3x3x3x8x8xf32, #tpu.memory_space<vmem>>, vector<1x1x1x8x8xf32>
      %109 = vector.shape_cast %108 : vector<1x1x1x8x8xf32> to vector<8x8xf32>
      %cst_130 = arith.constant dense<0.000000e+00> : vector<256x8xf32>
      %110 = tpu.matmul %107, %109, %cst_130 {dimension_numbers = #tpu.dot_dimension_numbers<[1], [0], [0], [1], [0, 0, 1, 1], [], []>} : vector<256x8xf32>, vector<8x8xf32>, vector<256x8xf32> -> vector<256x8xf32>
      %111 = arith.addf %102, %110 : vector<256x8xf32>
      %c1_i32_131 = arith.constant 1 : i32
      %112 = arith.addi %2, %c1_i32_131 : i32
      %c0_132 = arith.constant 0 : index
      %113 = arith.index_cast %112 : i32 to index
      %c1_133 = arith.constant 1 : index
      %c0_134 = arith.constant 0 : index
      %c0_135 = arith.constant 0 : index
      %114 = vector.load %arg2[%c0_132, %113, %c1_133, %c0_134, %c0_135] : memref<1x18x18x18x8xf32, #tpu.memory_space<vmem>>, vector<1x1x16x16x8xf32>
      %115 = vector.shape_cast %114 : vector<1x1x16x16x8xf32> to vector<1x16x16x8xf32>
      %116 = vector.shape_cast %115 : vector<1x16x16x8xf32> to vector<256x8xf32>
      %c1_136 = arith.constant 1 : index
      %c1_137 = arith.constant 1 : index
      %c0_138 = arith.constant 0 : index
      %c0_139 = arith.constant 0 : index
      %c0_140 = arith.constant 0 : index
      %117 = vector.load %arg3[%c1_136, %c1_137, %c0_138, %c0_139, %c0_140] : memref<3x3x3x8x8xf32, #tpu.memory_space<vmem>>, vector<1x1x1x8x8xf32>
      %118 = vector.shape_cast %117 : vector<1x1x1x8x8xf32> to vector<8x8xf32>
      %cst_141 = arith.constant dense<0.000000e+00> : vector<256x8xf32>
      %119 = tpu.matmul %116, %118, %cst_141 {dimension_numbers = #tpu.dot_dimension_numbers<[1], [0], [0], [1], [0, 0, 1, 1], [], []>} : vector<256x8xf32>, vector<8x8xf32>, vector<256x8xf32> -> vector<256x8xf32>
      %120 = arith.addf %111, %119 : vector<256x8xf32>
      %c1_i32_142 = arith.constant 1 : i32
      %121 = arith.addi %2, %c1_i32_142 : i32
      %c0_143 = arith.constant 0 : index
      %122 = arith.index_cast %121 : i32 to index
      %c1_144 = arith.constant 1 : index
      %c1_145 = arith.constant 1 : index
      %c0_146 = arith.constant 0 : index
      %123 = vector.load %arg2[%c0_143, %122, %c1_144, %c1_145, %c0_146] : memref<1x18x18x18x8xf32, #tpu.memory_space<vmem>>, vector<1x1x16x16x8xf32>
      %124 = vector.shape_cast %123 : vector<1x1x16x16x8xf32> to vector<1x16x16x8xf32>
      %125 = vector.shape_cast %124 : vector<1x16x16x8xf32> to vector<256x8xf32>
      %c1_147 = arith.constant 1 : index
      %c1_148 = arith.constant 1 : index
      %c1_149 = arith.constant 1 : index
      %c0_150 = arith.constant 0 : index
      %c0_151 = arith.constant 0 : index
      %126 = vector.load %arg3[%c1_147, %c1_148, %c1_149, %c0_150, %c0_151] : memref<3x3x3x8x8xf32, #tpu.memory_space<vmem>>, vector<1x1x1x8x8xf32>
      %127 = vector.shape_cast %126 : vector<1x1x1x8x8xf32> to vector<8x8xf32>
      %cst_152 = arith.constant dense<0.000000e+00> : vector<256x8xf32>
      %128 = tpu.matmul %125, %127, %cst_152 {dimension_numbers = #tpu.dot_dimension_numbers<[1], [0], [0], [1], [0, 0, 1, 1], [], []>} : vector<256x8xf32>, vector<8x8xf32>, vector<256x8xf32> -> vector<256x8xf32>
      %129 = arith.addf %120, %128 : vector<256x8xf32>
      %c1_i32_153 = arith.constant 1 : i32
      %130 = arith.addi %2, %c1_i32_153 : i32
      %c0_154 = arith.constant 0 : index
      %131 = arith.index_cast %130 : i32 to index
      %c1_155 = arith.constant 1 : index
      %c2_156 = arith.constant 2 : index
      %c0_157 = arith.constant 0 : index
      %132 = vector.load %arg2[%c0_154, %131, %c1_155, %c2_156, %c0_157] : memref<1x18x18x18x8xf32, #tpu.memory_space<vmem>>, vector<1x1x16x16x8xf32>
      %133 = vector.shape_cast %132 : vector<1x1x16x16x8xf32> to vector<1x16x16x8xf32>
      %134 = vector.shape_cast %133 : vector<1x16x16x8xf32> to vector<256x8xf32>
      %c1_158 = arith.constant 1 : index
      %c1_159 = arith.constant 1 : index
      %c2_160 = arith.constant 2 : index
      %c0_161 = arith.constant 0 : index
      %c0_162 = arith.constant 0 : index
      %135 = vector.load %arg3[%c1_158, %c1_159, %c2_160, %c0_161, %c0_162] : memref<3x3x3x8x8xf32, #tpu.memory_space<vmem>>, vector<1x1x1x8x8xf32>
      %136 = vector.shape_cast %135 : vector<1x1x1x8x8xf32> to vector<8x8xf32>
      %cst_163 = arith.constant dense<0.000000e+00> : vector<256x8xf32>
      %137 = tpu.matmul %134, %136, %cst_163 {dimension_numbers = #tpu.dot_dimension_numbers<[1], [0], [0], [1], [0, 0, 1, 1], [], []>} : vector<256x8xf32>, vector<8x8xf32>, vector<256x8xf32> -> vector<256x8xf32>
      %138 = arith.addf %129, %137 : vector<256x8xf32>
      %c1_i32_164 = arith.constant 1 : i32
      %139 = arith.addi %2, %c1_i32_164 : i32
      %c0_165 = arith.constant 0 : index
      %140 = arith.index_cast %139 : i32 to index
      %c2_166 = arith.constant 2 : index
      %c0_167 = arith.constant 0 : index
      %c0_168 = arith.constant 0 : index
      %141 = vector.load %arg2[%c0_165, %140, %c2_166, %c0_167, %c0_168] : memref<1x18x18x18x8xf32, #tpu.memory_space<vmem>>, vector<1x1x16x16x8xf32>
      %142 = vector.shape_cast %141 : vector<1x1x16x16x8xf32> to vector<1x16x16x8xf32>
      %143 = vector.shape_cast %142 : vector<1x16x16x8xf32> to vector<256x8xf32>
      %c1_169 = arith.constant 1 : index
      %c2_170 = arith.constant 2 : index
      %c0_171 = arith.constant 0 : index
      %c0_172 = arith.constant 0 : index
      %c0_173 = arith.constant 0 : index
      %144 = vector.load %arg3[%c1_169, %c2_170, %c0_171, %c0_172, %c0_173] : memref<3x3x3x8x8xf32, #tpu.memory_space<vmem>>, vector<1x1x1x8x8xf32>
      %145 = vector.shape_cast %144 : vector<1x1x1x8x8xf32> to vector<8x8xf32>
      %cst_174 = arith.constant dense<0.000000e+00> : vector<256x8xf32>
      %146 = tpu.matmul %143, %145, %cst_174 {dimension_numbers = #tpu.dot_dimension_numbers<[1], [0], [0], [1], [0, 0, 1, 1], [], []>} : vector<256x8xf32>, vector<8x8xf32>, vector<256x8xf32> -> vector<256x8xf32>
      %147 = arith.addf %138, %146 : vector<256x8xf32>
      %c1_i32_175 = arith.constant 1 : i32
      %148 = arith.addi %2, %c1_i32_175 : i32
      %c0_176 = arith.constant 0 : index
      %149 = arith.index_cast %148 : i32 to index
      %c2_177 = arith.constant 2 : index
      %c1_178 = arith.constant 1 : index
      %c0_179 = arith.constant 0 : index
      %150 = vector.load %arg2[%c0_176, %149, %c2_177, %c1_178, %c0_179] : memref<1x18x18x18x8xf32, #tpu.memory_space<vmem>>, vector<1x1x16x16x8xf32>
      %151 = vector.shape_cast %150 : vector<1x1x16x16x8xf32> to vector<1x16x16x8xf32>
      %152 = vector.shape_cast %151 : vector<1x16x16x8xf32> to vector<256x8xf32>
      %c1_180 = arith.constant 1 : index
      %c2_181 = arith.constant 2 : index
      %c1_182 = arith.constant 1 : index
      %c0_183 = arith.constant 0 : index
      %c0_184 = arith.constant 0 : index
      %153 = vector.load %arg3[%c1_180, %c2_181, %c1_182, %c0_183, %c0_184] : memref<3x3x3x8x8xf32, #tpu.memory_space<vmem>>, vector<1x1x1x8x8xf32>
      %154 = vector.shape_cast %153 : vector<1x1x1x8x8xf32> to vector<8x8xf32>
      %cst_185 = arith.constant dense<0.000000e+00> : vector<256x8xf32>
      %155 = tpu.matmul %152, %154, %cst_185 {dimension_numbers = #tpu.dot_dimension_numbers<[1], [0], [0], [1], [0, 0, 1, 1], [], []>} : vector<256x8xf32>, vector<8x8xf32>, vector<256x8xf32> -> vector<256x8xf32>
      %156 = arith.addf %147, %155 : vector<256x8xf32>
      %c1_i32_186 = arith.constant 1 : i32
      %157 = arith.addi %2, %c1_i32_186 : i32
      %c0_187 = arith.constant 0 : index
      %158 = arith.index_cast %157 : i32 to index
      %c2_188 = arith.constant 2 : index
      %c2_189 = arith.constant 2 : index
      %c0_190 = arith.constant 0 : index
      %159 = vector.load %arg2[%c0_187, %158, %c2_188, %c2_189, %c0_190] : memref<1x18x18x18x8xf32, #tpu.memory_space<vmem>>, vector<1x1x16x16x8xf32>
      %160 = vector.shape_cast %159 : vector<1x1x16x16x8xf32> to vector<1x16x16x8xf32>
      %161 = vector.shape_cast %160 : vector<1x16x16x8xf32> to vector<256x8xf32>
      %c1_191 = arith.constant 1 : index
      %c2_192 = arith.constant 2 : index
      %c2_193 = arith.constant 2 : index
      %c0_194 = arith.constant 0 : index
      %c0_195 = arith.constant 0 : index
      %162 = vector.load %arg3[%c1_191, %c2_192, %c2_193, %c0_194, %c0_195] : memref<3x3x3x8x8xf32, #tpu.memory_space<vmem>>, vector<1x1x1x8x8xf32>
      %163 = vector.shape_cast %162 : vector<1x1x1x8x8xf32> to vector<8x8xf32>
      %cst_196 = arith.constant dense<0.000000e+00> : vector<256x8xf32>
      %164 = tpu.matmul %161, %163, %cst_196 {dimension_numbers = #tpu.dot_dimension_numbers<[1], [0], [0], [1], [0, 0, 1, 1], [], []>} : vector<256x8xf32>, vector<8x8xf32>, vector<256x8xf32> -> vector<256x8xf32>
      %165 = arith.addf %156, %164 : vector<256x8xf32>
      %c2_i32 = arith.constant 2 : i32
      %166 = arith.addi %2, %c2_i32 : i32
      %c0_197 = arith.constant 0 : index
      %167 = arith.index_cast %166 : i32 to index
      %c0_198 = arith.constant 0 : index
      %c0_199 = arith.constant 0 : index
      %c0_200 = arith.constant 0 : index
      %168 = vector.load %arg2[%c0_197, %167, %c0_198, %c0_199, %c0_200] : memref<1x18x18x18x8xf32, #tpu.memory_space<vmem>>, vector<1x1x16x16x8xf32>
      %169 = vector.shape_cast %168 : vector<1x1x16x16x8xf32> to vector<1x16x16x8xf32>
      %170 = vector.shape_cast %169 : vector<1x16x16x8xf32> to vector<256x8xf32>
      %c2_201 = arith.constant 2 : index
      %c0_202 = arith.constant 0 : index
      %c0_203 = arith.constant 0 : index
      %c0_204 = arith.constant 0 : index
      %c0_205 = arith.constant 0 : index
      %171 = vector.load %arg3[%c2_201, %c0_202, %c0_203, %c0_204, %c0_205] : memref<3x3x3x8x8xf32, #tpu.memory_space<vmem>>, vector<1x1x1x8x8xf32>
      %172 = vector.shape_cast %171 : vector<1x1x1x8x8xf32> to vector<8x8xf32>
      %cst_206 = arith.constant dense<0.000000e+00> : vector<256x8xf32>
      %173 = tpu.matmul %170, %172, %cst_206 {dimension_numbers = #tpu.dot_dimension_numbers<[1], [0], [0], [1], [0, 0, 1, 1], [], []>} : vector<256x8xf32>, vector<8x8xf32>, vector<256x8xf32> -> vector<256x8xf32>
      %174 = arith.addf %165, %173 : vector<256x8xf32>
      %c2_i32_207 = arith.constant 2 : i32
      %175 = arith.addi %2, %c2_i32_207 : i32
      %c0_208 = arith.constant 0 : index
      %176 = arith.index_cast %175 : i32 to index
      %c0_209 = arith.constant 0 : index
      %c1_210 = arith.constant 1 : index
      %c0_211 = arith.constant 0 : index
      %177 = vector.load %arg2[%c0_208, %176, %c0_209, %c1_210, %c0_211] : memref<1x18x18x18x8xf32, #tpu.memory_space<vmem>>, vector<1x1x16x16x8xf32>
      %178 = vector.shape_cast %177 : vector<1x1x16x16x8xf32> to vector<1x16x16x8xf32>
      %179 = vector.shape_cast %178 : vector<1x16x16x8xf32> to vector<256x8xf32>
      %c2_212 = arith.constant 2 : index
      %c0_213 = arith.constant 0 : index
      %c1_214 = arith.constant 1 : index
      %c0_215 = arith.constant 0 : index
      %c0_216 = arith.constant 0 : index
      %180 = vector.load %arg3[%c2_212, %c0_213, %c1_214, %c0_215, %c0_216] : memref<3x3x3x8x8xf32, #tpu.memory_space<vmem>>, vector<1x1x1x8x8xf32>
      %181 = vector.shape_cast %180 : vector<1x1x1x8x8xf32> to vector<8x8xf32>
      %cst_217 = arith.constant dense<0.000000e+00> : vector<256x8xf32>
      %182 = tpu.matmul %179, %181, %cst_217 {dimension_numbers = #tpu.dot_dimension_numbers<[1], [0], [0], [1], [0, 0, 1, 1], [], []>} : vector<256x8xf32>, vector<8x8xf32>, vector<256x8xf32> -> vector<256x8xf32>
      %183 = arith.addf %174, %182 : vector<256x8xf32>
      %c2_i32_218 = arith.constant 2 : i32
      %184 = arith.addi %2, %c2_i32_218 : i32
      %c0_219 = arith.constant 0 : index
      %185 = arith.index_cast %184 : i32 to index
      %c0_220 = arith.constant 0 : index
      %c2_221 = arith.constant 2 : index
      %c0_222 = arith.constant 0 : index
      %186 = vector.load %arg2[%c0_219, %185, %c0_220, %c2_221, %c0_222] : memref<1x18x18x18x8xf32, #tpu.memory_space<vmem>>, vector<1x1x16x16x8xf32>
      %187 = vector.shape_cast %186 : vector<1x1x16x16x8xf32> to vector<1x16x16x8xf32>
      %188 = vector.shape_cast %187 : vector<1x16x16x8xf32> to vector<256x8xf32>
      %c2_223 = arith.constant 2 : index
      %c0_224 = arith.constant 0 : index
      %c2_225 = arith.constant 2 : index
      %c0_226 = arith.constant 0 : index
      %c0_227 = arith.constant 0 : index
      %189 = vector.load %arg3[%c2_223, %c0_224, %c2_225, %c0_226, %c0_227] : memref<3x3x3x8x8xf32, #tpu.memory_space<vmem>>, vector<1x1x1x8x8xf32>
      %190 = vector.shape_cast %189 : vector<1x1x1x8x8xf32> to vector<8x8xf32>
      %cst_228 = arith.constant dense<0.000000e+00> : vector<256x8xf32>
      %191 = tpu.matmul %188, %190, %cst_228 {dimension_numbers = #tpu.dot_dimension_numbers<[1], [0], [0], [1], [0, 0, 1, 1], [], []>} : vector<256x8xf32>, vector<8x8xf32>, vector<256x8xf32> -> vector<256x8xf32>
      %192 = arith.addf %183, %191 : vector<256x8xf32>
      %c2_i32_229 = arith.constant 2 : i32
      %193 = arith.addi %2, %c2_i32_229 : i32
      %c0_230 = arith.constant 0 : index
      %194 = arith.index_cast %193 : i32 to index
      %c1_231 = arith.constant 1 : index
      %c0_232 = arith.constant 0 : index
      %c0_233 = arith.constant 0 : index
      %195 = vector.load %arg2[%c0_230, %194, %c1_231, %c0_232, %c0_233] : memref<1x18x18x18x8xf32, #tpu.memory_space<vmem>>, vector<1x1x16x16x8xf32>
      %196 = vector.shape_cast %195 : vector<1x1x16x16x8xf32> to vector<1x16x16x8xf32>
      %197 = vector.shape_cast %196 : vector<1x16x16x8xf32> to vector<256x8xf32>
      %c2_234 = arith.constant 2 : index
      %c1_235 = arith.constant 1 : index
      %c0_236 = arith.constant 0 : index
      %c0_237 = arith.constant 0 : index
      %c0_238 = arith.constant 0 : index
      %198 = vector.load %arg3[%c2_234, %c1_235, %c0_236, %c0_237, %c0_238] : memref<3x3x3x8x8xf32, #tpu.memory_space<vmem>>, vector<1x1x1x8x8xf32>
      %199 = vector.shape_cast %198 : vector<1x1x1x8x8xf32> to vector<8x8xf32>
      %cst_239 = arith.constant dense<0.000000e+00> : vector<256x8xf32>
      %200 = tpu.matmul %197, %199, %cst_239 {dimension_numbers = #tpu.dot_dimension_numbers<[1], [0], [0], [1], [0, 0, 1, 1], [], []>} : vector<256x8xf32>, vector<8x8xf32>, vector<256x8xf32> -> vector<256x8xf32>
      %201 = arith.addf %192, %200 : vector<256x8xf32>
      %c2_i32_240 = arith.constant 2 : i32
      %202 = arith.addi %2, %c2_i32_240 : i32
      %c0_241 = arith.constant 0 : index
      %203 = arith.index_cast %202 : i32 to index
      %c1_242 = arith.constant 1 : index
      %c1_243 = arith.constant 1 : index
      %c0_244 = arith.constant 0 : index
      %204 = vector.load %arg2[%c0_241, %203, %c1_242, %c1_243, %c0_244] : memref<1x18x18x18x8xf32, #tpu.memory_space<vmem>>, vector<1x1x16x16x8xf32>
      %205 = vector.shape_cast %204 : vector<1x1x16x16x8xf32> to vector<1x16x16x8xf32>
      %206 = vector.shape_cast %205 : vector<1x16x16x8xf32> to vector<256x8xf32>
      %c2_245 = arith.constant 2 : index
      %c1_246 = arith.constant 1 : index
      %c1_247 = arith.constant 1 : index
      %c0_248 = arith.constant 0 : index
      %c0_249 = arith.constant 0 : index
      %207 = vector.load %arg3[%c2_245, %c1_246, %c1_247, %c0_248, %c0_249] : memref<3x3x3x8x8xf32, #tpu.memory_space<vmem>>, vector<1x1x1x8x8xf32>
      %208 = vector.shape_cast %207 : vector<1x1x1x8x8xf32> to vector<8x8xf32>
      %cst_250 = arith.constant dense<0.000000e+00> : vector<256x8xf32>
      %209 = tpu.matmul %206, %208, %cst_250 {dimension_numbers = #tpu.dot_dimension_numbers<[1], [0], [0], [1], [0, 0, 1, 1], [], []>} : vector<256x8xf32>, vector<8x8xf32>, vector<256x8xf32> -> vector<256x8xf32>
      %210 = arith.addf %201, %209 : vector<256x8xf32>
      %c2_i32_251 = arith.constant 2 : i32
      %211 = arith.addi %2, %c2_i32_251 : i32
      %c0_252 = arith.constant 0 : index
      %212 = arith.index_cast %211 : i32 to index
      %c1_253 = arith.constant 1 : index
      %c2_254 = arith.constant 2 : index
      %c0_255 = arith.constant 0 : index
      %213 = vector.load %arg2[%c0_252, %212, %c1_253, %c2_254, %c0_255] : memref<1x18x18x18x8xf32, #tpu.memory_space<vmem>>, vector<1x1x16x16x8xf32>
      %214 = vector.shape_cast %213 : vector<1x1x16x16x8xf32> to vector<1x16x16x8xf32>
      %215 = vector.shape_cast %214 : vector<1x16x16x8xf32> to vector<256x8xf32>
      %c2_256 = arith.constant 2 : index
      %c1_257 = arith.constant 1 : index
      %c2_258 = arith.constant 2 : index
      %c0_259 = arith.constant 0 : index
      %c0_260 = arith.constant 0 : index
      %216 = vector.load %arg3[%c2_256, %c1_257, %c2_258, %c0_259, %c0_260] : memref<3x3x3x8x8xf32, #tpu.memory_space<vmem>>, vector<1x1x1x8x8xf32>
      %217 = vector.shape_cast %216 : vector<1x1x1x8x8xf32> to vector<8x8xf32>
      %cst_261 = arith.constant dense<0.000000e+00> : vector<256x8xf32>
      %218 = tpu.matmul %215, %217, %cst_261 {dimension_numbers = #tpu.dot_dimension_numbers<[1], [0], [0], [1], [0, 0, 1, 1], [], []>} : vector<256x8xf32>, vector<8x8xf32>, vector<256x8xf32> -> vector<256x8xf32>
      %219 = arith.addf %210, %218 : vector<256x8xf32>
      %c2_i32_262 = arith.constant 2 : i32
      %220 = arith.addi %2, %c2_i32_262 : i32
      %c0_263 = arith.constant 0 : index
      %221 = arith.index_cast %220 : i32 to index
      %c2_264 = arith.constant 2 : index
      %c0_265 = arith.constant 0 : index
      %c0_266 = arith.constant 0 : index
      %222 = vector.load %arg2[%c0_263, %221, %c2_264, %c0_265, %c0_266] : memref<1x18x18x18x8xf32, #tpu.memory_space<vmem>>, vector<1x1x16x16x8xf32>
      %223 = vector.shape_cast %222 : vector<1x1x16x16x8xf32> to vector<1x16x16x8xf32>
      %224 = vector.shape_cast %223 : vector<1x16x16x8xf32> to vector<256x8xf32>
      %c2_267 = arith.constant 2 : index
      %c2_268 = arith.constant 2 : index
      %c0_269 = arith.constant 0 : index
      %c0_270 = arith.constant 0 : index
      %c0_271 = arith.constant 0 : index
      %225 = vector.load %arg3[%c2_267, %c2_268, %c0_269, %c0_270, %c0_271] : memref<3x3x3x8x8xf32, #tpu.memory_space<vmem>>, vector<1x1x1x8x8xf32>
      %226 = vector.shape_cast %225 : vector<1x1x1x8x8xf32> to vector<8x8xf32>
      %cst_272 = arith.constant dense<0.000000e+00> : vector<256x8xf32>
      %227 = tpu.matmul %224, %226, %cst_272 {dimension_numbers = #tpu.dot_dimension_numbers<[1], [0], [0], [1], [0, 0, 1, 1], [], []>} : vector<256x8xf32>, vector<8x8xf32>, vector<256x8xf32> -> vector<256x8xf32>
      %228 = arith.addf %219, %227 : vector<256x8xf32>
      %c2_i32_273 = arith.constant 2 : i32
      %229 = arith.addi %2, %c2_i32_273 : i32
      %c0_274 = arith.constant 0 : index
      %230 = arith.index_cast %229 : i32 to index
      %c2_275 = arith.constant 2 : index
      %c1_276 = arith.constant 1 : index
      %c0_277 = arith.constant 0 : index
      %231 = vector.load %arg2[%c0_274, %230, %c2_275, %c1_276, %c0_277] : memref<1x18x18x18x8xf32, #tpu.memory_space<vmem>>, vector<1x1x16x16x8xf32>
      %232 = vector.shape_cast %231 : vector<1x1x16x16x8xf32> to vector<1x16x16x8xf32>
      %233 = vector.shape_cast %232 : vector<1x16x16x8xf32> to vector<256x8xf32>
      %c2_278 = arith.constant 2 : index
      %c2_279 = arith.constant 2 : index
      %c1_280 = arith.constant 1 : index
      %c0_281 = arith.constant 0 : index
      %c0_282 = arith.constant 0 : index
      %234 = vector.load %arg3[%c2_278, %c2_279, %c1_280, %c0_281, %c0_282] : memref<3x3x3x8x8xf32, #tpu.memory_space<vmem>>, vector<1x1x1x8x8xf32>
      %235 = vector.shape_cast %234 : vector<1x1x1x8x8xf32> to vector<8x8xf32>
      %cst_283 = arith.constant dense<0.000000e+00> : vector<256x8xf32>
      %236 = tpu.matmul %233, %235, %cst_283 {dimension_numbers = #tpu.dot_dimension_numbers<[1], [0], [0], [1], [0, 0, 1, 1], [], []>} : vector<256x8xf32>, vector<8x8xf32>, vector<256x8xf32> -> vector<256x8xf32>
      %237 = arith.addf %228, %236 : vector<256x8xf32>
      %c2_i32_284 = arith.constant 2 : i32
      %238 = arith.addi %2, %c2_i32_284 : i32
      %c0_285 = arith.constant 0 : index
      %239 = arith.index_cast %238 : i32 to index
      %c2_286 = arith.constant 2 : index
      %c2_287 = arith.constant 2 : index
      %c0_288 = arith.constant 0 : index
      %240 = vector.load %arg2[%c0_285, %239, %c2_286, %c2_287, %c0_288] : memref<1x18x18x18x8xf32, #tpu.memory_space<vmem>>, vector<1x1x16x16x8xf32>
      %241 = vector.shape_cast %240 : vector<1x1x16x16x8xf32> to vector<1x16x16x8xf32>
      %242 = vector.shape_cast %241 : vector<1x16x16x8xf32> to vector<256x8xf32>
      %c2_289 = arith.constant 2 : index
      %c2_290 = arith.constant 2 : index
      %c2_291 = arith.constant 2 : index
      %c0_292 = arith.constant 0 : index
      %c0_293 = arith.constant 0 : index
      %243 = vector.load %arg3[%c2_289, %c2_290, %c2_291, %c0_292, %c0_293] : memref<3x3x3x8x8xf32, #tpu.memory_space<vmem>>, vector<1x1x1x8x8xf32>
      %244 = vector.shape_cast %243 : vector<1x1x1x8x8xf32> to vector<8x8xf32>
      %cst_294 = arith.constant dense<0.000000e+00> : vector<256x8xf32>
      %245 = tpu.matmul %242, %244, %cst_294 {dimension_numbers = #tpu.dot_dimension_numbers<[1], [0], [0], [1], [0, 0, 1, 1], [], []>} : vector<256x8xf32>, vector<8x8xf32>, vector<256x8xf32> -> vector<256x8xf32>
      %246 = arith.addf %237, %245 : vector<256x8xf32>
      %c0_295 = arith.constant 0 : index
      %c0_296 = arith.constant 0 : index
      %247 = vector.load %arg4[%c0_295, %c0_296] : memref<1x8xf32, #tpu.memory_space<vmem>>, vector<1x8xf32>
      %248 = vector.broadcast %247 : vector<1x8xf32> to vector<256x8xf32>
      %249 = arith.addf %246, %248 : vector<256x8xf32>
      %cst_297 = arith.constant 0.000000e+00 : f32
      %250 = vector.broadcast %cst_297 : f32 to vector<256x8xf32>
      %251 = arith.maximumf %249, %250 : vector<256x8xf32>
      %252 = vector.shape_cast %251 : vector<256x8xf32> to vector<1x16x16x8xf32>
      %c0_298 = arith.constant 0 : index
      %253 = arith.index_cast %arg6 : i32 to index
      %c0_299 = arith.constant 0 : index
      %c0_300 = arith.constant 0 : index
      %c0_301 = arith.constant 0 : index
      %254 = vector.load %arg5[%c0_298, %253, %c0_299, %c0_300, %c0_301] : memref<1x8x16x16x8xf32, #tpu.memory_space<vmem>>, vector<1x1x16x16x8xf32>
      %255 = vector.shape_cast %254 : vector<1x1x16x16x8xf32> to vector<1x16x16x8xf32>
      %256 = vector.shape_cast %252 : vector<1x16x16x8xf32> to vector<1x1x16x16x8xf32>
      tpu.vector_store %arg5[%c0_298, %253, %c0_299, %c0_300, %c0_301], %256 {strides = array<i32>} : memref<1x8x16x16x8xf32, #tpu.memory_space<vmem>>, vector<1x1x16x16x8xf32>,
    }
    %c8_i32_0 = arith.constant 8 : i32
    return
  }
  func.func @transform_0(%arg0: i32, %arg1: i32) -> (i32, i32, i32, i32, i32) {
    %c0_i32 = arith.constant 0 : i32
    %c0_i32_0 = arith.constant 0 : i32
    %c0_i32_1 = arith.constant 0 : i32
    %c0_i32_2 = arith.constant 0 : i32
    %c0_i32_3 = arith.constant 0 : i32
    return %arg0, %c0_i32, %c0_i32_0, %c0_i32_1, %c0_i32_2 : i32, i32, i32, i32, i32
  }
  func.func @transform_1(%arg0: i32, %arg1: i32) -> (i32, i32, i32, i32, i32) {
    %c0_i32 = arith.constant 0 : i32
    %c0_i32_0 = arith.constant 0 : i32
    %c0_i32_1 = arith.constant 0 : i32
    %c0_i32_2 = arith.constant 0 : i32
    %c0_i32_3 = arith.constant 0 : i32
    %c0_i32_4 = arith.constant 0 : i32
    return %c0_i32, %c0_i32_0, %c0_i32_1, %c0_i32_2, %c0_i32_3 : i32, i32, i32, i32, i32
  }
  func.func @transform_2(%arg0: i32, %arg1: i32) -> (i32, i32) {
    %c0_i32 = arith.constant 0 : i32
    %c0_i32_0 = arith.constant 0 : i32
    %c0_i32_1 = arith.constant 0 : i32
    return %c0_i32, %c0_i32_0 : i32, i32
  }
  func.func @transform_3(%arg0: i32, %arg1: i32) -> (i32, i32, i32, i32, i32) {
    %c0_i32 = arith.constant 0 : i32
    %c0_i32_0 = arith.constant 0 : i32
    %c0_i32_1 = arith.constant 0 : i32
    %c0_i32_2 = arith.constant 0 : i32
    return %arg0, %arg1, %c0_i32, %c0_i32_0, %c0_i32_1 : i32, i32, i32, i32, i32
  }
}

</mosaic_0001>

<bundles_post_ra>
// kernel: tpu_custom_call.1
= control target key start
LH: loop header
LB: loop body
LE: loop exit
PB: predicated region body
PF: predicated region fallthrough
CT: control target
= control target key end

     0   :  { %s14897_s12 = smov 0   ;;  %s14899_s13 = smov 0   ;;  %s19178_s0 = inlined_call_operand.vmem [shape: f32[2,18,18,18,8], index: 0, kind: input, shape index: {}]   ;;  %s19179_s1 = inlined_call_operand.vmem [shape: f32[3,3,3,8,8], index: 1, kind: input, shape index: {}]   ;;  %s19180_s2 = inlined_call_operand.vmem [shape: f32[1,8], index: 2, kind: input, shape index: {}]   ;;  %s19181_s3 = inlined_call_operand.vmem [shape: f32[2,16,16,16,8], index: 3, kind: output, shape index: {}]  }
   0x1   :  { %s14901_s14 = smov 0   ;;  %s14903_s15 = smov 0  }
   0x2   :  { %s14905_s16 = smov 0  }
   0x3 LB: > { %s22_s17 = sadd.s32 1, %s14863_s14  ;;  %s25_s18 = sadd.s32 1, %s14867_s15  ;;  %s14871_s16 = sphi %s14905_s16, %s13_s16   ;;  %s14867_s15 = sphi %s14903_s15, %s19746_s15   ;;  %s14863_s14 = sphi %s14901_s14, %s19745_s14   ;;  %s14859_s13 = sphi %s14899_s13, %s19744_s13   ;;  %s14855_s12 = sphi %s14897_s12, %s19743_s12  }
   0x4   : > { %p23_p0 = scmp.ge.s32.totalorder %s22_s17, 2  ;;  %p10859_p1 = scmp.ge.s32.totalorder %s14871_s16, 1 }
   0x5   : > { %p151_p2 = scmp.lt.s32.totalorder %s14871_s16, 5 }
   0x6   : > { %s19748_s17 = smov (%p23_p0, %s22_s17), 0  ;;  %s19750_s18 = smov (!%p23_p0, %s25_s18), %s14867_s15 }
   0x7   : > { %p152_p3 = pnand %p10859_p1, %p151_p2  ;;  %p27_p4 = scmp.ge.s32.totalorder %s19750_s18, 2 }
   0x8   : > { %p180_p5 = scmp.lt.s32.totalorder (!%p152_p3), %s14859_s13, 1  ;;  %s14927_s19 = sshll.u32 (!%p152_p3), %s14855_s12, 3 }
   0x9   : > { %s19752_s18 = smov (%p27_p4, %s19750_s18), 0  ;;  %155 = sbr.rel (%p152_p3) target bundleno = 1092 (0x444), region = 32 }
   0xa   : > { %p188_p6 = scmp.lt.s32.totalorder (!%p152_p3), %s14927_s19, 15  ;;  %s14941_s5 = smov (!%p152_p3), 0  }
   0xe   : > { %s19754_s13 = smov (!%p180_p5, %s14859_s13), 1 }
   0xf   : > { %s189_s20 = scalar_select %p188_p6, %s14927_s19, 15 }
  0x10   : > { %s14779_s21 = smul.u32 7776, %s19754_s13  ;;  %s10863_s22 = sshll.u32 %s19754_s13, 9 }
  0x11   : > { %s10862_s23 = sshll.u32 %s189_s20, 5 }
  0x12   : > { %s14934_s26 = scalar_lea.vmem %s19178_s0, %s14779_s21  ;;  %s192_s27 = sadd.s32 %s10863_s22, %s10862_s23 }
  0x13   : > { %s10864_s28 = sshll.u32 %s192_s27, 3 }
  0x14   : > { %s14939_s4 = scalar_lea.vmem %s19181_s3, %s10864_s28 }
  0x15 LB: >> { %v10866_v0 = vld [vmem:[%s19179_s1 + $0x8] sm:$0xff]  ;;  %v238_v1 = vld [vmem:[%s19179_s1] sm:$0xff]  ;;  %v10931_v2 = vld [vmem:[%s19179_s1 + $0x10] sm:$0xff]  ;;  %s203_s12 = sadd.s32 %s14875_s5, %s14927_s19  ;;  %vm273_vm0 = vcmask 64512   ;;  %s14875_s5 = sphi %s14941_s5, %s201_s5  }
  0x16   : >> { %14777 = vmatprep.subr.mxu1 %v10866_v0  ;;  %13427 = vmatprep.subr.mxu0 %v10866_v0  ;;  %s204_s13 = smul.u32 432, %s203_s12  ;;  %v14983_v9 = vld [vmem:[%s19179_s1 + $0x18] sm:$0xff]  ;;  %v14988_v10 = vld [vmem:[%s19179_s1 + $0x20] sm:$0xff]  ;;  %v15143_v43 = vld [vmem:[%s19179_s1 + $0x28] sm:$0xff]  ;;  %s12533_s12 = sshll.u32 %s14875_s5, 8 }
  0x17   : >> { %14778 = vmatpush3.msra.mxu1 %v10866_v0  ;;  %13428 = vmatpush3.msra.mxu0 %v10866_v0  ;;  %v15148_v44 = vld [vmem:[%s19179_s1 + $0x30] sm:$0xff]  ;;  %s201_s5 = sadd.s32 1, %s14875_s5  }
  0x18   : >> { %13477 = vmatprep.subr.mxu1 %v238_v1  ;;  %13527 = vmatprep.subr.mxu0 %v10931_v2  ;;  %s14958_s20 = scalar_lea.vmem %s14934_s26, %s204_s13  ;;  %s18986_s13 = scalar_lea.vmem %s14939_s4, %s12533_s12 }
  0x19   : >> { %v239_v3 = vld [vmem:[%s14958_s20 + $0x1] sm:$0xff]  ;;  %v240_v5 = vld [vmem:[%s14958_s20 + $0x9] sm:$0xff]  ;;  %v14972_v7 = vld [vmem:[%s14958_s20 + $0x19] sm:$0xff]  ;;  %p198_p7 = scmp.ge.s32.totalorder %s201_s5, 8  }
  0x1a   : >> { %v14962_v4 = vld [vmem:[%s14958_s20 + $0xc1] sm:$0xff]  ;;  %13429 = vmatprep.mubr.msk.f32.mxu0 %vm273_vm0, %v239_v3  ;;  %v14969_v6 = vld [vmem:[%s14958_s20 + $0xc9] sm:$0xff]  ;;  %v14975_v8 = vld [vmem:[%s14958_s20 + $0xd9] sm:$0xff] }
  0x1b   : >> { %13453 = vmatprep.mubr.msk.f32.mxu1 %vm273_vm0, %v14962_v4  ;;  %13430 = vmatmul.mubr.msk.f32.vlgmr.msra.gmra.mxu0 %vm273_vm0, %v240_v5  ;;  %v14991_v11 = vld [vmem:[%s14958_s20 + $0x21] sm:$0xff]  ;;  %v15001_v13 = vld [vmem:[%s14958_s20 + $0x31] sm:$0xff]  ;;  %v15017_v15 = vld [vmem:[%s14958_s20 + $0x39] sm:$0xff] }
  0x1c   : >> { %13454 = vmatmul.mubr.msk.f32.vlgmr.msra.gmra.mxu1 %vm273_vm0, %v14969_v6  ;;  %13528 = vmatpush3.msra.mxu0 %v10931_v2  ;;  %v14994_v12 = vld [vmem:[%s14958_s20 + $0xe1] sm:$0xff]  ;;  %v15004_v14 = vld [vmem:[%s14958_s20 + $0xf1] sm:$0xff]  ;;  %v15020_v16 = vld [vmem:[%s14958_s20 + $0xf9] sm:$0xff] }
  0x1d   : >> { %13478 = vmatpush3.msra.mxu1 %v238_v1  ;;  %13432 = vmatprep.mubr.msk.f32.mxu0 %vm273_vm0, %v14972_v7  ;;  %v15023_v17 = vld [vmem:[%s14958_s20 + $0x49] sm:$0xff]  ;;  %v15037_v19 = vld [vmem:[%s14958_s20 + $0x51] sm:$0xff]  ;;  %v15043_v21 = vld [vmem:[%s14958_s20 + $0x61] sm:$0xff] }
  0x1e   : >> { %13456 = vmatprep.mubr.msk.f32.mxu1 %vm273_vm0, %v14975_v8  ;;  %13577 = vmatprep.subr.mxu1 %v14983_v9  ;;  %v15026_v18 = vld [vmem:[%s14958_s20 + $0x109] sm:$0xff]  ;;  %v15040_v20 = vld [vmem:[%s14958_s20 + $0x111] sm:$0xff]  ;;  %v15046_v22 = vld [vmem:[%s14958_s20 + $0x121] sm:$0xff] }
  0x1f   : >> { %13627 = vmatprep.subr.mxu0 %v14988_v10  ;;  %13433 = vmatmul.mubr.msk.f32.gmra.mxu0 %vm273_vm0, %v14991_v11  ;;  %v15057_v23 = vld [vmem:[%s14958_s20 + $0x69] sm:$0xff]  ;;  %v15063_v25 = vld [vmem:[%s14958_s20 + $0x79] sm:$0xff]  ;;  %v15077_v27 = vld [vmem:[%s14958_s20 + $0x81] sm:$0xff] }
  0x20   : >> { %13457 = vmatmul.mubr.msk.f32.gmra.mxu1 %vm273_vm0, %v14994_v12  ;;  %13435 = vmatprep.mubr.msk.f32.mxu0 %vm273_vm0, %v15001_v13  ;;  %v15060_v24 = vld [vmem:[%s14958_s20 + $0x129] sm:$0xff]  ;;  %v15066_v26 = vld [vmem:[%s14958_s20 + $0x139] sm:$0xff]  ;;  %v15080_v28 = vld [vmem:[%s14958_s20 + $0x141] sm:$0xff] }
  0x21   : >> { %13459 = vmatprep.mubr.msk.f32.mxu1 %vm273_vm0, %v15004_v14  ;;  %v15083_v29 = vld [vmem:[%s14958_s20 + $0x91] sm:$0xff]  ;;  %v15097_v31 = vld [vmem:[%s14958_s20 + $0x99] sm:$0xff]  ;;  %v15103_v33 = vld [vmem:[%s14958_s20 + $0xa9] sm:$0xff] }
  0x22   : >> { %v15086_v30 = vld [vmem:[%s14958_s20 + $0x151] sm:$0xff]  ;;  %v15100_v32 = vld [vmem:[%s14958_s20 + $0x159] sm:$0xff]  ;;  %v15106_v34 = vld [vmem:[%s14958_s20 + $0x169] sm:$0xff] }
  0x23   : >> { %13436 = vmatmul.mubr.msk.f32.gmra.mxu0 %vm273_vm0, %v15017_v15  ;;  %v15117_v35 = vld [vmem:[%s14958_s20 + $0xb1] sm:$0xff]  ;;  %v206_v37 = vld [vmem:[%s14958_s20] sm:$0xff]  ;;  %v207_v39 = vld [vmem:[%s14958_s20 + $0x8] sm:$0xff] }
  0x24   : >> { %13460 = vmatmul.mubr.msk.f32.gmra.mxu1 %vm273_vm0, %v15020_v16  ;;  %13438 = vmatprep.mubr.msk.f32.mxu0 %vm273_vm0, %v15023_v17  ;;  %v15120_v36 = vld [vmem:[%s14958_s20 + $0x171] sm:$0xff]  ;;  %v916_v38 = vld [vmem:[%s14958_s20 + $0x2] sm:$0xff]  ;;  %v15136_v42 = vld [vmem:[%s14958_s20 + $0x1a] sm:$0xff] }
  0x25   : >> { %13462 = vmatprep.mubr.msk.f32.mxu1 %vm273_vm0, %v15026_v18  ;;  %19323 = vst [vmem:[#allocation2_spill] sm:$0xff] %v15120_v36  ;;  %v917_v40 = vld [vmem:[%s14958_s20 + $0xa] sm:$0xff]  ;;  %v15133_v41 = vld [vmem:[%s14958_s20 + $0x18] sm:$0xff]  ;;  %19324 = vst [vmem:[#allocation3_spill] sm:$0xff] %v15136_v42 }
  0x26   : >> { %v15153_v45 = vld [vmem:[%s14958_s20 + $0x20] sm:$0xff]  ;;  %v15163_v47 = vld [vmem:[%s14958_s20 + $0x30] sm:$0xff]  ;;  %v15179_v49 = vld [vmem:[%s14958_s20 + $0x38] sm:$0xff] }
  0x27   : >> { %13439 = vmatmul.mubr.msk.f32.gmra.mxu0 %vm273_vm0, %v15037_v19  ;;  %v15156_v46 = vld [vmem:[%s14958_s20 + $0x22] sm:$0xff]  ;;  %v15166_v48 = vld [vmem:[%s14958_s20 + $0x32] sm:$0xff]  ;;  %v15182_v50 = vld [vmem:[%s14958_s20 + $0x3a] sm:$0xff] }
  0x28   : >> { %13463 = vmatmul.mubr.msk.f32.gmra.mxu1 %vm273_vm0, %v15040_v20  ;;  %13441 = vmatprep.mubr.msk.f32.mxu0 %vm273_vm0, %v15043_v21  ;;  %19325 = vst [vmem:[#allocation4_spill] sm:$0xff] %v15156_v46  ;;  %19326 = vst [vmem:[#allocation5_spill] sm:$0xff] %v15166_v48  ;;  %v15185_v51 = vld [vmem:[%s14958_s20 + $0x48] sm:$0xff]  ;;  %v15199_v53 = vld [vmem:[%s14958_s20 + $0x50] sm:$0xff] }
  0x29   : >> { %13465 = vmatprep.mubr.msk.f32.mxu1 %vm273_vm0, %v15046_v22  ;;  %19327 = vst [vmem:[#allocation6_spill] sm:$0xff] %v15182_v50  ;;  %v15188_v52 = vld [vmem:[%s14958_s20 + $0x4a] sm:$0xff]  ;;  %v15202_v54 = vld [vmem:[%s14958_s20 + $0x52] sm:$0xff]  ;;  %v15205_v55 = vld [vmem:[%s14958_s20 + $0x60] sm:$0xff] }
  0x2a   : >> { %19328 = vst [vmem:[#allocation7_spill] sm:$0xff] %v15188_v52  ;;  %19329 = vst [vmem:[#allocation8_spill] sm:$0xff] %v15202_v54  ;;  %v15208_v56 = vld [vmem:[%s14958_s20 + $0x62] sm:$0xff]  ;;  %v15222_v58 = vld [vmem:[%s14958_s20 + $0x6a] sm:$0xff] }
  0x2b   : >> { %13442 = vmatmul.mubr.msk.f32.gmra.mxu0 %vm273_vm0, %v15057_v23  ;;  %19330 = vst [vmem:[#allocation9_spill] sm:$0xff] %v15208_v56  ;;  %v15219_v57 = vld [vmem:[%s14958_s20 + $0x68] sm:$0xff]  ;;  %19331 = vst [vmem:[#allocation10_spill] sm:$0xff] %v15222_v58  ;;  %v15225_v59 = vld [vmem:[%s14958_s20 + $0x78] sm:$0xff] }
  0x2c   : >> { %13466 = vmatmul.mubr.msk.f32.gmra.mxu1 %vm273_vm0, %v15060_v24  ;;  %13444 = vmatprep.mubr.msk.f32.mxu0 %vm273_vm0, %v15063_v25  ;;  %v15228_v60 = vld [vmem:[%s14958_s20 + $0x7a] sm:$0xff]  ;;  %v15242_v62 = vld [vmem:[%s14958_s20 + $0x82] sm:$0xff]  ;;  %v15245_v63 = vld [vmem:[%s14958_s20 + $0x90] sm:$0xff] }
  0x2d   : >> { %13468 = vmatprep.mubr.msk.f32.mxu1 %vm273_vm0, %v15066_v26  ;;  %19332 = vst [vmem:[#allocation11_spill] sm:$0xff] %v15228_v60  ;;  %v15239_v61 = vld [vmem:[%s14958_s20 + $0x80] sm:$0xff]  ;;  %19333 = vst [vmem:[#allocation12_spill] sm:$0xff] %v15242_v62  ;;  %v15248_v0 = vld [vmem:[%s14958_s20 + $0x92] sm:$0xff] }
  0x2e   : >> { %19334 = vst [vmem:[#allocation13_spill] sm:$0xff] %v15248_v0  ;;  %v15259_v1 = vld [vmem:[%s14958_s20 + $0x98] sm:$0xff]  ;;  %v15265_v3 = vld [vmem:[%s14958_s20 + $0xa8] sm:$0xff] }
  0x2f   : >> { %13445 = vmatmul.mubr.msk.f32.gmra.mxu0 %vm273_vm0, %v15077_v27  ;;  %v15262_v2 = vld [vmem:[%s14958_s20 + $0x9a] sm:$0xff]  ;;  %v15268_v5 = vld [vmem:[%s14958_s20 + $0xaa] sm:$0xff] }
  0x30   : >> { %13469 = vmatmul.mubr.msk.f32.gmra.mxu1 %vm273_vm0, %v15080_v28  ;;  %13447 = vmatprep.mubr.msk.f32.mxu0 %vm273_vm0, %v15083_v29  ;;  %19335 = vst [vmem:[#allocation14_spill] sm:$0xff] %v15262_v2  ;;  %19336 = vst [vmem:[#allocation15_spill] sm:$0xff] %v15268_v5 }
  0x31   : >> { %13471 = vmatprep.mubr.msk.f32.mxu1 %vm273_vm0, %v15086_v30 }
  0x33   : >> { %13448 = vmatmul.mubr.msk.f32.gmra.mxu0 %vm273_vm0, %v15097_v31 }
  0x34   : >> { %13472 = vmatmul.mubr.msk.f32.gmra.mxu1 %vm273_vm0, %v15100_v32  ;;  %13450 = vmatprep.mubr.msk.f32.mxu0 %vm273_vm0, %v15103_v33 }
  0x35   : >> { %13474 = vmatprep.mubr.msk.f32.mxu1 %vm273_vm0, %v15106_v34 }
  0x37   : >> { %13451 = vmatmul.mubr.msk.f32.gmra.mxu0 %vm273_vm0, %v15117_v35 }
  0x38   : >> { %13475 = vmatmul.mubr.msk.f32.gmra.mxu1 %vm273_vm0, %v15120_v36  ;;  %13529 = vmatprep.mubr.msk.f32.mxu0 %vm273_vm0, %v916_v38  ;;  %v15288_v38 = vld [vmem:[%s14958_s20 + $0xc2] sm:$0xff]  ;;  %v15428_v36 = vld [vmem:[%s14958_s20 + $0x16a] sm:$0xff] }
  0x39   : >> { %13479 = vmatprep.mubr.msk.f32.mxu1 %vm273_vm0, %v206_v37  ;;  %v15285_v37 = vld [vmem:[%s14958_s20 + $0xc0] sm:$0xff]  ;;  %19338 = vst [vmem:[#allocation17_spill] sm:$0xff] %v15288_v38  ;;  %19351 = vst [vmem:[#allocation30_spill] sm:$0xff] %v15428_v36 }
  0x3b   : >> { %13530 = vmatmul.mubr.msk.f32.vlgmr.msra.gmra.mxu0 %vm273_vm0, %v917_v40  ;;  %v15302_v40 = vld [vmem:[%s14958_s20 + $0xca] sm:$0xff] }
  0x3c   : >> { %13480 = vmatmul.mubr.msk.f32.vlgmr.msra.gmra.mxu1 %vm273_vm0, %v207_v39  ;;  %13628 = vmatpush3.msra.mxu0 %v14988_v10  ;;  %v15282_v10 = vld [vmem:[%s14958_s20 + $0xb2] sm:$0xff]  ;;  %v15299_v39 = vld [vmem:[%s14958_s20 + $0xc8] sm:$0xff]  ;;  %19339 = vst [vmem:[#allocation18_spill] sm:$0xff] %v15302_v40 }
  0x3d   : >> { %13578 = vmatpush3.msra.mxu1 %v14983_v9  ;;  %13482 = vmatprep.mubr.msk.f32.mxu1 %vm273_vm0, %v15133_v41  ;;  %v15279_v9 = vld [vmem:[%s14958_s20 + $0xb0] sm:$0xff]  ;;  %19337 = vst [vmem:[#allocation16_spill] sm:$0xff] %v15282_v10 }
  0x3e   : >> { %13532 = vmatprep.mubr.msk.f32.mxu0 %vm273_vm0, %v15136_v42  ;;  %13677 = vmatprep.subr.mxu1 %v15143_v43  ;;  %v15425_v42 = vld [vmem:[%s14958_s20 + $0x168] sm:$0xff] }
  0x3f   : >> { %13727 = vmatprep.subr.mxu0 %v15148_v44  ;;  %13533 = vmatmul.mubr.msk.f32.gmra.mxu0 %vm273_vm0, %v15156_v46  ;;  %v15408_v46 = vld [vmem:[%s14958_s20 + $0x152] sm:$0xff] }
  0x40   : >> { %13483 = vmatmul.mubr.msk.f32.gmra.mxu1 %vm273_vm0, %v15153_v45  ;;  %13535 = vmatprep.mubr.msk.f32.mxu0 %vm273_vm0, %v15166_v48  ;;  %v15405_v48 = vld [vmem:[%s14958_s20 + $0x150] sm:$0xff]  ;;  %19350 = vst [vmem:[#allocation29_spill] sm:$0xff] %v15408_v46 }
  0x41   : >> { %13485 = vmatprep.mubr.msk.f32.mxu1 %vm273_vm0, %v15163_v47 }
  0x43   : >> { %13536 = vmatmul.mubr.msk.f32.gmra.mxu0 %vm273_vm0, %v15182_v50  ;;  %v15388_v50 = vld [vmem:[%s14958_s20 + $0x13a] sm:$0xff] }
  0x44   : >> { %13486 = vmatmul.mubr.msk.f32.gmra.mxu1 %vm273_vm0, %v15179_v49  ;;  %13538 = vmatprep.mubr.msk.f32.mxu0 %vm273_vm0, %v15188_v52  ;;  %v15385_v52 = vld [vmem:[%s14958_s20 + $0x138] sm:$0xff]  ;;  %19348 = vst [vmem:[#allocation27_spill] sm:$0xff] %v15388_v50 }
  0x45   : >> { %13488 = vmatprep.mubr.msk.f32.mxu1 %vm273_vm0, %v15185_v51 }
  0x47   : >> { %13539 = vmatmul.mubr.msk.f32.gmra.mxu0 %vm273_vm0, %v15202_v54  ;;  %v15368_v54 = vld [vmem:[%s14958_s20 + $0x122] sm:$0xff] }
  0x48   : >> { %13489 = vmatmul.mubr.msk.f32.gmra.mxu1 %vm273_vm0, %v15199_v53  ;;  %13541 = vmatprep.mubr.msk.f32.mxu0 %vm273_vm0, %v15208_v56  ;;  %v15365_v56 = vld [vmem:[%s14958_s20 + $0x120] sm:$0xff]  ;;  %19346 = vst [vmem:[#allocation25_spill] sm:$0xff] %v15368_v54 }
  0x49   : >> { %13491 = vmatprep.mubr.msk.f32.mxu1 %vm273_vm0, %v15205_v55 }
  0x4b   : >> { %13542 = vmatmul.mubr.msk.f32.gmra.mxu0 %vm273_vm0, %v15222_v58  ;;  %v15348_v58 = vld [vmem:[%s14958_s20 + $0x10a] sm:$0xff] }
  0x4c   : >> { %13492 = vmatmul.mubr.msk.f32.gmra.mxu1 %vm273_vm0, %v15219_v57  ;;  %13544 = vmatprep.mubr.msk.f32.mxu0 %vm273_vm0, %v15228_v60  ;;  %v15345_v60 = vld [vmem:[%s14958_s20 + $0x108] sm:$0xff]  ;;  %19344 = vst [vmem:[#allocation23_spill] sm:$0xff] %v15348_v58 }
  0x4d   : >> { %13494 = vmatprep.mubr.msk.f32.mxu1 %vm273_vm0, %v15225_v59 }
  0x4f   : >> { %13545 = vmatmul.mubr.msk.f32.gmra.mxu0 %vm273_vm0, %v15242_v62  ;;  %v15328_v62 = vld [vmem:[%s14958_s20 + $0xf2] sm:$0xff] }
  0x50   : >> { %13495 = vmatmul.mubr.msk.f32.gmra.mxu1 %vm273_vm0, %v15239_v61  ;;  %13547 = vmatprep.mubr.msk.f32.mxu0 %vm273_vm0, %v15248_v0  ;;  %v15325_v0 = vld [vmem:[%s14958_s20 + $0xf0] sm:$0xff]  ;;  %19342 = vst [vmem:[#allocation21_spill] sm:$0xff] %v15328_v62 }
  0x51   : >> { %13497 = vmatprep.mubr.msk.f32.mxu1 %vm273_vm0, %v15245_v63 }
  0x53   : >> { %13548 = vmatmul.mubr.msk.f32.gmra.mxu0 %vm273_vm0, %v15262_v2  ;;  %v15308_v2 = vld [vmem:[%s14958_s20 + $0xda] sm:$0xff] }
  0x54   : >> { %13498 = vmatmul.mubr.msk.f32.gmra.mxu1 %vm273_vm0, %v15259_v1  ;;  %13550 = vmatprep.mubr.msk.f32.mxu0 %vm273_vm0, %v15268_v5  ;;  %v15305_v5 = vld [vmem:[%s14958_s20 + $0xd8] sm:$0xff]  ;;  %19340 = vst [vmem:[#allocation19_spill] sm:$0xff] %v15308_v2 }
  0x55   : >> { %13500 = vmatprep.mubr.msk.f32.mxu1 %vm273_vm0, %v15265_v3 }
  0x57   : >> { %13551 = vmatmul.mubr.msk.f32.gmra.mxu0 %vm273_vm0, %v15282_v10  ;;  %v15322_v10 = vld [vmem:[%s14958_s20 + $0xe2] sm:$0xff] }
  0x58   : >> { %13501 = vmatmul.mubr.msk.f32.gmra.mxu1 %vm273_vm0, %v15279_v9  ;;  %13553 = vmatprep.mubr.msk.f32.mxu0 %vm273_vm0, %v15288_v38  ;;  %v15319_v38 = vld [vmem:[%s14958_s20 + $0xe0] sm:$0xff]  ;;  %19341 = vst [vmem:[#allocation20_spill] sm:$0xff] %v15322_v10 }
  0x59   : >> { %13503 = vmatprep.mubr.msk.f32.mxu1 %vm273_vm0, %v15285_v37 }
  0x5b   : >> { %13554 = vmatmul.mubr.msk.f32.gmra.mxu0 %vm273_vm0, %v15302_v40  ;;  %v15342_v40 = vld [vmem:[%s14958_s20 + $0xfa] sm:$0xff] }
  0x5c   : >> { %13504 = vmatmul.mubr.msk.f32.gmra.mxu1 %vm273_vm0, %v15299_v39  ;;  %13556 = vmatprep.mubr.msk.f32.mxu0 %vm273_vm0, %v15308_v2  ;;  %v15339_v2 = vld [vmem:[%s14958_s20 + $0xf8] sm:$0xff]  ;;  %19343 = vst [vmem:[#allocation22_spill] sm:$0xff] %v15342_v40 }
  0x5d   : >> { %13506 = vmatprep.mubr.msk.f32.mxu1 %vm273_vm0, %v15305_v5 }
  0x5f   : >> { %13557 = vmatmul.mubr.msk.f32.gmra.mxu0 %vm273_vm0, %v15322_v10  ;;  %v15362_v10 = vld [vmem:[%s14958_s20 + $0x112] sm:$0xff] }
  0x60   : >> { %13507 = vmatmul.mubr.msk.f32.gmra.mxu1 %vm273_vm0, %v15319_v38  ;;  %13559 = vmatprep.mubr.msk.f32.mxu0 %vm273_vm0, %v15328_v62  ;;  %v15359_v62 = vld [vmem:[%s14958_s20 + $0x110] sm:$0xff]  ;;  %19345 = vst [vmem:[#allocation24_spill] sm:$0xff] %v15362_v10 }
  0x61   : >> { %13509 = vmatprep.mubr.msk.f32.mxu1 %vm273_vm0, %v15325_v0 }
  0x63   : >> { %13560 = vmatmul.mubr.msk.f32.gmra.mxu0 %vm273_vm0, %v15342_v40  ;;  %v15382_v40 = vld [vmem:[%s14958_s20 + $0x12a] sm:$0xff] }
  0x64   : >> { %13510 = vmatmul.mubr.msk.f32.gmra.mxu1 %vm273_vm0, %v15339_v2  ;;  %13562 = vmatprep.mubr.msk.f32.mxu0 %vm273_vm0, %v15348_v58  ;;  %v15379_v58 = vld [vmem:[%s14958_s20 + $0x128] sm:$0xff]  ;;  %19347 = vst [vmem:[#allocation26_spill] sm:$0xff] %v15382_v40 }
  0x65   : >> { %13512 = vmatprep.mubr.msk.f32.mxu1 %vm273_vm0, %v15345_v60 }
  0x67   : >> { %13563 = vmatmul.mubr.msk.f32.gmra.mxu0 %vm273_vm0, %v15362_v10  ;;  %v15402_v10 = vld [vmem:[%s14958_s20 + $0x142] sm:$0xff] }
  0x68   : >> { %13513 = vmatmul.mubr.msk.f32.gmra.mxu1 %vm273_vm0, %v15359_v62  ;;  %13565 = vmatprep.mubr.msk.f32.mxu0 %vm273_vm0, %v15368_v54  ;;  %v15399_v54 = vld [vmem:[%s14958_s20 + $0x140] sm:$0xff]  ;;  %19349 = vst [vmem:[#allocation28_spill] sm:$0xff] %v15402_v10 }
  0x69   : >> { %13515 = vmatprep.mubr.msk.f32.mxu1 %vm273_vm0, %v15365_v56 }
  0x6b   : >> { %13566 = vmatmul.mubr.msk.f32.gmra.mxu0 %vm273_vm0, %v15382_v40  ;;  %v15422_v40 = vld [vmem:[%s14958_s20 + $0x15a] sm:$0xff] }
  0x6c   : >> { %13516 = vmatmul.mubr.msk.f32.gmra.mxu1 %vm273_vm0, %v15379_v58  ;;  %13568 = vmatprep.mubr.msk.f32.mxu0 %vm273_vm0, %v15388_v50  ;;  %v15419_v50 = vld [vmem:[%s14958_s20 + $0x158] sm:$0xff] }
  0x6d   : >> { %13518 = vmatprep.mubr.msk.f32.mxu1 %vm273_vm0, %v15385_v52 }
  0x6f   : >> { %13569 = vmatmul.mubr.msk.f32.gmra.mxu0 %vm273_vm0, %v15402_v10  ;;  %v15442_v10 = vld [vmem:[%s14958_s20 + $0x172] sm:$0xff] }
  0x70   : >> { %13519 = vmatmul.mubr.msk.f32.gmra.mxu1 %vm273_vm0, %v15399_v54  ;;  %13571 = vmatprep.mubr.msk.f32.mxu0 %vm273_vm0, %v15408_v46  ;;  %v15439_v46 = vld [vmem:[%s14958_s20 + $0x170] sm:$0xff]  ;;  %19352 = vst [vmem:[#allocation31_spill] sm:$0xff] %v15442_v10 }
  0x71   : >> { %13521 = vmatprep.mubr.msk.f32.mxu1 %vm273_vm0, %v15405_v48 }
  0x73   : >> { %13572 = vmatmul.mubr.msk.f32.gmra.mxu0 %vm273_vm0, %v15422_v40 }
  0x74   : >> { %13522 = vmatmul.mubr.msk.f32.gmra.mxu1 %vm273_vm0, %v15419_v50  ;;  %13574 = vmatprep.mubr.msk.f32.mxu0 %vm273_vm0, %v15428_v36  ;;  %v15459_v36 = vld [vmem:[%s19179_s1 + $0x38] sm:$0xff] }
  0x75   : >> { %13524 = vmatprep.mubr.msk.f32.mxu1 %vm273_vm0, %v15425_v42 }
  0x77   : >> { %13575 = vmatmul.mubr.msk.f32.gmra.mxu0 %vm273_vm0, %v15442_v10  ;;  %v15464_v10 = vld [vmem:[%s19179_s1 + $0x40] sm:$0xff] }
  0x78   : >> { %13525 = vmatmul.mubr.msk.f32.gmra.mxu1 %vm273_vm0, %v15439_v46  ;;  %13629 = vmatprep.mubr.msk.f32.mxu0 %vm273_vm0, %v14972_v7  ;;  %v19354_v7 = vld [vmem:[#allocation2_spill] sm:$0xff] }
  0x79   : >> { %13579 = vmatprep.mubr.msk.f32.mxu1 %vm273_vm0, %v15133_v41  ;;  %v19372_v41 = vld [vmem:[#allocation19_spill] sm:$0xff] }
  0x7b   : >> { %13630 = vmatmul.mubr.msk.f32.vlgmr.msra.gmra.mxu0 %vm273_vm0, %v14991_v11  ;;  %v15596_v11 = vld [vmem:[%s14958_s20 + $0x189] sm:$0xff] }
  0x7c   : >> { %13580 = vmatmul.mubr.msk.f32.vlgmr.msra.gmra.mxu1 %vm273_vm0, %v15153_v45  ;;  %13728 = vmatpush3.msra.mxu0 %v15148_v44  ;;  %19355 = vst [vmem:[#allocation2_spill] sm:$0xff] %v15596_v11  ;;  %v19373_v45 = vld [vmem:[#allocation20_spill] sm:$0xff] }
  0x7d   : >> { %13678 = vmatpush3.msra.mxu1 %v15143_v43  ;;  %13582 = vmatprep.mubr.msk.f32.mxu1 %vm273_vm0, %v15163_v47 }
  0x7e   : >> { %13632 = vmatprep.mubr.msk.f32.mxu0 %vm273_vm0, %v15001_v13  ;;  %13777 = vmatprep.subr.mxu1 %v15459_v36 }
  0x7f   : >> { %13827 = vmatprep.subr.mxu0 %v15464_v10  ;;  %13633 = vmatmul.mubr.msk.f32.gmra.mxu0 %vm273_vm0, %v15017_v15 }
  0x80   : >> { %13583 = vmatmul.mubr.msk.f32.gmra.mxu1 %vm273_vm0, %v15179_v49  ;;  %13635 = vmatprep.mubr.msk.f32.mxu0 %vm273_vm0, %v15023_v17 }
  0x81   : >> { %13585 = vmatprep.mubr.msk.f32.mxu1 %vm273_vm0, %v15185_v51 }
  0x83   : >> { %13636 = vmatmul.mubr.msk.f32.gmra.mxu0 %vm273_vm0, %v15037_v19 }
  0x84   : >> { %13586 = vmatmul.mubr.msk.f32.gmra.mxu1 %vm273_vm0, %v15199_v53  ;;  %13638 = vmatprep.mubr.msk.f32.mxu0 %vm273_vm0, %v15043_v21 }
  0x85   : >> { %13588 = vmatprep.mubr.msk.f32.mxu1 %vm273_vm0, %v15205_v55 }
  0x87   : >> { %13639 = vmatmul.mubr.msk.f32.gmra.mxu0 %vm273_vm0, %v15057_v23 }
  0x88   : >> { %13589 = vmatmul.mubr.msk.f32.gmra.mxu1 %vm273_vm0, %v15219_v57  ;;  %13641 = vmatprep.mubr.msk.f32.mxu0 %vm273_vm0, %v15063_v25 }
  0x89   : >> { %13591 = vmatprep.mubr.msk.f32.mxu1 %vm273_vm0, %v15225_v59 }
  0x8b   : >> { %13642 = vmatmul.mubr.msk.f32.gmra.mxu0 %vm273_vm0, %v15077_v27  ;;  %v19362_v27 = vld [vmem:[#allocation9_spill] sm:$0xff] }
  0x8c   : >> { %13592 = vmatmul.mubr.msk.f32.gmra.mxu1 %vm273_vm0, %v15239_v61  ;;  %13644 = vmatprep.mubr.msk.f32.mxu0 %vm273_vm0, %v15083_v29  ;;  %v19364_v29 = vld [vmem:[#allocation11_spill] sm:$0xff] }
  0x8d   : >> { %13594 = vmatprep.mubr.msk.f32.mxu1 %vm273_vm0, %v15245_v63 }
  0x8f   : >> { %13645 = vmatmul.mubr.msk.f32.gmra.mxu0 %vm273_vm0, %v15097_v31  ;;  %v19366_v31 = vld [vmem:[#allocation13_spill] sm:$0xff] }
  0x90   : >> { %13595 = vmatmul.mubr.msk.f32.gmra.mxu1 %vm273_vm0, %v15259_v1  ;;  %13647 = vmatprep.mubr.msk.f32.mxu0 %vm273_vm0, %v15103_v33  ;;  %v19368_v33 = vld [vmem:[#allocation15_spill] sm:$0xff] }
  0x91   : >> { %13597 = vmatprep.mubr.msk.f32.mxu1 %vm273_vm0, %v15265_v3 }
  0x93   : >> { %13648 = vmatmul.mubr.msk.f32.gmra.mxu0 %vm273_vm0, %v15117_v35  ;;  %v19370_v35 = vld [vmem:[#allocation17_spill] sm:$0xff] }
  0x94   : >> { %13598 = vmatmul.mubr.msk.f32.gmra.mxu1 %vm273_vm0, %v15279_v9  ;;  %13650 = vmatprep.mubr.msk.f32.mxu0 %vm273_vm0, %v14962_v4  ;;  %v15579_v4 = vld [vmem:[%s14958_s20 + $0x180] sm:$0xff] }
  0x95   : >> { %13600 = vmatprep.mubr.msk.f32.mxu1 %vm273_vm0, %v15285_v37 }
  0x97   : >> { %13651 = vmatmul.mubr.msk.f32.gmra.mxu0 %vm273_vm0, %v14969_v6  ;;  %v15582_v6 = vld [vmem:[%s14958_s20 + $0x181] sm:$0xff] }
  0x98   : >> { %13601 = vmatmul.mubr.msk.f32.gmra.mxu1 %vm273_vm0, %v15299_v39  ;;  %13653 = vmatprep.mubr.msk.f32.mxu0 %vm273_vm0, %v14975_v8  ;;  %19353 = vst [vmem:[#allocation32_spill] sm:$0xff] %v15582_v6  ;;  %v15593_v8 = vld [vmem:[%s14958_s20 + $0x188] sm:$0xff] }
  0x99   : >> { %13603 = vmatprep.mubr.msk.f32.mxu1 %vm273_vm0, %v15305_v5 }
  0x9b   : >> { %13654 = vmatmul.mubr.msk.f32.gmra.mxu0 %vm273_vm0, %v14994_v12  ;;  %v19356_v12 = vld [vmem:[#allocation3_spill] sm:$0xff] }
  0x9c   : >> { %13604 = vmatmul.mubr.msk.f32.gmra.mxu1 %vm273_vm0, %v15319_v38  ;;  %13656 = vmatprep.mubr.msk.f32.mxu0 %vm273_vm0, %v15004_v14  ;;  %v19357_v14 = vld [vmem:[#allocation4_spill] sm:$0xff] }
  0x9d   : >> { %13606 = vmatprep.mubr.msk.f32.mxu1 %vm273_vm0, %v15325_v0 }
  0x9f   : >> { %13657 = vmatmul.mubr.msk.f32.gmra.mxu0 %vm273_vm0, %v15020_v16  ;;  %v15613_v16 = vld [vmem:[%s19179_s1 + $0x48] sm:$0xff] }
  0xa0   : >> { %13607 = vmatmul.mubr.msk.f32.gmra.mxu1 %vm273_vm0, %v15339_v2  ;;  %13659 = vmatprep.mubr.msk.f32.mxu0 %vm273_vm0, %v15026_v18  ;;  %v15618_v18 = vld [vmem:[%s19179_s1 + $0x50] sm:$0xff] }
  0xa1   : >> { %13609 = vmatprep.mubr.msk.f32.mxu1 %vm273_vm0, %v15345_v60 }
  0xa3   : >> { %13660 = vmatmul.mubr.msk.f32.gmra.mxu0 %vm273_vm0, %v15040_v20  ;;  %v19358_v20 = vld [vmem:[#allocation5_spill] sm:$0xff] }
  0xa4   : >> { %13610 = vmatmul.mubr.msk.f32.gmra.mxu1 %vm273_vm0, %v15359_v62  ;;  %13662 = vmatprep.mubr.msk.f32.mxu0 %vm273_vm0, %v15046_v22  ;;  %v19359_v22 = vld [vmem:[#allocation6_spill] sm:$0xff] }
  0xa5   : >> { %13612 = vmatprep.mubr.msk.f32.mxu1 %vm273_vm0, %v15365_v56 }
  0xa7   : >> { %13663 = vmatmul.mubr.msk.f32.gmra.mxu0 %vm273_vm0, %v15060_v24  ;;  %v19360_v24 = vld [vmem:[#allocation7_spill] sm:$0xff] }
  0xa8   : >> { %13613 = vmatmul.mubr.msk.f32.gmra.mxu1 %vm273_vm0, %v15379_v58  ;;  %13665 = vmatprep.mubr.msk.f32.mxu0 %vm273_vm0, %v15066_v26  ;;  %v19361_v26 = vld [vmem:[#allocation8_spill] sm:$0xff] }
  0xa9   : >> { %13615 = vmatprep.mubr.msk.f32.mxu1 %vm273_vm0, %v15385_v52 }
  0xab   : >> { %13666 = vmatmul.mubr.msk.f32.gmra.mxu0 %vm273_vm0, %v15080_v28  ;;  %v19363_v28 = vld [vmem:[#allocation10_spill] sm:$0xff] }
  0xac   : >> { %13616 = vmatmul.mubr.msk.f32.gmra.mxu1 %vm273_vm0, %v15399_v54  ;;  %13668 = vmatprep.mubr.msk.f32.mxu0 %vm273_vm0, %v15086_v30  ;;  %v19365_v30 = vld [vmem:[#allocation12_spill] sm:$0xff] }
  0xad   : >> { %13618 = vmatprep.mubr.msk.f32.mxu1 %vm273_vm0, %v15405_v48 }
  0xaf   : >> { %13669 = vmatmul.mubr.msk.f32.gmra.mxu0 %vm273_vm0, %v15100_v32  ;;  %v19367_v32 = vld [vmem:[#allocation14_spill] sm:$0xff] }
  0xb0   : >> { %13619 = vmatmul.mubr.msk.f32.gmra.mxu1 %vm273_vm0, %v15419_v50  ;;  %13671 = vmatprep.mubr.msk.f32.mxu0 %vm273_vm0, %v15106_v34  ;;  %v19369_v34 = vld [vmem:[#allocation16_spill] sm:$0xff] }
  0xb1   : >> { %13621 = vmatprep.mubr.msk.f32.mxu1 %vm273_vm0, %v15425_v42 }
  0xb3   : >> { %13672 = vmatmul.mubr.msk.f32.gmra.mxu0 %vm273_vm0, %v19354_v7 }
  0xb4   : >> { %13622 = vmatmul.mubr.msk.f32.gmra.mxu1 %vm273_vm0, %v15439_v46  ;;  %13674 = vmatprep.mubr.msk.f32.mxu0 %vm273_vm0, %v15582_v6  ;;  %v11191_v6 = vld [vmem:[%s14958_s20 + $0x198] sm:$0xff] }
  0xb5   : >> { %13624 = vmatprep.mubr.msk.f32.mxu1 %vm273_vm0, %v15579_v4 }
  0xb7   : >> { %13675 = vmatmul.mubr.msk.f32.gmra.mxu0 %vm273_vm0, %v15596_v11  ;;  %v15781_v11 = vld [vmem:[%s14958_s20 + $0x182] sm:$0xff] }
  0xb8   : >> { %13625 = vmatmul.mubr.msk.f32.gmra.mxu1 %vm273_vm0, %v15593_v8  ;;  %13729 = vmatprep.mubr.msk.f32.mxu0 %vm273_vm0, %v15163_v47  ;;  %v19374_v47 = vld [vmem:[#allocation21_spill] sm:$0xff] }
  0xb9   : >> { %13679 = vmatprep.mubr.msk.f32.mxu1 %vm273_vm0, %v19356_v12 }
  0xbb   : >> { %13730 = vmatmul.mubr.msk.f32.vlgmr.msra.gmra.mxu0 %vm273_vm0, %v15179_v49 }
  0xbc   : >> { %13680 = vmatmul.mubr.msk.f32.vlgmr.msra.gmra.mxu1 %vm273_vm0, %v19357_v14  ;;  %13828 = vmatpush3.msra.mxu0 %v15464_v10 }
  0xbd   : >> { %13778 = vmatpush3.msra.mxu1 %v15459_v36  ;;  %13682 = vmatprep.mubr.msk.f32.mxu1 %vm273_vm0, %v19358_v20  ;;  %v19371_v36 = vld [vmem:[#allocation18_spill] sm:$0xff] }
  0xbe   : >> { %13732 = vmatprep.mubr.msk.f32.mxu0 %vm273_vm0, %v15185_v51  ;;  %13877 = vmatprep.subr.mxu1 %v15613_v16 }
  0xbf   : >> { %13927 = vmatprep.subr.mxu0 %v15618_v18  ;;  %13733 = vmatmul.mubr.msk.f32.gmra.mxu0 %vm273_vm0, %v15199_v53 }
  0xc0   : >> { %13683 = vmatmul.mubr.msk.f32.gmra.mxu1 %vm273_vm0, %v19359_v22  ;;  %13735 = vmatprep.mubr.msk.f32.mxu0 %vm273_vm0, %v15205_v55 }
  0xc1   : >> { %13685 = vmatprep.mubr.msk.f32.mxu1 %vm273_vm0, %v19360_v24 }
  0xc3   : >> { %13736 = vmatmul.mubr.msk.f32.gmra.mxu0 %vm273_vm0, %v15219_v57  ;;  %v19375_v57 = vld [vmem:[#allocation22_spill] sm:$0xff] }
  0xc4   : >> { %13686 = vmatmul.mubr.msk.f32.gmra.mxu1 %vm273_vm0, %v19361_v26  ;;  %13738 = vmatprep.mubr.msk.f32.mxu0 %vm273_vm0, %v15225_v59  ;;  %v19376_v59 = vld [vmem:[#allocation23_spill] sm:$0xff] }
  0xc5   : >> { %13688 = vmatprep.mubr.msk.f32.mxu1 %vm273_vm0, %v19362_v27 }
  0xc7   : >> { %13739 = vmatmul.mubr.msk.f32.gmra.mxu0 %vm273_vm0, %v15239_v61 }
  0xc8   : >> { %13689 = vmatmul.mubr.msk.f32.gmra.mxu1 %vm273_vm0, %v19363_v28  ;;  %13741 = vmatprep.mubr.msk.f32.mxu0 %vm273_vm0, %v15245_v63 }
  0xc9   : >> { %13691 = vmatprep.mubr.msk.f32.mxu1 %vm273_vm0, %v19364_v29 }
  0xcb   : >> { %13742 = vmatmul.mubr.msk.f32.gmra.mxu0 %vm273_vm0, %v15259_v1  ;;  %v19377_v1 = vld [vmem:[#allocation24_spill] sm:$0xff] }
  0xcc   : >> { %13692 = vmatmul.mubr.msk.f32.gmra.mxu1 %vm273_vm0, %v19365_v30  ;;  %13744 = vmatprep.mubr.msk.f32.mxu0 %vm273_vm0, %v15265_v3 }
  0xcd   : >> { %13694 = vmatprep.mubr.msk.f32.mxu1 %vm273_vm0, %v19366_v31 }
  0xcf   : >> { %13745 = vmatmul.mubr.msk.f32.gmra.mxu0 %vm273_vm0, %v15279_v9  ;;  %v19379_v9 = vld [vmem:[#allocation26_spill] sm:$0xff] }
  0xd0   : >> { %13695 = vmatmul.mubr.msk.f32.gmra.mxu1 %vm273_vm0, %v19367_v32  ;;  %13747 = vmatprep.mubr.msk.f32.mxu0 %vm273_vm0, %v15285_v37 }
  0xd1   : >> { %13697 = vmatprep.mubr.msk.f32.mxu1 %vm273_vm0, %v19368_v33 }
  0xd3   : >> { %13748 = vmatmul.mubr.msk.f32.gmra.mxu0 %vm273_vm0, %v15299_v39  ;;  %v19382_v39 = vld [vmem:[#allocation28_spill] sm:$0xff] }
  0xd4   : >> { %13698 = vmatmul.mubr.msk.f32.gmra.mxu1 %vm273_vm0, %v19369_v34  ;;  %13750 = vmatprep.mubr.msk.f32.mxu0 %vm273_vm0, %v15305_v5 }
  0xd5   : >> { %13700 = vmatprep.mubr.msk.f32.mxu1 %vm273_vm0, %v19370_v35 }
  0xd7   : >> { %13751 = vmatmul.mubr.msk.f32.gmra.mxu0 %vm273_vm0, %v15319_v38 }
  0xd8   : >> { %13701 = vmatmul.mubr.msk.f32.gmra.mxu1 %vm273_vm0, %v19371_v36  ;;  %13753 = vmatprep.mubr.msk.f32.mxu0 %vm273_vm0, %v15325_v0 }
  0xd9   : >> { %13703 = vmatprep.mubr.msk.f32.mxu1 %vm273_vm0, %v19372_v41 }
  0xdb   : >> { %v15684_v43 = vpop.f32.mrf.mxu0  ;;  %13754 = vmatmul.mubr.msk.f32.gmra.mxu0 %vm273_vm0, %v15339_v2 }
  0xdc   : >> { %v15686_v44 = vpop.f32.mrf.mxu1  ;;  %13704 = vmatmul.mubr.msk.f32.gmra.mxu1 %vm273_vm0, %v19373_v45  ;;  %13756 = vmatprep.mubr.msk.f32.mxu0 %vm273_vm0, %v15345_v60 }
  0xdd   : >> { %13706 = vmatprep.mubr.msk.f32.mxu1 %vm273_vm0, %v19374_v47  ;;  %v15696_v49 = vpop.f32.mrf.mxu0 }
  0xde   : >> { %v15698_v51 = vpop.f32.mrf.mxu1 }
  0xdf   : >> { %v15700_v53 = vpop.f32.mrf.mxu0  ;;  %13757 = vmatmul.mubr.msk.f32.gmra.mxu0 %vm273_vm0, %v15359_v62  ;;  %v19378_v62 = vld [vmem:[#allocation25_spill] sm:$0xff] }
  0xe0   : >> { %v15702_v55 = vpop.f32.mrf.mxu1  ;;  %13707 = vmatmul.mubr.msk.f32.gmra.mxu1 %vm273_vm0, %v19375_v57  ;;  %13759 = vmatprep.mubr.msk.f32.mxu0 %vm273_vm0, %v15365_v56 }
  0xe1   : >> { %13709 = vmatprep.mubr.msk.f32.mxu1 %vm273_vm0, %v19376_v59  ;;  %v15712_v60 = vpop.f32.mrf.mxu0 }
  0xe2   : >> { %v15714_v61 = vpop.f32.mrf.mxu1 }
  0xe3   : >> { %v15716_v63 = vpop.f32.mrf.mxu0  ;;  %13760 = vmatmul.mubr.msk.f32.gmra.mxu0 %vm273_vm0, %v15379_v58  ;;  %v19380_v58 = vld [vmem:[#allocation27_spill] sm:$0xff] }
  0xe4   : >> { %v15718_v0 = vpop.f32.mrf.mxu1  ;;  %13710 = vmatmul.mubr.msk.f32.gmra.mxu1 %vm273_vm0, %v19377_v1  ;;  %13762 = vmatprep.mubr.msk.f32.mxu0 %vm273_vm0, %v15385_v52 }
  0xe5   : >> { %13712 = vmatprep.mubr.msk.f32.mxu1 %vm273_vm0, %v19378_v62  ;;  %v15728_v56 = vpop.f32.mrf.mxu0 }
  0xe6   : >> { %v15730_v2 = vpop.f32.mrf.mxu1 }
  0xe7   : >> { %v15732_v3 = vpop.f32.mrf.mxu0  ;;  %13763 = vmatmul.mubr.msk.f32.gmra.mxu0 %vm273_vm0, %v15399_v54  ;;  %v19383_v54 = vld [vmem:[#allocation29_spill] sm:$0xff] }
  0xe8   : >> { %v15734_v5 = vpop.f32.mrf.mxu1  ;;  %13713 = vmatmul.mubr.msk.f32.gmra.mxu1 %vm273_vm0, %v19379_v9  ;;  %13765 = vmatprep.mubr.msk.f32.mxu0 %vm273_vm0, %v15405_v48 }
  0xe9   : >> { %13715 = vmatprep.mubr.msk.f32.mxu1 %vm273_vm0, %v19380_v58  ;;  %v15744_v52 = vpop.f32.mrf.mxu0 }
  0xea   : >> { %v15746_v10 = vpop.f32.mrf.mxu1 }
  0xeb   : >> { %v15748_v37 = vpop.f32.mrf.mxu0  ;;  %13766 = vmatmul.mubr.msk.f32.gmra.mxu0 %vm273_vm0, %v15419_v50  ;;  %v19386_v50 = vld [vmem:[#allocation30_spill] sm:$0xff] }
  0xec   : >> { %v15750_v38 = vpop.f32.mrf.mxu1  ;;  %13716 = vmatmul.mubr.msk.f32.gmra.mxu1 %vm273_vm0, %v19382_v39  ;;  %13768 = vmatprep.mubr.msk.f32.mxu0 %vm273_vm0, %v15425_v42 }
  0xed   : >> { %19381 = vst [vmem:[#allocation3_spill] sm:$0xff] %v15750_v38  ;;  %13718 = vmatprep.mubr.msk.f32.mxu1 %vm273_vm0, %v19383_v54  ;;  %v15760_v48 = vpop.f32.mrf.mxu0 }
  0xee   : >> { %v15762_v7 = vpop.f32.mrf.mxu1 }
  0xef   : >> { %19384 = vst [vmem:[#allocation4_spill] sm:$0xff] %v15762_v7  ;;  %v15764_v12 = vpop.f32.mrf.mxu0  ;;  %13769 = vmatmul.mubr.msk.f32.gmra.mxu0 %vm273_vm0, %v15439_v46  ;;  %v15796_v46 = vld [vmem:[%s14958_s20 + $0x18a] sm:$0xff] }
  0xf0   : >> { %v15766_v14 = vpop.f32.mrf.mxu1  ;;  %13719 = vmatmul.mubr.msk.f32.gmra.mxu1 %vm273_vm0, %v15422_v40  ;;  %13771 = vmatprep.mubr.msk.f32.mxu0 %vm273_vm0, %v15579_v4  ;;  %v19389_v40 = vld [vmem:[#allocation31_spill] sm:$0xff]  ;;  %v11192_v4 = vld [vmem:[%s14958_s20 + $0x1a0] sm:$0xff] }
  0xf1   : >> { %19385 = vst [vmem:[#allocation5_spill] sm:$0xff] %v15766_v14  ;;  %13721 = vmatprep.mubr.msk.f32.mxu1 %vm273_vm0, %v19386_v50  ;;  %v15776_v42 = vpop.f32.mrf.mxu0 }
  0xf2   : >> { %v15778_v54 = vpop.f32.mrf.mxu1 }
  0xf3   : >> { %19387 = vst [vmem:[#allocation6_spill] sm:$0xff] %v15778_v54  ;;  %v15784_v14 = vpop.f32.mrf.mxu0  ;;  %13772 = vmatmul.mubr.msk.f32.gmra.mxu0 %vm273_vm0, %v15593_v8 }
  0xf4   : >> { %v15786_v7 = vpop.f32.mrf.mxu1  ;;  %13722 = vmatmul.mubr.msk.f32.gmra.mxu1 %vm273_vm0, %v19389_v40  ;;  %13774 = vmatprep.mubr.msk.f32.mxu0 %vm273_vm0, %v11191_v6 }
  0xf5   : >> { %19388 = vst [vmem:[#allocation7_spill] sm:$0xff] %v15786_v7  ;;  %13724 = vmatprep.mubr.msk.f32.mxu1 %vm273_vm0, %v15781_v11  ;;  %v15799_v50 = vpop.f32.mrf.mxu0 }
  0xf6   : >> { %v15801_v54 = vpop.f32.mrf.mxu1 }
  0xf7   : >> { %19390 = vst [vmem:[#allocation8_spill] sm:$0xff] %v15801_v54  ;;  %v15803_v38 = vpop.f32.mrf.mxu0  ;;  %13775 = vmatmul.mubr.msk.f32.gmra.mxu0 %vm273_vm0, %v11192_v4  ;;  %v15825_v4 = vld [vmem:[%s19179_s1 + $0x58] sm:$0xff] }
  0xf8   : >> { %v15805_v7 = vpop.f32.mrf.mxu1  ;;  %13725 = vmatmul.mubr.msk.f32.gmra.mxu1 %vm273_vm0, %v15796_v46  ;;  %13829 = vmatprep.mubr.msk.f32.mxu0 %vm273_vm0, %v19358_v20 }
  0xf9   : >> { %19391 = vst [vmem:[#allocation9_spill] sm:$0xff] %v15805_v7  ;;  %13779 = vmatprep.mubr.msk.f32.mxu1 %vm273_vm0, %v15001_v13  ;;  %v15814_v6 = vpop.f32.mrf.mxu0  ;;  %v15830_v13 = vld [vmem:[%s19179_s1 + $0x60] sm:$0xff] }
  0xfa   : >> { %v15816_v8 = vpop.f32.mrf.mxu1 }
  0xfb   : >> { %19392 = vst [vmem:[#allocation10_spill] sm:$0xff] %v15816_v8  ;;  %v13531_v54 = vpop.f32.mrf.mxu0  ;;  %13830 = vmatmul.mubr.msk.f32.vlgmr.msra.gmra.mxu0 %vm273_vm0, %v19359_v22 }
  0xfc   : >> { %v13481_v40 = vpop.f32.mrf.mxu1  ;;  %13780 = vmatmul.mubr.msk.f32.vlgmr.msra.gmra.mxu1 %vm273_vm0, %v15017_v15  ;;  %13928 = vmatpush3.msra.mxu0 %v15618_v18 }
  0xfd   : >> { %v763_v20 = vadd.f32 %v13481_v40, %v15684_v43  ;;  %13878 = vmatpush3.msra.mxu1 %v15613_v16  ;;  %v1112_v8 = vpop.f32.mrf.mxu0  ;;  %13782 = vmatprep.mubr.msk.f32.mxu1 %vm273_vm0, %v15023_v17 }
  0xfe   : >> { %v757_v15 = vpop.f32.mrf.mxu1  ;;  %13832 = vmatprep.mubr.msk.f32.mxu0 %vm273_vm0, %v19360_v24  ;;  %13977 = vmatprep.subr.mxu1 %v15825_v4 }
  0xff   : >> { %v15839_v22 = vadd.f32 %v13531_v54, %v763_v20  ;;  %v758_v7 = vadd.f32 %v757_v15, %v15696_v49  ;;  %14027 = vmatprep.subr.mxu0 %v15830_v13  ;;  %v13534_v16 = vpop.f32.mrf.mxu0  ;;  %13833 = vmatmul.mubr.msk.f32.gmra.mxu0 %vm273_vm0, %v19361_v26 }
 0x100   : >> { %v13484_v43 = vpop.f32.mrf.mxu1  ;;  %13783 = vmatmul.mubr.msk.f32.gmra.mxu1 %vm273_vm0, %v15037_v19  ;;  %13835 = vmatprep.mubr.msk.f32.mxu0 %vm273_vm0, %v19362_v27  ;;  %v11233_v27 = vld [vmem:[%s14958_s20 + $0x81] sm:$0xff] }
 0x101   : >> { %v15848_v17 = vadd.f32 %v1112_v8, %v758_v7  ;;  %v773_v18 = vadd.f32 %v13484_v43, %v15700_v53  ;;  %13785 = vmatprep.mubr.msk.f32.mxu1 %vm273_vm0, %v15043_v21  ;;  %v1122_v49 = vpop.f32.mrf.mxu0  ;;  %v11234_v8 = vld [vmem:[%s14958_s20 + $0x91] sm:$0xff] }
 0x102   : >> { %v767_v24 = vpop.f32.mrf.mxu1 }
 0x103   : >> { %v15855_v54 = vadd.f32 %v13534_v16, %v773_v18  ;;  %v768_v19 = vadd.f32 %v767_v24, %v15712_v60  ;;  %v13537_v26 = vpop.f32.mrf.mxu0  ;;  %13836 = vmatmul.mubr.msk.f32.gmra.mxu0 %vm273_vm0, %v19363_v28  ;;  %v11236_v16 = vld [vmem:[%s14958_s20 + $0xa9] sm:$0xff] }
 0x104   : >> { %v13487_v40 = vpop.f32.mrf.mxu1  ;;  %13786 = vmatmul.mubr.msk.f32.gmra.mxu1 %vm273_vm0, %v15057_v23  ;;  %13838 = vmatprep.mubr.msk.f32.mxu0 %vm273_vm0, %v19364_v29 }
 0x105   : >> { %v15862_v53 = vadd.f32 %v1122_v49, %v768_v19  ;;  %v783_v21 = vadd.f32 %v13487_v40, %v15716_v63  ;;  %13788 = vmatprep.mubr.msk.f32.mxu1 %vm273_vm0, %v15063_v25  ;;  %v1132_v7 = vpop.f32.mrf.mxu0  ;;  %v11235_v63 = vld [vmem:[%s14958_s20 + $0x99] sm:$0xff]  ;;  %v11237_v19 = vld [vmem:[%s14958_s20 + $0xb1] sm:$0xff] }
 0x106   : >> { %v777_v60 = vpop.f32.mrf.mxu1 }
 0x107   : >> { %v15871_v23 = vadd.f32 %v13537_v26, %v783_v21  ;;  %v778_v28 = vadd.f32 %v777_v60, %v15728_v56  ;;  %v13540_v15 = vpop.f32.mrf.mxu0  ;;  %13839 = vmatmul.mubr.msk.f32.gmra.mxu0 %vm273_vm0, %v19365_v30  ;;  %v11238_v26 = vld [vmem:[%s14958_s20 + $0xc1] sm:$0xff] }
 0x108   : >> { %v13490_v20 = vpop.f32.mrf.mxu1  ;;  %13789 = vmatmul.mubr.msk.f32.gmra.mxu1 %vm273_vm0, %v11233_v27  ;;  %13841 = vmatprep.mubr.msk.f32.mxu0 %vm273_vm0, %v19366_v31 }
 0x109   : >> { %v15877_v25 = vadd.f32 %v1132_v7, %v778_v28  ;;  %v793_v29 = vadd.f32 %v13490_v20, %v15732_v3  ;;  %13791 = vmatprep.mubr.msk.f32.mxu1 %vm273_vm0, %v11234_v8  ;;  %v1142_v56 = vpop.f32.mrf.mxu0  ;;  %v11239_v7 = vld [vmem:[%s14958_s20 + $0xc9] sm:$0xff]  ;;  %v11240_v28 = vld [vmem:[%s14958_s20 + $0xd9] sm:$0xff] }
 0x10a   : >> { %v787_v43 = vpop.f32.mrf.mxu1 }
 0x10b   : >> { %v15885_v18 = vadd.f32 %v13540_v15, %v793_v29  ;;  %v788_v24 = vadd.f32 %v787_v43, %v15744_v52  ;;  %v13543_v49 = vpop.f32.mrf.mxu0  ;;  %13842 = vmatmul.mubr.msk.f32.gmra.mxu0 %vm273_vm0, %v19367_v32 }
 0x10c   : >> { %v13493_v30 = vpop.f32.mrf.mxu1  ;;  %13792 = vmatmul.mubr.msk.f32.gmra.mxu1 %vm273_vm0, %v11235_v63  ;;  %13844 = vmatprep.mubr.msk.f32.mxu0 %vm273_vm0, %v19368_v33  ;;  %v11241_v63 = vld [vmem:[%s14958_s20 + $0xe1] sm:$0xff] }
 0x10d   : >> { %v15891_v3 = vadd.f32 %v1142_v56, %v788_v24  ;;  %v803_v31 = vadd.f32 %v13493_v30, %v15748_v37  ;;  %13794 = vmatprep.mubr.msk.f32.mxu1 %vm273_vm0, %v11236_v16  ;;  %v1152_v52 = vpop.f32.mrf.mxu0  ;;  %v11242_v56 = vld [vmem:[%s14958_s20 + $0xf1] sm:$0xff] }
 0x10e   : >> { %v797_v40 = vpop.f32.mrf.mxu1 }
 0x10f   : >> { %v15899_v21 = vadd.f32 %v13543_v49, %v803_v31  ;;  %v798_v27 = vadd.f32 %v797_v40, %v15760_v48  ;;  %v13546_v60 = vpop.f32.mrf.mxu0  ;;  %13845 = vmatmul.mubr.msk.f32.gmra.mxu0 %vm273_vm0, %v19369_v34  ;;  %v11243_v49 = vld [vmem:[%s14958_s20 + $0xf9] sm:$0xff] }
 0x110   : >> { %v13496_v32 = vpop.f32.mrf.mxu1  ;;  %13795 = vmatmul.mubr.msk.f32.gmra.mxu1 %vm273_vm0, %v11237_v19  ;;  %13847 = vmatprep.mubr.msk.f32.mxu0 %vm273_vm0, %v19370_v35  ;;  %v11244_v19 = vld [vmem:[%s14958_s20 + $0x109] sm:$0xff] }
 0x111   : >> { %v15905_v37 = vadd.f32 %v1152_v52, %v798_v27  ;;  %v813_v33 = vadd.f32 %v13496_v32, %v15764_v12  ;;  %13797 = vmatprep.mubr.msk.f32.mxu1 %vm273_vm0, %v11238_v26  ;;  %v1162_v48 = vpop.f32.mrf.mxu0  ;;  %v11245_v27 = vld [vmem:[%s14958_s20 + $0x111] sm:$0xff] }
 0x112   : >> { %v807_v8 = vpop.f32.mrf.mxu1 }
 0x113   : >> { %v15913_v20 = vadd.f32 %v13546_v60, %v813_v33  ;;  %v808_v15 = vadd.f32 %v807_v8, %v15776_v42  ;;  %v13549_v29 = vpop.f32.mrf.mxu0  ;;  %13848 = vmatmul.mubr.msk.f32.gmra.mxu0 %vm273_vm0, %v19371_v36  ;;  %v11246_v60 = vld [vmem:[%s14958_s20 + $0x121] sm:$0xff] }
 0x114   : >> { %v13499_v34 = vpop.f32.mrf.mxu1  ;;  %13798 = vmatmul.mubr.msk.f32.gmra.mxu1 %vm273_vm0, %v11239_v7  ;;  %13850 = vmatprep.mubr.msk.f32.mxu0 %vm273_vm0, %v19372_v41 }
 0x115   : >> { %v15919_v12 = vadd.f32 %v1162_v48, %v808_v15  ;;  %v823_v35 = vadd.f32 %v13499_v34, %v15784_v14  ;;  %13800 = vmatprep.mubr.msk.f32.mxu1 %vm273_vm0, %v11240_v28  ;;  %v1172_v42 = vpop.f32.mrf.mxu0  ;;  %v11247_v48 = vld [vmem:[%s14958_s20 + $0x129] sm:$0xff]  ;;  %v11248_v15 = vld [vmem:[%s14958_s20 + $0x139] sm:$0xff] }
 0x116   : >> { %v817_v43 = vpop.f32.mrf.mxu1 }
 0x117   : >> { %v15927_v16 = vadd.f32 %v13549_v29, %v823_v35  ;;  %v818_v24 = vadd.f32 %v817_v43, %v15799_v50  ;;  %v13552_v30 = vpop.f32.mrf.mxu0  ;;  %13851 = vmatmul.mubr.msk.f32.gmra.mxu0 %vm273_vm0, %v19373_v45 }
 0x118   : >> { %v13502_v36 = vpop.f32.mrf.mxu1  ;;  %13801 = vmatmul.mubr.msk.f32.gmra.mxu1 %vm273_vm0, %v11241_v63  ;;  %13853 = vmatprep.mubr.msk.f32.mxu0 %vm273_vm0, %v19374_v47  ;;  %v11249_v63 = vld [vmem:[%s14958_s20 + $0x141] sm:$0xff] }
 0x119   : >> { %v15933_v14 = vadd.f32 %v1172_v42, %v818_v24  ;;  %v833_v41 = vadd.f32 %v13502_v36, %v15803_v38  ;;  %13803 = vmatprep.mubr.msk.f32.mxu1 %vm273_vm0, %v11242_v56  ;;  %v1182_v50 = vpop.f32.mrf.mxu0  ;;  %v11250_v42 = vld [vmem:[%s14958_s20 + $0x151] sm:$0xff] }
 0x11a   : >> { %v827_v31 = vpop.f32.mrf.mxu1  ;;  %v11315_v56 = vld [vmem:[%s14958_s20 + $0x152] sm:$0xff] }
 0x11b   : >> { %v15941_v40 = vadd.f32 %v13552_v30, %v833_v41  ;;  %v828_v52 = vadd.f32 %v827_v31, %v15814_v6  ;;  %v13555_v26 = vpop.f32.mrf.mxu0  ;;  %13854 = vmatmul.mubr.msk.f32.gmra.mxu0 %vm273_vm0, %v19375_v57  ;;  %v11251_v41 = vld [vmem:[%s14958_s20 + $0x159] sm:$0xff] }
 0x11c   : >> { %v13505_v45 = vpop.f32.mrf.mxu1  ;;  %13804 = vmatmul.mubr.msk.f32.gmra.mxu1 %vm273_vm0, %v11243_v49  ;;  %13856 = vmatprep.mubr.msk.f32.mxu0 %vm273_vm0, %v19376_v59  ;;  %v11316_v49 = vld [vmem:[%s14958_s20 + $0x15a] sm:$0xff] }
 0x11d   : >> { %v15947_v38 = vadd.f32 %v1182_v50, %v828_v52  ;;  %v843_v47 = vadd.f32 %v13505_v45, %v15686_v44  ;;  %13806 = vmatprep.mubr.msk.f32.mxu1 %vm273_vm0, %v11244_v19  ;;  %v1192_v6 = vpop.f32.mrf.mxu0  ;;  %v11252_v50 = vld [vmem:[%s14958_s20 + $0x169] sm:$0xff] }
 0x11e   : >> { %v837_v32 = vpop.f32.mrf.mxu1  ;;  %v11317_v19 = vld [vmem:[%s14958_s20 + $0x16a] sm:$0xff] }
 0x11f   : >> { %v15955_v33 = vadd.f32 %v13555_v26, %v843_v47  ;;  %v838_v7 = vadd.f32 %v837_v32, %v15698_v51  ;;  %v13558_v8 = vpop.f32.mrf.mxu0  ;;  %13857 = vmatmul.mubr.msk.f32.gmra.mxu0 %vm273_vm0, %v19377_v1  ;;  %v19393_v47 = vld [vmem:[#allocation3_spill] sm:$0xff]  ;;  %v11253_v32 = vld [vmem:[%s14958_s20 + $0x171] sm:$0xff] }
 0x120   : >> { %v13508_v57 = vpop.f32.mrf.mxu1  ;;  %13807 = vmatmul.mubr.msk.f32.gmra.mxu1 %vm273_vm0, %v11245_v27  ;;  %13859 = vmatprep.mubr.msk.f32.mxu0 %vm273_vm0, %v19378_v62 }
 0x121   : >> { %v15961_v44 = vadd.f32 %v1192_v6, %v838_v7  ;;  %v853_v59 = vadd.f32 %v13508_v57, %v15702_v55  ;;  %13809 = vmatprep.mubr.msk.f32.mxu1 %vm273_vm0, %v11246_v60  ;;  %v1202_v51 = vpop.f32.mrf.mxu0  ;;  %v11318_v6 = vld [vmem:[%s14958_s20 + $0x172] sm:$0xff] }
 0x122   : >> { %v847_v28 = vpop.f32.mrf.mxu1  ;;  %v19394_v57 = vld [vmem:[#allocation4_spill] sm:$0xff] }
 0x123   : >> { %v15969_v34 = vadd.f32 %v13558_v8, %v853_v59  ;;  %v848_v1 = vadd.f32 %v847_v28, %v15714_v61  ;;  %v13561_v35 = vpop.f32.mrf.mxu0  ;;  %13860 = vmatmul.mubr.msk.f32.gmra.mxu0 %vm273_vm0, %v19379_v9 }
 0x124   : >> { %v13511_v29 = vpop.f32.mrf.mxu1  ;;  %13810 = vmatmul.mubr.msk.f32.gmra.mxu1 %vm273_vm0, %v11247_v48  ;;  %13862 = vmatprep.mubr.msk.f32.mxu0 %vm273_vm0, %v19380_v58 }
 0x125   : >> { %v15975_v55 = vadd.f32 %v1202_v51, %v848_v1  ;;  %v863_v62 = vadd.f32 %v13511_v29, %v15718_v0  ;;  %13812 = vmatprep.mubr.msk.f32.mxu1 %vm273_vm0, %v11248_v15  ;;  %v1212_v43 = vpop.f32.mrf.mxu0  ;;  %v19395_v51 = vld [vmem:[#allocation5_spill] sm:$0xff]  ;;  %v19396_v1 = vld [vmem:[#allocation32_spill] sm:$0xff] }
 0x126   : >> { %v857_v61 = vpop.f32.mrf.mxu1 }
 0x127   : >> { %v15984_v24 = vadd.f32 %v13561_v35, %v863_v62  ;;  %v858_v9 = vadd.f32 %v857_v61, %v15730_v2  ;;  %v13564_v0 = vpop.f32.mrf.mxu0  ;;  %13863 = vmatmul.mubr.msk.f32.gmra.mxu0 %vm273_vm0, %v19382_v39  ;;  %v11256_v62 = vld [vmem:[%s14958_s20 + $0x199] sm:$0xff] }
 0x128   : >> { %v13514_v36 = vpop.f32.mrf.mxu1  ;;  %13813 = vmatmul.mubr.msk.f32.gmra.mxu1 %vm273_vm0, %v11249_v63  ;;  %13865 = vmatprep.mubr.msk.f32.mxu0 %vm273_vm0, %v11315_v56  ;;  %v11321_v63 = vld [vmem:[%s14958_s20 + $0x19a] sm:$0xff] }
 0x129   : >> { %v15990_v58 = vadd.f32 %v1212_v43, %v858_v9  ;;  %v873_v30 = vadd.f32 %v13514_v36, %v15734_v5  ;;  %13815 = vmatprep.mubr.msk.f32.mxu1 %vm273_vm0, %v11250_v42  ;;  %v1222_v31 = vpop.f32.mrf.mxu0  ;;  %v19397_v43 = vld [vmem:[#allocation6_spill] sm:$0xff] }
 0x12a   : >> { %v867_v2 = vpop.f32.mrf.mxu1  ;;  %v19398_v36 = vld [vmem:[#allocation2_spill] sm:$0xff] }
 0x12b   : >> { %v15999_v52 = vadd.f32 %v13564_v0, %v873_v30  ;;  %v868_v39 = vadd.f32 %v867_v2, %v15746_v10  ;;  %v13567_v26 = vpop.f32.mrf.mxu0  ;;  %13866 = vmatmul.mubr.msk.f32.gmra.mxu0 %vm273_vm0, %v11316_v49  ;;  %v19399_v0 = vld [vmem:[#allocation7_spill] sm:$0xff] }
 0x12c   : >> { %v13517_v45 = vpop.f32.mrf.mxu1  ;;  %13816 = vmatmul.mubr.msk.f32.gmra.mxu1 %vm273_vm0, %v11251_v41  ;;  %13868 = vmatprep.mubr.msk.f32.mxu0 %vm273_vm0, %v11317_v19  ;;  %v11257_v41 = vld [vmem:[%s14958_s20 + $0x1a1] sm:$0xff]  ;;  %v11422_v19 = vld [vmem:[%s14958_s20 + $0x1b1] sm:$0xff] }
 0x12d   : >> { %v16004_v5 = vadd.f32 %v1222_v31, %v868_v39  ;;  %v883_v27 = vadd.f32 %v13517_v45, %v19393_v47  ;;  %13818 = vmatprep.mubr.msk.f32.mxu1 %vm273_vm0, %v11252_v50  ;;  %v1232_v10 = vpop.f32.mrf.mxu0  ;;  %v11322_v49 = vld [vmem:[%s14958_s20 + $0x1a2] sm:$0xff]  ;;  %v11357_v50 = vld [vmem:[%s14958_s20 + $0x1b0] sm:$0xff] }
 0x12e   : >> { %v877_v60 = vpop.f32.mrf.mxu1  ;;  %v19400_v45 = vld [vmem:[#allocation8_spill] sm:$0xff] }
 0x12f   : >> { %v16011_v7 = vadd.f32 %v13567_v26, %v883_v27  ;;  %v878_v8 = vadd.f32 %v877_v60, %v19394_v57  ;;  %v13570_v48 = vpop.f32.mrf.mxu0  ;;  %13869 = vmatmul.mubr.msk.f32.gmra.mxu0 %vm273_vm0, %v11318_v6  ;;  %v11358_v60 = vld [vmem:[%s14958_s20 + $0x1b8] sm:$0xff] }
 0x130   : >> { %v13520_v59 = vpop.f32.mrf.mxu1  ;;  %13819 = vmatmul.mubr.msk.f32.gmra.mxu1 %vm273_vm0, %v11253_v32  ;;  %13871 = vmatprep.mubr.msk.f32.mxu0 %vm273_vm0, %v15781_v11  ;;  %v19401_v32 = vld [vmem:[#allocation9_spill] sm:$0xff] }
 0x131   : >> { %v16016_v28 = vadd.f32 %v1232_v10, %v878_v8  ;;  %v893_v15 = vadd.f32 %v13520_v59, %v19395_v51  ;;  %13821 = vmatprep.mubr.msk.f32.mxu1 %vm273_vm0, %v19396_v1  ;;  %v1242_v35 = vpop.f32.mrf.mxu0  ;;  %v11423_v10 = vld [vmem:[%s14958_s20 + $0x1b9] sm:$0xff]  ;;  %v16060_v1 = vld [vmem:[%s14958_s20 + $0x1c9] sm:$0xff] }
 0x132   : >> { %v887_v29 = vpop.f32.mrf.mxu1  ;;  %19403 = vst [vmem:[#allocation11_spill] sm:$0xff] %v16060_v1 }
 0x133   : >> { %v16025_v61 = vadd.f32 %v13570_v48, %v893_v15  ;;  %v888_v42 = vadd.f32 %v887_v29, %v19397_v43  ;;  %v13573_v9 = vpop.f32.mrf.mxu0  ;;  %13872 = vmatmul.mubr.msk.f32.gmra.mxu0 %vm273_vm0, %v15796_v46  ;;  %v19402_v48 = vld [vmem:[#allocation10_spill] sm:$0xff]  ;;  %v16057_v15 = vld [vmem:[%s14958_s20 + $0x1c8] sm:$0xff] }
 0x134   : >> { %v13523_v56 = vpop.f32.mrf.mxu1  ;;  %13822 = vmatmul.mubr.msk.f32.gmra.mxu1 %vm273_vm0, %v19398_v36  ;;  %13874 = vmatprep.mubr.msk.f32.mxu0 %vm273_vm0, %v11321_v63  ;;  %v16072_v63 = vld [vmem:[%s19179_s1 + $0x70] sm:$0xff] }
 0x135   : >> { %v16032_v11 = vadd.f32 %v1242_v35, %v888_v42  ;;  %v903_v30 = vadd.f32 %v13523_v56, %v19399_v0  ;;  %13824 = vmatprep.mubr.msk.f32.mxu1 %vm273_vm0, %v11256_v62  ;;  %v1252_v31 = vpop.f32.mrf.mxu0  ;;  %v16067_v62 = vld [vmem:[%s19179_s1 + $0x68] sm:$0xff]  ;;  %v16080_v56 = vld [vmem:[%s14958_s20 + $0x1d0] sm:$0xff] }
 0x136   : >> { %v897_v2 = vpop.f32.mrf.mxu1 }
 0x137   : >> { %v16041_v39 = vadd.f32 %v13573_v9, %v903_v30  ;;  %v898_v46 = vadd.f32 %v897_v2, %v19400_v45  ;;  %v13576_v47 = vpop.f32.mrf.mxu0  ;;  %13875 = vmatmul.mubr.msk.f32.gmra.mxu0 %vm273_vm0, %v11322_v49  ;;  %v16083_v9 = vld [vmem:[%s14958_s20 + $0x1d1] sm:$0xff]  ;;  %v16090_v30 = vld [vmem:[%s14958_s20 + $0x1e0] sm:$0xff] }
 0x138   : >> { %v13526_v26 = vpop.f32.mrf.mxu1  ;;  %13825 = vmatmul.mubr.msk.f32.gmra.mxu1 %vm273_vm0, %v11257_v41  ;;  %13929 = vmatprep.mubr.msk.f32.mxu0 %vm273_vm0, %v11422_v19  ;;  %19404 = vst [vmem:[#allocation12_spill] sm:$0xff] %v16083_v9 }
 0x139   : >> { %v16046_v27 = vadd.f32 %v1252_v31, %v898_v46  ;;  %v913_v6 = vadd.f32 %v13526_v26, %v19401_v32  ;;  %13879 = vmatprep.mubr.msk.f32.mxu1 %vm273_vm0, %v11357_v50  ;;  %v1262_v8 = vpop.f32.mrf.mxu0  ;;  %v16115_v50 = vld [vmem:[%s14958_s20 + $0x1e9] sm:$0xff]  ;;  %v16118_v46 = vld [vmem:[%s14958_s20 + $0x1f8] sm:$0xff] }
 0x13a   : >> { %v907_v57 = vpop.f32.mrf.mxu1  ;;  %19406 = vst [vmem:[#allocation14_spill] sm:$0xff] %v16115_v50  ;;  %v16121_v26 = vld [vmem:[%s14958_s20 + $0x1f9] sm:$0xff] }
 0x13b   : >> { %v16053_v59 = vadd.f32 %v13576_v47, %v913_v6  ;;  %v908_v51 = vadd.f32 %v907_v57, %v19402_v48  ;;  %v13631_v35 = vpop.f32.mrf.mxu0  ;;  %13930 = vmatmul.mubr.msk.f32.vlgmr.msra.gmra.mxu0 %vm273_vm0, %v11423_v10  ;;  %19407 = vst [vmem:[#allocation15_spill] sm:$0xff] %v16121_v26  ;;  %v16138_v57 = vld [vmem:[%s14958_s20 + $0x200] sm:$0xff] }
 0x13c   : >> { %v13581_v29 = vpop.f32.mrf.mxu1  ;;  %13880 = vmatmul.mubr.msk.f32.vlgmr.msra.gmra.mxu1 %vm273_vm0, %v11358_v60  ;;  %14028 = vmatpush3.msra.mxu0 %v15830_v13 }
 0x13d   : >> { %v16074_v43 = vadd.f32 %v1262_v8, %v908_v51  ;;  %v1661_v42 = vadd.f32 %v13581_v29, %v15839_v22  ;;  %13978 = vmatpush3.msra.mxu1 %v15825_v4  ;;  %v1888_v0 = vpop.f32.mrf.mxu0  ;;  %13882 = vmatprep.mubr.msk.f32.mxu1 %vm273_vm0, %v16057_v15  ;;  %v16093_v22 = vld [vmem:[%s14958_s20 + $0x1e1] sm:$0xff]  ;;  %v16144_v51 = vld [vmem:[%s14958_s20 + $0x210] sm:$0xff] }
 0x13e   : >> { %v1501_v36 = vpop.f32.mrf.mxu1  ;;  %13932 = vmatprep.mubr.msk.f32.mxu0 %vm273_vm0, %v16060_v1  ;;  %19405 = vst [vmem:[#allocation13_spill] sm:$0xff] %v16093_v22  ;;  %14077 = vmatprep.subr.mxu1 %v16067_v62  ;;  %v16147_v29 = vld [vmem:[%s14958_s20 + $0x211] sm:$0xff] }
 0x13f   : >> { %v16095_v4 = vadd.f32 %v13631_v35, %v1661_v42  ;;  %v1660_v13 = vadd.f32 %v1501_v36, %v15848_v17  ;;  %14127 = vmatprep.subr.mxu0 %v16072_v63  ;;  %v13634_v49 = vpop.f32.mrf.mxu0  ;;  %13933 = vmatmul.mubr.msk.f32.gmra.mxu0 %vm273_vm0, %v16083_v9  ;;  %v16112_v17 = vld [vmem:[%s14958_s20 + $0x1e8] sm:$0xff]  ;;  %19409 = vst [vmem:[#allocation17_spill] sm:$0xff] %v16147_v29  ;;  %v16300_v9 = vld [vmem:[%s14958_s20 + $0x2a0] sm:$0xff] }
 0x140   : >> { %v13584_v41 = vpop.f32.mrf.mxu1  ;;  %13883 = vmatmul.mubr.msk.f32.gmra.mxu1 %vm273_vm0, %v16080_v56  ;;  %13935 = vmatprep.mubr.msk.f32.mxu0 %vm273_vm0, %v16093_v22 }
 0x141   : >> { %v16104_v2 = vadd.f32 %v1888_v0, %v1660_v13  ;;  %v1663_v31 = vadd.f32 %v13584_v41, %v15855_v54  ;;  %13885 = vmatprep.mubr.msk.f32.mxu1 %vm273_vm0, %v16090_v30  ;;  %v1898_v45 = vpop.f32.mrf.mxu0  ;;  %v16164_v41 = vld [vmem:[%s14958_s20 + $0x218] sm:$0xff] }
 0x142   : >> { %v1511_v19 = vpop.f32.mrf.mxu1 }
 0x143   : >> { %v16123_v54 = vadd.f32 %v13634_v49, %v1663_v31  ;;  %v1662_v47 = vadd.f32 %v1511_v19, %v15862_v53  ;;  %v13637_v6 = vpop.f32.mrf.mxu0  ;;  %13936 = vmatmul.mubr.msk.f32.gmra.mxu0 %vm273_vm0, %v16115_v50  ;;  %v16141_v53 = vld [vmem:[%s14958_s20 + $0x201] sm:$0xff] }
 0x144   : >> { %v13587_v32 = vpop.f32.mrf.mxu1  ;;  %13886 = vmatmul.mubr.msk.f32.gmra.mxu1 %vm273_vm0, %v16112_v17  ;;  %13938 = vmatprep.mubr.msk.f32.mxu0 %vm273_vm0, %v16121_v26  ;;  %19408 = vst [vmem:[#allocation16_spill] sm:$0xff] %v16141_v53  ;;  %v16170_v19 = vld [vmem:[%s14958_s20 + $0x228] sm:$0xff] }
 0x145   : >> { %v16130_v60 = vadd.f32 %v1898_v45, %v1662_v47  ;;  %v1665_v10 = vadd.f32 %v13587_v32, %v15871_v23  ;;  %13888 = vmatprep.mubr.msk.f32.mxu1 %vm273_vm0, %v16118_v46  ;;  %v1908_v48 = vpop.f32.mrf.mxu0  ;;  %v16173_v45 = vld [vmem:[%s14958_s20 + $0x229] sm:$0xff] }
 0x146   : >> { %v1521_v8 = vpop.f32.mrf.mxu1  ;;  %19411 = vst [vmem:[#allocation19_spill] sm:$0xff] %v16173_v45  ;;  %v16274_v50 = vld [vmem:[%s14958_s20 + $0x288] sm:$0xff] }
 0x147   : >> { %v16149_v23 = vadd.f32 %v13637_v6, %v1665_v10  ;;  %v1664_v35 = vadd.f32 %v1521_v8, %v15877_v25  ;;  %v13640_v36 = vpop.f32.mrf.mxu0  ;;  %13939 = vmatmul.mubr.msk.f32.gmra.mxu0 %vm273_vm0, %v16141_v53  ;;  %v16167_v25 = vld [vmem:[%s14958_s20 + $0x219] sm:$0xff]  ;;  %v16248_v53 = vld [vmem:[%s14958_s20 + $0x270] sm:$0xff] }
 0x148   : >> { %v13590_v42 = vpop.f32.mrf.mxu1  ;;  %13889 = vmatmul.mubr.msk.f32.gmra.mxu1 %vm273_vm0, %v16138_v57  ;;  %13941 = vmatprep.mubr.msk.f32.mxu0 %vm273_vm0, %v16147_v29  ;;  %19410 = vst [vmem:[#allocation18_spill] sm:$0xff] %v16167_v25 }
 0x149   : >> { %v16156_v0 = vadd.f32 %v1908_v48, %v1664_v35  ;;  %v1667_v13 = vadd.f32 %v13590_v42, %v15885_v18  ;;  %13891 = vmatprep.mubr.msk.f32.mxu1 %vm273_vm0, %v16144_v51  ;;  %v1918_v31 = vpop.f32.mrf.mxu0  ;;  %v16190_v48 = vld [vmem:[%s14958_s20 + $0x230] sm:$0xff] }
 0x14a   : >> { %v1531_v49 = vpop.f32.mrf.mxu1 }
 0x14b   : >> { %v16175_v18 = vadd.f32 %v13640_v36, %v1667_v13  ;;  %v1666_v47 = vadd.f32 %v1531_v49, %v15891_v3  ;;  %v13643_v6 = vpop.f32.mrf.mxu0  ;;  %13942 = vmatmul.mubr.msk.f32.gmra.mxu0 %vm273_vm0, %v16167_v25  ;;  %v16193_v3 = vld [vmem:[%s14958_s20 + $0x231] sm:$0xff]  ;;  %v16196_v36 = vld [vmem:[%s14958_s20 + $0x240] sm:$0xff] }
 0x14c   : >> { %v13593_v32 = vpop.f32.mrf.mxu1  ;;  %13892 = vmatmul.mubr.msk.f32.gmra.mxu1 %vm273_vm0, %v16164_v41  ;;  %13944 = vmatprep.mubr.msk.f32.mxu0 %vm273_vm0, %v16173_v45  ;;  %19412 = vst [vmem:[#allocation20_spill] sm:$0xff] %v16193_v3  ;;  %v16199_v13 = vld [vmem:[%s14958_s20 + $0x241] sm:$0xff]  ;;  %v16222_v25 = vld [vmem:[%s14958_s20 + $0x258] sm:$0xff] }
 0x14d   : >> { %v16182_v10 = vadd.f32 %v1918_v31, %v1666_v47  ;;  %v1669_v8 = vadd.f32 %v13593_v32, %v15899_v21  ;;  %13894 = vmatprep.mubr.msk.f32.mxu1 %vm273_vm0, %v16170_v19  ;;  %v1928_v42 = vpop.f32.mrf.mxu0  ;;  %19413 = vst [vmem:[#allocation21_spill] sm:$0xff] %v16199_v13 }
 0x14e   : >> { %v1541_v35 = vpop.f32.mrf.mxu1 }
 0x14f   : >> { %v16201_v21 = vadd.f32 %v13643_v6, %v1669_v8  ;;  %v1668_v49 = vadd.f32 %v1541_v35, %v15905_v37  ;;  %v13646_v47 = vpop.f32.mrf.mxu0  ;;  %13945 = vmatmul.mubr.msk.f32.gmra.mxu0 %vm273_vm0, %v16193_v3  ;;  %v16216_v6 = vld [vmem:[%s14958_s20 + $0x248] sm:$0xff] }
 0x150   : >> { %v13596_v31 = vpop.f32.mrf.mxu1  ;;  %13895 = vmatmul.mubr.msk.f32.gmra.mxu1 %vm273_vm0, %v16190_v48  ;;  %13947 = vmatprep.mubr.msk.f32.mxu0 %vm273_vm0, %v16199_v13  ;;  %v16219_v37 = vld [vmem:[%s14958_s20 + $0x249] sm:$0xff] }
 0x151   : >> { %v16208_v32 = vadd.f32 %v1928_v42, %v1668_v49  ;;  %v1671_v45 = vadd.f32 %v13596_v31, %v15913_v20  ;;  %13897 = vmatprep.mubr.msk.f32.mxu1 %vm273_vm0, %v16196_v36  ;;  %19414 = vst [vmem:[#allocation22_spill] sm:$0xff] %v16219_v37  ;;  %v1938_v35 = vpop.f32.mrf.mxu0  ;;  %v16225_v42 = vld [vmem:[%s14958_s20 + $0x259] sm:$0xff] }
 0x152   : >> { %v1551_v8 = vpop.f32.mrf.mxu1  ;;  %19415 = vst [vmem:[#allocation23_spill] sm:$0xff] %v16225_v42 }
 0x153   : >> { %v16227_v20 = vadd.f32 %v13646_v47, %v1671_v45  ;;  %v1670_v49 = vadd.f32 %v1551_v8, %v15919_v12  ;;  %v13649_v13 = vpop.f32.mrf.mxu0  ;;  %13948 = vmatmul.mubr.msk.f32.gmra.mxu0 %vm273_vm0, %v16219_v37  ;;  %v16242_v45 = vld [vmem:[%s14958_s20 + $0x260] sm:$0xff] }
 0x154   : >> { %v13599_v31 = vpop.f32.mrf.mxu1  ;;  %13898 = vmatmul.mubr.msk.f32.gmra.mxu1 %vm273_vm0, %v16216_v6  ;;  %13950 = vmatprep.mubr.msk.f32.mxu0 %vm273_vm0, %v16225_v42  ;;  %v16245_v12 = vld [vmem:[%s14958_s20 + $0x261] sm:$0xff] }
 0x155   : >> { %v16234_v3 = vadd.f32 %v1938_v35, %v1670_v49  ;;  %v1673_v29 = vadd.f32 %v13599_v31, %v15927_v16  ;;  %13900 = vmatprep.mubr.msk.f32.mxu1 %vm273_vm0, %v16222_v25  ;;  %19416 = vst [vmem:[#allocation24_spill] sm:$0xff] %v16245_v12  ;;  %v1948_v8 = vpop.f32.mrf.mxu0  ;;  %v16251_v35 = vld [vmem:[%s14958_s20 + $0x271] sm:$0xff] }
 0x156   : >> { %v1561_v47 = vpop.f32.mrf.mxu1  ;;  %19417 = vst [vmem:[#allocation25_spill] sm:$0xff] %v16251_v35 }
 0x157   : >> { %v16253_v16 = vadd.f32 %v13649_v13, %v1673_v29  ;;  %v1672_v49 = vadd.f32 %v1561_v47, %v15933_v14  ;;  %v13652_v42 = vpop.f32.mrf.mxu0  ;;  %13951 = vmatmul.mubr.msk.f32.gmra.mxu0 %vm273_vm0, %v16245_v12  ;;  %v16268_v29 = vld [vmem:[%s14958_s20 + $0x278] sm:$0xff] }
 0x158   : >> { %v13602_v31 = vpop.f32.mrf.mxu1  ;;  %13901 = vmatmul.mubr.msk.f32.gmra.mxu1 %vm273_vm0, %v16242_v45  ;;  %13953 = vmatprep.mubr.msk.f32.mxu0 %vm273_vm0, %v16251_v35  ;;  %v16271_v14 = vld [vmem:[%s14958_s20 + $0x279] sm:$0xff] }
 0x159   : >> { %v16260_v37 = vadd.f32 %v1948_v8, %v1672_v49  ;;  %v1675_v26 = vadd.f32 %v13602_v31, %v15941_v40  ;;  %13903 = vmatprep.mubr.msk.f32.mxu1 %vm273_vm0, %v16248_v53  ;;  %19418 = vst [vmem:[#allocation26_spill] sm:$0xff] %v16271_v14  ;;  %v1958_v47 = vpop.f32.mrf.mxu0  ;;  %v16277_v8 = vld [vmem:[%s14958_s20 + $0x289] sm:$0xff] }
 0x15a   : >> { %v1571_v13 = vpop.f32.mrf.mxu1  ;;  %19419 = vst [vmem:[#allocation27_spill] sm:$0xff] %v16277_v8 }
 0x15b   : >> { %v16279_v40 = vadd.f32 %v13652_v42, %v1675_v26  ;;  %v1674_v49 = vadd.f32 %v1571_v13, %v15947_v38  ;;  %v13655_v35 = vpop.f32.mrf.mxu0  ;;  %13954 = vmatmul.mubr.msk.f32.gmra.mxu0 %vm273_vm0, %v16271_v14  ;;  %v16294_v26 = vld [vmem:[%s14958_s20 + $0x290] sm:$0xff] }
 0x15c   : >> { %v13605_v31 = vpop.f32.mrf.mxu1  ;;  %13904 = vmatmul.mubr.msk.f32.gmra.mxu1 %vm273_vm0, %v16268_v29  ;;  %13956 = vmatprep.mubr.msk.f32.mxu0 %vm273_vm0, %v16277_v8  ;;  %v16297_v38 = vld [vmem:[%s14958_s20 + $0x291] sm:$0xff] }
 0x15d   : >> { %v16286_v12 = vadd.f32 %v1958_v47, %v1674_v49  ;;  %v1677_v22 = vadd.f32 %v13605_v31, %v15955_v33  ;;  %13906 = vmatprep.mubr.msk.f32.mxu1 %vm273_vm0, %v16274_v50  ;;  %19420 = vst [vmem:[#allocation28_spill] sm:$0xff] %v16297_v38  ;;  %v1968_v13 = vpop.f32.mrf.mxu0  ;;  %v16303_v47 = vld [vmem:[%s14958_s20 + $0x2a1] sm:$0xff] }
 0x15e   : >> { %v1581_v42 = vpop.f32.mrf.mxu1  ;;  %19421 = vst [vmem:[#allocation29_spill] sm:$0xff] %v16303_v47 }
 0x15f   : >> { %v16305_v33 = vadd.f32 %v13655_v35, %v1677_v22  ;;  %v1676_v49 = vadd.f32 %v1581_v42, %v15961_v44  ;;  %v13658_v8 = vpop.f32.mrf.mxu0  ;;  %13957 = vmatmul.mubr.msk.f32.gmra.mxu0 %vm273_vm0, %v16297_v38  ;;  %v16320_v22 = vld [vmem:[%s14958_s20 + $0x2a8] sm:$0xff] }
 0x160   : >> { %v13608_v31 = vpop.f32.mrf.mxu1  ;;  %13907 = vmatmul.mubr.msk.f32.gmra.mxu1 %vm273_vm0, %v16294_v26  ;;  %13959 = vmatprep.mubr.msk.f32.mxu0 %vm273_vm0, %v16303_v47  ;;  %v16323_v44 = vld [vmem:[%s14958_s20 + $0x2a9] sm:$0xff] }
 0x161   : >> { %19422 = vst [vmem:[#allocation30_spill] sm:$0xff] %v16305_v33  ;;  %v16312_v14 = vadd.f32 %v1968_v13, %v1676_v49  ;;  %v1679_v1 = vadd.f32 %v13608_v31, %v15969_v34  ;;  %13909 = vmatprep.mubr.msk.f32.mxu1 %vm273_vm0, %v16300_v9  ;;  %19424 = vst [vmem:[#allocation3_spill] sm:$0xff] %v16323_v44  ;;  %v1978_v42 = vpop.f32.mrf.mxu0  ;;  %v16326_v33 = vld [vmem:[%s14958_s20 + $0x2b8] sm:$0xff] }
 0x162   : >> { %v1591_v35 = vpop.f32.mrf.mxu1  ;;  %v16329_v13 = vld [vmem:[%s14958_s20 + $0x2b9] sm:$0xff] }
 0x163   : >> { %19423 = vst [vmem:[#allocation31_spill] sm:$0xff] %v16312_v14  ;;  %19425 = vst [vmem:[#allocation4_spill] sm:$0xff] %v16329_v13  ;;  %v16331_v34 = vadd.f32 %v13658_v8, %v1679_v1  ;;  %v1678_v49 = vadd.f32 %v1591_v35, %v15975_v55  ;;  %v13661_v47 = vpop.f32.mrf.mxu0  ;;  %13960 = vmatmul.mubr.msk.f32.gmra.mxu0 %vm273_vm0, %v16323_v44  ;;  %v16346_v1 = vld [vmem:[%s14958_s20 + $0x2c0] sm:$0xff] }
 0x164   : >> { %v13611_v31 = vpop.f32.mrf.mxu1  ;;  %13910 = vmatmul.mubr.msk.f32.gmra.mxu1 %vm273_vm0, %v16320_v22  ;;  %13962 = vmatprep.mubr.msk.f32.mxu0 %vm273_vm0, %v16329_v13  ;;  %v16349_v55 = vld [vmem:[%s14958_s20 + $0x2c1] sm:$0xff] }
 0x165   : >> { %19426 = vst [vmem:[#allocation5_spill] sm:$0xff] %v16331_v34  ;;  %v16338_v38 = vadd.f32 %v1978_v42, %v1678_v49  ;;  %v1681_v14 = vadd.f32 %v13611_v31, %v15984_v24  ;;  %13912 = vmatprep.mubr.msk.f32.mxu1 %vm273_vm0, %v16326_v33  ;;  %19428 = vst [vmem:[#allocation6_spill] sm:$0xff] %v16349_v55  ;;  %v1988_v35 = vpop.f32.mrf.mxu0  ;;  %v16352_v34 = vld [vmem:[%s14958_s20 + $0x2d0] sm:$0xff] }
 0x166   : >> { %v1601_v8 = vpop.f32.mrf.mxu1  ;;  %v16355_v42 = vld [vmem:[%s14958_s20 + $0x2d1] sm:$0xff] }
 0x167   : >> { %19427 = vst [vmem:[#allocation32_spill] sm:$0xff] %v16338_v38  ;;  %19429 = vst [vmem:[#allocation2_spill] sm:$0xff] %v16355_v42  ;;  %v16357_v24 = vadd.f32 %v13661_v47, %v1681_v14  ;;  %v1680_v49 = vadd.f32 %v1601_v8, %v15990_v58  ;;  %v13664_v13 = vpop.f32.mrf.mxu0  ;;  %13963 = vmatmul.mubr.msk.f32.gmra.mxu0 %vm273_vm0, %v16349_v55  ;;  %v16372_v14 = vld [vmem:[%s14958_s20 + $0x2d8] sm:$0xff] }
 0x168   : >> { %v13614_v31 = vpop.f32.mrf.mxu1  ;;  %13913 = vmatmul.mubr.msk.f32.gmra.mxu1 %vm273_vm0, %v16346_v1  ;;  %13965 = vmatprep.mubr.msk.f32.mxu0 %vm273_vm0, %v16355_v42  ;;  %v16375_v58 = vld [vmem:[%s14958_s20 + $0x2d9] sm:$0xff] }
 0x169   : >> { %19430 = vst [vmem:[#allocation7_spill] sm:$0xff] %v16357_v24  ;;  %v16364_v44 = vadd.f32 %v1988_v35, %v1680_v49  ;;  %v1683_v38 = vadd.f32 %v13614_v31, %v15999_v52  ;;  %13915 = vmatprep.mubr.msk.f32.mxu1 %vm273_vm0, %v16352_v34  ;;  %19432 = vst [vmem:[#allocation9_spill] sm:$0xff] %v16375_v58  ;;  %v1998_v8 = vpop.f32.mrf.mxu0  ;;  %v16378_v24 = vld [vmem:[%s14958_s20 + $0x2e8] sm:$0xff] }
 0x16a   : >> { %v1611_v47 = vpop.f32.mrf.mxu1  ;;  %v16381_v35 = vld [vmem:[%s14958_s20 + $0x2e9] sm:$0xff] }
 0x16b   : >> { %19431 = vst [vmem:[#allocation8_spill] sm:$0xff] %v16364_v44  ;;  %19433 = vst [vmem:[#allocation10_spill] sm:$0xff] %v16381_v35  ;;  %v16383_v52 = vadd.f32 %v13664_v13, %v1683_v38  ;;  %v1682_v49 = vadd.f32 %v1611_v47, %v16004_v5  ;;  %v13667_v42 = vpop.f32.mrf.mxu0  ;;  %13966 = vmatmul.mubr.msk.f32.gmra.mxu0 %vm273_vm0, %v16375_v58  ;;  %v16398_v38 = vld [vmem:[%s14958_s20 + $0x2f0] sm:$0xff] }
 0x16c   : >> { %v13617_v31 = vpop.f32.mrf.mxu1  ;;  %13916 = vmatmul.mubr.msk.f32.gmra.mxu1 %vm273_vm0, %v16372_v14  ;;  %13968 = vmatprep.mubr.msk.f32.mxu0 %vm273_vm0, %v16381_v35  ;;  %v16401_v5 = vld [vmem:[%s14958_s20 + $0x2f1] sm:$0xff] }
 0x16d   : >> { %19434 = vst [vmem:[#allocation33_spill] sm:$0xff] %v16383_v52  ;;  %v16390_v55 = vadd.f32 %v1998_v8, %v1682_v49  ;;  %v1685_v44 = vadd.f32 %v13617_v31, %v16011_v7  ;;  %13918 = vmatprep.mubr.msk.f32.mxu1 %vm273_vm0, %v16378_v24  ;;  %19436 = vst [vmem:[#allocation35_spill] sm:$0xff] %v16401_v5  ;;  %v2008_v47 = vpop.f32.mrf.mxu0  ;;  %v16404_v52 = vld [vmem:[%s14958_s20 + $0x300] sm:$0xff] }
 0x16e   : >> { %v1621_v13 = vpop.f32.mrf.mxu1  ;;  %v16407_v8 = vld [vmem:[%s14958_s20 + $0x301] sm:$0xff] }
 0x16f   : >> { %19435 = vst [vmem:[#allocation34_spill] sm:$0xff] %v16390_v55  ;;  %19437 = vst [vmem:[#allocation36_spill] sm:$0xff] %v16407_v8  ;;  %v16409_v7 = vadd.f32 %v13667_v42, %v1685_v44  ;;  %v1684_v49 = vadd.f32 %v1621_v13, %v16016_v28  ;;  %v13670_v35 = vpop.f32.mrf.mxu0  ;;  %13969 = vmatmul.mubr.msk.f32.gmra.mxu0 %vm273_vm0, %v16401_v5  ;;  %v16424_v44 = vld [vmem:[%s14958_s20 + $0x308] sm:$0xff] }
 0x170   : >> { %v13620_v31 = vpop.f32.mrf.mxu1  ;;  %13919 = vmatmul.mubr.msk.f32.gmra.mxu1 %vm273_vm0, %v16398_v38  ;;  %13971 = vmatprep.mubr.msk.f32.mxu0 %vm273_vm0, %v16407_v8  ;;  %v16427_v28 = vld [vmem:[%s14958_s20 + $0x309] sm:$0xff] }
 0x171   : >> { %19438 = vst [vmem:[#allocation37_spill] sm:$0xff] %v16409_v7  ;;  %v16416_v58 = vadd.f32 %v2008_v47, %v1684_v49  ;;  %v1687_v55 = vadd.f32 %v13620_v31, %v16025_v61  ;;  %13921 = vmatprep.mubr.msk.f32.mxu1 %vm273_vm0, %v16404_v52  ;;  %19440 = vst [vmem:[#allocation39_spill] sm:$0xff] %v16427_v28  ;;  %v2018_v13 = vpop.f32.mrf.mxu0  ;;  %v16430_v7 = vld [vmem:[%s14958_s20 + $0x318] sm:$0xff] }
 0x172   : >> { %v1631_v42 = vpop.f32.mrf.mxu1  ;;  %v16433_v47 = vld [vmem:[%s14958_s20 + $0x319] sm:$0xff] }
 0x173   : >> { %19439 = vst [vmem:[#allocation38_spill] sm:$0xff] %v16416_v58  ;;  %19441 = vst [vmem:[#allocation40_spill] sm:$0xff] %v16433_v47  ;;  %v16435_v61 = vadd.f32 %v13670_v35, %v1687_v55  ;;  %v1686_v49 = vadd.f32 %v1631_v42, %v16032_v11  ;;  %v13673_v5 = vpop.f32.mrf.mxu0  ;;  %13972 = vmatmul.mubr.msk.f32.gmra.mxu0 %vm273_vm0, %v16427_v28  ;;  %v16450_v11 = vld [vmem:[%s14958_s20 + $0x320] sm:$0xff] }
 0x174   : >> { %v13623_v31 = vpop.f32.mrf.mxu1  ;;  %13922 = vmatmul.mubr.msk.f32.gmra.mxu1 %vm273_vm0, %v16424_v44  ;;  %13974 = vmatprep.mubr.msk.f32.mxu0 %vm273_vm0, %v16433_v47  ;;  %19443 = vst [vmem:[#allocation42_spill] sm:$0xff] %v16450_v11  ;;  %v16453_v55 = vld [vmem:[%s14958_s20 + $0x321] sm:$0xff] }
 0x175   : >> { %19442 = vst [vmem:[#allocation41_spill] sm:$0xff] %v16435_v61  ;;  %v16442_v8 = vadd.f32 %v2018_v13, %v1686_v49  ;;  %v1689_v58 = vadd.f32 %v13623_v31, %v16041_v39  ;;  %13924 = vmatprep.mubr.msk.f32.mxu1 %vm273_vm0, %v16430_v7  ;;  %19444 = vst [vmem:[#allocation43_spill] sm:$0xff] %v16453_v55  ;;  %v2028_v42 = vpop.f32.mrf.mxu0  ;;  %v11487_v61 = vld [vmem:[%s14958_s20 + $0x1b2] sm:$0xff] }
 0x176   : >> { %v1641_v35 = vpop.f32.mrf.mxu1 }
 0x177   : >> { %v16456_v28 = vadd.f32 %v13673_v5, %v1689_v58  ;;  %v1688_v13 = vadd.f32 %v1641_v35, %v16046_v27  ;;  %v13676_v49 = vpop.f32.mrf.mxu0  ;;  %13975 = vmatmul.mubr.msk.f32.gmra.mxu0 %vm273_vm0, %v16453_v55  ;;  %v11488_v58 = vld [vmem:[%s14958_s20 + $0x1ba] sm:$0xff] }
 0x178   : >> { %v13626_v39 = vpop.f32.mrf.mxu1  ;;  %13925 = vmatmul.mubr.msk.f32.gmra.mxu1 %vm273_vm0, %v16450_v11  ;;  %14029 = vmatprep.mubr.msk.f32.mxu0 %vm273_vm0, %v16057_v15  ;;  %v16474_v11 = vld [vmem:[%s14958_s20 + $0x1ca] sm:$0xff]  ;;  %v16487_v15 = vld [vmem:[%s19179_s1 + $0x80] sm:$0xff] }
 0x179   : >> { %19445 = vst [vmem:[#allocation44_spill] sm:$0xff] %v16456_v28  ;;  %v16463_v31 = vadd.f32 %v2028_v42, %v1688_v13  ;;  %v1691_v47 = vadd.f32 %v13626_v39, %v16053_v59  ;;  %13979 = vmatprep.mubr.msk.f32.mxu1 %vm273_vm0, %v11487_v61  ;;  %v2038_v5 = vpop.f32.mrf.mxu0  ;;  %v16482_v59 = vld [vmem:[%s19179_s1 + $0x78] sm:$0xff] }
 0x17a   : >> { %v1651_v27 = vpop.f32.mrf.mxu1  ;;  %v16495_v61 = vld [vmem:[%s14958_s20 + $0x1d2] sm:$0xff] }
 0x17b   : >> { %v16470_v35 = vadd.f32 %v13676_v49, %v1691_v47  ;;  %v1690_v28 = vadd.f32 %v1651_v27, %v16074_v43  ;;  %v13731_v13 = vpop.f32.mrf.mxu0  ;;  %14030 = vmatmul.mubr.msk.f32.vlgmr.msra.gmra.mxu0 %vm273_vm0, %v16080_v56  ;;  %v16502_v49 = vld [vmem:[%s14958_s20 + $0x1e2] sm:$0xff] }
 0x17c   : >> { %v13681_v42 = vpop.f32.mrf.mxu1  ;;  %13980 = vmatmul.mubr.msk.f32.vlgmr.msra.gmra.mxu1 %vm273_vm0, %v11488_v58  ;;  %14128 = vmatpush3.msra.mxu0 %v16072_v63 }
 0x17d   : >> { %v16489_v43 = vadd.f32 %v2038_v5, %v1690_v28  ;;  %v2435_v47 = vadd.f32 %v13681_v42, %v16095_v4  ;;  %14078 = vmatpush3.msra.mxu1 %v16067_v62  ;;  %v2664_v39 = vpop.f32.mrf.mxu0  ;;  %13982 = vmatprep.mubr.msk.f32.mxu1 %vm273_vm0, %v16474_v11  ;;  %v16524_v42 = vld [vmem:[%s14958_s20 + $0x1fa] sm:$0xff] }
 0x17e   : >> { %v2275_v56 = vpop.f32.mrf.mxu1  ;;  %14032 = vmatprep.mubr.msk.f32.mxu0 %vm273_vm0, %v16090_v30  ;;  %14177 = vmatprep.subr.mxu1 %v16482_v59 }
 0x17f   : >> { %v16504_v28 = vadd.f32 %v13731_v13, %v2435_v47  ;;  %v2434_v62 = vadd.f32 %v2275_v56, %v16104_v2  ;;  %14227 = vmatprep.subr.mxu0 %v16487_v15  ;;  %v13734_v4 = vpop.f32.mrf.mxu0  ;;  %14033 = vmatmul.mubr.msk.f32.gmra.mxu0 %vm273_vm0, %v16112_v17  ;;  %v16521_v2 = vld [vmem:[%s14958_s20 + $0x1ea] sm:$0xff] }
 0x180   : >> { %v13684_v63 = vpop.f32.mrf.mxu1  ;;  %13983 = vmatmul.mubr.msk.f32.gmra.mxu1 %vm273_vm0, %v16495_v61  ;;  %14035 = vmatprep.mubr.msk.f32.mxu0 %vm273_vm0, %v16118_v46 }
 0x181   : >> { %v16513_v30 = vadd.f32 %v2664_v39, %v2434_v62  ;;  %v2437_v58 = vadd.f32 %v13684_v63, %v16123_v54  ;;  %13985 = vmatprep.mubr.msk.f32.mxu1 %vm273_vm0, %v16502_v49  ;;  %v2674_v5 = vpop.f32.mrf.mxu0  ;;  %v16544_v63 = vld [vmem:[%s14958_s20 + $0x212] sm:$0xff] }
 0x182   : >> { %v2285_v27 = vpop.f32.mrf.mxu1 }
 0x183   : >> { %v16526_v13 = vadd.f32 %v13734_v4, %v2437_v58  ;;  %v2436_v17 = vadd.f32 %v2285_v27, %v16130_v60  ;;  %v13737_v54 = vpop.f32.mrf.mxu0  ;;  %14036 = vmatmul.mubr.msk.f32.gmra.mxu0 %vm273_vm0, %v16138_v57  ;;  %v16541_v60 = vld [vmem:[%s14958_s20 + $0x202] sm:$0xff] }
 0x184   : >> { %v13687_v47 = vpop.f32.mrf.mxu1  ;;  %13986 = vmatmul.mubr.msk.f32.gmra.mxu1 %vm273_vm0, %v16521_v2  ;;  %14038 = vmatprep.mubr.msk.f32.mxu0 %vm273_vm0, %v16144_v51 }
 0x185   : >> { %v16533_v46 = vadd.f32 %v2674_v5, %v2436_v17  ;;  %v2439_v56 = vadd.f32 %v13687_v47, %v16149_v23  ;;  %13988 = vmatprep.mubr.msk.f32.mxu1 %vm273_vm0, %v16524_v42  ;;  %v2684_v62 = vpop.f32.mrf.mxu0  ;;  %v16564_v47 = vld [vmem:[%s14958_s20 + $0x22a] sm:$0xff] }
 0x186   : >> { %v2295_v39 = vpop.f32.mrf.mxu1 }
 0x187   : >> { %v16546_v4 = vadd.f32 %v13737_v54, %v2439_v56  ;;  %v2438_v57 = vadd.f32 %v2295_v39, %v16156_v0  ;;  %v13740_v23 = vpop.f32.mrf.mxu0  ;;  %14039 = vmatmul.mubr.msk.f32.gmra.mxu0 %vm273_vm0, %v16164_v41  ;;  %v16561_v0 = vld [vmem:[%s14958_s20 + $0x21a] sm:$0xff] }
 0x188   : >> { %v13690_v58 = vpop.f32.mrf.mxu1  ;;  %13989 = vmatmul.mubr.msk.f32.gmra.mxu1 %vm273_vm0, %v16541_v60  ;;  %14041 = vmatprep.mubr.msk.f32.mxu0 %vm273_vm0, %v16170_v19 }
 0x189   : >> { %v16553_v51 = vadd.f32 %v2684_v62, %v2438_v57  ;;  %v2441_v27 = vadd.f32 %v13690_v58, %v16175_v18  ;;  %13991 = vmatprep.mubr.msk.f32.mxu1 %vm273_vm0, %v16544_v63  ;;  %v2694_v17 = vpop.f32.mrf.mxu0  ;;  %v16584_v58 = vld [vmem:[%s14958_s20 + $0x242] sm:$0xff] }
 0x18a   : >> { %v2305_v5 = vpop.f32.mrf.mxu1 }
 0x18b   : >> { %v16566_v54 = vadd.f32 %v13740_v23, %v2441_v27  ;;  %v2440_v41 = vadd.f32 %v2305_v5, %v16182_v10  ;;  %v13743_v18 = vpop.f32.mrf.mxu0  ;;  %14042 = vmatmul.mubr.msk.f32.gmra.mxu0 %vm273_vm0, %v16190_v48  ;;  %v16581_v10 = vld [vmem:[%s14958_s20 + $0x232] sm:$0xff] }
 0x18c   : >> { %v13693_v56 = vpop.f32.mrf.mxu1  ;;  %13992 = vmatmul.mubr.msk.f32.gmra.mxu1 %vm273_vm0, %v16561_v0  ;;  %14044 = vmatprep.mubr.msk.f32.mxu0 %vm273_vm0, %v16196_v36 }
 0x18d   : >> { %v16573_v19 = vadd.f32 %v2694_v17, %v2440_v41  ;;  %v2443_v39 = vadd.f32 %v13693_v56, %v16201_v21  ;;  %13994 = vmatprep.mubr.msk.f32.mxu1 %vm273_vm0, %v16564_v47  ;;  %v2704_v57 = vpop.f32.mrf.mxu0  ;;  %v16604_v56 = vld [vmem:[%s14958_s20 + $0x25a] sm:$0xff] }
 0x18e   : >> { %v2315_v62 = vpop.f32.mrf.mxu1 }
 0x18f   : >> { %v16586_v23 = vadd.f32 %v13743_v18, %v2443_v39  ;;  %v2442_v48 = vadd.f32 %v2315_v62, %v16208_v32  ;;  %v13746_v21 = vpop.f32.mrf.mxu0  ;;  %14045 = vmatmul.mubr.msk.f32.gmra.mxu0 %vm273_vm0, %v16216_v6  ;;  %v16601_v32 = vld [vmem:[%s14958_s20 + $0x24a] sm:$0xff] }
 0x190   : >> { %v13696_v27 = vpop.f32.mrf.mxu1  ;;  %13995 = vmatmul.mubr.msk.f32.gmra.mxu1 %vm273_vm0, %v16581_v10  ;;  %14047 = vmatprep.mubr.msk.f32.mxu0 %vm273_vm0, %v16222_v25 }
 0x191   : >> { %v16593_v36 = vadd.f32 %v2704_v57, %v2442_v48  ;;  %v2445_v5 = vadd.f32 %v13696_v27, %v16227_v20  ;;  %13997 = vmatprep.mubr.msk.f32.mxu1 %vm273_vm0, %v16584_v58  ;;  %v2714_v41 = vpop.f32.mrf.mxu0  ;;  %v16624_v27 = vld [vmem:[%s14958_s20 + $0x272] sm:$0xff] }
 0x192   : >> { %v2325_v17 = vpop.f32.mrf.mxu1 }
 0x193   : >> { %v16606_v18 = vadd.f32 %v13746_v21, %v2445_v5  ;;  %v2444_v6 = vadd.f32 %v2325_v17, %v16234_v3  ;;  %v13749_v20 = vpop.f32.mrf.mxu0  ;;  %14048 = vmatmul.mubr.msk.f32.gmra.mxu0 %vm273_vm0, %v16242_v45  ;;  %v16621_v3 = vld [vmem:[%s14958_s20 + $0x262] sm:$0xff] }
 0x194   : >> { %v13699_v39 = vpop.f32.mrf.mxu1  ;;  %13998 = vmatmul.mubr.msk.f32.gmra.mxu1 %vm273_vm0, %v16601_v32  ;;  %14050 = vmatprep.mubr.msk.f32.mxu0 %vm273_vm0, %v16248_v53 }
 0x195   : >> { %v16613_v25 = vadd.f32 %v2714_v41, %v2444_v6  ;;  %v2447_v62 = vadd.f32 %v13699_v39, %v16253_v16  ;;  %14000 = vmatprep.mubr.msk.f32.mxu1 %vm273_vm0, %v16604_v56  ;;  %v2724_v48 = vpop.f32.mrf.mxu0  ;;  %v16644_v39 = vld [vmem:[%s14958_s20 + $0x28a] sm:$0xff] }
 0x196   : >> { %v2335_v57 = vpop.f32.mrf.mxu1 }
 0x197   : >> { %v16626_v21 = vadd.f32 %v13749_v20, %v2447_v62  ;;  %v2446_v45 = vadd.f32 %v2335_v57, %v16260_v37  ;;  %v13752_v16 = vpop.f32.mrf.mxu0  ;;  %14051 = vmatmul.mubr.msk.f32.gmra.mxu0 %vm273_vm0, %v16268_v29  ;;  %v16641_v37 = vld [vmem:[%s14958_s20 + $0x27a] sm:$0xff] }
 0x198   : >> { %v13702_v5 = vpop.f32.mrf.mxu1  ;;  %14001 = vmatmul.mubr.msk.f32.gmra.mxu1 %vm273_vm0, %v16621_v3  ;;  %14053 = vmatprep.mubr.msk.f32.mxu0 %vm273_vm0, %v16274_v50  ;;  %v19446_v57 = vld [vmem:[#allocation30_spill] sm:$0xff] }
 0x199   : >> { %v16633_v53 = vadd.f32 %v2724_v48, %v2446_v45  ;;  %v2449_v17 = vadd.f32 %v13702_v5, %v16279_v40  ;;  %14003 = vmatprep.mubr.msk.f32.mxu1 %vm273_vm0, %v16624_v27  ;;  %v2734_v6 = vpop.f32.mrf.mxu0 }
 0x19a   : >> { %v2345_v41 = vpop.f32.mrf.mxu1 }
 0x19b   : >> { %v16646_v20 = vadd.f32 %v13752_v16, %v2449_v17  ;;  %v2448_v29 = vadd.f32 %v2345_v41, %v16286_v12  ;;  %v13755_v40 = vpop.f32.mrf.mxu0  ;;  %14054 = vmatmul.mubr.msk.f32.gmra.mxu0 %vm273_vm0, %v16294_v26  ;;  %v16661_v12 = vld [vmem:[%s14958_s20 + $0x292] sm:$0xff]  ;;  %v16664_v16 = vld [vmem:[%s14958_s20 + $0x2a2] sm:$0xff] }
 0x19c   : >> { %v13705_v62 = vpop.f32.mrf.mxu1  ;;  %14004 = vmatmul.mubr.msk.f32.gmra.mxu1 %vm273_vm0, %v16641_v37  ;;  %14056 = vmatprep.mubr.msk.f32.mxu0 %vm273_vm0, %v16300_v9  ;;  %v19447_v26 = vld [vmem:[#allocation31_spill] sm:$0xff] }
 0x19d   : >> { %v16653_v50 = vadd.f32 %v2734_v6, %v2448_v29  ;;  %v2451_v48 = vadd.f32 %v13705_v62, %v19446_v57  ;;  %14006 = vmatprep.mubr.msk.f32.mxu1 %vm273_vm0, %v16644_v39  ;;  %v2744_v5 = vpop.f32.mrf.mxu0  ;;  %v19449_v62 = vld [vmem:[#allocation5_spill] sm:$0xff] }
 0x19e   : >> { %v2355_v45 = vpop.f32.mrf.mxu1 }
 0x19f   : >> { %v16666_v17 = vadd.f32 %v13755_v40, %v2451_v48  ;;  %v2450_v41 = vadd.f32 %v2355_v45, %v19447_v26  ;;  %v13758_v29 = vpop.f32.mrf.mxu0  ;;  %14057 = vmatmul.mubr.msk.f32.gmra.mxu0 %vm273_vm0, %v16320_v22  ;;  %v16681_v40 = vld [vmem:[%s14958_s20 + $0x2aa] sm:$0xff]  ;;  %v16684_v26 = vld [vmem:[%s14958_s20 + $0x2ba] sm:$0xff] }
 0x1a0   : >> { %v13708_v6 = vpop.f32.mrf.mxu1  ;;  %14007 = vmatmul.mubr.msk.f32.gmra.mxu1 %vm273_vm0, %v16661_v12  ;;  %14059 = vmatprep.mubr.msk.f32.mxu0 %vm273_vm0, %v16326_v33  ;;  %v19451_v22 = vld [vmem:[#allocation32_spill] sm:$0xff] }
 0x1a1   : >> { %v16673_v9 = vadd.f32 %v2744_v5, %v2450_v41  ;;  %v2453_v57 = vadd.f32 %v13708_v6, %v19449_v62  ;;  %14009 = vmatprep.mubr.msk.f32.mxu1 %vm273_vm0, %v16664_v16  ;;  %v2754_v45 = vpop.f32.mrf.mxu0  ;;  %v19453_v62 = vld [vmem:[#allocation7_spill] sm:$0xff] }
 0x1a2   : >> { %v2365_v48 = vpop.f32.mrf.mxu1 }
 0x1a3   : >> { %19448 = vst [vmem:[#allocation30_spill] sm:$0xff] %v16673_v9  ;;  %v16686_v55 = vadd.f32 %v13758_v29, %v2453_v57  ;;  %v2452_v5 = vadd.f32 %v2365_v48, %v19451_v22  ;;  %v13761_v6 = vpop.f32.mrf.mxu0  ;;  %14060 = vmatmul.mubr.msk.f32.gmra.mxu0 %vm273_vm0, %v16346_v1  ;;  %v16701_v29 = vld [vmem:[%s14958_s20 + $0x2c2] sm:$0xff]  ;;  %v16704_v22 = vld [vmem:[%s14958_s20 + $0x2d2] sm:$0xff] }
 0x1a4   : >> { %v13711_v41 = vpop.f32.mrf.mxu1  ;;  %14010 = vmatmul.mubr.msk.f32.gmra.mxu1 %vm273_vm0, %v16681_v40  ;;  %14062 = vmatprep.mubr.msk.f32.mxu0 %vm273_vm0, %v16352_v34  ;;  %v19455_v1 = vld [vmem:[#allocation8_spill] sm:$0xff] }
 0x1a5   : >> { %19450 = vst [vmem:[#allocation31_spill] sm:$0xff] %v16686_v55  ;;  %v16693_v33 = vadd.f32 %v2754_v45, %v2452_v5  ;;  %v2455_v9 = vadd.f32 %v13711_v41, %v19453_v62  ;;  %14012 = vmatprep.mubr.msk.f32.mxu1 %vm273_vm0, %v16684_v26  ;;  %v2764_v48 = vpop.f32.mrf.mxu0  ;;  %v19457_v62 = vld [vmem:[#allocation33_spill] sm:$0xff] }
 0x1a6   : >> { %v2375_v57 = vpop.f32.mrf.mxu1 }
 0x1a7   : >> { %19452 = vst [vmem:[#allocation5_spill] sm:$0xff] %v16693_v33  ;;  %v16706_v55 = vadd.f32 %v13761_v6, %v2455_v9  ;;  %v2454_v45 = vadd.f32 %v2375_v57, %v19455_v1  ;;  %v13764_v41 = vpop.f32.mrf.mxu0  ;;  %14063 = vmatmul.mubr.msk.f32.gmra.mxu0 %vm273_vm0, %v16372_v14  ;;  %v16721_v9 = vld [vmem:[%s14958_s20 + $0x2da] sm:$0xff]  ;;  %v16724_v1 = vld [vmem:[%s14958_s20 + $0x2ea] sm:$0xff] }
 0x1a8   : >> { %v13714_v5 = vpop.f32.mrf.mxu1  ;;  %14013 = vmatmul.mubr.msk.f32.gmra.mxu1 %vm273_vm0, %v16701_v29  ;;  %14065 = vmatprep.mubr.msk.f32.mxu0 %vm273_vm0, %v16378_v24  ;;  %19458 = vst [vmem:[#allocation8_spill] sm:$0xff] %v16724_v1  ;;  %v19459_v14 = vld [vmem:[#allocation34_spill] sm:$0xff] }
 0x1a9   : >> { %19454 = vst [vmem:[#allocation32_spill] sm:$0xff] %v16706_v55  ;;  %v16713_v34 = vadd.f32 %v2764_v48, %v2454_v45  ;;  %v2457_v33 = vadd.f32 %v13714_v5, %v19457_v62  ;;  %14015 = vmatprep.mubr.msk.f32.mxu1 %vm273_vm0, %v16704_v22  ;;  %v2774_v57 = vpop.f32.mrf.mxu0  ;;  %v19461_v62 = vld [vmem:[#allocation37_spill] sm:$0xff] }
 0x1aa   : >> { %v2385_v6 = vpop.f32.mrf.mxu1 }
 0x1ab   : >> { %19456 = vst [vmem:[#allocation7_spill] sm:$0xff] %v16713_v34  ;;  %v16726_v55 = vadd.f32 %v13764_v41, %v2457_v33  ;;  %v2456_v48 = vadd.f32 %v2385_v6, %v19459_v14  ;;  %v13767_v5 = vpop.f32.mrf.mxu0  ;;  %14066 = vmatmul.mubr.msk.f32.gmra.mxu0 %vm273_vm0, %v16398_v38  ;;  %v16741_v33 = vld [vmem:[%s14958_s20 + $0x2f2] sm:$0xff]  ;;  %v16744_v14 = vld [vmem:[%s14958_s20 + $0x302] sm:$0xff] }
 0x1ac   : >> { %v13717_v45 = vpop.f32.mrf.mxu1  ;;  %14016 = vmatmul.mubr.msk.f32.gmra.mxu1 %vm273_vm0, %v16721_v9  ;;  %14068 = vmatprep.mubr.msk.f32.mxu0 %vm273_vm0, %v16404_v52  ;;  %19462 = vst [vmem:[#allocation34_spill] sm:$0xff] %v16744_v14 }
 0x1ad   : >> { %v16733_v24 = vadd.f32 %v2774_v57, %v2456_v48  ;;  %v2459_v34 = vadd.f32 %v13717_v45, %v19461_v62  ;;  %14018 = vmatprep.mubr.msk.f32.mxu1 %vm273_vm0, %v16724_v1  ;;  %v2784_v6 = vpop.f32.mrf.mxu0  ;;  %v19464_v57 = vld [vmem:[#allocation38_spill] sm:$0xff] }
 0x1ae   : >> { %v2395_v41 = vpop.f32.mrf.mxu1 }
 0x1af   : >> { %19460 = vst [vmem:[#allocation33_spill] sm:$0xff] %v16733_v24  ;;  %v16746_v38 = vadd.f32 %v13767_v5, %v2459_v34  ;;  %v2458_v48 = vadd.f32 %v2395_v41, %v19464_v57  ;;  %v13770_v62 = vpop.f32.mrf.mxu0  ;;  %14069 = vmatmul.mubr.msk.f32.gmra.mxu0 %vm273_vm0, %v16424_v44  ;;  %v19466_v24 = vld [vmem:[#allocation41_spill] sm:$0xff]  ;;  %v16761_v34 = vld [vmem:[%s14958_s20 + $0x30a] sm:$0xff] }
 0x1b0   : >> { %v13720_v45 = vpop.f32.mrf.mxu1  ;;  %14019 = vmatmul.mubr.msk.f32.gmra.mxu1 %vm273_vm0, %v16741_v33  ;;  %14071 = vmatprep.mubr.msk.f32.mxu0 %vm273_vm0, %v16430_v7  ;;  %v16764_v57 = vld [vmem:[%s14958_s20 + $0x31a] sm:$0xff] }
 0x1b1   : >> { %19463 = vst [vmem:[#allocation37_spill] sm:$0xff] %v16746_v38  ;;  %v16753_v52 = vadd.f32 %v2784_v6, %v2458_v48  ;;  %v2461_v1 = vadd.f32 %v13720_v45, %v19466_v24  ;;  %14021 = vmatprep.mubr.msk.f32.mxu1 %vm273_vm0, %v16744_v14  ;;  %v2794_v41 = vpop.f32.mrf.mxu0  ;;  %v16767_v38 = vld [vmem:[%s14958_s20 + $0x330] sm:$0xff]  ;;  %v19469_v7 = vld [vmem:[#allocation42_spill] sm:$0xff] }
 0x1b2   : >> { %v2405_v5 = vpop.f32.mrf.mxu1  ;;  %19467 = vst [vmem:[#allocation41_spill] sm:$0xff] %v16767_v38 }
 0x1b3   : >> { %19465 = vst [vmem:[#allocation38_spill] sm:$0xff] %v16753_v52  ;;  %v16769_v44 = vadd.f32 %v13770_v62, %v2461_v1  ;;  %v2460_v24 = vadd.f32 %v2405_v5, %v16442_v8  ;;  %v13773_v48 = vpop.f32.mrf.mxu0  ;;  %14072 = vmatmul.mubr.msk.f32.gmra.mxu0 %vm273_vm0, %v19469_v7  ;;  %v19471_v52 = vld [vmem:[#allocation44_spill] sm:$0xff]  ;;  %v16784_v1 = vld [vmem:[%s14958_s20 + $0x322] sm:$0xff]  ;;  %v16787_v8 = vld [vmem:[%s14958_s20 + $0x338] sm:$0xff] }
 0x1b4   : >> { %v13723_v6 = vpop.f32.mrf.mxu1  ;;  %14022 = vmatmul.mubr.msk.f32.gmra.mxu1 %vm273_vm0, %v16761_v34  ;;  %14074 = vmatprep.mubr.msk.f32.mxu0 %vm273_vm0, %v16767_v38  ;;  %19472 = vst [vmem:[#allocation44_spill] sm:$0xff] %v16784_v1  ;;  %v19474_v38 = vld [vmem:[#allocation11_spill] sm:$0xff] }
 0x1b5   : >> { %19468 = vst [vmem:[#allocation45_spill] sm:$0xff] %v16769_v44  ;;  %v16776_v45 = vadd.f32 %v2794_v41, %v2460_v24  ;;  %v2463_v14 = vadd.f32 %v13723_v6, %v19471_v52  ;;  %14024 = vmatprep.mubr.msk.f32.mxu1 %vm273_vm0, %v16764_v57  ;;  %v2804_v5 = vpop.f32.mrf.mxu0 }
 0x1b6   : >> { %v2415_v62 = vpop.f32.mrf.mxu1 }
 0x1b7   : >> { %19470 = vst [vmem:[#allocation42_spill] sm:$0xff] %v16776_v45  ;;  %v16789_v44 = vadd.f32 %v13773_v48, %v2463_v14  ;;  %v2462_v7 = vadd.f32 %v2415_v62, %v16463_v31  ;;  %v13776_v24 = vpop.f32.mrf.mxu0  ;;  %14075 = vmatmul.mubr.msk.f32.gmra.mxu0 %vm273_vm0, %v16787_v8  ;;  %v19475_v45 = vld [vmem:[#allocation12_spill] sm:$0xff] }
 0x1b8   : >> { %v13726_v41 = vpop.f32.mrf.mxu1  ;;  %14025 = vmatmul.mubr.msk.f32.gmra.mxu1 %vm273_vm0, %v16784_v1  ;;  %14129 = vmatprep.mubr.msk.f32.mxu0 %vm273_vm0, %v16474_v11  ;;  %v16818_v11 = vld [vmem:[%s19179_s1 + $0x90] sm:$0xff] }
 0x1b9   : >> { %19473 = vst [vmem:[#allocation46_spill] sm:$0xff] %v16789_v44  ;;  %v16796_v52 = vadd.f32 %v2804_v5, %v2462_v7  ;;  %v2465_v6 = vadd.f32 %v13726_v41, %v16470_v35  ;;  %14079 = vmatprep.mubr.msk.f32.mxu1 %vm273_vm0, %v19474_v38  ;;  %v2814_v31 = vpop.f32.mrf.mxu0  ;;  %v16813_v35 = vld [vmem:[%s19179_s1 + $0x88] sm:$0xff]  ;;  %v19476_v5 = vld [vmem:[#allocation13_spill] sm:$0xff] }
 0x1ba   : >> { %v2425_v14 = vpop.f32.mrf.mxu1 }
 0x1bb   : >> { %v16803_v48 = vadd.f32 %v13776_v24, %v2465_v6  ;;  %v2464_v62 = vadd.f32 %v2425_v14, %v16489_v43  ;;  %v13831_v1 = vpop.f32.mrf.mxu0  ;;  %14130 = vmatmul.mubr.msk.f32.vlgmr.msra.gmra.mxu0 %vm273_vm0, %v16495_v61 }
 0x1bc   : >> { %v13781_v44 = vpop.f32.mrf.mxu1  ;;  %14080 = vmatmul.mubr.msk.f32.vlgmr.msra.gmra.mxu1 %vm273_vm0, %v19475_v45  ;;  %14228 = vmatpush3.msra.mxu0 %v16487_v15 }
 0x1bd   : >> { %v16820_v38 = vadd.f32 %v2814_v31, %v2464_v62  ;;  %v3211_v43 = vadd.f32 %v13781_v44, %v16504_v28  ;;  %14178 = vmatpush3.msra.mxu1 %v16482_v59  ;;  %v3438_v61 = vpop.f32.mrf.mxu0  ;;  %14082 = vmatprep.mubr.msk.f32.mxu1 %vm273_vm0, %v19476_v5  ;;  %v19477_v44 = vld [vmem:[#allocation14_spill] sm:$0xff] }
 0x1be   : >> { %v3051_v45 = vpop.f32.mrf.mxu1  ;;  %14132 = vmatprep.mubr.msk.f32.mxu0 %vm273_vm0, %v16502_v49  ;;  %14277 = vmatprep.subr.mxu1 %v16813_v35 }
 0x1bf   : >> { %v16829_v7 = vadd.f32 %v13831_v1, %v3211_v43  ;;  %v3210_v41 = vadd.f32 %v3051_v45, %v16513_v30  ;;  %14327 = vmatprep.subr.mxu0 %v16818_v11  ;;  %v13834_v59 = vpop.f32.mrf.mxu0  ;;  %14133 = vmatmul.mubr.msk.f32.gmra.mxu0 %vm273_vm0, %v16521_v2  ;;  %v19478_v1 = vld [vmem:[#allocation15_spill] sm:$0xff]  ;;  %v19479_v43 = vld [vmem:[#allocation16_spill] sm:$0xff]  ;;  %v19480_v45 = vld [vmem:[#allocation17_spill] sm:$0xff] }
 0x1c0   : >> { %v13784_v28 = vpop.f32.mrf.mxu1  ;;  %14083 = vmatmul.mubr.msk.f32.gmra.mxu1 %vm273_vm0, %v19477_v44  ;;  %14135 = vmatprep.mubr.msk.f32.mxu0 %vm273_vm0, %v16524_v42  ;;  %v19482_v44 = vld [vmem:[#allocation19_spill] sm:$0xff] }
 0x1c1   : >> { %v16838_v15 = vadd.f32 %v3438_v61, %v3210_v41  ;;  %v3213_v49 = vadd.f32 %v13784_v28, %v16526_v13  ;;  %14085 = vmatprep.mubr.msk.f32.mxu1 %vm273_vm0, %v19478_v1  ;;  %v3448_v24 = vpop.f32.mrf.mxu0 }
 0x1c2   : >> { %v3061_v30 = vpop.f32.mrf.mxu1 }
 0x1c3   : >> { %v16845_v6 = vadd.f32 %v13834_v59, %v3213_v49  ;;  %v3212_v14 = vadd.f32 %v3061_v30, %v16533_v46  ;;  %v13837_v62 = vpop.f32.mrf.mxu0  ;;  %14136 = vmatmul.mubr.msk.f32.gmra.mxu0 %vm273_vm0, %v16541_v60  ;;  %v19481_v59 = vld [vmem:[#allocation18_spill] sm:$0xff] }
 0x1c4   : >> { %v13787_v31 = vpop.f32.mrf.mxu1  ;;  %14086 = vmatmul.mubr.msk.f32.gmra.mxu1 %vm273_vm0, %v19479_v43  ;;  %14138 = vmatprep.mubr.msk.f32.mxu0 %vm273_vm0, %v16544_v63 }
 0x1c5   : >> { %v16852_v2 = vadd.f32 %v3448_v24, %v3212_v14  ;;  %v3215_v13 = vadd.f32 %v13787_v31, %v16546_v4  ;;  %14088 = vmatprep.mubr.msk.f32.mxu1 %vm273_vm0, %v19480_v45  ;;  %v3458_v46 = vpop.f32.mrf.mxu0  ;;  %v19483_v14 = vld [vmem:[#allocation20_spill] sm:$0xff]  ;;  %v19484_v31 = vld [vmem:[#allocation21_spill] sm:$0xff] }
 0x1c6   : >> { %v3071_v42 = vpop.f32.mrf.mxu1 }
 0x1c7   : >> { %v16859_v61 = vadd.f32 %v13837_v62, %v3215_v13  ;;  %v3214_v5 = vadd.f32 %v3071_v42, %v16553_v51  ;;  %v13840_v28 = vpop.f32.mrf.mxu0  ;;  %14139 = vmatmul.mubr.msk.f32.gmra.mxu0 %vm273_vm0, %v16561_v0  ;;  %v19485_v42 = vld [vmem:[#allocation22_spill] sm:$0xff] }
 0x1c8   : >> { %v13790_v41 = vpop.f32.mrf.mxu1  ;;  %14089 = vmatmul.mubr.msk.f32.gmra.mxu1 %vm273_vm0, %v19481_v59  ;;  %14141 = vmatprep.mubr.msk.f32.mxu0 %vm273_vm0, %v16564_v47 }
 0x1c9   : >> { %v16866_v60 = vadd.f32 %v3458_v46, %v3214_v5  ;;  %v3217_v4 = vadd.f32 %v13790_v41, %v16566_v54  ;;  %14091 = vmatprep.mubr.msk.f32.mxu1 %vm273_vm0, %v19482_v44  ;;  %v3468_v51 = vpop.f32.mrf.mxu0  ;;  %v19486_v46 = vld [vmem:[#allocation23_spill] sm:$0xff]  ;;  %v19488_v44 = vld [vmem:[#allocation25_spill] sm:$0xff] }
 0x1ca   : >> { %v3081_v63 = vpop.f32.mrf.mxu1 }
 0x1cb   : >> { %v16873_v49 = vadd.f32 %v13840_v28, %v3217_v4  ;;  %v3216_v1 = vadd.f32 %v3081_v63, %v16573_v19  ;;  %v13843_v24 = vpop.f32.mrf.mxu0  ;;  %14142 = vmatmul.mubr.msk.f32.gmra.mxu0 %vm273_vm0, %v16581_v10  ;;  %v19487_v4 = vld [vmem:[#allocation24_spill] sm:$0xff] }
 0x1cc   : >> { %v13793_v30 = vpop.f32.mrf.mxu1  ;;  %14092 = vmatmul.mubr.msk.f32.gmra.mxu1 %vm273_vm0, %v19483_v14  ;;  %14144 = vmatprep.mubr.msk.f32.mxu0 %vm273_vm0, %v16584_v58  ;;  %v19490_v14 = vld [vmem:[#allocation27_spill] sm:$0xff] }
 0x1cd   : >> { %v16880_v0 = vadd.f32 %v3468_v51, %v3216_v1  ;;  %v3219_v54 = vadd.f32 %v13793_v30, %v16586_v23  ;;  %14094 = vmatprep.mubr.msk.f32.mxu1 %vm273_vm0, %v19484_v31  ;;  %v3478_v19 = vpop.f32.mrf.mxu0 }
 0x1ce   : >> { %v3091_v47 = vpop.f32.mrf.mxu1 }
 0x1cf   : >> { %v16887_v62 = vadd.f32 %v13843_v24, %v3219_v54  ;;  %v3218_v43 = vadd.f32 %v3091_v47, %v16593_v36  ;;  %v13846_v45 = vpop.f32.mrf.mxu0  ;;  %14145 = vmatmul.mubr.msk.f32.gmra.mxu0 %vm273_vm0, %v16601_v32  ;;  %v19489_v24 = vld [vmem:[#allocation26_spill] sm:$0xff] }
 0x1d0   : >> { %v13796_v13 = vpop.f32.mrf.mxu1  ;;  %14095 = vmatmul.mubr.msk.f32.gmra.mxu1 %vm273_vm0, %v19485_v42  ;;  %14147 = vmatprep.mubr.msk.f32.mxu0 %vm273_vm0, %v16604_v56  ;;  %v19493_v42 = vld [vmem:[#allocation30_spill] sm:$0xff] }
 0x1d1   : >> { %v16894_v10 = vadd.f32 %v3478_v19, %v3218_v43  ;;  %v3221_v23 = vadd.f32 %v13796_v13, %v16606_v18  ;;  %14097 = vmatprep.mubr.msk.f32.mxu1 %vm273_vm0, %v19486_v46  ;;  %v3488_v36 = vpop.f32.mrf.mxu0  ;;  %v19491_v43 = vld [vmem:[#allocation28_spill] sm:$0xff]  ;;  %v19492_v13 = vld [vmem:[#allocation29_spill] sm:$0xff] }
 0x1d2   : >> { %v3101_v58 = vpop.f32.mrf.mxu1 }
 0x1d3   : >> { %v16901_v5 = vadd.f32 %v13846_v45, %v3221_v23  ;;  %v3220_v41 = vadd.f32 %v3101_v58, %v16613_v25  ;;  %v13849_v59 = vpop.f32.mrf.mxu0  ;;  %14148 = vmatmul.mubr.msk.f32.gmra.mxu0 %vm273_vm0, %v16621_v3 }
 0x1d4   : >> { %v13799_v28 = vpop.f32.mrf.mxu1  ;;  %14098 = vmatmul.mubr.msk.f32.gmra.mxu1 %vm273_vm0, %v19487_v4  ;;  %14150 = vmatprep.mubr.msk.f32.mxu0 %vm273_vm0, %v16624_v27 }
 0x1d5   : >> { %v16908_v32 = vadd.f32 %v3488_v36, %v3220_v41  ;;  %v3223_v18 = vadd.f32 %v13799_v28, %v16626_v21  ;;  %14100 = vmatprep.mubr.msk.f32.mxu1 %vm273_vm0, %v19488_v44  ;;  %v3498_v25 = vpop.f32.mrf.mxu0  ;;  %v19494_v36 = vld [vmem:[#allocation3_spill] sm:$0xff]  ;;  %v19496_v28 = vld [vmem:[#allocation4_spill] sm:$0xff] }
 0x1d6   : >> { %v3111_v56 = vpop.f32.mrf.mxu1 }
 0x1d7   : >> { %v16915_v63 = vadd.f32 %v13849_v59, %v3223_v18  ;;  %v3222_v51 = vadd.f32 %v3111_v56, %v16633_v53  ;;  %v13852_v30 = vpop.f32.mrf.mxu0  ;;  %14151 = vmatmul.mubr.msk.f32.gmra.mxu0 %vm273_vm0, %v16641_v37  ;;  %v19497_v18 = vld [vmem:[#allocation5_spill] sm:$0xff] }
 0x1d8   : >> { %v13802_v1 = vpop.f32.mrf.mxu1  ;;  %14101 = vmatmul.mubr.msk.f32.gmra.mxu1 %vm273_vm0, %v19489_v24  ;;  %14153 = vmatprep.mubr.msk.f32.mxu0 %vm273_vm0, %v16644_v39  ;;  %v19500_v24 = vld [vmem:[#allocation2_spill] sm:$0xff] }
 0x1d9   : >> { %v16922_v3 = vadd.f32 %v3498_v25, %v3222_v51  ;;  %v3225_v21 = vadd.f32 %v13802_v1, %v16646_v20  ;;  %14103 = vmatprep.mubr.msk.f32.mxu1 %vm273_vm0, %v19490_v14  ;;  %v3508_v53 = vpop.f32.mrf.mxu0  ;;  %v19498_v51 = vld [vmem:[#allocation6_spill] sm:$0xff]  ;;  %v19499_v1 = vld [vmem:[#allocation32_spill] sm:$0xff] }
 0x1da   : >> { %v3121_v27 = vpop.f32.mrf.mxu1 }
 0x1db   : >> { %v16929_v54 = vadd.f32 %v13852_v30, %v3225_v21  ;;  %v3224_v31 = vadd.f32 %v3121_v27, %v16653_v50  ;;  %v13855_v19 = vpop.f32.mrf.mxu0  ;;  %14154 = vmatmul.mubr.msk.f32.gmra.mxu0 %vm273_vm0, %v16661_v12  ;;  %v19501_v27 = vld [vmem:[#allocation7_spill] sm:$0xff] }
 0x1dc   : >> { %v13805_v47 = vpop.f32.mrf.mxu1  ;;  %14104 = vmatmul.mubr.msk.f32.gmra.mxu1 %vm273_vm0, %v19491_v43  ;;  %14156 = vmatprep.mubr.msk.f32.mxu0 %vm273_vm0, %v16664_v16 }
 0x1dd   : >> { %v16936_v37 = vadd.f32 %v3508_v53, %v3224_v31  ;;  %v3227_v20 = vadd.f32 %v13805_v47, %v16666_v17  ;;  %14106 = vmatprep.mubr.msk.f32.mxu1 %vm273_vm0, %v19492_v13  ;;  %v3518_v50 = vpop.f32.mrf.mxu0  ;;  %v19495_v17 = vld [vmem:[#allocation31_spill] sm:$0xff] }
 0x1de   : >> { %v3131_v39 = vpop.f32.mrf.mxu1 }
 0x1df   : >> { %v16943_v45 = vadd.f32 %v13855_v19, %v3227_v20  ;;  %v3226_v23 = vadd.f32 %v3131_v39, %v19493_v42  ;;  %v13858_v58 = vpop.f32.mrf.mxu0  ;;  %14157 = vmatmul.mubr.msk.f32.gmra.mxu0 %vm273_vm0, %v16681_v40  ;;  %v19502_v19 = vld [vmem:[#allocation9_spill] sm:$0xff]  ;;  %v19503_v20 = vld [vmem:[#allocation10_spill] sm:$0xff] }
 0x1e0   : >> { %v13808_v46 = vpop.f32.mrf.mxu1  ;;  %14107 = vmatmul.mubr.msk.f32.gmra.mxu1 %vm273_vm0, %v19494_v36  ;;  %14159 = vmatprep.mubr.msk.f32.mxu0 %vm273_vm0, %v16684_v26  ;;  %v19505_v42 = vld [vmem:[#allocation33_spill] sm:$0xff]  ;;  %v19506_v36 = vld [vmem:[#allocation35_spill] sm:$0xff] }
 0x1e1   : >> { %v16950_v12 = vadd.f32 %v3518_v50, %v3226_v23  ;;  %v3229_v41 = vadd.f32 %v13808_v46, %v19495_v17  ;;  %14109 = vmatprep.mubr.msk.f32.mxu1 %vm273_vm0, %v19496_v28  ;;  %v3528_v59 = vpop.f32.mrf.mxu0  ;;  %v19509_v28 = vld [vmem:[#allocation34_spill] sm:$0xff] }
 0x1e2   : >> { %v3141_v16 = vpop.f32.mrf.mxu1 }
 0x1e3   : >> { %v16957_v4 = vadd.f32 %v13858_v58, %v3229_v41  ;;  %v3228_v44 = vadd.f32 %v3141_v16, %v19497_v18  ;;  %v13861_v25 = vpop.f32.mrf.mxu0  ;;  %14160 = vmatmul.mubr.msk.f32.gmra.mxu0 %vm273_vm0, %v16701_v29  ;;  %v19508_v41 = vld [vmem:[#allocation36_spill] sm:$0xff] }
 0x1e4   : >> { %v13811_v56 = vpop.f32.mrf.mxu1  ;;  %14110 = vmatmul.mubr.msk.f32.gmra.mxu1 %vm273_vm0, %v19498_v51  ;;  %14162 = vmatprep.mubr.msk.f32.mxu0 %vm273_vm0, %v16704_v22  ;;  %v19504_v22 = vld [vmem:[#allocation8_spill] sm:$0xff]  ;;  %v19511_v51 = vld [vmem:[#allocation39_spill] sm:$0xff] }
 0x1e5   : >> { %v16964_v40 = vadd.f32 %v3528_v59, %v3228_v44  ;;  %v3231_v30 = vadd.f32 %v13811_v56, %v19499_v1  ;;  %14112 = vmatprep.mubr.msk.f32.mxu1 %vm273_vm0, %v19500_v24  ;;  %v3538_v21 = vpop.f32.mrf.mxu0  ;;  %v19510_v44 = vld [vmem:[#allocation38_spill] sm:$0xff] }
 0x1e6   : >> { %v3151_v26 = vpop.f32.mrf.mxu1 }
 0x1e7   : >> { %v16971_v14 = vadd.f32 %v13861_v25, %v3231_v30  ;;  %v3230_v53 = vadd.f32 %v3151_v26, %v19501_v27  ;;  %v13864_v47 = vpop.f32.mrf.mxu0  ;;  %14163 = vmatmul.mubr.msk.f32.gmra.mxu0 %vm273_vm0, %v16721_v9  ;;  %v19507_v9 = vld [vmem:[#allocation37_spill] sm:$0xff]  ;;  %v19513_v26 = vld [vmem:[#allocation40_spill] sm:$0xff] }
 0x1e8   : >> { %v13814_v31 = vpop.f32.mrf.mxu1  ;;  %14113 = vmatmul.mubr.msk.f32.gmra.mxu1 %vm273_vm0, %v19502_v19  ;;  %14165 = vmatprep.mubr.msk.f32.mxu0 %vm273_vm0, %v19504_v22  ;;  %v19512_v30 = vld [vmem:[#allocation45_spill] sm:$0xff]  ;;  %v19515_v22 = vld [vmem:[#allocation43_spill] sm:$0xff] }
 0x1e9   : >> { %v16978_v29 = vadd.f32 %v3538_v21, %v3230_v53  ;;  %v3233_v43 = vadd.f32 %v13814_v31, %v16726_v55  ;;  %14115 = vmatprep.mubr.msk.f32.mxu1 %vm273_vm0, %v19503_v20  ;;  %v3548_v39 = vpop.f32.mrf.mxu0  ;;  %v17014_v53 = vld [vmem:[%s14958_s20 + $0x331] sm:$0xff] }
 0x1ea   : >> { %v3161_v13 = vpop.f32.mrf.mxu1  ;;  %v11713_v31 = vld [vmem:[%s14958_s20 + $0x332] sm:$0xff] }
 0x1eb   : >> { %v16985_v50 = vadd.f32 %v13864_v47, %v3233_v43  ;;  %v3232_v23 = vadd.f32 %v3161_v13, %v19505_v42  ;;  %v13867_v58 = vpop.f32.mrf.mxu0  ;;  %14166 = vmatmul.mubr.msk.f32.gmra.mxu0 %vm273_vm0, %v16741_v33  ;;  %v19514_v47 = vld [vmem:[#allocation42_spill] sm:$0xff]  ;;  %v19516_v13 = vld [vmem:[#allocation44_spill] sm:$0xff] }
 0x1ec   : >> { %v13817_v46 = vpop.f32.mrf.mxu1  ;;  %14116 = vmatmul.mubr.msk.f32.gmra.mxu1 %vm273_vm0, %v19506_v36  ;;  %14168 = vmatprep.mubr.msk.f32.mxu0 %vm273_vm0, %v19509_v28 }
 0x1ed   : >> { %v16992_v55 = vadd.f32 %v3548_v39, %v3232_v23  ;;  %v3235_v17 = vadd.f32 %v13817_v46, %v19507_v9  ;;  %14118 = vmatprep.mubr.msk.f32.mxu1 %vm273_vm0, %v19508_v41  ;;  %v3558_v59 = vpop.f32.mrf.mxu0  ;;  %v19517_v39 = vld [vmem:[#allocation46_spill] sm:$0xff] }
 0x1ee   : >> { %v3171_v16 = vpop.f32.mrf.mxu1  ;;  %v17031_v23 = vld [vmem:[%s14958_s20 + $0x339] sm:$0xff] }
 0x1ef   : >> { %v16999_v18 = vadd.f32 %v13867_v58, %v3235_v17  ;;  %v3234_v56 = vadd.f32 %v3171_v16, %v19510_v44  ;;  %v13870_v33 = vpop.f32.mrf.mxu0  ;;  %14169 = vmatmul.mubr.msk.f32.gmra.mxu0 %vm273_vm0, %v16761_v34  ;;  %v17034_v46 = vld [vmem:[%s14958_s20 + $0x33a] sm:$0xff] }
 0x1f0   : >> { %v13820_v25 = vpop.f32.mrf.mxu1  ;;  %14119 = vmatmul.mubr.msk.f32.gmra.mxu1 %vm273_vm0, %v19511_v51  ;;  %14171 = vmatprep.mubr.msk.f32.mxu0 %vm273_vm0, %v16764_v57  ;;  %v11749_v9 = vld [vmem:[%s14958_s20 + $0x1e0] sm:$0xff] }
 0x1f1   : >> { %v17006_v1 = vadd.f32 %v3558_v59, %v3234_v56  ;;  %v3237_v24 = vadd.f32 %v13820_v25, %v19512_v30  ;;  %14121 = vmatprep.mubr.msk.f32.mxu1 %vm273_vm0, %v19513_v26  ;;  %v3568_v27 = vpop.f32.mrf.mxu0  ;;  %v11814_v17 = vld [vmem:[%s14958_s20 + $0x1e1] sm:$0xff]  ;;  %v11751_v26 = vld [vmem:[%s14958_s20 + $0x1f8] sm:$0xff] }
 0x1f2   : >> { %v3181_v21 = vpop.f32.mrf.mxu1  ;;  %v11750_v25 = vld [vmem:[%s14958_s20 + $0x1e8] sm:$0xff] }
 0x1f3   : >> { %v17017_v34 = vadd.f32 %v13870_v33, %v3237_v24  ;;  %v3236_v19 = vadd.f32 %v3181_v21, %v19514_v47  ;;  %v13873_v20 = vpop.f32.mrf.mxu0  ;;  %14172 = vmatmul.mubr.msk.f32.gmra.mxu0 %vm273_vm0, %v19516_v13  ;;  %v11815_v33 = vld [vmem:[%s14958_s20 + $0x1e9] sm:$0xff]  ;;  %v11816_v21 = vld [vmem:[%s14958_s20 + $0x1f9] sm:$0xff] }
 0x1f4   : >> { %v13823_v43 = vpop.f32.mrf.mxu1  ;;  %14122 = vmatmul.mubr.msk.f32.gmra.mxu1 %vm273_vm0, %v19515_v22  ;;  %14174 = vmatprep.mubr.msk.f32.mxu0 %vm273_vm0, %v11713_v31  ;;  %v17067_v47 = vld [vmem:[%s19179_s1 + $0xa0] sm:$0xff] }
 0x1f5   : >> { %v17024_v57 = vadd.f32 %v3568_v27, %v3236_v19  ;;  %v3239_v42 = vadd.f32 %v13823_v43, %v19517_v39  ;;  %14124 = vmatprep.mubr.msk.f32.mxu1 %vm273_vm0, %v17014_v53  ;;  %v3578_v36 = vpop.f32.mrf.mxu0  ;;  %v11752_v43 = vld [vmem:[%s14958_s20 + $0x200] sm:$0xff]  ;;  %v11753_v39 = vld [vmem:[%s14958_s20 + $0x210] sm:$0xff] }
 0x1f6   : >> { %v3191_v58 = vpop.f32.mrf.mxu1 }
 0x1f7   : >> { %v17038_v41 = vadd.f32 %v13873_v20, %v3239_v42  ;;  %v3238_v28 = vadd.f32 %v3191_v58, %v16796_v52  ;;  %v13876_v59 = vpop.f32.mrf.mxu0  ;;  %14175 = vmatmul.mubr.msk.f32.gmra.mxu0 %vm273_vm0, %v17034_v46  ;;  %v11817_v20 = vld [vmem:[%s14958_s20 + $0x201] sm:$0xff]  ;;  %v11818_v42 = vld [vmem:[%s14958_s20 + $0x211] sm:$0xff] }
 0x1f8   : >> { %v13826_v16 = vpop.f32.mrf.mxu1  ;;  %14125 = vmatmul.mubr.msk.f32.gmra.mxu1 %vm273_vm0, %v17031_v23  ;;  %14229 = vmatprep.mubr.msk.f32.mxu0 %vm273_vm0, %v11814_v17  ;;  %v11819_v17 = vld [vmem:[%s14958_s20 + $0x219] sm:$0xff] }
 0x1f9   : >> { %v17045_v44 = vadd.f32 %v3578_v36, %v3238_v28  ;;  %v3241_v56 = vadd.f32 %v13826_v16, %v16803_v48  ;;  %14179 = vmatprep.mubr.msk.f32.mxu1 %vm273_vm0, %v11749_v9  ;;  %v3588_v51 = vpop.f32.mrf.mxu0  ;;  %v17062_v48 = vld [vmem:[%s19179_s1 + $0x98] sm:$0xff] }
 0x1fa   : >> { %v3201_v52 = vpop.f32.mrf.mxu1 }
 0x1fb   : >> { %v17052_v30 = vadd.f32 %v13876_v59, %v3241_v56  ;;  %v3240_v24 = vadd.f32 %v3201_v52, %v16820_v38  ;;  %v13931_v31 = vpop.f32.mrf.mxu0  ;;  %14230 = vmatmul.mubr.msk.f32.vlgmr.msra.gmra.mxu0 %vm273_vm0, %v11815_v33  ;;  %v11755_v59 = vld [vmem:[%s14958_s20 + $0x228] sm:$0xff] }
 0x1fc   : >> { %v13881_v27 = vpop.f32.mrf.mxu1  ;;  %14180 = vmatmul.mubr.msk.f32.vlgmr.msra.gmra.mxu1 %vm273_vm0, %v11750_v25  ;;  %14328 = vmatpush3.msra.mxu0 %v16818_v11  ;;  %v11820_v56 = vld [vmem:[%s14958_s20 + $0x229] sm:$0xff] }
 0x1fd   : >> { %v17069_v38 = vadd.f32 %v3588_v51, %v3240_v24  ;;  %v3988_v19 = vadd.f32 %v13881_v27, %v16829_v7  ;;  %14278 = vmatpush3.msra.mxu1 %v16813_v35  ;;  %v4215_v13 = vpop.f32.mrf.mxu0  ;;  %14182 = vmatprep.mubr.msk.f32.mxu1 %vm273_vm0, %v11751_v26  ;;  %v11756_v26 = vld [vmem:[%s14958_s20 + $0x230] sm:$0xff] }
 0x1fe   : >> { %v3828_v22 = vpop.f32.mrf.mxu1  ;;  %14232 = vmatprep.mubr.msk.f32.mxu0 %vm273_vm0, %v11816_v21  ;;  %14377 = vmatprep.subr.mxu1 %v17062_v48  ;;  %v11821_v21 = vld [vmem:[%s14958_s20 + $0x231] sm:$0xff] }
 0x1ff   : >> { %v17080_v58 = vadd.f32 %v13931_v31, %v3988_v19  ;;  %v3987_v7 = vadd.f32 %v3828_v22, %v16838_v15  ;;  %14427 = vmatprep.subr.mxu0 %v17067_v47  ;;  %v13934_v11 = vpop.f32.mrf.mxu0  ;;  %14233 = vmatmul.mubr.msk.f32.gmra.mxu0 %vm273_vm0, %v11817_v20  ;;  %v11754_v15 = vld [vmem:[%s14958_s20 + $0x218] sm:$0xff]  ;;  %v11757_v31 = vld [vmem:[%s14958_s20 + $0x240] sm:$0xff] }
 0x200   : >> { %v13884_v35 = vpop.f32.mrf.mxu1  ;;  %14183 = vmatmul.mubr.msk.f32.gmra.mxu1 %vm273_vm0, %v11752_v43  ;;  %14235 = vmatprep.mubr.msk.f32.mxu0 %vm273_vm0, %v11818_v42  ;;  %v11822_v19 = vld [vmem:[%s14958_s20 + $0x241] sm:$0xff] }
 0x201   : >> { %v17087_v36 = vadd.f32 %v4215_v13, %v3987_v7  ;;  %v3990_v9 = vadd.f32 %v13884_v35, %v16845_v6  ;;  %14185 = vmatprep.mubr.msk.f32.mxu1 %vm273_vm0, %v11753_v39  ;;  %v4225_v16 = vpop.f32.mrf.mxu0  ;;  %v11758_v42 = vld [vmem:[%s14958_s20 + $0x248] sm:$0xff] }
 0x202   : >> { %v3838_v28 = vpop.f32.mrf.mxu1  ;;  %v11823_v7 = vld [vmem:[%s14958_s20 + $0x249] sm:$0xff] }
 0x203   : >> { %v17096_v25 = vadd.f32 %v13934_v11, %v3990_v9  ;;  %v3989_v33 = vadd.f32 %v3838_v28, %v16852_v2  ;;  %v13937_v6 = vpop.f32.mrf.mxu0  ;;  %14236 = vmatmul.mubr.msk.f32.gmra.mxu0 %vm273_vm0, %v11819_v17  ;;  %v11759_v11 = vld [vmem:[%s14958_s20 + $0x258] sm:$0xff] }
 0x204   : >> { %v13887_v52 = vpop.f32.mrf.mxu1  ;;  %14186 = vmatmul.mubr.msk.f32.gmra.mxu1 %vm273_vm0, %v11754_v15  ;;  %14238 = vmatprep.mubr.msk.f32.mxu0 %vm273_vm0, %v11820_v56  ;;  %v11824_v9 = vld [vmem:[%s14958_s20 + $0x259] sm:$0xff] }
 0x205   : >> { %v17101_v51 = vadd.f32 %v4225_v16, %v3989_v33  ;;  %v3992_v24 = vadd.f32 %v13887_v52, %v16859_v61  ;;  %14188 = vmatprep.mubr.msk.f32.mxu1 %vm273_vm0, %v11755_v59  ;;  %v4235_v2 = vpop.f32.mrf.mxu0  ;;  %v11760_v56 = vld [vmem:[%s14958_s20 + $0x260] sm:$0xff] }
 0x206   : >> { %v3848_v27 = vpop.f32.mrf.mxu1  ;;  %v11825_v33 = vld [vmem:[%s14958_s20 + $0x261] sm:$0xff] }
 0x207   : >> { %v17110_v43 = vadd.f32 %v13937_v6, %v3992_v24  ;;  %v3991_v20 = vadd.f32 %v3848_v27, %v16866_v60  ;;  %v13940_v61 = vpop.f32.mrf.mxu0  ;;  %14239 = vmatmul.mubr.msk.f32.gmra.mxu0 %vm273_vm0, %v11821_v21  ;;  %v11761_v6 = vld [vmem:[%s14958_s20 + $0x270] sm:$0xff] }
 0x208   : >> { %v13890_v22 = vpop.f32.mrf.mxu1  ;;  %14189 = vmatmul.mubr.msk.f32.gmra.mxu1 %vm273_vm0, %v11756_v26  ;;  %14241 = vmatprep.mubr.msk.f32.mxu0 %vm273_vm0, %v11822_v19  ;;  %v11826_v24 = vld [vmem:[%s14958_s20 + $0x271] sm:$0xff] }
 0x209   : >> { %v17115_v13 = vadd.f32 %v4235_v2, %v3991_v20  ;;  %v3994_v39 = vadd.f32 %v13890_v22, %v16873_v49  ;;  %14191 = vmatprep.mubr.msk.f32.mxu1 %vm273_vm0, %v11757_v31  ;;  %v4245_v60 = vpop.f32.mrf.mxu0  ;;  %v11762_v19 = vld [vmem:[%s14958_s20 + $0x278] sm:$0xff] }
 0x20a   : >> { %v3858_v35 = vpop.f32.mrf.mxu1  ;;  %v11827_v20 = vld [vmem:[%s14958_s20 + $0x279] sm:$0xff] }
 0x20b   : >> { %v17124_v15 = vadd.f32 %v13940_v61, %v3994_v39  ;;  %v3993_v17 = vadd.f32 %v3858_v35, %v16880_v0  ;;  %v13943_v49 = vpop.f32.mrf.mxu0  ;;  %14242 = vmatmul.mubr.msk.f32.gmra.mxu0 %vm273_vm0, %v11823_v7  ;;  %v11763_v61 = vld [vmem:[%s14958_s20 + $0x288] sm:$0xff] }
 0x20c   : >> { %v13893_v28 = vpop.f32.mrf.mxu1  ;;  %14192 = vmatmul.mubr.msk.f32.gmra.mxu1 %vm273_vm0, %v11758_v42  ;;  %14244 = vmatprep.mubr.msk.f32.mxu0 %vm273_vm0, %v11824_v9  ;;  %v11828_v39 = vld [vmem:[%s14958_s20 + $0x289] sm:$0xff] }
 0x20d   : >> { %v17129_v16 = vadd.f32 %v4245_v60, %v3993_v17  ;;  %v3996_v59 = vadd.f32 %v13893_v28, %v16887_v62  ;;  %14194 = vmatprep.mubr.msk.f32.mxu1 %vm273_vm0, %v11759_v11  ;;  %v4255_v0 = vpop.f32.mrf.mxu0  ;;  %v11764_v9 = vld [vmem:[%s14958_s20 + $0x290] sm:$0xff] }
 0x20e   : >> { %v3868_v52 = vpop.f32.mrf.mxu1  ;;  %v11829_v17 = vld [vmem:[%s14958_s20 + $0x291] sm:$0xff] }
 0x20f   : >> { %v17138_v26 = vadd.f32 %v13943_v49, %v3996_v59  ;;  %v3995_v21 = vadd.f32 %v3868_v52, %v16894_v10  ;;  %v13946_v62 = vpop.f32.mrf.mxu0  ;;  %14245 = vmatmul.mubr.msk.f32.gmra.mxu0 %vm273_vm0, %v11825_v33  ;;  %v11765_v49 = vld [vmem:[%s14958_s20 + $0x2a0] sm:$0xff] }
 0x210   : >> { %v13896_v27 = vpop.f32.mrf.mxu1  ;;  %14195 = vmatmul.mubr.msk.f32.gmra.mxu1 %vm273_vm0, %v11760_v56  ;;  %14247 = vmatprep.mubr.msk.f32.mxu0 %vm273_vm0, %v11826_v24  ;;  %v11830_v59 = vld [vmem:[%s14958_s20 + $0x2a1] sm:$0xff] }
 0x211   : >> { %v17143_v2 = vadd.f32 %v4255_v0, %v3995_v21  ;;  %v3998_v31 = vadd.f32 %v13896_v27, %v16901_v5  ;;  %14197 = vmatprep.mubr.msk.f32.mxu1 %vm273_vm0, %v11761_v6  ;;  %v4265_v10 = vpop.f32.mrf.mxu0  ;;  %v11766_v24 = vld [vmem:[%s14958_s20 + $0x2a8] sm:$0xff] }
 0x212   : >> { %v3878_v22 = vpop.f32.mrf.mxu1  ;;  %v11831_v21 = vld [vmem:[%s14958_s20 + $0x2a9] sm:$0xff] }
 0x213   : >> { %v17152_v42 = vadd.f32 %v13946_v62, %v3998_v31  ;;  %v3997_v7 = vadd.f32 %v3878_v22, %v16908_v32  ;;  %v13949_v5 = vpop.f32.mrf.mxu0  ;;  %14248 = vmatmul.mubr.msk.f32.gmra.mxu0 %vm273_vm0, %v11827_v20  ;;  %v11767_v62 = vld [vmem:[%s14958_s20 + $0x2b8] sm:$0xff] }
 0x214   : >> { %v13899_v35 = vpop.f32.mrf.mxu1  ;;  %14198 = vmatmul.mubr.msk.f32.gmra.mxu1 %vm273_vm0, %v11762_v19  ;;  %14250 = vmatprep.mubr.msk.f32.mxu0 %vm273_vm0, %v11828_v39  ;;  %v11832_v31 = vld [vmem:[%s14958_s20 + $0x2b9] sm:$0xff] }
 0x215   : >> { %v17157_v60 = vadd.f32 %v4265_v10, %v3997_v7  ;;  %v4000_v11 = vadd.f32 %v13899_v35, %v16915_v63  ;;  %14200 = vmatprep.mubr.msk.f32.mxu1 %vm273_vm0, %v11763_v61  ;;  %v4275_v32 = vpop.f32.mrf.mxu0  ;;  %v11768_v39 = vld [vmem:[%s14958_s20 + $0x2c0] sm:$0xff] }
 0x216   : >> { %v3888_v28 = vpop.f32.mrf.mxu1  ;;  %v11833_v7 = vld [vmem:[%s14958_s20 + $0x2c1] sm:$0xff] }
 0x217   : >> { %v17166_v56 = vadd.f32 %v13949_v5, %v4000_v11  ;;  %v3999_v33 = vadd.f32 %v3888_v28, %v16922_v3  ;;  %v13952_v63 = vpop.f32.mrf.mxu0  ;;  %14251 = vmatmul.mubr.msk.f32.gmra.mxu0 %vm273_vm0, %v11829_v17  ;;  %v11769_v5 = vld [vmem:[%s14958_s20 + $0x2d0] sm:$0xff] }
 0x218   : >> { %v13902_v52 = vpop.f32.mrf.mxu1  ;;  %14201 = vmatmul.mubr.msk.f32.gmra.mxu1 %vm273_vm0, %v11764_v9  ;;  %14253 = vmatprep.mubr.msk.f32.mxu0 %vm273_vm0, %v11830_v59  ;;  %v11834_v11 = vld [vmem:[%s14958_s20 + $0x2d1] sm:$0xff] }
 0x219   : >> { %v17171_v0 = vadd.f32 %v4275_v32, %v3999_v33  ;;  %v4002_v6 = vadd.f32 %v13902_v52, %v16929_v54  ;;  %14203 = vmatprep.mubr.msk.f32.mxu1 %vm273_vm0, %v11765_v49  ;;  %v4285_v3 = vpop.f32.mrf.mxu0  ;;  %v11770_v59 = vld [vmem:[%s14958_s20 + $0x2d8] sm:$0xff] }
 0x21a   : >> { %v3898_v27 = vpop.f32.mrf.mxu1  ;;  %v11835_v33 = vld [vmem:[%s14958_s20 + $0x2d9] sm:$0xff] }
 0x21b   : >> { %v17180_v19 = vadd.f32 %v13952_v63, %v4002_v6  ;;  %v4001_v20 = vadd.f32 %v3898_v27, %v16936_v37  ;;  %v13955_v54 = vpop.f32.mrf.mxu0  ;;  %14254 = vmatmul.mubr.msk.f32.gmra.mxu0 %vm273_vm0, %v11831_v21  ;;  %v11771_v63 = vld [vmem:[%s14958_s20 + $0x2e8] sm:$0xff] }
 0x21c   : >> { %v13905_v22 = vpop.f32.mrf.mxu1  ;;  %14204 = vmatmul.mubr.msk.f32.gmra.mxu1 %vm273_vm0, %v11766_v24  ;;  %14256 = vmatprep.mubr.msk.f32.mxu0 %vm273_vm0, %v11832_v31  ;;  %v11836_v6 = vld [vmem:[%s14958_s20 + $0x2e9] sm:$0xff] }
 0x21d   : >> { %v17185_v10 = vadd.f32 %v4285_v3, %v4001_v20  ;;  %v4004_v61 = vadd.f32 %v13905_v22, %v16943_v45  ;;  %14206 = vmatprep.mubr.msk.f32.mxu1 %vm273_vm0, %v11767_v62  ;;  %v4295_v37 = vpop.f32.mrf.mxu0  ;;  %v11772_v31 = vld [vmem:[%s14958_s20 + $0x2f0] sm:$0xff] }
 0x21e   : >> { %v3908_v35 = vpop.f32.mrf.mxu1  ;;  %v11837_v20 = vld [vmem:[%s14958_s20 + $0x2f1] sm:$0xff] }
 0x21f   : >> { %v17194_v9 = vadd.f32 %v13955_v54, %v4004_v61  ;;  %v4003_v17 = vadd.f32 %v3908_v35, %v16950_v12  ;;  %v13958_v45 = vpop.f32.mrf.mxu0  ;;  %14257 = vmatmul.mubr.msk.f32.gmra.mxu0 %vm273_vm0, %v11833_v7  ;;  %v11773_v54 = vld [vmem:[%s14958_s20 + $0x300] sm:$0xff] }
 0x220   : >> { %v13908_v28 = vpop.f32.mrf.mxu1  ;;  %14207 = vmatmul.mubr.msk.f32.gmra.mxu1 %vm273_vm0, %v11768_v39  ;;  %14259 = vmatprep.mubr.msk.f32.mxu0 %vm273_vm0, %v11834_v11  ;;  %v11838_v61 = vld [vmem:[%s14958_s20 + $0x301] sm:$0xff] }
 0x221   : >> { %v17199_v32 = vadd.f32 %v4295_v37, %v4003_v17  ;;  %v4006_v49 = vadd.f32 %v13908_v28, %v16957_v4  ;;  %14209 = vmatprep.mubr.msk.f32.mxu1 %vm273_vm0, %v11769_v5  ;;  %v4305_v12 = vpop.f32.mrf.mxu0  ;;  %v11774_v11 = vld [vmem:[%s14958_s20 + $0x308] sm:$0xff] }
 0x222   : >> { %v3918_v52 = vpop.f32.mrf.mxu1  ;;  %v11839_v17 = vld [vmem:[%s14958_s20 + $0x309] sm:$0xff] }
 0x223   : >> { %v17208_v24 = vadd.f32 %v13958_v45, %v4006_v49  ;;  %v4005_v21 = vadd.f32 %v3918_v52, %v16964_v40  ;;  %v13961_v4 = vpop.f32.mrf.mxu0  ;;  %14260 = vmatmul.mubr.msk.f32.gmra.mxu0 %vm273_vm0, %v11835_v33  ;;  %v11775_v45 = vld [vmem:[%s14958_s20 + $0x318] sm:$0xff] }
 0x224   : >> { %v13911_v27 = vpop.f32.mrf.mxu1  ;;  %14210 = vmatmul.mubr.msk.f32.gmra.mxu1 %vm273_vm0, %v11770_v59  ;;  %14262 = vmatprep.mubr.msk.f32.mxu0 %vm273_vm0, %v11836_v6  ;;  %v11840_v49 = vld [vmem:[%s14958_s20 + $0x319] sm:$0xff] }
 0x225   : >> { %v17213_v3 = vadd.f32 %v4305_v12, %v4005_v21  ;;  %v4008_v62 = vadd.f32 %v13911_v27, %v16971_v14  ;;  %14212 = vmatprep.mubr.msk.f32.mxu1 %vm273_vm0, %v11771_v63  ;;  %v4315_v40 = vpop.f32.mrf.mxu0  ;;  %v11776_v6 = vld [vmem:[%s14958_s20 + $0x320] sm:$0xff] }
 0x226   : >> { %v3928_v22 = vpop.f32.mrf.mxu1  ;;  %v11841_v21 = vld [vmem:[%s14958_s20 + $0x321] sm:$0xff] }
 0x227   : >> { %v17222_v39 = vadd.f32 %v13961_v4, %v4008_v62  ;;  %v4007_v7 = vadd.f32 %v3928_v22, %v16978_v29  ;;  %v13964_v14 = vpop.f32.mrf.mxu0  ;;  %14263 = vmatmul.mubr.msk.f32.gmra.mxu0 %vm273_vm0, %v11837_v20 }
 0x228   : >> { %v13914_v35 = vpop.f32.mrf.mxu1  ;;  %14213 = vmatmul.mubr.msk.f32.gmra.mxu1 %vm273_vm0, %v11772_v31  ;;  %14265 = vmatprep.mubr.msk.f32.mxu0 %vm273_vm0, %v11838_v61  ;;  %v11779_v61 = vld [vmem:[%s14958_s20 + $0x348] sm:$0xff] }
 0x229   : >> { %v17227_v37 = vadd.f32 %v4315_v40, %v4007_v7  ;;  %v4010_v5 = vadd.f32 %v13914_v35, %v16985_v50  ;;  %14215 = vmatprep.mubr.msk.f32.mxu1 %vm273_vm0, %v11773_v54  ;;  %v4325_v29 = vpop.f32.mrf.mxu0  ;;  %v19518_v40 = vld [vmem:[#allocation41_spill] sm:$0xff]  ;;  %v11844_v7 = vld [vmem:[%s14958_s20 + $0x349] sm:$0xff] }
 0x22a   : >> { %v3938_v28 = vpop.f32.mrf.mxu1 }
 0x22b   : >> { %v17236_v59 = vadd.f32 %v13964_v14, %v4010_v5  ;;  %v4009_v33 = vadd.f32 %v3938_v28, %v16992_v55  ;;  %v13967_v12 = vpop.f32.mrf.mxu0  ;;  %14266 = vmatmul.mubr.msk.f32.gmra.mxu0 %vm273_vm0, %v11839_v17  ;;  %v11780_v17 = vld [vmem:[%s14958_s20 + $0x350] sm:$0xff] }
 0x22c   : >> { %v13917_v52 = vpop.f32.mrf.mxu1  ;;  %14216 = vmatmul.mubr.msk.f32.gmra.mxu1 %vm273_vm0, %v11774_v11  ;;  %14268 = vmatprep.mubr.msk.f32.mxu0 %vm273_vm0, %v11840_v49  ;;  %v11845_v28 = vld [vmem:[%s14958_s20 + $0x351] sm:$0xff]  ;;  %v11945_v49 = vld [vmem:[%s14958_s20 + $0x360] sm:$0xff] }
 0x22d   : >> { %v17241_v50 = vadd.f32 %v4325_v29, %v4009_v33  ;;  %v4012_v63 = vadd.f32 %v13917_v52, %v16999_v18  ;;  %14218 = vmatprep.mubr.msk.f32.mxu1 %vm273_vm0, %v11775_v45  ;;  %v4335_v55 = vpop.f32.mrf.mxu0  ;;  %v11879_v45 = vld [vmem:[%s14958_s20 + $0x1e2] sm:$0xff] }
 0x22e   : >> { %v3948_v27 = vpop.f32.mrf.mxu1 }
 0x22f   : >> { %v17248_v4 = vadd.f32 %v13967_v12, %v4012_v63  ;;  %v4011_v62 = vadd.f32 %v3948_v27, %v17006_v1  ;;  %v13970_v20 = vpop.f32.mrf.mxu0  ;;  %14269 = vmatmul.mubr.msk.f32.gmra.mxu0 %vm273_vm0, %v11841_v21  ;;  %v11880_v63 = vld [vmem:[%s14958_s20 + $0x1ea] sm:$0xff] }
 0x230   : >> { %v13920_v31 = vpop.f32.mrf.mxu1  ;;  %14219 = vmatmul.mubr.msk.f32.gmra.mxu1 %vm273_vm0, %v11776_v6  ;;  %14271 = vmatprep.mubr.msk.f32.mxu0 %vm273_vm0, %v17014_v53  ;;  %v11946_v6 = vld [vmem:[%s14958_s20 + $0x368] sm:$0xff] }
 0x231   : >> { %v17253_v18 = vadd.f32 %v4335_v55, %v4011_v62  ;;  %v4014_v22 = vadd.f32 %v13920_v31, %v17017_v34  ;;  %14221 = vmatprep.mubr.msk.f32.mxu1 %vm273_vm0, %v19518_v40  ;;  %v4345_v1 = vpop.f32.mrf.mxu0  ;;  %v11881_v62 = vld [vmem:[%s14958_s20 + $0x1fa] sm:$0xff] }
 0x232   : >> { %v3958_v54 = vpop.f32.mrf.mxu1  ;;  %v17295_v31 = vld [vmem:[%s14958_s20 + $0x378] sm:$0xff] }
 0x233   : >> { %v17262_v35 = vadd.f32 %v13970_v20, %v4014_v22  ;;  %v4013_v14 = vadd.f32 %v3958_v54, %v17024_v57  ;;  %v13973_v34 = vpop.f32.mrf.mxu0  ;;  %14272 = vmatmul.mubr.msk.f32.gmra.mxu0 %vm273_vm0, %v17031_v23  ;;  %v17302_v22 = vld [vmem:[%s19179_s1 + $0xa8] sm:$0xff] }
 0x234   : >> { %v13923_v5 = vpop.f32.mrf.mxu1  ;;  %14222 = vmatmul.mubr.msk.f32.gmra.mxu1 %vm273_vm0, %v16787_v8  ;;  %14274 = vmatprep.mubr.msk.f32.mxu0 %vm273_vm0, %v11844_v7 }
 0x235   : >> { %v17269_v53 = vadd.f32 %v4345_v1, %v4013_v14  ;;  %v4016_v11 = vadd.f32 %v13923_v5, %v17038_v41  ;;  %14224 = vmatprep.mubr.msk.f32.mxu1 %vm273_vm0, %v11779_v61  ;;  %v4355_v29 = vpop.f32.mrf.mxu0  ;;  %v11882_v1 = vld [vmem:[%s14958_s20 + $0x202] sm:$0xff]  ;;  %v11883_v5 = vld [vmem:[%s14958_s20 + $0x212] sm:$0xff] }
 0x236   : >> { %v3968_v57 = vpop.f32.mrf.mxu1  ;;  %v17316_v61 = vld [vmem:[%s14958_s20 + $0x380] sm:$0xff] }
 0x237   : >> { %v17278_v8 = vadd.f32 %v13973_v34, %v4016_v11  ;;  %v4015_v23 = vadd.f32 %v3968_v57, %v17045_v44  ;;  %v13976_v41 = vpop.f32.mrf.mxu0  ;;  %14275 = vmatmul.mubr.msk.f32.gmra.mxu0 %vm273_vm0, %v11845_v28  ;;  %v17323_v34 = vld [vmem:[%s14958_s20 + $0x390] sm:$0xff]  ;;  %v17341_v57 = vld [vmem:[%s14958_s20 + $0x398] sm:$0xff] }
 0x238   : >> { %v13926_v33 = vpop.f32.mrf.mxu1  ;;  %14225 = vmatmul.mubr.msk.f32.gmra.mxu1 %vm273_vm0, %v11780_v17  ;;  %14329 = vmatprep.mubr.msk.f32.mxu0 %vm273_vm0, %v11945_v49  ;;  %v11885_v49 = vld [vmem:[%s14958_s20 + $0x22a] sm:$0xff] }
 0x239   : >> { %v17283_v52 = vadd.f32 %v4355_v29, %v4015_v23  ;;  %v4018_v12 = vadd.f32 %v13926_v33, %v17052_v30  ;;  %14279 = vmatprep.mubr.msk.f32.mxu1 %vm273_vm0, %v11879_v45  ;;  %v4365_v44 = vpop.f32.mrf.mxu0  ;;  %v17345_v23 = vld [vmem:[%s14958_s20 + $0x3a8] sm:$0xff] }
 0x23a   : >> { %v3978_v21 = vpop.f32.mrf.mxu1 }
 0x23b   : >> { %v17290_v27 = vadd.f32 %v13976_v41, %v4018_v12  ;;  %v4017_v55 = vadd.f32 %v3978_v21, %v17069_v38  ;;  %v14031_v30 = vpop.f32.mrf.mxu0  ;;  %14330 = vmatmul.mubr.msk.f32.vlgmr.msra.gmra.mxu0 %vm273_vm0, %v11946_v6  ;;  %v17307_v38 = vld [vmem:[%s19179_s1 + $0xb0] sm:$0xff] }
 0x23c   : >> { %v13981_v20 = vpop.f32.mrf.mxu1  ;;  %14280 = vmatmul.mubr.msk.f32.vlgmr.msra.gmra.mxu1 %vm273_vm0, %v11880_v63  ;;  %14428 = vmatpush3.msra.mxu0 %v17067_v47  ;;  %v11886_v21 = vld [vmem:[%s14958_s20 + $0x232] sm:$0xff] }
 0x23d   : >> { %v17309_v40 = vadd.f32 %v4365_v44, %v4017_v55  ;;  %v4762_v54 = vadd.f32 %v13981_v20, %v17080_v58  ;;  %14378 = vmatpush3.msra.mxu1 %v17062_v48  ;;  %v4991_v14 = vpop.f32.mrf.mxu0  ;;  %14282 = vmatprep.mubr.msk.f32.mxu1 %vm273_vm0, %v11881_v62  ;;  %v17361_v44 = vld [vmem:[%s14958_s20 + $0x3b0] sm:$0xff]  ;;  %v11887_v62 = vld [vmem:[%s14958_s20 + $0x242] sm:$0xff] }
 0x23e   : >> { %v4602_v7 = vpop.f32.mrf.mxu1  ;;  %14332 = vmatprep.mubr.msk.f32.mxu0 %vm273_vm0, %v17295_v31  ;;  %14477 = vmatprep.subr.mxu1 %v17302_v22  ;;  %v17365_v20 = vld [vmem:[%s14958_s20 + $0x3c0] sm:$0xff] }
 0x23f   : >> { %v17325_v58 = vadd.f32 %v14031_v30, %v4762_v54  ;;  %v4761_v48 = vadd.f32 %v4602_v7, %v17087_v36  ;;  %14527 = vmatprep.subr.mxu0 %v17307_v38  ;;  %v14034_v11 = vpop.f32.mrf.mxu0  ;;  %14333 = vmatmul.mubr.msk.f32.gmra.mxu0 %vm273_vm0, %v17316_v61  ;;  %v11884_v36 = vld [vmem:[%s14958_s20 + $0x21a] sm:$0xff] }
 0x240   : >> { %v13984_v47 = vpop.f32.mrf.mxu1  ;;  %14283 = vmatmul.mubr.msk.f32.gmra.mxu1 %vm273_vm0, %v11882_v1  ;;  %14335 = vmatprep.mubr.msk.f32.mxu0 %vm273_vm0, %v17323_v34 }
 0x241   : >> { %v17333_v17 = vadd.f32 %v4991_v14, %v4761_v48  ;;  %v4764_v28 = vadd.f32 %v13984_v47, %v17096_v25  ;;  %14285 = vmatprep.mubr.msk.f32.mxu1 %vm273_vm0, %v11883_v5  ;;  %v5001_v45 = vpop.f32.mrf.mxu0  ;;  %v11888_v5 = vld [vmem:[%s14958_s20 + $0x24a] sm:$0xff] }
 0x242   : >> { %v4612_v29 = vpop.f32.mrf.mxu1  ;;  %v17381_v48 = vld [vmem:[%s14958_s20 + $0x3c8] sm:$0xff] }
 0x243   : >> { %v17347_v33 = vadd.f32 %v14034_v11, %v4764_v28  ;;  %v4763_v25 = vadd.f32 %v4612_v29, %v17101_v51  ;;  %v14037_v12 = vpop.f32.mrf.mxu0  ;;  %14336 = vmatmul.mubr.msk.f32.gmra.mxu0 %vm273_vm0, %v17341_v57  ;;  %v11889_v11 = vld [vmem:[%s14958_s20 + $0x25a] sm:$0xff] }
 0x244   : >> { %v13987_v41 = vpop.f32.mrf.mxu1  ;;  %14286 = vmatmul.mubr.msk.f32.gmra.mxu1 %vm273_vm0, %v11884_v36  ;;  %14338 = vmatprep.mubr.msk.f32.mxu0 %vm273_vm0, %v17345_v23  ;;  %v17385_v28 = vld [vmem:[%s14958_s20 + $0x3d8] sm:$0xff] }
 0x245   : >> { %v17353_v63 = vadd.f32 %v5001_v45, %v4763_v25  ;;  %v4766_v6 = vadd.f32 %v13987_v41, %v17110_v43  ;;  %14288 = vmatprep.mubr.msk.f32.mxu1 %vm273_vm0, %v11885_v49  ;;  %v5011_v55 = vpop.f32.mrf.mxu0  ;;  %v11890_v41 = vld [vmem:[%s14958_s20 + $0x262] sm:$0xff] }
 0x246   : >> { %v4622_v51 = vpop.f32.mrf.mxu1 }
 0x247   : >> { %v17367_v30 = vadd.f32 %v14037_v12, %v4766_v6  ;;  %v4765_v43 = vadd.f32 %v4622_v51, %v17115_v13  ;;  %v14040_v1 = vpop.f32.mrf.mxu0  ;;  %14339 = vmatmul.mubr.msk.f32.gmra.mxu0 %vm273_vm0, %v17361_v44  ;;  %v17401_v12 = vld [vmem:[%s14958_s20 + $0x3e0] sm:$0xff]  ;;  %v17405_v51 = vld [vmem:[%s14958_s20 + $0x3f0] sm:$0xff] }
 0x248   : >> { %v13990_v54 = vpop.f32.mrf.mxu1  ;;  %14289 = vmatmul.mubr.msk.f32.gmra.mxu1 %vm273_vm0, %v11886_v21  ;;  %14341 = vmatprep.mubr.msk.f32.mxu0 %vm273_vm0, %v17365_v20  ;;  %19519 = vst [vmem:[#allocation11_spill] sm:$0xff] %v17401_v12  ;;  %v11891_v21 = vld [vmem:[%s14958_s20 + $0x272] sm:$0xff]  ;;  %19520 = vst [vmem:[#allocation12_spill] sm:$0xff] %v17405_v51 }
 0x249   : >> { %v17373_v7 = vadd.f32 %v5011_v55, %v4765_v43  ;;  %v4768_v14 = vadd.f32 %v13990_v54, %v17124_v15  ;;  %14291 = vmatprep.mubr.msk.f32.mxu1 %vm273_vm0, %v11887_v62  ;;  %v5021_v47 = vpop.f32.mrf.mxu0 }
 0x24a   : >> { %v4632_v13 = vpop.f32.mrf.mxu1 }
 0x24b   : >> { %v17387_v36 = vadd.f32 %v14040_v1, %v4768_v14  ;;  %v4767_v15 = vadd.f32 %v4632_v13, %v17129_v16  ;;  %v14043_v45 = vpop.f32.mrf.mxu0  ;;  %14342 = vmatmul.mubr.msk.f32.gmra.mxu0 %vm273_vm0, %v17381_v48  ;;  %v11892_v14 = vld [vmem:[%s14958_s20 + $0x27a] sm:$0xff] }
 0x24c   : >> { %v13993_v29 = vpop.f32.mrf.mxu1  ;;  %14292 = vmatmul.mubr.msk.f32.gmra.mxu1 %vm273_vm0, %v11888_v5  ;;  %14344 = vmatprep.mubr.msk.f32.mxu0 %vm273_vm0, %v17385_v28  ;;  %v17421_v5 = vld [vmem:[%s14958_s20 + $0x3f8] sm:$0xff] }
 0x24d   : >> { %v17393_v49 = vadd.f32 %v5021_v47, %v4767_v15  ;;  %v4770_v25 = vadd.f32 %v13993_v29, %v17138_v26  ;;  %14294 = vmatprep.mubr.msk.f32.mxu1 %vm273_vm0, %v11889_v11  ;;  %v5031_v6 = vpop.f32.mrf.mxu0  ;;  %19521 = vst [vmem:[#allocation13_spill] sm:$0xff] %v17421_v5  ;;  %v11893_v47 = vld [vmem:[%s14958_s20 + $0x28a] sm:$0xff] }
 0x24e   : >> { %v4642_v16 = vpop.f32.mrf.mxu1  ;;  %v17425_v11 = vld [vmem:[%s14958_s20 + $0x408] sm:$0xff] }
 0x24f   : >> { %v17407_v55 = vadd.f32 %v14043_v45, %v4770_v25  ;;  %v4769_v26 = vadd.f32 %v4642_v16, %v17143_v2  ;;  %v14046_v43 = vpop.f32.mrf.mxu0  ;;  %14345 = vmatmul.mubr.msk.f32.gmra.mxu0 %vm273_vm0, %v17401_v12  ;;  %19522 = vst [vmem:[#allocation14_spill] sm:$0xff] %v17425_v11  ;;  %v11894_v16 = vld [vmem:[%s14958_s20 + $0x292] sm:$0xff] }
 0x250   : >> { %v13996_v62 = vpop.f32.mrf.mxu1  ;;  %14295 = vmatmul.mubr.msk.f32.gmra.mxu1 %vm273_vm0, %v11890_v41  ;;  %14347 = vmatprep.mubr.msk.f32.mxu0 %vm273_vm0, %v17405_v51  ;;  %v17761_v12 = vld [vmem:[%s14958_s20 + $0x3f1] sm:$0xff] }
 0x251   : >> { %v17413_v54 = vadd.f32 %v5031_v6, %v4769_v26  ;;  %v4772_v1 = vadd.f32 %v13996_v62, %v17152_v42  ;;  %14297 = vmatprep.mubr.msk.f32.mxu1 %vm273_vm0, %v11891_v21  ;;  %v5041_v13 = vpop.f32.mrf.mxu0  ;;  %v17441_v6 = vld [vmem:[%s14958_s20 + $0x410] sm:$0xff]  ;;  %v11895_v26 = vld [vmem:[%s14958_s20 + $0x2a2] sm:$0xff] }
 0x252   : >> { %v4652_v2 = vpop.f32.mrf.mxu1  ;;  %19523 = vst [vmem:[#allocation15_spill] sm:$0xff] %v17441_v6  ;;  %v17445_v62 = vld [vmem:[%s14958_s20 + $0x420] sm:$0xff] }
 0x253   : >> { %v17427_v15 = vadd.f32 %v14046_v43, %v4772_v1  ;;  %v4771_v42 = vadd.f32 %v4652_v2, %v17157_v60  ;;  %v14049_v45 = vpop.f32.mrf.mxu0  ;;  %14348 = vmatmul.mubr.msk.f32.gmra.mxu0 %vm273_vm0, %v17421_v5  ;;  %19524 = vst [vmem:[#allocation16_spill] sm:$0xff] %v17445_v62  ;;  %v17735_v5 = vld [vmem:[%s14958_s20 + $0x3d9] sm:$0xff] }
 0x254   : >> { %v13999_v29 = vpop.f32.mrf.mxu1  ;;  %14298 = vmatmul.mubr.msk.f32.gmra.mxu1 %vm273_vm0, %v11892_v14  ;;  %14350 = vmatprep.mubr.msk.f32.mxu0 %vm273_vm0, %v17425_v11 }
 0x255   : >> { %v17433_v25 = vadd.f32 %v5041_v13, %v4771_v42  ;;  %v4774_v41 = vadd.f32 %v13999_v29, %v17166_v56  ;;  %14300 = vmatprep.mubr.msk.f32.mxu1 %vm273_vm0, %v11893_v47  ;;  %v5051_v21 = vpop.f32.mrf.mxu0  ;;  %v11896_v47 = vld [vmem:[%s14958_s20 + $0x2aa] sm:$0xff] }
 0x256   : >> { %v4662_v60 = vpop.f32.mrf.mxu1  ;;  %v17461_v42 = vld [vmem:[%s14958_s20 + $0x428] sm:$0xff] }
 0x257   : >> { %v17447_v43 = vadd.f32 %v14049_v45, %v4774_v41  ;;  %v4773_v56 = vadd.f32 %v4662_v60, %v17171_v0  ;;  %v14052_v14 = vpop.f32.mrf.mxu0  ;;  %14351 = vmatmul.mubr.msk.f32.gmra.mxu0 %vm273_vm0, %v17441_v6  ;;  %19525 = vst [vmem:[#allocation17_spill] sm:$0xff] %v17461_v42  ;;  %v11897_v45 = vld [vmem:[%s14958_s20 + $0x2ba] sm:$0xff] }
 0x258   : >> { %v14002_v1 = vpop.f32.mrf.mxu1  ;;  %14301 = vmatmul.mubr.msk.f32.gmra.mxu1 %vm273_vm0, %v11894_v16  ;;  %14353 = vmatprep.mubr.msk.f32.mxu0 %vm273_vm0, %v17445_v62  ;;  %v17465_v41 = vld [vmem:[%s14958_s20 + $0x438] sm:$0xff]  ;;  %v17709_v6 = vld [vmem:[%s14958_s20 + $0x3c1] sm:$0xff] }
 0x259   : >> { %v17453_v2 = vadd.f32 %v5051_v21, %v4773_v56  ;;  %v4776_v13 = vadd.f32 %v14002_v1, %v17180_v19  ;;  %14303 = vmatprep.mubr.msk.f32.mxu1 %vm273_vm0, %v11895_v26  ;;  %v5061_v29 = vpop.f32.mrf.mxu0  ;;  %19526 = vst [vmem:[#allocation18_spill] sm:$0xff] %v17465_v41  ;;  %v11898_v1 = vld [vmem:[%s14958_s20 + $0x2c2] sm:$0xff] }
 0x25a   : >> { %v4672_v0 = vpop.f32.mrf.mxu1 }
 0x25b   : >> { %v17467_v16 = vadd.f32 %v14052_v14, %v4776_v13  ;;  %v4775_v19 = vadd.f32 %v4672_v0, %v17185_v10  ;;  %v14055_v21 = vpop.f32.mrf.mxu0  ;;  %14354 = vmatmul.mubr.msk.f32.gmra.mxu0 %vm273_vm0, %v17461_v42  ;;  %v17481_v14 = vld [vmem:[%s14958_s20 + $0x440] sm:$0xff]  ;;  %v17485_v0 = vld [vmem:[%s14958_s20 + $0x450] sm:$0xff]  ;;  %v17505_v42 = vld [vmem:[%s14958_s20 + $0x468] sm:$0xff] }
 0x25c   : >> { %v14005_v60 = vpop.f32.mrf.mxu1  ;;  %14304 = vmatmul.mubr.msk.f32.gmra.mxu1 %vm273_vm0, %v11896_v47  ;;  %14356 = vmatprep.mubr.msk.f32.mxu0 %vm273_vm0, %v17465_v41  ;;  %19527 = vst [vmem:[#allocation19_spill] sm:$0xff] %v17481_v14  ;;  %v11899_v47 = vld [vmem:[%s14958_s20 + $0x2d2] sm:$0xff]  ;;  %19528 = vst [vmem:[#allocation20_spill] sm:$0xff] %v17485_v0 }
 0x25d   : >> { %v17473_v26 = vadd.f32 %v5061_v29, %v4775_v19  ;;  %v4778_v56 = vadd.f32 %v14005_v60, %v17194_v9  ;;  %14306 = vmatprep.mubr.msk.f32.mxu1 %vm273_vm0, %v11897_v45  ;;  %v5071_v13 = vpop.f32.mrf.mxu0  ;;  %19530 = vst [vmem:[#allocation22_spill] sm:$0xff] %v17505_v42 }
 0x25e   : >> { %v4682_v10 = vpop.f32.mrf.mxu1 }
 0x25f   : >> { %v17487_v29 = vadd.f32 %v14055_v21, %v4778_v56  ;;  %v4777_v9 = vadd.f32 %v4682_v10, %v17199_v32  ;;  %v14058_v19 = vpop.f32.mrf.mxu0  ;;  %14357 = vmatmul.mubr.msk.f32.gmra.mxu0 %vm273_vm0, %v17481_v14  ;;  %v11900_v21 = vld [vmem:[%s14958_s20 + $0x2da] sm:$0xff] }
 0x260   : >> { %v14008_v45 = vpop.f32.mrf.mxu1  ;;  %14307 = vmatmul.mubr.msk.f32.gmra.mxu1 %vm273_vm0, %v11898_v1  ;;  %14359 = vmatprep.mubr.msk.f32.mxu0 %vm273_vm0, %v17485_v0  ;;  %v17501_v56 = vld [vmem:[%s14958_s20 + $0x458] sm:$0xff]  ;;  %v11901_v1 = vld [vmem:[%s14958_s20 + $0x2ea] sm:$0xff]  ;;  %v17525_v14 = vld [vmem:[%s14958_s20 + $0x480] sm:$0xff] }
 0x261   : >> { %v17493_v60 = vadd.f32 %v5071_v13, %v4777_v9  ;;  %v4780_v41 = vadd.f32 %v14008_v45, %v17208_v24  ;;  %14309 = vmatprep.mubr.msk.f32.mxu1 %vm273_vm0, %v11899_v47  ;;  %19529 = vst [vmem:[#allocation21_spill] sm:$0xff] %v17501_v56  ;;  %v5081_v10 = vpop.f32.mrf.mxu0  ;;  %19532 = vst [vmem:[#allocation24_spill] sm:$0xff] %v17525_v14 }
 0x262   : >> { %v4692_v32 = vpop.f32.mrf.mxu1 }
 0x263   : >> { %v17507_v13 = vadd.f32 %v14058_v19, %v4780_v41  ;;  %v4779_v24 = vadd.f32 %v4692_v32, %v17213_v3  ;;  %v14061_v9 = vpop.f32.mrf.mxu0  ;;  %14360 = vmatmul.mubr.msk.f32.gmra.mxu0 %vm273_vm0, %v17501_v56  ;;  %v11902_v41 = vld [vmem:[%s14958_s20 + $0x2f2] sm:$0xff] }
 0x264   : >> { %v14011_v47 = vpop.f32.mrf.mxu1  ;;  %14310 = vmatmul.mubr.msk.f32.gmra.mxu1 %vm273_vm0, %v11900_v21  ;;  %14362 = vmatprep.mubr.msk.f32.mxu0 %vm273_vm0, %v17505_v42  ;;  %v17521_v19 = vld [vmem:[%s14958_s20 + $0x470] sm:$0xff]  ;;  %v11903_v21 = vld [vmem:[%s14958_s20 + $0x302] sm:$0xff]  ;;  %v17545_v56 = vld [vmem:[%s14958_s20 + $0x498] sm:$0xff] }
 0x265   : >> { %v17513_v45 = vadd.f32 %v5081_v10, %v4779_v24  ;;  %v4782_v0 = vadd.f32 %v14011_v47, %v17222_v39  ;;  %14312 = vmatprep.mubr.msk.f32.mxu1 %vm273_vm0, %v11901_v1  ;;  %19531 = vst [vmem:[#allocation23_spill] sm:$0xff] %v17521_v19  ;;  %v5091_v32 = vpop.f32.mrf.mxu0  ;;  %19534 = vst [vmem:[#allocation26_spill] sm:$0xff] %v17545_v56 }
 0x266   : >> { %v4702_v3 = vpop.f32.mrf.mxu1 }
 0x267   : >> { %v17527_v10 = vadd.f32 %v14061_v9, %v4782_v0  ;;  %v4781_v39 = vadd.f32 %v4702_v3, %v17227_v37  ;;  %v14064_v24 = vpop.f32.mrf.mxu0  ;;  %14363 = vmatmul.mubr.msk.f32.gmra.mxu0 %vm273_vm0, %v17521_v19  ;;  %v11904_v0 = vld [vmem:[%s14958_s20 + $0x30a] sm:$0xff] }
 0x268   : >> { %v14014_v1 = vpop.f32.mrf.mxu1  ;;  %14313 = vmatmul.mubr.msk.f32.gmra.mxu1 %vm273_vm0, %v11902_v41  ;;  %14365 = vmatprep.mubr.msk.f32.mxu0 %vm273_vm0, %v17525_v14  ;;  %v17541_v9 = vld [vmem:[%s14958_s20 + $0x488] sm:$0xff]  ;;  %v11905_v41 = vld [vmem:[%s14958_s20 + $0x31a] sm:$0xff] }
 0x269   : >> { %v17533_v47 = vadd.f32 %v5091_v32, %v4781_v39  ;;  %v4784_v42 = vadd.f32 %v14014_v1, %v17236_v59  ;;  %14315 = vmatprep.mubr.msk.f32.mxu1 %vm273_vm0, %v11903_v21  ;;  %19533 = vst [vmem:[#allocation25_spill] sm:$0xff] %v17541_v9  ;;  %v5101_v3 = vpop.f32.mrf.mxu0 }
 0x26a   : >> { %v4712_v37 = vpop.f32.mrf.mxu1 }
 0x26b   : >> { %v17547_v32 = vadd.f32 %v14064_v24, %v4784_v42  ;;  %v4783_v59 = vadd.f32 %v4712_v37, %v17241_v50  ;;  %v14067_v21 = vpop.f32.mrf.mxu0  ;;  %14366 = vmatmul.mubr.msk.f32.gmra.mxu0 %vm273_vm0, %v17541_v9  ;;  %v11906_v42 = vld [vmem:[%s14958_s20 + $0x322] sm:$0xff]  ;;  %v14828_v9 = vld [vmem:[%s14958_s20 + $0x332] sm:$0xff] }
 0x26c   : >> { %v14017_v39 = vpop.f32.mrf.mxu1  ;;  %14316 = vmatmul.mubr.msk.f32.gmra.mxu1 %vm273_vm0, %v11904_v0  ;;  %14368 = vmatprep.mubr.msk.f32.mxu0 %vm273_vm0, %v17545_v56  ;;  %v17561_v50 = vld [vmem:[%s14958_s20 + $0x4a0] sm:$0xff]  ;;  %v17564_v0 = vld [vmem:[%s14958_s20 + $0x4b0] sm:$0xff] }
 0x26d   : >> { %v17553_v1 = vadd.f32 %v5101_v3, %v4783_v59  ;;  %v4786_v14 = vadd.f32 %v14017_v39, %v17248_v4  ;;  %14318 = vmatprep.mubr.msk.f32.mxu1 %vm273_vm0, %v11905_v41  ;;  %19535 = vst [vmem:[#allocation27_spill] sm:$0xff] %v17561_v50  ;;  %v5111_v37 = vpop.f32.mrf.mxu0  ;;  %19536 = vst [vmem:[#allocation28_spill] sm:$0xff] %v17564_v0 }
 0x26e   : >> { %v4722_v24 = vpop.f32.mrf.mxu1 }
 0x26f   : >> { %v17566_v3 = vadd.f32 %v14067_v21, %v4786_v14  ;;  %v4785_v4 = vadd.f32 %v4722_v24, %v17253_v18  ;;  %v14070_v39 = vpop.f32.mrf.mxu0  ;;  %14369 = vmatmul.mubr.msk.f32.gmra.mxu0 %vm273_vm0, %v17561_v50  ;;  %v17580_v14 = vld [vmem:[%s14958_s20 + $0x4b8] sm:$0xff]  ;;  %v17584_v24 = vld [vmem:[%s14958_s20 + $0x4c8] sm:$0xff] }
 0x270   : >> { %v14020_v59 = vpop.f32.mrf.mxu1  ;;  %14319 = vmatmul.mubr.msk.f32.gmra.mxu1 %vm273_vm0, %v11906_v42  ;;  %14371 = vmatprep.mubr.msk.f32.mxu0 %vm273_vm0, %v17564_v0  ;;  %19537 = vst [vmem:[#allocation29_spill] sm:$0xff] %v17580_v14  ;;  %v11909_v42 = vld [vmem:[%s14958_s20 + $0x34a] sm:$0xff]  ;;  %19538 = vst [vmem:[#allocation30_spill] sm:$0xff] %v17584_v24  ;;  %v12075_v50 = vld [vmem:[%s14958_s20 + $0x362] sm:$0xff] }
 0x271   : >> { %v17572_v41 = vadd.f32 %v5111_v37, %v4785_v4  ;;  %v4788_v56 = vadd.f32 %v14020_v59, %v17262_v35  ;;  %14321 = vmatprep.mubr.msk.f32.mxu1 %vm273_vm0, %v14828_v9  ;;  %v5121_v21 = vpop.f32.mrf.mxu0 }
 0x272   : >> { %v4732_v18 = vpop.f32.mrf.mxu1 }
 0x273   : >> { %v17586_v37 = vadd.f32 %v14070_v39, %v4788_v56  ;;  %v4787_v35 = vadd.f32 %v4732_v18, %v17269_v53  ;;  %v14073_v9 = vpop.f32.mrf.mxu0  ;;  %14372 = vmatmul.mubr.msk.f32.gmra.mxu0 %vm273_vm0, %v17580_v14  ;;  %v11910_v56 = vld [vmem:[%s14958_s20 + $0x352] sm:$0xff] }
 0x274   : >> { %v14023_v4 = vpop.f32.mrf.mxu1  ;;  %14322 = vmatmul.mubr.msk.f32.gmra.mxu1 %vm273_vm0, %v17034_v46  ;;  %14374 = vmatprep.mubr.msk.f32.mxu0 %vm273_vm0, %v17584_v24  ;;  %v17601_v53 = vld [vmem:[%s14958_s20 + $0x4d0] sm:$0xff]  ;;  %v12010_v46 = vld [vmem:[%s14958_s20 + $0x361] sm:$0xff]  ;;  %v17622_v14 = vld [vmem:[%s14958_s20 + $0x379] sm:$0xff] }
 0x275   : >> { %v17593_v59 = vadd.f32 %v5121_v21, %v4787_v35  ;;  %v4790_v0 = vadd.f32 %v14023_v4, %v17278_v8  ;;  %14324 = vmatprep.mubr.msk.f32.mxu1 %vm273_vm0, %v11909_v42  ;;  %19539 = vst [vmem:[#allocation3_spill] sm:$0xff] %v17601_v53  ;;  %v5131_v18 = vpop.f32.mrf.mxu0 }
 0x276   : >> { %v4742_v39 = vpop.f32.mrf.mxu1 }
 0x277   : >> { %v17605_v19 = vadd.f32 %v14073_v9, %v4790_v0  ;;  %v4789_v21 = vadd.f32 %v4742_v39, %v17283_v52  ;;  %v14076_v42 = vpop.f32.mrf.mxu0  ;;  %14375 = vmatmul.mubr.msk.f32.gmra.mxu0 %vm273_vm0, %v17601_v53  ;;  %v12011_v0 = vld [vmem:[%s14958_s20 + $0x369] sm:$0xff] }
 0x278   : >> { %v14026_v8 = vpop.f32.mrf.mxu1  ;;  %14325 = vmatmul.mubr.msk.f32.gmra.mxu1 %vm273_vm0, %v11910_v56  ;;  %14429 = vmatprep.mubr.msk.f32.mxu0 %vm273_vm0, %v12075_v50  ;;  %v12076_v9 = vld [vmem:[%s14958_s20 + $0x36a] sm:$0xff]  ;;  %v17632_v50 = vld [vmem:[%s19179_s1 + $0xb8] sm:$0xff] }
 0x279   : >> { %v17611_v35 = vadd.f32 %v5131_v18, %v4789_v21  ;;  %v4792_v4 = vadd.f32 %v14026_v8, %v17290_v27  ;;  %14379 = vmatprep.mubr.msk.f32.mxu1 %vm273_vm0, %v12010_v46  ;;  %v5141_v52 = vpop.f32.mrf.mxu0  ;;  %v17625_v18 = vld [vmem:[%s14958_s20 + $0x37a] sm:$0xff]  ;;  %v17683_v53 = vld [vmem:[%s14958_s20 + $0x3a9] sm:$0xff] }
 0x27a   : >> { %v4752_v24 = vpop.f32.mrf.mxu1  ;;  %19540 = vst [vmem:[#allocation31_spill] sm:$0xff] %v17625_v18  ;;  %v17645_v8 = vld [vmem:[%s14958_s20 + $0x381] sm:$0xff] }
 0x27b   : >> { %v17618_v39 = vadd.f32 %v14076_v42, %v4792_v4  ;;  %v4791_v56 = vadd.f32 %v4752_v24, %v17309_v40  ;;  %v14131_v27 = vpop.f32.mrf.mxu0  ;;  %14430 = vmatmul.mubr.msk.f32.vlgmr.msra.gmra.mxu0 %vm273_vm0, %v12076_v9  ;;  %v17637_v40 = vld [vmem:[%s19179_s1 + $0xc0] sm:$0xff]  ;;  %v17655_v9 = vld [vmem:[%s14958_s20 + $0x391] sm:$0xff] }
 0x27c   : >> { %v14081_v21 = vpop.f32.mrf.mxu1  ;;  %14380 = vmatmul.mubr.msk.f32.vlgmr.msra.gmra.mxu1 %vm273_vm0, %v12011_v0  ;;  %14528 = vmatpush3.msra.mxu0 %v17307_v38  ;;  %v17648_v42 = vld [vmem:[%s14958_s20 + $0x382] sm:$0xff] }
 0x27d   : >> { %v17639_v24 = vadd.f32 %v5141_v52, %v4791_v56  ;;  %v5538_v46 = vadd.f32 %v14081_v21, %v17325_v58  ;;  %14478 = vmatpush3.msra.mxu1 %v17302_v22  ;;  %19541 = vst [vmem:[#allocation4_spill] sm:$0xff] %v17648_v42  ;;  %v5765_v0 = vpop.f32.mrf.mxu0  ;;  %14382 = vmatprep.mubr.msk.f32.mxu1 %vm273_vm0, %v17622_v14  ;;  %v17658_v58 = vld [vmem:[%s14958_s20 + $0x392] sm:$0xff] }
 0x27e   : >> { %v5378_v4 = vpop.f32.mrf.mxu1  ;;  %14432 = vmatprep.mubr.msk.f32.mxu0 %vm273_vm0, %v17625_v18  ;;  %19542 = vst [vmem:[#allocation5_spill] sm:$0xff] %v17658_v58  ;;  %14577 = vmatprep.subr.mxu1 %v17632_v50 }
 0x27f   : >> { %v17660_v22 = vadd.f32 %v14131_v27, %v5538_v46  ;;  %v5537_v38 = vadd.f32 %v5378_v4, %v17333_v17  ;;  %14627 = vmatprep.subr.mxu0 %v17637_v40  ;;  %v14134_v56 = vpop.f32.mrf.mxu0  ;;  %14433 = vmatmul.mubr.msk.f32.gmra.mxu0 %vm273_vm0, %v17648_v42  ;;  %v17677_v17 = vld [vmem:[%s14958_s20 + $0x399] sm:$0xff] }
 0x280   : >> { %v14084_v52 = vpop.f32.mrf.mxu1  ;;  %14383 = vmatmul.mubr.msk.f32.gmra.mxu1 %vm273_vm0, %v17645_v8  ;;  %14435 = vmatprep.mubr.msk.f32.mxu0 %vm273_vm0, %v17658_v58  ;;  %v17680_v46 = vld [vmem:[%s14958_s20 + $0x39a] sm:$0xff] }
 0x281   : >> { %v17669_v21 = vadd.f32 %v5765_v0, %v5537_v38  ;;  %v5540_v27 = vadd.f32 %v14084_v52, %v17347_v33  ;;  %14385 = vmatprep.mubr.msk.f32.mxu1 %vm273_vm0, %v17655_v9  ;;  %19543 = vst [vmem:[#allocation6_spill] sm:$0xff] %v17680_v46  ;;  %v5775_v18 = vpop.f32.mrf.mxu0  ;;  %v17686_v0 = vld [vmem:[%s14958_s20 + $0x3aa] sm:$0xff] }
 0x282   : >> { %v5388_v4 = vpop.f32.mrf.mxu1  ;;  %19544 = vst [vmem:[#allocation32_spill] sm:$0xff] %v17686_v0 }
 0x283   : >> { %v17688_v33 = vadd.f32 %v14134_v56, %v5540_v27  ;;  %v5539_v38 = vadd.f32 %v5388_v4, %v17353_v63  ;;  %v14137_v58 = vpop.f32.mrf.mxu0  ;;  %14436 = vmatmul.mubr.msk.f32.gmra.mxu0 %vm273_vm0, %v17680_v46  ;;  %v17703_v56 = vld [vmem:[%s14958_s20 + $0x3b1] sm:$0xff] }
 0x284   : >> { %v14087_v52 = vpop.f32.mrf.mxu1  ;;  %14386 = vmatmul.mubr.msk.f32.gmra.mxu1 %vm273_vm0, %v17677_v17  ;;  %14438 = vmatprep.mubr.msk.f32.mxu0 %vm273_vm0, %v17686_v0  ;;  %v17706_v63 = vld [vmem:[%s14958_s20 + $0x3b2] sm:$0xff] }
 0x285   : >> { %v17695_v42 = vadd.f32 %v5775_v18, %v5539_v38  ;;  %v5542_v62 = vadd.f32 %v14087_v52, %v17367_v30  ;;  %14388 = vmatprep.mubr.msk.f32.mxu1 %vm273_vm0, %v17683_v53  ;;  %19545 = vst [vmem:[#allocation2_spill] sm:$0xff] %v17706_v63  ;;  %v5785_v4 = vpop.f32.mrf.mxu0  ;;  %v17712_v18 = vld [vmem:[%s14958_s20 + $0x3c2] sm:$0xff] }
 0x286   : >> { %v5398_v27 = vpop.f32.mrf.mxu1  ;;  %19546 = vst [vmem:[#allocation7_spill] sm:$0xff] %v17712_v18 }
 0x287   : >> { %v17714_v30 = vadd.f32 %v14137_v58, %v5542_v62  ;;  %v5541_v38 = vadd.f32 %v5398_v27, %v17373_v7  ;;  %v14140_v0 = vpop.f32.mrf.mxu0  ;;  %14439 = vmatmul.mubr.msk.f32.gmra.mxu0 %vm273_vm0, %v17706_v63  ;;  %v17729_v62 = vld [vmem:[%s14958_s20 + $0x3c9] sm:$0xff] }
 0x288   : >> { %v14090_v52 = vpop.f32.mrf.mxu1  ;;  %14389 = vmatmul.mubr.msk.f32.gmra.mxu1 %vm273_vm0, %v17703_v56  ;;  %14441 = vmatprep.mubr.msk.f32.mxu0 %vm273_vm0, %v17712_v18  ;;  %v17732_v7 = vld [vmem:[%s14958_s20 + $0x3ca] sm:$0xff] }
 0x289   : >> { %v17721_v46 = vadd.f32 %v5785_v4, %v5541_v38  ;;  %v5544_v11 = vadd.f32 %v14090_v52, %v17387_v36  ;;  %14391 = vmatprep.mubr.msk.f32.mxu1 %vm273_vm0, %v17709_v6  ;;  %19547 = vst [vmem:[#allocation9_spill] sm:$0xff] %v17732_v7  ;;  %v5795_v27 = vpop.f32.mrf.mxu0  ;;  %v17738_v4 = vld [vmem:[%s14958_s20 + $0x3da] sm:$0xff] }
 0x28a   : >> { %v5408_v58 = vpop.f32.mrf.mxu1  ;;  %19548 = vst [vmem:[#allocation10_spill] sm:$0xff] %v17738_v4 }
 0x28b   : >> { %v17740_v36 = vadd.f32 %v14140_v0, %v5544_v11  ;;  %v5543_v38 = vadd.f32 %v5408_v58, %v17393_v49  ;;  %v14143_v18 = vpop.f32.mrf.mxu0  ;;  %14442 = vmatmul.mubr.msk.f32.gmra.mxu0 %vm273_vm0, %v17732_v7  ;;  %v17755_v11 = vld [vmem:[%s14958_s20 + $0x3e1] sm:$0xff] }
 0x28c   : >> { %v14093_v52 = vpop.f32.mrf.mxu1  ;;  %14392 = vmatmul.mubr.msk.f32.gmra.mxu1 %vm273_vm0, %v17729_v62  ;;  %14444 = vmatprep.mubr.msk.f32.mxu0 %vm273_vm0, %v17738_v4  ;;  %v17758_v49 = vld [vmem:[%s14958_s20 + $0x3e2] sm:$0xff] }
 0x28d   : >> { %v17747_v63 = vadd.f32 %v5795_v27, %v5543_v38  ;;  %v5546_v51 = vadd.f32 %v14093_v52, %v17407_v55  ;;  %14394 = vmatprep.mubr.msk.f32.mxu1 %vm273_vm0, %v17735_v5  ;;  %19550 = vst [vmem:[#allocation33_spill] sm:$0xff] %v17758_v49  ;;  %v5805_v58 = vpop.f32.mrf.mxu0  ;;  %v17764_v27 = vld [vmem:[%s14958_s20 + $0x3f2] sm:$0xff] }
 0x28e   : >> { %v5418_v0 = vpop.f32.mrf.mxu1  ;;  %19551 = vst [vmem:[#allocation35_spill] sm:$0xff] %v17764_v27 }
 0x28f   : >> { %19549 = vst [vmem:[#allocation8_spill] sm:$0xff] %v17747_v63  ;;  %v17766_v55 = vadd.f32 %v14143_v18, %v5546_v51  ;;  %v5545_v38 = vadd.f32 %v5418_v0, %v17413_v54  ;;  %v14146_v4 = vpop.f32.mrf.mxu0  ;;  %14445 = vmatmul.mubr.msk.f32.gmra.mxu0 %vm273_vm0, %v17758_v49  ;;  %v17781_v51 = vld [vmem:[%s14958_s20 + $0x3f9] sm:$0xff] }
 0x290   : >> { %v14096_v52 = vpop.f32.mrf.mxu1  ;;  %14395 = vmatmul.mubr.msk.f32.gmra.mxu1 %vm273_vm0, %v17755_v11  ;;  %14447 = vmatprep.mubr.msk.f32.mxu0 %vm273_vm0, %v17764_v27  ;;  %v17784_v54 = vld [vmem:[%s14958_s20 + $0x3fa] sm:$0xff] }
 0x291   : >> { %19552 = vst [vmem:[#allocation37_spill] sm:$0xff] %v17766_v55  ;;  %v17773_v7 = vadd.f32 %v5805_v58, %v5545_v38  ;;  %v5548_v63 = vadd.f32 %v14096_v52, %v17427_v15  ;;  %14397 = vmatprep.mubr.msk.f32.mxu1 %vm273_vm0, %v17761_v12  ;;  %19554 = vst [vmem:[#allocation34_spill] sm:$0xff] %v17784_v54  ;;  %v5815_v0 = vpop.f32.mrf.mxu0  ;;  %v17787_v55 = vld [vmem:[%s14958_s20 + $0x409] sm:$0xff] }
 0x292   : >> { %v5428_v18 = vpop.f32.mrf.mxu1  ;;  %v17790_v58 = vld [vmem:[%s14958_s20 + $0x40a] sm:$0xff] }
 0x293   : >> { %19553 = vst [vmem:[#allocation36_spill] sm:$0xff] %v17773_v7  ;;  %19555 = vst [vmem:[#allocation38_spill] sm:$0xff] %v17790_v58  ;;  %v17792_v15 = vadd.f32 %v14146_v4, %v5548_v63  ;;  %v5547_v38 = vadd.f32 %v5428_v18, %v17433_v25  ;;  %v14149_v27 = vpop.f32.mrf.mxu0  ;;  %14448 = vmatmul.mubr.msk.f32.gmra.mxu0 %vm273_vm0, %v17784_v54  ;;  %v17807_v63 = vld [vmem:[%s14958_s20 + $0x411] sm:$0xff] }
 0x294   : >> { %v14099_v52 = vpop.f32.mrf.mxu1  ;;  %14398 = vmatmul.mubr.msk.f32.gmra.mxu1 %vm273_vm0, %v17781_v51  ;;  %14450 = vmatprep.mubr.msk.f32.mxu0 %vm273_vm0, %v17790_v58  ;;  %v17810_v25 = vld [vmem:[%s14958_s20 + $0x412] sm:$0xff] }
 0x295   : >> { %19556 = vst [vmem:[#allocation39_spill] sm:$0xff] %v17792_v15  ;;  %v17799_v49 = vadd.f32 %v5815_v0, %v5547_v38  ;;  %v5550_v7 = vadd.f32 %v14099_v52, %v17447_v43  ;;  %14400 = vmatprep.mubr.msk.f32.mxu1 %vm273_vm0, %v17787_v55  ;;  %19558 = vst [vmem:[#allocation40_spill] sm:$0xff] %v17810_v25  ;;  %v5825_v18 = vpop.f32.mrf.mxu0  ;;  %v17813_v15 = vld [vmem:[%s14958_s20 + $0x421] sm:$0xff] }
 0x296   : >> { %v5438_v4 = vpop.f32.mrf.mxu1  ;;  %v17816_v0 = vld [vmem:[%s14958_s20 + $0x422] sm:$0xff] }
 0x297   : >> { %19557 = vst [vmem:[#allocation45_spill] sm:$0xff] %v17799_v49  ;;  %19559 = vst [vmem:[#allocation42_spill] sm:$0xff] %v17816_v0  ;;  %v17818_v43 = vadd.f32 %v14149_v27, %v5550_v7  ;;  %v5549_v38 = vadd.f32 %v5438_v4, %v17453_v2  ;;  %v14152_v58 = vpop.f32.mrf.mxu0  ;;  %14451 = vmatmul.mubr.msk.f32.gmra.mxu0 %vm273_vm0, %v17810_v25  ;;  %v17833_v7 = vld [vmem:[%s14958_s20 + $0x429] sm:$0xff] }
 0x298   : >> { %v14102_v52 = vpop.f32.mrf.mxu1  ;;  %14401 = vmatmul.mubr.msk.f32.gmra.mxu1 %vm273_vm0, %v17807_v63  ;;  %14453 = vmatprep.mubr.msk.f32.mxu0 %vm273_vm0, %v17816_v0  ;;  %v17836_v2 = vld [vmem:[%s14958_s20 + $0x42a] sm:$0xff] }
 0x299   : >> { %19560 = vst [vmem:[#allocation43_spill] sm:$0xff] %v17818_v43  ;;  %v17825_v54 = vadd.f32 %v5825_v18, %v5549_v38  ;;  %v5552_v49 = vadd.f32 %v14102_v52, %v17467_v16  ;;  %14403 = vmatprep.mubr.msk.f32.mxu1 %vm273_vm0, %v17813_v15  ;;  %19562 = vst [vmem:[#allocation46_spill] sm:$0xff] %v17836_v2  ;;  %v5835_v4 = vpop.f32.mrf.mxu0  ;;  %v17839_v43 = vld [vmem:[%s14958_s20 + $0x439] sm:$0xff] }
 0x29a   : >> { %v5448_v27 = vpop.f32.mrf.mxu1  ;;  %v17842_v18 = vld [vmem:[%s14958_s20 + $0x43a] sm:$0xff] }
 0x29b   : >> { %19561 = vst [vmem:[#allocation44_spill] sm:$0xff] %v17825_v54  ;;  %19563 = vst [vmem:[#allocation41_spill] sm:$0xff] %v17842_v18  ;;  %v17844_v16 = vadd.f32 %v14152_v58, %v5552_v49  ;;  %v5551_v38 = vadd.f32 %v5448_v27, %v17473_v26  ;;  %v14155_v0 = vpop.f32.mrf.mxu0  ;;  %14454 = vmatmul.mubr.msk.f32.gmra.mxu0 %vm273_vm0, %v17836_v2  ;;  %v17859_v49 = vld [vmem:[%s14958_s20 + $0x441] sm:$0xff] }
 0x29c   : >> { %v14105_v52 = vpop.f32.mrf.mxu1  ;;  %14404 = vmatmul.mubr.msk.f32.gmra.mxu1 %vm273_vm0, %v17833_v7  ;;  %14456 = vmatprep.mubr.msk.f32.mxu0 %vm273_vm0, %v17842_v18  ;;  %v17862_v26 = vld [vmem:[%s14958_s20 + $0x442] sm:$0xff] }
 0x29d   : >> { %19564 = vst [vmem:[#allocation47_spill] sm:$0xff] %v17844_v16  ;;  %v17851_v25 = vadd.f32 %v5835_v4, %v5551_v38  ;;  %v5554_v54 = vadd.f32 %v14105_v52, %v17487_v29  ;;  %14406 = vmatprep.mubr.msk.f32.mxu1 %vm273_vm0, %v17839_v43  ;;  %19566 = vst [vmem:[#allocation49_spill] sm:$0xff] %v17862_v26  ;;  %v5845_v27 = vpop.f32.mrf.mxu0  ;;  %v17865_v16 = vld [vmem:[%s14958_s20 + $0x451] sm:$0xff] }
 0x29e   : >> { %v5458_v58 = vpop.f32.mrf.mxu1  ;;  %v17868_v4 = vld [vmem:[%s14958_s20 + $0x452] sm:$0xff] }
 0x29f   : >> { %19565 = vst [vmem:[#allocation48_spill] sm:$0xff] %v17851_v25  ;;  %19567 = vst [vmem:[#allocation50_spill] sm:$0xff] %v17868_v4  ;;  %v17870_v29 = vadd.f32 %v14155_v0, %v5554_v54  ;;  %v5553_v38 = vadd.f32 %v5458_v58, %v17493_v60  ;;  %v14158_v18 = vpop.f32.mrf.mxu0  ;;  %14457 = vmatmul.mubr.msk.f32.gmra.mxu0 %vm273_vm0, %v17862_v26  ;;  %v17885_v54 = vld [vmem:[%s14958_s20 + $0x459] sm:$0xff] }
 0x2a0   : >> { %v14108_v52 = vpop.f32.mrf.mxu1  ;;  %14407 = vmatmul.mubr.msk.f32.gmra.mxu1 %vm273_vm0, %v17859_v49  ;;  %14459 = vmatprep.mubr.msk.f32.mxu0 %vm273_vm0, %v17868_v4  ;;  %v17888_v60 = vld [vmem:[%s14958_s20 + $0x45a] sm:$0xff] }
 0x2a1   : >> { %19568 = vst [vmem:[#allocation51_spill] sm:$0xff] %v17870_v29  ;;  %v17877_v2 = vadd.f32 %v5845_v27, %v5553_v38  ;;  %v5556_v25 = vadd.f32 %v14108_v52, %v17507_v13  ;;  %14409 = vmatprep.mubr.msk.f32.mxu1 %vm273_vm0, %v17865_v16  ;;  %19570 = vst [vmem:[#allocation53_spill] sm:$0xff] %v17888_v60  ;;  %v5855_v58 = vpop.f32.mrf.mxu0  ;;  %v17891_v29 = vld [vmem:[%s14958_s20 + $0x469] sm:$0xff] }
 0x2a2   : >> { %v5468_v0 = vpop.f32.mrf.mxu1  ;;  %v17894_v27 = vld [vmem:[%s14958_s20 + $0x46a] sm:$0xff] }
 0x2a3   : >> { %19569 = vst [vmem:[#allocation52_spill] sm:$0xff] %v17877_v2  ;;  %19571 = vst [vmem:[#allocation54_spill] sm:$0xff] %v17894_v27  ;;  %v17896_v13 = vadd.f32 %v14158_v18, %v5556_v25  ;;  %v5555_v38 = vadd.f32 %v5468_v0, %v17513_v45  ;;  %v14161_v4 = vpop.f32.mrf.mxu0  ;;  %14460 = vmatmul.mubr.msk.f32.gmra.mxu0 %vm273_vm0, %v17888_v60  ;;  %v17911_v25 = vld [vmem:[%s14958_s20 + $0x471] sm:$0xff] }
 0x2a4   : >> { %v14111_v52 = vpop.f32.mrf.mxu1  ;;  %14410 = vmatmul.mubr.msk.f32.gmra.mxu1 %vm273_vm0, %v17885_v54  ;;  %14462 = vmatprep.mubr.msk.f32.mxu0 %vm273_vm0, %v17894_v27  ;;  %v17914_v45 = vld [vmem:[%s14958_s20 + $0x472] sm:$0xff] }
 0x2a5   : >> { %19572 = vst [vmem:[#allocation55_spill] sm:$0xff] %v17896_v13  ;;  %v17903_v26 = vadd.f32 %v5855_v58, %v5555_v38  ;;  %v5558_v2 = vadd.f32 %v14111_v52, %v17527_v10  ;;  %14412 = vmatprep.mubr.msk.f32.mxu1 %vm273_vm0, %v17891_v29  ;;  %19574 = vst [vmem:[#allocation57_spill] sm:$0xff] %v17914_v45  ;;  %v5865_v0 = vpop.f32.mrf.mxu0  ;;  %v17917_v13 = vld [vmem:[%s14958_s20 + $0x481] sm:$0xff] }
 0x2a6   : >> { %v5478_v18 = vpop.f32.mrf.mxu1  ;;  %v17920_v58 = vld [vmem:[%s14958_s20 + $0x482] sm:$0xff] }
 0x2a7   : >> { %19573 = vst [vmem:[#allocation56_spill] sm:$0xff] %v17903_v26  ;;  %19575 = vst [vmem:[#allocation58_spill] sm:$0xff] %v17920_v58  ;;  %v17922_v10 = vadd.f32 %v14161_v4, %v5558_v2  ;;  %v5557_v38 = vadd.f32 %v5478_v18, %v17533_v47  ;;  %v14164_v27 = vpop.f32.mrf.mxu0  ;;  %14463 = vmatmul.mubr.msk.f32.gmra.mxu0 %vm273_vm0, %v17914_v45  ;;  %v17937_v2 = vld [vmem:[%s14958_s20 + $0x489] sm:$0xff] }
 0x2a8   : >> { %v14114_v52 = vpop.f32.mrf.mxu1  ;;  %14413 = vmatmul.mubr.msk.f32.gmra.mxu1 %vm273_vm0, %v17911_v25  ;;  %14465 = vmatprep.mubr.msk.f32.mxu0 %vm273_vm0, %v17920_v58  ;;  %v17940_v47 = vld [vmem:[%s14958_s20 + $0x48a] sm:$0xff] }
 0x2a9   : >> { %19576 = vst [vmem:[#allocation59_spill] sm:$0xff] %v17922_v10  ;;  %v17929_v60 = vadd.f32 %v5865_v0, %v5557_v38  ;;  %v5560_v26 = vadd.f32 %v14114_v52, %v17547_v32  ;;  %14415 = vmatprep.mubr.msk.f32.mxu1 %vm273_vm0, %v17917_v13  ;;  %19578 = vst [vmem:[#allocation61_spill] sm:$0xff] %v17940_v47  ;;  %v5875_v18 = vpop.f32.mrf.mxu0  ;;  %v17943_v10 = vld [vmem:[%s14958_s20 + $0x499] sm:$0xff] }
 0x2aa   : >> { %v5488_v4 = vpop.f32.mrf.mxu1  ;;  %v17946_v0 = vld [vmem:[%s14958_s20 + $0x49a] sm:$0xff] }
 0x2ab   : >> { %19577 = vst [vmem:[#allocation60_spill] sm:$0xff] %v17929_v60  ;;  %19579 = vst [vmem:[#allocation62_spill] sm:$0xff] %v17946_v0  ;;  %v17948_v32 = vadd.f32 %v14164_v27, %v5560_v26  ;;  %v5559_v38 = vadd.f32 %v5488_v4, %v17553_v1  ;;  %v14167_v58 = vpop.f32.mrf.mxu0  ;;  %14466 = vmatmul.mubr.msk.f32.gmra.mxu0 %vm273_vm0, %v17940_v47  ;;  %v17963_v26 = vld [vmem:[%s14958_s20 + $0x4a1] sm:$0xff] }
 0x2ac   : >> { %v14117_v52 = vpop.f32.mrf.mxu1  ;;  %14416 = vmatmul.mubr.msk.f32.gmra.mxu1 %vm273_vm0, %v17937_v2  ;;  %14468 = vmatprep.mubr.msk.f32.mxu0 %vm273_vm0, %v17946_v0  ;;  %v17966_v1 = vld [vmem:[%s14958_s20 + $0x4a2] sm:$0xff] }
 0x2ad   : >> { %19580 = vst [vmem:[#allocation63_spill] sm:$0xff] %v17948_v32  ;;  %v17955_v45 = vadd.f32 %v5875_v18, %v5559_v38  ;;  %v5562_v60 = vadd.f32 %v14117_v52, %v17566_v3  ;;  %14418 = vmatprep.mubr.msk.f32.mxu1 %vm273_vm0, %v17943_v10  ;;  %19582 = vst [vmem:[#allocation65_spill] sm:$0xff] %v17966_v1  ;;  %v5885_v4 = vpop.f32.mrf.mxu0  ;;  %v17969_v32 = vld [vmem:[%s14958_s20 + $0x4b1] sm:$0xff] }
 0x2ae   : >> { %v5498_v27 = vpop.f32.mrf.mxu1  ;;  %v17972_v18 = vld [vmem:[%s14958_s20 + $0x4b2] sm:$0xff] }
 0x2af   : >> { %19581 = vst [vmem:[#allocation64_spill] sm:$0xff] %v17955_v45  ;;  %19583 = vst [vmem:[#allocation66_spill] sm:$0xff] %v17972_v18  ;;  %v17974_v3 = vadd.f32 %v14167_v58, %v5562_v60  ;;  %v5561_v38 = vadd.f32 %v5498_v27, %v17572_v41  ;;  %v14170_v0 = vpop.f32.mrf.mxu0  ;;  %14469 = vmatmul.mubr.msk.f32.gmra.mxu0 %vm273_vm0, %v17966_v1  ;;  %v17989_v60 = vld [vmem:[%s14958_s20 + $0x4b9] sm:$0xff] }
 0x2b0   : >> { %v14120_v52 = vpop.f32.mrf.mxu1  ;;  %14419 = vmatmul.mubr.msk.f32.gmra.mxu1 %vm273_vm0, %v17963_v26  ;;  %14471 = vmatprep.mubr.msk.f32.mxu0 %vm273_vm0, %v17972_v18  ;;  %v17992_v41 = vld [vmem:[%s14958_s20 + $0x4ba] sm:$0xff] }
 0x2b1   : >> { %19584 = vst [vmem:[#allocation67_spill] sm:$0xff] %v17974_v3  ;;  %v17981_v47 = vadd.f32 %v5885_v4, %v5561_v38  ;;  %v5564_v45 = vadd.f32 %v14120_v52, %v17586_v37  ;;  %14421 = vmatprep.mubr.msk.f32.mxu1 %vm273_vm0, %v17969_v32  ;;  %19586 = vst [vmem:[#allocation69_spill] sm:$0xff] %v17992_v41  ;;  %v5895_v27 = vpop.f32.mrf.mxu0  ;;  %v17995_v3 = vld [vmem:[%s14958_s20 + $0x4c9] sm:$0xff] }
 0x2b2   : >> { %v5508_v58 = vpop.f32.mrf.mxu1  ;;  %v17998_v4 = vld [vmem:[%s14958_s20 + $0x4ca] sm:$0xff] }
 0x2b3   : >> { %19585 = vst [vmem:[#allocation68_spill] sm:$0xff] %v17981_v47  ;;  %19587 = vst [vmem:[#allocation70_spill] sm:$0xff] %v17998_v4  ;;  %v18000_v38 = vadd.f32 %v14170_v0, %v5564_v45  ;;  %v5563_v37 = vadd.f32 %v5508_v58, %v17593_v59  ;;  %v14173_v1 = vpop.f32.mrf.mxu0  ;;  %14472 = vmatmul.mubr.msk.f32.gmra.mxu0 %vm273_vm0, %v17992_v41  ;;  %v18015_v45 = vld [vmem:[%s14958_s20 + $0x4d1] sm:$0xff] }
 0x2b4   : >> { %v14123_v52 = vpop.f32.mrf.mxu1  ;;  %14422 = vmatmul.mubr.msk.f32.gmra.mxu1 %vm273_vm0, %v17989_v60  ;;  %14474 = vmatprep.mubr.msk.f32.mxu0 %vm273_vm0, %v17998_v4  ;;  %v18018_v59 = vld [vmem:[%s14958_s20 + $0x4d2] sm:$0xff] }
 0x2b5   : >> { %19588 = vst [vmem:[#allocation71_spill] sm:$0xff] %v18000_v38  ;;  %v18007_v18 = vadd.f32 %v5895_v27, %v5563_v37  ;;  %v5566_v47 = vadd.f32 %v14123_v52, %v17605_v19  ;;  %14424 = vmatprep.mubr.msk.f32.mxu1 %vm273_vm0, %v17995_v3  ;;  %v5905_v58 = vpop.f32.mrf.mxu0 }
 0x2b6   : >> { %v5518_v0 = vpop.f32.mrf.mxu1 }
 0x2b7   : >> { %v18020_v38 = vadd.f32 %v14173_v1, %v5566_v47  ;;  %v5565_v41 = vadd.f32 %v5518_v0, %v17611_v35  ;;  %v14176_v37 = vpop.f32.mrf.mxu0  ;;  %14475 = vmatmul.mubr.msk.f32.gmra.mxu0 %vm273_vm0, %v18018_v59 }
 0x2b8   : >> { %v14126_v27 = vpop.f32.mrf.mxu1  ;;  %14425 = vmatmul.mubr.msk.f32.gmra.mxu1 %vm273_vm0, %v18015_v45  ;;  %14529 = vmatprep.mubr.msk.f32.mxu0 %vm273_vm0, %v17622_v14  ;;  %v18049_v14 = vld [vmem:[%s19179_s1 + $0xd0] sm:$0xff] }
 0x2b9   : >> { %19589 = vst [vmem:[#allocation72_spill] sm:$0xff] %v18020_v38  ;;  %v18027_v19 = vadd.f32 %v5905_v58, %v5565_v41  ;;  %v5568_v52 = vadd.f32 %v14126_v27, %v17618_v39  ;;  %14479 = vmatprep.mubr.msk.f32.mxu1 %vm273_vm0, %v17295_v31  ;;  %v5915_v35 = vpop.f32.mrf.mxu0  ;;  %v18044_v31 = vld [vmem:[%s19179_s1 + $0xc8] sm:$0xff] }
 0x2ba   : >> { %v5528_v47 = vpop.f32.mrf.mxu1 }
 0x2bb   : >> { %v18034_v1 = vadd.f32 %v14176_v37, %v5568_v52  ;;  %v5567_v0 = vadd.f32 %v5528_v47, %v17639_v24  ;;  %v14231_v38 = vpop.f32.mrf.mxu0  ;;  %14530 = vmatmul.mubr.msk.f32.vlgmr.msra.gmra.mxu0 %vm273_vm0, %v17645_v8  ;;  %v19590_v47 = vld [vmem:[#allocation8_spill] sm:$0xff] }
 0x2bc   : >> { %v14181_v4 = vpop.f32.mrf.mxu1  ;;  %14480 = vmatmul.mubr.msk.f32.vlgmr.msra.gmra.mxu1 %vm273_vm0, %v17316_v61  ;;  %14628 = vmatpush3.msra.mxu0 %v17637_v40 }
 0x2bd   : >> { %v18051_v39 = vadd.f32 %v5915_v35, %v5567_v0  ;;  %v6314_v24 = vadd.f32 %v14181_v4, %v17660_v22  ;;  %14578 = vmatpush3.msra.mxu1 %v17632_v50  ;;  %v6541_v8 = vpop.f32.mrf.mxu0  ;;  %14482 = vmatprep.mubr.msk.f32.mxu1 %vm273_vm0, %v17323_v34 }
 0x2be   : >> { %v6154_v61 = vpop.f32.mrf.mxu1  ;;  %14532 = vmatprep.mubr.msk.f32.mxu0 %vm273_vm0, %v17655_v9  ;;  %14677 = vmatprep.subr.mxu1 %v18044_v31 }
 0x2bf   : >> { %v18060_v41 = vadd.f32 %v14231_v38, %v6314_v24  ;;  %v6313_v58 = vadd.f32 %v6154_v61, %v17669_v21  ;;  %14727 = vmatprep.subr.mxu0 %v18049_v14  ;;  %v14234_v50 = vpop.f32.mrf.mxu0  ;;  %14533 = vmatmul.mubr.msk.f32.gmra.mxu0 %vm273_vm0, %v17677_v17  ;;  %v19591_v24 = vld [vmem:[#allocation11_spill] sm:$0xff]  ;;  %v19593_v61 = vld [vmem:[#allocation12_spill] sm:$0xff] }
 0x2c0   : >> { %v14184_v22 = vpop.f32.mrf.mxu1  ;;  %14483 = vmatmul.mubr.msk.f32.gmra.mxu1 %vm273_vm0, %v17341_v57  ;;  %14535 = vmatprep.mubr.msk.f32.mxu0 %vm273_vm0, %v17683_v53 }
 0x2c1   : >> { %v18069_v34 = vadd.f32 %v6541_v8, %v6313_v58  ;;  %v6316_v40 = vadd.f32 %v14184_v22, %v17688_v33  ;;  %14485 = vmatprep.mubr.msk.f32.mxu1 %vm273_vm0, %v17345_v23  ;;  %v6551_v21 = vpop.f32.mrf.mxu0  ;;  %v19594_v22 = vld [vmem:[#allocation36_spill] sm:$0xff] }
 0x2c2   : >> { %v6164_v9 = vpop.f32.mrf.mxu1 }
 0x2c3   : >> { %v18076_v4 = vadd.f32 %v14234_v50, %v6316_v40  ;;  %v6315_v38 = vadd.f32 %v6164_v9, %v17695_v42  ;;  %v14237_v27 = vpop.f32.mrf.mxu0  ;;  %14536 = vmatmul.mubr.msk.f32.gmra.mxu0 %vm273_vm0, %v17703_v56 }
 0x2c4   : >> { %v14187_v57 = vpop.f32.mrf.mxu1  ;;  %14486 = vmatmul.mubr.msk.f32.gmra.mxu1 %vm273_vm0, %v17361_v44  ;;  %14538 = vmatprep.mubr.msk.f32.mxu0 %vm273_vm0, %v17709_v6 }
 0x2c5   : >> { %v18083_v17 = vadd.f32 %v6551_v21, %v6315_v38  ;;  %v6318_v23 = vadd.f32 %v14187_v57, %v17714_v30  ;;  %14488 = vmatprep.mubr.msk.f32.mxu1 %vm273_vm0, %v17365_v20  ;;  %v6561_v42 = vpop.f32.mrf.mxu0  ;;  %v19595_v21 = vld [vmem:[#allocation13_spill] sm:$0xff]  ;;  %v19596_v38 = vld [vmem:[#allocation39_spill] sm:$0xff] }
 0x2c6   : >> { %v6174_v53 = vpop.f32.mrf.mxu1 }
 0x2c7   : >> { %v18090_v33 = vadd.f32 %v14237_v27, %v6318_v23  ;;  %v6317_v37 = vadd.f32 %v6174_v53, %v17721_v46  ;;  %v14240_v52 = vpop.f32.mrf.mxu0  ;;  %14539 = vmatmul.mubr.msk.f32.gmra.mxu0 %vm273_vm0, %v17729_v62  ;;  %v19597_v27 = vld [vmem:[#allocation14_spill] sm:$0xff] }
 0x2c8   : >> { %v14190_v44 = vpop.f32.mrf.mxu1  ;;  %14489 = vmatmul.mubr.msk.f32.gmra.mxu1 %vm273_vm0, %v17381_v48  ;;  %14541 = vmatprep.mubr.msk.f32.mxu0 %vm273_vm0, %v17735_v5 }
 0x2c9   : >> { %v18097_v56 = vadd.f32 %v6561_v42, %v6317_v37  ;;  %v6320_v20 = vadd.f32 %v14190_v44, %v17740_v36  ;;  %14491 = vmatprep.mubr.msk.f32.mxu1 %vm273_vm0, %v17385_v28  ;;  %v6571_v46 = vpop.f32.mrf.mxu0  ;;  %v19592_v28 = vld [vmem:[#allocation37_spill] sm:$0xff] }
 0x2ca   : >> { %v6184_v6 = vpop.f32.mrf.mxu1  ;;  %v19598_v42 = vld [vmem:[#allocation45_spill] sm:$0xff] }
 0x2cb   : >> { %v18104_v30 = vadd.f32 %v14240_v52, %v6320_v20  ;;  %v6319_v35 = vadd.f32 %v6184_v6, %v19590_v47  ;;  %v14243_v0 = vpop.f32.mrf.mxu0  ;;  %14542 = vmatmul.mubr.msk.f32.gmra.mxu0 %vm273_vm0, %v17755_v11  ;;  %v19599_v20 = vld [vmem:[#allocation15_spill] sm:$0xff]  ;;  %v19601_v47 = vld [vmem:[#allocation16_spill] sm:$0xff] }
 0x2cc   : >> { %v14193_v48 = vpop.f32.mrf.mxu1  ;;  %14492 = vmatmul.mubr.msk.f32.gmra.mxu1 %vm273_vm0, %v19591_v24  ;;  %14544 = vmatprep.mubr.msk.f32.mxu0 %vm273_vm0, %v17761_v12  ;;  %v19600_v6 = vld [vmem:[#allocation43_spill] sm:$0xff] }
 0x2cd   : >> { %v18111_v62 = vadd.f32 %v6571_v46, %v6319_v35  ;;  %v6322_v36 = vadd.f32 %v14193_v48, %v19592_v28  ;;  %14494 = vmatprep.mubr.msk.f32.mxu1 %vm273_vm0, %v19593_v61  ;;  %v6581_v8 = vpop.f32.mrf.mxu0  ;;  %v19603_v61 = vld [vmem:[#allocation17_spill] sm:$0xff] }
 0x2ce   : >> { %v6194_v5 = vpop.f32.mrf.mxu1 }
 0x2cf   : >> { %v18118_v58 = vadd.f32 %v14243_v0, %v6322_v36  ;;  %v6321_v50 = vadd.f32 %v6194_v5, %v19594_v22  ;;  %v14246_v9 = vpop.f32.mrf.mxu0  ;;  %14545 = vmatmul.mubr.msk.f32.gmra.mxu0 %vm273_vm0, %v17781_v51  ;;  %v19602_v0 = vld [vmem:[#allocation44_spill] sm:$0xff]  ;;  %v19604_v5 = vld [vmem:[#allocation47_spill] sm:$0xff]  ;;  %v19605_v22 = vld [vmem:[#allocation18_spill] sm:$0xff] }
 0x2d0   : >> { %v14196_v40 = vpop.f32.mrf.mxu1  ;;  %14495 = vmatmul.mubr.msk.f32.gmra.mxu1 %vm273_vm0, %v19595_v21  ;;  %14547 = vmatprep.mubr.msk.f32.mxu0 %vm273_vm0, %v17787_v55 }
 0x2d1   : >> { %v18125_v11 = vadd.f32 %v6581_v8, %v6321_v50  ;;  %v6324_v57 = vadd.f32 %v14196_v40, %v19596_v38  ;;  %14497 = vmatprep.mubr.msk.f32.mxu1 %vm273_vm0, %v19597_v27  ;;  %v6591_v23 = vpop.f32.mrf.mxu0  ;;  %v19607_v27 = vld [vmem:[#allocation19_spill] sm:$0xff] }
 0x2d2   : >> { %v6204_v12 = vpop.f32.mrf.mxu1 }
 0x2d3   : >> { %v18132_v53 = vadd.f32 %v14246_v9, %v6324_v57  ;;  %v6323_v37 = vadd.f32 %v6204_v12, %v19598_v42  ;;  %v14249_v52 = vpop.f32.mrf.mxu0  ;;  %14548 = vmatmul.mubr.msk.f32.gmra.mxu0 %vm273_vm0, %v17807_v63  ;;  %v19606_v9 = vld [vmem:[#allocation48_spill] sm:$0xff]  ;;  %v19608_v12 = vld [vmem:[#allocation51_spill] sm:$0xff] }
 0x2d4   : >> { %v14199_v44 = vpop.f32.mrf.mxu1  ;;  %14498 = vmatmul.mubr.msk.f32.gmra.mxu1 %vm273_vm0, %v19599_v20  ;;  %14550 = vmatprep.mubr.msk.f32.mxu0 %vm273_vm0, %v17813_v15  ;;  %v19609_v42 = vld [vmem:[#allocation20_spill] sm:$0xff] }
 0x2d5   : >> { %v18139_v51 = vadd.f32 %v6591_v23, %v6323_v37  ;;  %v6326_v46 = vadd.f32 %v14199_v44, %v19600_v6  ;;  %14500 = vmatprep.mubr.msk.f32.mxu1 %vm273_vm0, %v19601_v47  ;;  %v6601_v35 = vpop.f32.mrf.mxu0  ;;  %v19611_v47 = vld [vmem:[#allocation21_spill] sm:$0xff] }
 0x2d6   : >> { %v6214_v55 = vpop.f32.mrf.mxu1 }
 0x2d7   : >> { %v18146_v48 = vadd.f32 %v14249_v52, %v6326_v46  ;;  %v6325_v24 = vadd.f32 %v6214_v55, %v19602_v0  ;;  %v14252_v36 = vpop.f32.mrf.mxu0  ;;  %14551 = vmatmul.mubr.msk.f32.gmra.mxu0 %vm273_vm0, %v17833_v7  ;;  %v19610_v52 = vld [vmem:[#allocation52_spill] sm:$0xff]  ;;  %v19612_v55 = vld [vmem:[#allocation55_spill] sm:$0xff]  ;;  %v19613_v0 = vld [vmem:[#allocation22_spill] sm:$0xff] }
 0x2d8   : >> { %v14202_v28 = vpop.f32.mrf.mxu1  ;;  %14501 = vmatmul.mubr.msk.f32.gmra.mxu1 %vm273_vm0, %v19603_v61  ;;  %14553 = vmatprep.mubr.msk.f32.mxu0 %vm273_vm0, %v17839_v43 }
 0x2d9   : >> { %v18153_v63 = vadd.f32 %v6601_v35, %v6325_v24  ;;  %v6328_v8 = vadd.f32 %v14202_v28, %v19604_v5  ;;  %14503 = vmatprep.mubr.msk.f32.mxu1 %vm273_vm0, %v19605_v22  ;;  %v6611_v50 = vpop.f32.mrf.mxu0  ;;  %v19615_v22 = vld [vmem:[#allocation23_spill] sm:$0xff] }
 0x2da   : >> { %v6224_v15 = vpop.f32.mrf.mxu1 }
 0x2db   : >> { %v18160_v40 = vadd.f32 %v14252_v36, %v6328_v8  ;;  %v6327_v21 = vadd.f32 %v6224_v15, %v19606_v9  ;;  %v14255_v57 = vpop.f32.mrf.mxu0  ;;  %14554 = vmatmul.mubr.msk.f32.gmra.mxu0 %vm273_vm0, %v17859_v49  ;;  %v19614_v36 = vld [vmem:[#allocation56_spill] sm:$0xff]  ;;  %v19616_v15 = vld [vmem:[#allocation59_spill] sm:$0xff] }
 0x2dc   : >> { %v14205_v38 = vpop.f32.mrf.mxu1  ;;  %14504 = vmatmul.mubr.msk.f32.gmra.mxu1 %vm273_vm0, %v19607_v27  ;;  %14556 = vmatprep.mubr.msk.f32.mxu0 %vm273_vm0, %v17865_v16  ;;  %v19617_v9 = vld [vmem:[#allocation24_spill] sm:$0xff] }
 0x2dd   : >> { %v18167_v7 = vadd.f32 %v6611_v50, %v6327_v21  ;;  %v6330_v23 = vadd.f32 %v14205_v38, %v19608_v12  ;;  %14506 = vmatprep.mubr.msk.f32.mxu1 %vm273_vm0, %v19609_v42  ;;  %v6621_v37 = vpop.f32.mrf.mxu0  ;;  %v19619_v42 = vld [vmem:[#allocation25_spill] sm:$0xff] }
 0x2de   : >> { %v6234_v43 = vpop.f32.mrf.mxu1 }
 0x2df   : >> { %v18174_v44 = vadd.f32 %v14255_v57, %v6330_v23  ;;  %v6329_v20 = vadd.f32 %v6234_v43, %v19610_v52  ;;  %v14258_v46 = vpop.f32.mrf.mxu0  ;;  %14557 = vmatmul.mubr.msk.f32.gmra.mxu0 %vm273_vm0, %v17885_v54  ;;  %v19618_v57 = vld [vmem:[#allocation60_spill] sm:$0xff]  ;;  %v19620_v43 = vld [vmem:[#allocation63_spill] sm:$0xff]  ;;  %v19621_v52 = vld [vmem:[#allocation26_spill] sm:$0xff] }
 0x2e0   : >> { %v14208_v6 = vpop.f32.mrf.mxu1  ;;  %14507 = vmatmul.mubr.msk.f32.gmra.mxu1 %vm273_vm0, %v19611_v47  ;;  %14559 = vmatprep.mubr.msk.f32.mxu0 %vm273_vm0, %v17891_v29 }
 0x2e1   : >> { %v18181_v49 = vadd.f32 %v6621_v37, %v6329_v20  ;;  %v6332_v35 = vadd.f32 %v14208_v6, %v19612_v55  ;;  %14509 = vmatprep.mubr.msk.f32.mxu1 %vm273_vm0, %v19613_v0  ;;  %v6631_v24 = vpop.f32.mrf.mxu0  ;;  %v19623_v0 = vld [vmem:[#allocation27_spill] sm:$0xff] }
 0x2e2   : >> { %v6244_v16 = vpop.f32.mrf.mxu1 }
 0x2e3   : >> { %v18188_v28 = vadd.f32 %v14258_v46, %v6332_v35  ;;  %v6331_v61 = vadd.f32 %v6244_v16, %v19614_v36  ;;  %v14261_v8 = vpop.f32.mrf.mxu0  ;;  %14560 = vmatmul.mubr.msk.f32.gmra.mxu0 %vm273_vm0, %v17911_v25  ;;  %v19622_v46 = vld [vmem:[#allocation64_spill] sm:$0xff]  ;;  %v19624_v16 = vld [vmem:[#allocation67_spill] sm:$0xff] }
 0x2e4   : >> { %v14211_v5 = vpop.f32.mrf.mxu1  ;;  %14510 = vmatmul.mubr.msk.f32.gmra.mxu1 %vm273_vm0, %v19615_v22  ;;  %14562 = vmatprep.mubr.msk.f32.mxu0 %vm273_vm0, %v17917_v13  ;;  %v19625_v36 = vld [vmem:[#allocation28_spill] sm:$0xff] }
 0x2e5   : >> { %v18195_v54 = vadd.f32 %v6631_v24, %v6331_v61  ;;  %v6334_v50 = vadd.f32 %v14211_v5, %v19616_v15  ;;  %14512 = vmatprep.mubr.msk.f32.mxu1 %vm273_vm0, %v19617_v9  ;;  %v6641_v21 = vpop.f32.mrf.mxu0 }
 0x2e6   : >> { %v6254_v29 = vpop.f32.mrf.mxu1 }
 0x2e7   : >> { %v18202_v38 = vadd.f32 %v14261_v8, %v6334_v50  ;;  %v6333_v27 = vadd.f32 %v6254_v29, %v19618_v57  ;;  %v14264_v23 = vpop.f32.mrf.mxu0  ;;  %14563 = vmatmul.mubr.msk.f32.gmra.mxu0 %vm273_vm0, %v17937_v2  ;;  %v19626_v8 = vld [vmem:[#allocation68_spill] sm:$0xff]  ;;  %v19627_v50 = vld [vmem:[#allocation29_spill] sm:$0xff]  ;;  %v19628_v29 = vld [vmem:[#allocation71_spill] sm:$0xff] }
 0x2e8   : >> { %v14214_v12 = vpop.f32.mrf.mxu1  ;;  %14513 = vmatmul.mubr.msk.f32.gmra.mxu1 %vm273_vm0, %v19619_v42  ;;  %14565 = vmatprep.mubr.msk.f32.mxu0 %vm273_vm0, %v17943_v10 }
 0x2e9   : >> { %v18209_v25 = vadd.f32 %v6641_v21, %v6333_v27  ;;  %v6336_v37 = vadd.f32 %v14214_v12, %v19620_v43  ;;  %14515 = vmatprep.mubr.msk.f32.mxu1 %vm273_vm0, %v19621_v52  ;;  %v6651_v20 = vpop.f32.mrf.mxu0  ;;  %v18245_v12 = vld [vmem:[%s14958_s20 + $0x4e0] sm:$0xff]  ;;  %v19630_v52 = vld [vmem:[#allocation3_spill] sm:$0xff] }
 0x2ea   : >> { %v6264_v13 = vpop.f32.mrf.mxu1 }
 0x2eb   : >> { %v18216_v6 = vadd.f32 %v14264_v23, %v6336_v37  ;;  %v6335_v47 = vadd.f32 %v6264_v13, %v19622_v46  ;;  %v14267_v35 = vpop.f32.mrf.mxu0  ;;  %14566 = vmatmul.mubr.msk.f32.gmra.mxu0 %vm273_vm0, %v17963_v26  ;;  %v18248_v23 = vld [vmem:[%s14958_s20 + $0x4e1] sm:$0xff]  ;;  %v19631_v13 = vld [vmem:[#allocation72_spill] sm:$0xff] }
 0x2ec   : >> { %v14217_v55 = vpop.f32.mrf.mxu1  ;;  %14516 = vmatmul.mubr.msk.f32.gmra.mxu1 %vm273_vm0, %v19623_v0  ;;  %14568 = vmatprep.mubr.msk.f32.mxu0 %vm273_vm0, %v17969_v32  ;;  %v19629_v32 = vld [vmem:[#allocation30_spill] sm:$0xff]  ;;  %v18268_v46 = vld [vmem:[%s14958_s20 + $0x4e9] sm:$0xff] }
 0x2ed   : >> { %v18223_v2 = vadd.f32 %v6651_v20, %v6335_v47  ;;  %v6338_v24 = vadd.f32 %v14217_v55, %v19624_v16  ;;  %14518 = vmatprep.mubr.msk.f32.mxu1 %vm273_vm0, %v19625_v36  ;;  %v6661_v61 = vpop.f32.mrf.mxu0 }
 0x2ee   : >> { %v6274_v10 = vpop.f32.mrf.mxu1 }
 0x2ef   : >> { %v18230_v5 = vadd.f32 %v14267_v35, %v6338_v24  ;;  %v6337_v22 = vadd.f32 %v6274_v10, %v19626_v8  ;;  %v14270_v26 = vpop.f32.mrf.mxu0  ;;  %14569 = vmatmul.mubr.msk.f32.gmra.mxu0 %vm273_vm0, %v17989_v60  ;;  %v12337_v35 = vld [vmem:[%s14958_s20 + $0x390] sm:$0xff]  ;;  %v12338_v8 = vld [vmem:[%s14958_s20 + $0x398] sm:$0xff] }
 0x2f0   : >> { %v14220_v15 = vpop.f32.mrf.mxu1  ;;  %14519 = vmatmul.mubr.msk.f32.gmra.mxu1 %vm273_vm0, %v19627_v50  ;;  %14571 = vmatprep.mubr.msk.f32.mxu0 %vm273_vm0, %v17995_v3  ;;  %v12339_v50 = vld [vmem:[%s14958_s20 + $0x3a8] sm:$0xff] }
 0x2f1   : >> { %v18237_v9 = vadd.f32 %v6661_v61, %v6337_v22  ;;  %v6340_v21 = vadd.f32 %v14220_v15, %v19628_v29  ;;  %14521 = vmatprep.mubr.msk.f32.mxu1 %vm273_vm0, %v19629_v32  ;;  %v6671_v27 = vpop.f32.mrf.mxu0  ;;  %v19632_v61 = vld [vmem:[#allocation31_spill] sm:$0xff]  ;;  %v19633_v32 = vld [vmem:[#allocation4_spill] sm:$0xff] }
 0x2f2   : >> { %v6284_v57 = vpop.f32.mrf.mxu1 }
 0x2f3   : >> { %v18250_v60 = vadd.f32 %v14270_v26, %v6340_v21  ;;  %v6339_v42 = vadd.f32 %v6284_v57, %v18007_v18  ;;  %v14273_v37 = vpop.f32.mrf.mxu0  ;;  %14572 = vmatmul.mubr.msk.f32.gmra.mxu0 %vm273_vm0, %v18015_v45  ;;  %v18265_v18 = vld [vmem:[%s14958_s20 + $0x4e8] sm:$0xff] }
 0x2f4   : >> { %v14223_v43 = vpop.f32.mrf.mxu1  ;;  %14522 = vmatmul.mubr.msk.f32.gmra.mxu1 %vm273_vm0, %v19630_v52  ;;  %14574 = vmatprep.mubr.msk.f32.mxu0 %vm273_vm0, %v18248_v23 }
 0x2f5   : >> { %v18257_v3 = vadd.f32 %v6671_v27, %v6339_v42  ;;  %v6342_v20 = vadd.f32 %v14223_v43, %v19631_v13  ;;  %14524 = vmatprep.mubr.msk.f32.mxu1 %vm273_vm0, %v18245_v12  ;;  %v6681_v55 = vpop.f32.mrf.mxu0  ;;  %v12340_v27 = vld [vmem:[%s14958_s20 + $0x3b0] sm:$0xff]  ;;  %v19634_v43 = vld [vmem:[#allocation5_spill] sm:$0xff] }
 0x2f6   : >> { %v6294_v47 = vpop.f32.mrf.mxu1 }
 0x2f7   : >> { %v18271_v45 = vadd.f32 %v14273_v37, %v6342_v20  ;;  %v6341_v0 = vadd.f32 %v6294_v47, %v18027_v19  ;;  %v14276_v24 = vpop.f32.mrf.mxu0  ;;  %14575 = vmatmul.mubr.msk.f32.gmra.mxu0 %vm273_vm0, %v18268_v46  ;;  %v12341_v37 = vld [vmem:[%s14958_s20 + $0x3c0] sm:$0xff] }
 0x2f8   : >> { %v14226_v16 = vpop.f32.mrf.mxu1  ;;  %14525 = vmatmul.mubr.msk.f32.gmra.mxu1 %vm273_vm0, %v18265_v18  ;;  %14629 = vmatprep.mubr.msk.f32.mxu0 %vm273_vm0, %v12337_v35  ;;  %v12342_v35 = vld [vmem:[%s14958_s20 + $0x3c8] sm:$0xff] }
 0x2f9   : >> { %v18278_v36 = vadd.f32 %v6681_v55, %v6341_v0  ;;  %v6344_v10 = vadd.f32 %v14226_v16, %v18034_v1  ;;  %14579 = vmatprep.mubr.msk.f32.mxu1 %vm273_vm0, %v19632_v61  ;;  %v6691_v22 = vpop.f32.mrf.mxu0  ;;  %v19636_v55 = vld [vmem:[#allocation32_spill] sm:$0xff]  ;;  %v12343_v16 = vld [vmem:[%s14958_s20 + $0x3d8] sm:$0xff] }
 0x2fa   : >> { %v6304_v19 = vpop.f32.mrf.mxu1 }
 0x2fb   : >> { %v18285_v15 = vadd.f32 %v14276_v24, %v6344_v10  ;;  %v6343_v26 = vadd.f32 %v6304_v19, %v18051_v39  ;;  %v14331_v21 = vpop.f32.mrf.mxu0  ;;  %14630 = vmatmul.mubr.msk.f32.vlgmr.msra.gmra.mxu0 %vm273_vm0, %v12338_v8  ;;  %v19637_v19 = vld [vmem:[#allocation2_spill] sm:$0xff] }
 0x2fc   : >> { %v14281_v29 = vpop.f32.mrf.mxu1  ;;  %14580 = vmatmul.mubr.msk.f32.vlgmr.msra.gmra.mxu1 %vm273_vm0, %v19633_v32  ;;  %14728 = vmatpush3.msra.mxu0 %v18049_v14 }
 0x2fd   : >> { %v18292_v1 = vadd.f32 %v6691_v22, %v6343_v26  ;;  %v7088_v57 = vadd.f32 %v14281_v29, %v18060_v41  ;;  %14678 = vmatpush3.msra.mxu1 %v18044_v31  ;;  %v7318_v39 = vpop.f32.mrf.mxu0  ;;  %14582 = vmatprep.mubr.msk.f32.mxu1 %vm273_vm0, %v19634_v43  ;;  %v19635_v31 = vld [vmem:[#allocation6_spill] sm:$0xff]  ;;  %v19638_v26 = vld [vmem:[#allocation7_spill] sm:$0xff] }
 0x2fe   : >> { %v6928_v42 = vpop.f32.mrf.mxu1  ;;  %14632 = vmatprep.mubr.msk.f32.mxu0 %vm273_vm0, %v12339_v50  ;;  %v12344_v50 = vld [vmem:[%s14958_s20 + $0x3e0] sm:$0xff] }
 0x2ff   : >> { %v18302_v52 = vadd.f32 %v14331_v21, %v7088_v57  ;;  %v7087_v13 = vadd.f32 %v6928_v42, %v18069_v34  ;;  %v14334_v20 = vpop.f32.mrf.mxu0  ;;  %14633 = vmatmul.mubr.msk.f32.gmra.mxu0 %vm273_vm0, %v12340_v27  ;;  %v12345_v21 = vld [vmem:[%s14958_s20 + $0x3f0] sm:$0xff] }
 0x300   : >> { %v14284_v41 = vpop.f32.mrf.mxu1  ;;  %14583 = vmatmul.mubr.msk.f32.gmra.mxu1 %vm273_vm0, %v19635_v31  ;;  %14635 = vmatprep.mubr.msk.f32.mxu0 %vm273_vm0, %v12341_v37  ;;  %v19640_v37 = vld [vmem:[#allocation10_spill] sm:$0xff] }
 0x301   : >> { %v18308_v14 = vadd.f32 %v7318_v39, %v7087_v13  ;;  %v7090_v47 = vadd.f32 %v14284_v41, %v18076_v4  ;;  %14585 = vmatprep.mubr.msk.f32.mxu1 %vm273_vm0, %v19636_v55  ;;  %v7328_v34 = vpop.f32.mrf.mxu0  ;;  %v19639_v39 = vld [vmem:[#allocation9_spill] sm:$0xff] }
 0x302   : >> { %v6938_v0 = vpop.f32.mrf.mxu1  ;;  %v12346_v13 = vld [vmem:[%s14958_s20 + $0x3f8] sm:$0xff] }
 0x303   : >> { %v18316_v24 = vadd.f32 %v14334_v20, %v7090_v47  ;;  %v7089_v10 = vadd.f32 %v6938_v0, %v18083_v17  ;;  %v14337_v8 = vpop.f32.mrf.mxu0  ;;  %14636 = vmatmul.mubr.msk.f32.gmra.mxu0 %vm273_vm0, %v12342_v35  ;;  %v12347_v20 = vld [vmem:[%s14958_s20 + $0x408] sm:$0xff]  ;;  %v19641_v0 = vld [vmem:[#allocation33_spill] sm:$0xff] }
 0x304   : >> { %v14287_v61 = vpop.f32.mrf.mxu1  ;;  %14586 = vmatmul.mubr.msk.f32.gmra.mxu1 %vm273_vm0, %v19637_v19  ;;  %14638 = vmatprep.mubr.msk.f32.mxu0 %vm273_vm0, %v12343_v16  ;;  %v19642_v16 = vld [vmem:[#allocation35_spill] sm:$0xff] }
 0x305   : >> { %v18322_v4 = vadd.f32 %v7328_v34, %v7089_v10  ;;  %v7092_v22 = vadd.f32 %v14287_v61, %v18090_v33  ;;  %14588 = vmatprep.mubr.msk.f32.mxu1 %vm273_vm0, %v19638_v26  ;;  %v7338_v17 = vpop.f32.mrf.mxu0  ;;  %v12348_v10 = vld [vmem:[%s14958_s20 + $0x410] sm:$0xff] }
 0x306   : >> { %v6948_v29 = vpop.f32.mrf.mxu1 }
 0x307   : >> { %v18330_v32 = vadd.f32 %v14337_v8, %v7092_v22  ;;  %v7091_v57 = vadd.f32 %v6948_v29, %v18097_v56  ;;  %v14340_v42 = vpop.f32.mrf.mxu0  ;;  %14639 = vmatmul.mubr.msk.f32.gmra.mxu0 %vm273_vm0, %v12344_v50  ;;  %v12349_v8 = vld [vmem:[%s14958_s20 + $0x420] sm:$0xff] }
 0x308   : >> { %v14290_v27 = vpop.f32.mrf.mxu1  ;;  %14589 = vmatmul.mubr.msk.f32.gmra.mxu1 %vm273_vm0, %v19639_v39  ;;  %14641 = vmatprep.mubr.msk.f32.mxu0 %vm273_vm0, %v12345_v21  ;;  %v19643_v29 = vld [vmem:[#allocation34_spill] sm:$0xff] }
 0x309   : >> { %v18336_v33 = vadd.f32 %v7338_v17, %v7091_v57  ;;  %v7094_v43 = vadd.f32 %v14290_v27, %v18104_v30  ;;  %14591 = vmatprep.mubr.msk.f32.mxu1 %vm273_vm0, %v19640_v37  ;;  %v7348_v56 = vpop.f32.mrf.mxu0  ;;  %v19644_v21 = vld [vmem:[#allocation38_spill] sm:$0xff]  ;;  %v12350_v57 = vld [vmem:[%s14958_s20 + $0x428] sm:$0xff] }
 0x30a   : >> { %v6958_v41 = vpop.f32.mrf.mxu1 }
 0x30b   : >> { %v18344_v31 = vadd.f32 %v14340_v42, %v7094_v43  ;;  %v7093_v47 = vadd.f32 %v6958_v41, %v18111_v62  ;;  %v14343_v35 = vpop.f32.mrf.mxu0  ;;  %14642 = vmatmul.mubr.msk.f32.gmra.mxu0 %vm273_vm0, %v12346_v13  ;;  %v12351_v42 = vld [vmem:[%s14958_s20 + $0x438] sm:$0xff]  ;;  %v19645_v41 = vld [vmem:[#allocation40_spill] sm:$0xff] }
 0x30c   : >> { %v14293_v55 = vpop.f32.mrf.mxu1  ;;  %14592 = vmatmul.mubr.msk.f32.gmra.mxu1 %vm273_vm0, %v19641_v0  ;;  %14644 = vmatprep.mubr.msk.f32.mxu0 %vm273_vm0, %v12347_v20  ;;  %v19646_v20 = vld [vmem:[#allocation42_spill] sm:$0xff] }
 0x30d   : >> { %v18350_v30 = vadd.f32 %v7348_v56, %v7093_v47  ;;  %v7096_v34 = vadd.f32 %v14293_v55, %v18118_v58  ;;  %14594 = vmatprep.mubr.msk.f32.mxu1 %vm273_vm0, %v19642_v16  ;;  %v7358_v62 = vpop.f32.mrf.mxu0  ;;  %v12352_v47 = vld [vmem:[%s14958_s20 + $0x440] sm:$0xff] }
 0x30e   : >> { %v6968_v61 = vpop.f32.mrf.mxu1 }
 0x30f   : >> { %v18358_v19 = vadd.f32 %v14343_v35, %v7096_v34  ;;  %v7095_v22 = vadd.f32 %v6968_v61, %v18125_v11  ;;  %v14346_v50 = vpop.f32.mrf.mxu0  ;;  %14645 = vmatmul.mubr.msk.f32.gmra.mxu0 %vm273_vm0, %v12348_v10  ;;  %v12353_v35 = vld [vmem:[%s14958_s20 + $0x450] sm:$0xff]  ;;  %v19647_v61 = vld [vmem:[#allocation46_spill] sm:$0xff] }
 0x310   : >> { %v14296_v26 = vpop.f32.mrf.mxu1  ;;  %14595 = vmatmul.mubr.msk.f32.gmra.mxu1 %vm273_vm0, %v19643_v29  ;;  %14647 = vmatprep.mubr.msk.f32.mxu0 %vm273_vm0, %v12349_v8  ;;  %v19648_v8 = vld [vmem:[#allocation41_spill] sm:$0xff] }
 0x311   : >> { %v18364_v58 = vadd.f32 %v7358_v62, %v7095_v22  ;;  %v7098_v17 = vadd.f32 %v14296_v26, %v18132_v53  ;;  %14597 = vmatprep.mubr.msk.f32.mxu1 %vm273_vm0, %v19644_v21  ;;  %v7368_v11 = vpop.f32.mrf.mxu0  ;;  %v12354_v22 = vld [vmem:[%s14958_s20 + $0x458] sm:$0xff] }
 0x312   : >> { %v6978_v27 = vpop.f32.mrf.mxu1 }
 0x313   : >> { %v18372_v39 = vadd.f32 %v14346_v50, %v7098_v17  ;;  %v7097_v43 = vadd.f32 %v6978_v27, %v18139_v51  ;;  %v14349_v13 = vpop.f32.mrf.mxu0  ;;  %14648 = vmatmul.mubr.msk.f32.gmra.mxu0 %vm273_vm0, %v12350_v57  ;;  %v12355_v50 = vld [vmem:[%s14958_s20 + $0x468] sm:$0xff]  ;;  %v19649_v27 = vld [vmem:[#allocation49_spill] sm:$0xff] }
 0x314   : >> { %v14299_v37 = vpop.f32.mrf.mxu1  ;;  %14598 = vmatmul.mubr.msk.f32.gmra.mxu1 %vm273_vm0, %v19645_v41  ;;  %14650 = vmatprep.mubr.msk.f32.mxu0 %vm273_vm0, %v12351_v42  ;;  %v19650_v42 = vld [vmem:[#allocation50_spill] sm:$0xff] }
 0x315   : >> { %v18378_v53 = vadd.f32 %v7368_v11, %v7097_v43  ;;  %v7100_v56 = vadd.f32 %v14299_v37, %v18146_v48  ;;  %14600 = vmatprep.mubr.msk.f32.mxu1 %vm273_vm0, %v19646_v20  ;;  %v7378_v51 = vpop.f32.mrf.mxu0  ;;  %v12356_v43 = vld [vmem:[%s14958_s20 + $0x470] sm:$0xff] }
 0x316   : >> { %v6988_v55 = vpop.f32.mrf.mxu1 }
 0x317   : >> { %v18386_v0 = vadd.f32 %v14349_v13, %v7100_v56  ;;  %v7099_v34 = vadd.f32 %v6988_v55, %v18153_v63  ;;  %v14352_v10 = vpop.f32.mrf.mxu0  ;;  %14651 = vmatmul.mubr.msk.f32.gmra.mxu0 %vm273_vm0, %v12352_v47  ;;  %v12357_v13 = vld [vmem:[%s14958_s20 + $0x480] sm:$0xff]  ;;  %v19651_v55 = vld [vmem:[#allocation53_spill] sm:$0xff] }
 0x318   : >> { %v14302_v16 = vpop.f32.mrf.mxu1  ;;  %14601 = vmatmul.mubr.msk.f32.gmra.mxu1 %vm273_vm0, %v19647_v61  ;;  %14653 = vmatprep.mubr.msk.f32.mxu0 %vm273_vm0, %v12353_v35  ;;  %v19652_v35 = vld [vmem:[#allocation54_spill] sm:$0xff] }
 0x319   : >> { %v18392_v48 = vadd.f32 %v7378_v51, %v7099_v34  ;;  %v7102_v62 = vadd.f32 %v14302_v16, %v18160_v40  ;;  %14603 = vmatprep.mubr.msk.f32.mxu1 %vm273_vm0, %v19648_v8  ;;  %v7388_v63 = vpop.f32.mrf.mxu0  ;;  %v12358_v34 = vld [vmem:[%s14958_s20 + $0x488] sm:$0xff] }
 0x31a   : >> { %v6998_v26 = vpop.f32.mrf.mxu1 }
 0x31b   : >> { %v18400_v29 = vadd.f32 %v14352_v10, %v7102_v62  ;;  %v7101_v17 = vadd.f32 %v6998_v26, %v18167_v7  ;;  %v14355_v57 = vpop.f32.mrf.mxu0  ;;  %14654 = vmatmul.mubr.msk.f32.gmra.mxu0 %vm273_vm0, %v12354_v22  ;;  %v12359_v10 = vld [vmem:[%s14958_s20 + $0x498] sm:$0xff] }
 0x31c   : >> { %v14305_v21 = vpop.f32.mrf.mxu1  ;;  %14604 = vmatmul.mubr.msk.f32.gmra.mxu1 %vm273_vm0, %v19649_v27  ;;  %14656 = vmatprep.mubr.msk.f32.mxu0 %vm273_vm0, %v12355_v50  ;;  %v19653_v26 = vld [vmem:[#allocation57_spill] sm:$0xff]  ;;  %v19654_v50 = vld [vmem:[#allocation58_spill] sm:$0xff] }
 0x31d   : >> { %v18406_v40 = vadd.f32 %v7388_v63, %v7101_v17  ;;  %v7104_v11 = vadd.f32 %v14305_v21, %v18174_v44  ;;  %14606 = vmatprep.mubr.msk.f32.mxu1 %vm273_vm0, %v19650_v42  ;;  %v7398_v7 = vpop.f32.mrf.mxu0  ;;  %v12360_v17 = vld [vmem:[%s14958_s20 + $0x4a0] sm:$0xff] }
 0x31e   : >> { %v7008_v37 = vpop.f32.mrf.mxu1 }
 0x31f   : >> { %v18414_v41 = vadd.f32 %v14355_v57, %v7104_v11  ;;  %v7103_v56 = vadd.f32 %v7008_v37, %v18181_v49  ;;  %v14358_v47 = vpop.f32.mrf.mxu0  ;;  %14657 = vmatmul.mubr.msk.f32.gmra.mxu0 %vm273_vm0, %v12356_v43  ;;  %v12361_v57 = vld [vmem:[%s14958_s20 + $0x4b0] sm:$0xff]  ;;  %v19655_v37 = vld [vmem:[#allocation61_spill] sm:$0xff] }
 0x320   : >> { %v14308_v20 = vpop.f32.mrf.mxu1  ;;  %14607 = vmatmul.mubr.msk.f32.gmra.mxu1 %vm273_vm0, %v19651_v55  ;;  %14659 = vmatprep.mubr.msk.f32.mxu0 %vm273_vm0, %v12357_v13  ;;  %v19656_v13 = vld [vmem:[#allocation62_spill] sm:$0xff] }
 0x321   : >> { %v18420_v44 = vadd.f32 %v7398_v7, %v7103_v56  ;;  %v7106_v51 = vadd.f32 %v14308_v20, %v18188_v28  ;;  %14609 = vmatprep.mubr.msk.f32.mxu1 %vm273_vm0, %v19652_v35  ;;  %v7408_v49 = vpop.f32.mrf.mxu0  ;;  %v12362_v56 = vld [vmem:[%s14958_s20 + $0x4b8] sm:$0xff] }
 0x322   : >> { %v7018_v16 = vpop.f32.mrf.mxu1 }
 0x323   : >> { %v18428_v61 = vadd.f32 %v14358_v47, %v7106_v51  ;;  %v7105_v62 = vadd.f32 %v7018_v16, %v18195_v54  ;;  %v14361_v22 = vpop.f32.mrf.mxu0  ;;  %14660 = vmatmul.mubr.msk.f32.gmra.mxu0 %vm273_vm0, %v12358_v34  ;;  %v12363_v47 = vld [vmem:[%s14958_s20 + $0x4c8] sm:$0xff]  ;;  %v19657_v16 = vld [vmem:[#allocation65_spill] sm:$0xff] }
 0x324   : >> { %v14311_v8 = vpop.f32.mrf.mxu1  ;;  %14610 = vmatmul.mubr.msk.f32.gmra.mxu1 %vm273_vm0, %v19653_v26  ;;  %14662 = vmatprep.mubr.msk.f32.mxu0 %vm273_vm0, %v12359_v10  ;;  %v19658_v10 = vld [vmem:[#allocation66_spill] sm:$0xff] }
 0x325   : >> { %v18434_v28 = vadd.f32 %v7408_v49, %v7105_v62  ;;  %v7108_v63 = vadd.f32 %v14311_v8, %v18202_v38  ;;  %14612 = vmatprep.mubr.msk.f32.mxu1 %vm273_vm0, %v19654_v50  ;;  %v7418_v54 = vpop.f32.mrf.mxu0  ;;  %v12364_v62 = vld [vmem:[%s14958_s20 + $0x4d0] sm:$0xff] }
 0x326   : >> { %v7028_v21 = vpop.f32.mrf.mxu1 }
 0x327   : >> { %v18442_v27 = vadd.f32 %v14361_v22, %v7108_v63  ;;  %v7107_v11 = vadd.f32 %v7028_v21, %v18209_v25  ;;  %v14364_v43 = vpop.f32.mrf.mxu0  ;;  %14663 = vmatmul.mubr.msk.f32.gmra.mxu0 %vm273_vm0, %v12360_v17  ;;  %v19659_v17 = vld [vmem:[#allocation69_spill] sm:$0xff] }
 0x328   : >> { %v14314_v42 = vpop.f32.mrf.mxu1  ;;  %14613 = vmatmul.mubr.msk.f32.gmra.mxu1 %vm273_vm0, %v19655_v37  ;;  %14665 = vmatprep.mubr.msk.f32.mxu0 %vm273_vm0, %v12361_v57 }
 0x329   : >> { %v18448_v38 = vadd.f32 %v7418_v54, %v7107_v11  ;;  %v7110_v7 = vadd.f32 %v14314_v42, %v18216_v6  ;;  %14615 = vmatprep.mubr.msk.f32.mxu1 %vm273_vm0, %v19656_v13  ;;  %v7428_v25 = vpop.f32.mrf.mxu0  ;;  %v19660_v54 = vld [vmem:[#allocation70_spill] sm:$0xff]  ;;  %v12367_v42 = vld [vmem:[%s14958_s20 + $0x4f8] sm:$0xff] }
 0x32a   : >> { %v7038_v20 = vpop.f32.mrf.mxu1  ;;  %v18483_v11 = vld [vmem:[%s14958_s20 + $0x4e2] sm:$0xff] }
 0x32b   : >> { %v18456_v55 = vadd.f32 %v14364_v43, %v7110_v7  ;;  %v7109_v51 = vadd.f32 %v7038_v20, %v18223_v2  ;;  %v14367_v34 = vpop.f32.mrf.mxu0  ;;  %14666 = vmatmul.mubr.msk.f32.gmra.mxu0 %vm273_vm0, %v12362_v56  ;;  %v18500_v56 = vld [vmem:[%s14958_s20 + $0x4ea] sm:$0xff] }
 0x32c   : >> { %v14317_v35 = vpop.f32.mrf.mxu1  ;;  %14616 = vmatmul.mubr.msk.f32.gmra.mxu1 %vm273_vm0, %v19657_v16  ;;  %14668 = vmatprep.mubr.msk.f32.mxu0 %vm273_vm0, %v12363_v47  ;;  %v12467_v47 = vld [vmem:[%s14958_s20 + $0x392] sm:$0xff] }
 0x32d   : >> { %v18462_v6 = vadd.f32 %v7428_v25, %v7109_v51  ;;  %v7112_v49 = vadd.f32 %v14317_v35, %v18230_v5  ;;  %14618 = vmatprep.mubr.msk.f32.mxu1 %vm273_vm0, %v19658_v10  ;;  %v7438_v8 = vpop.f32.mrf.mxu0  ;;  %v12468_v10 = vld [vmem:[%s14958_s20 + $0x39a] sm:$0xff] }
 0x32e   : >> { %v7048_v2 = vpop.f32.mrf.mxu1 }
 0x32f   : >> { %v18469_v22 = vadd.f32 %v14367_v34, %v7112_v49  ;;  %v7111_v26 = vadd.f32 %v7048_v2, %v18237_v9  ;;  %v14370_v50 = vpop.f32.mrf.mxu0  ;;  %14669 = vmatmul.mubr.msk.f32.gmra.mxu0 %vm273_vm0, %v12364_v62  ;;  %v12403_v49 = vld [vmem:[%s14958_s20 + $0x399] sm:$0xff]  ;;  %v12404_v2 = vld [vmem:[%s14958_s20 + $0x3a9] sm:$0xff] }
 0x330   : >> { %v14320_v63 = vpop.f32.mrf.mxu1  ;;  %14619 = vmatmul.mubr.msk.f32.gmra.mxu1 %vm273_vm0, %v19659_v17  ;;  %14671 = vmatprep.mubr.msk.f32.mxu0 %vm273_vm0, %v18245_v12 }
 0x331   : >> { %v18475_v5 = vadd.f32 %v7438_v8, %v7111_v26  ;;  %v7114_v21 = vadd.f32 %v14320_v63, %v18250_v60  ;;  %14621 = vmatprep.mubr.msk.f32.mxu1 %vm273_vm0, %v19660_v54  ;;  %v7448_v57 = vpop.f32.mrf.mxu0  ;;  %v12469_v8 = vld [vmem:[%s14958_s20 + $0x3aa] sm:$0xff] }
 0x332   : >> { %v7058_v9 = vpop.f32.mrf.mxu1  ;;  %v12405_v54 = vld [vmem:[%s14958_s20 + $0x3b1] sm:$0xff] }
 0x333   : >> { %v18486_v43 = vadd.f32 %v14370_v50, %v7114_v21  ;;  %v7113_v37 = vadd.f32 %v7058_v9, %v18257_v3  ;;  %v14373_v7 = vpop.f32.mrf.mxu0  ;;  %14672 = vmatmul.mubr.msk.f32.gmra.mxu0 %vm273_vm0, %v18265_v18  ;;  %v12368_v3 = vld [vmem:[%s14958_s20 + $0x500] sm:$0xff]  ;;  %v12470_v9 = vld [vmem:[%s14958_s20 + $0x3b2] sm:$0xff] }
 0x334   : >> { %v14323_v60 = vpop.f32.mrf.mxu1  ;;  %14622 = vmatmul.mubr.msk.f32.gmra.mxu1 %vm273_vm0, %v18018_v59  ;;  %14674 = vmatprep.mubr.msk.f32.mxu0 %vm273_vm0, %v12367_v42  ;;  %v12402_v59 = vld [vmem:[%s14958_s20 + $0x391] sm:$0xff]  ;;  %v12406_v42 = vld [vmem:[%s14958_s20 + $0x3c1] sm:$0xff] }
 0x335   : >> { %v18493_v12 = vadd.f32 %v7448_v57, %v7113_v37  ;;  %v7116_v13 = vadd.f32 %v14323_v60, %v18271_v45  ;;  %14624 = vmatprep.mubr.msk.f32.mxu1 %vm273_vm0, %v18483_v11  ;;  %v7458_v25 = vpop.f32.mrf.mxu0  ;;  %v12471_v37 = vld [vmem:[%s14958_s20 + $0x3c2] sm:$0xff] }
 0x336   : >> { %v7068_v20 = vpop.f32.mrf.mxu1 }
 0x337   : >> { %v18505_v18 = vadd.f32 %v14373_v7, %v7116_v13  ;;  %v7115_v45 = vadd.f32 %v7068_v20, %v18278_v36  ;;  %v14376_v35 = vpop.f32.mrf.mxu0  ;;  %14675 = vmatmul.mubr.msk.f32.gmra.mxu0 %vm273_vm0, %v12368_v3 }
 0x338   : >> { %v14326_v51 = vpop.f32.mrf.mxu1  ;;  %14625 = vmatmul.mubr.msk.f32.gmra.mxu1 %vm273_vm0, %v18500_v56  ;;  %14729 = vmatprep.mubr.msk.f32.mxu0 %vm273_vm0, %v12467_v47 }
 0x339   : >> { %v18511_v34 = vadd.f32 %v7458_v25, %v7115_v45  ;;  %v7118_v16 = vadd.f32 %v14326_v51, %v18285_v15  ;;  %14679 = vmatprep.mubr.msk.f32.mxu1 %vm273_vm0, %v12402_v59  ;;  %v7468_v62 = vpop.f32.mrf.mxu0  ;;  %v12407_v25 = vld [vmem:[%s14958_s20 + $0x3c9] sm:$0xff]  ;;  %v12408_v45 = vld [vmem:[%s14958_s20 + $0x3d9] sm:$0xff] }
 0x33a   : >> { %v7078_v36 = vpop.f32.mrf.mxu1  ;;  %v12472_v59 = vld [vmem:[%s14958_s20 + $0x3ca] sm:$0xff]  ;;  %v12473_v51 = vld [vmem:[%s14958_s20 + $0x3da] sm:$0xff] }
 0x33b   : >> { %v18520_v26 = vadd.f32 %v14376_v35, %v7118_v16  ;;  %v7117_v63 = vadd.f32 %v7078_v36, %v18292_v1  ;;  %v14431_v15 = vpop.f32.mrf.mxu0  ;;  %14730 = vmatmul.mubr.msk.f32.vlgmr.msra.gmra.mxu0 %vm273_vm0, %v12468_v10 }
 0x33c   : >> { %v14381_v50 = vpop.f32.mrf.mxu1  ;;  %14680 = vmatmul.mubr.msk.f32.vlgmr.msra.gmra.mxu1 %vm273_vm0, %v12403_v49  ;;  %14732 = vmatprep.mubr.msk.f32.mxu0 %vm273_vm0, %v12469_v8 }
 0x33d   : >> { %v18525_v17 = vadd.f32 %v7468_v62, %v7117_v63  ;;  %v7865_v21 = vadd.f32 %v14381_v50, %v18302_v52  ;;  %14682 = vmatprep.mubr.msk.f32.mxu1 %vm273_vm0, %v12404_v2  ;;  %v8092_v1 = vpop.f32.mrf.mxu0  ;;  %v12409_v62 = vld [vmem:[%s14958_s20 + $0x3e1] sm:$0xff]  ;;  %v12410_v63 = vld [vmem:[%s14958_s20 + $0x3f1] sm:$0xff] }
 0x33e   : >> { %v7705_v57 = vpop.f32.mrf.mxu1  ;;  %v12474_v2 = vld [vmem:[%s14958_s20 + $0x3e2] sm:$0xff]  ;;  %v12475_v50 = vld [vmem:[%s14958_s20 + $0x3f2] sm:$0xff] }
 0x33f   : >> { %v18534_v60 = vadd.f32 %v14431_v15, %v7865_v21  ;;  %v7864_v7 = vadd.f32 %v7705_v57, %v18308_v14  ;;  %v14434_v52 = vpop.f32.mrf.mxu0  ;;  %14733 = vmatmul.mubr.msk.f32.gmra.mxu0 %vm273_vm0, %v12470_v9 }
 0x340   : >> { %v14384_v13 = vpop.f32.mrf.mxu1  ;;  %14683 = vmatmul.mubr.msk.f32.gmra.mxu1 %vm273_vm0, %v12405_v54  ;;  %14735 = vmatprep.mubr.msk.f32.mxu0 %vm273_vm0, %v12471_v37 }
 0x341   : >> { %v18539_v3 = vadd.f32 %v8092_v1, %v7864_v7  ;;  %v7867_v20 = vadd.f32 %v14384_v13, %v18316_v24  ;;  %14685 = vmatprep.mubr.msk.f32.mxu1 %vm273_vm0, %v12406_v42  ;;  %v8102_v14 = vpop.f32.mrf.mxu0  ;;  %v12411_v1 = vld [vmem:[%s14958_s20 + $0x3f9] sm:$0xff]  ;;  %v12412_v7 = vld [vmem:[%s14958_s20 + $0x409] sm:$0xff] }
 0x342   : >> { %v7715_v47 = vpop.f32.mrf.mxu1  ;;  %v12476_v42 = vld [vmem:[%s14958_s20 + $0x3fa] sm:$0xff]  ;;  %v12477_v13 = vld [vmem:[%s14958_s20 + $0x40a] sm:$0xff] }
 0x343   : >> { %v18548_v35 = vadd.f32 %v14434_v52, %v7867_v20  ;;  %v7866_v16 = vadd.f32 %v7715_v47, %v18322_v4  ;;  %v14437_v24 = vpop.f32.mrf.mxu0  ;;  %14736 = vmatmul.mubr.msk.f32.gmra.mxu0 %vm273_vm0, %v12472_v59 }
 0x344   : >> { %v14387_v49 = vpop.f32.mrf.mxu1  ;;  %14686 = vmatmul.mubr.msk.f32.gmra.mxu1 %vm273_vm0, %v12407_v25  ;;  %14738 = vmatprep.mubr.msk.f32.mxu0 %vm273_vm0, %v12473_v51 }
 0x345   : >> { %v18553_v10 = vadd.f32 %v8102_v14, %v7866_v16  ;;  %v7869_v36 = vadd.f32 %v14387_v49, %v18330_v32  ;;  %14688 = vmatprep.mubr.msk.f32.mxu1 %vm273_vm0, %v12408_v45  ;;  %v8112_v4 = vpop.f32.mrf.mxu0  ;;  %v12413_v14 = vld [vmem:[%s14958_s20 + $0x411] sm:$0xff]  ;;  %v12414_v16 = vld [vmem:[%s14958_s20 + $0x421] sm:$0xff] }
 0x346   : >> { %v7725_v8 = vpop.f32.mrf.mxu1  ;;  %v12478_v45 = vld [vmem:[%s14958_s20 + $0x412] sm:$0xff]  ;;  %v12479_v49 = vld [vmem:[%s14958_s20 + $0x422] sm:$0xff] }
 0x347   : >> { %v18562_v15 = vadd.f32 %v14437_v24, %v7869_v36  ;;  %v7868_v21 = vadd.f32 %v7725_v8, %v18336_v33  ;;  %v14440_v32 = vpop.f32.mrf.mxu0  ;;  %14739 = vmatmul.mubr.msk.f32.gmra.mxu0 %vm273_vm0, %v12474_v2 }
 0x348   : >> { %v14390_v54 = vpop.f32.mrf.mxu1  ;;  %14689 = vmatmul.mubr.msk.f32.gmra.mxu1 %vm273_vm0, %v12409_v62  ;;  %14741 = vmatprep.mubr.msk.f32.mxu0 %vm273_vm0, %v12475_v50 }
 0x349   : >> { %v18567_v9 = vadd.f32 %v8112_v4, %v7868_v21  ;;  %v7871_v57 = vadd.f32 %v14390_v54, %v18344_v31  ;;  %14691 = vmatprep.mubr.msk.f32.mxu1 %vm273_vm0, %v12410_v63  ;;  %v8122_v33 = vpop.f32.mrf.mxu0  ;;  %v12415_v4 = vld [vmem:[%s14958_s20 + $0x429] sm:$0xff]  ;;  %v12416_v21 = vld [vmem:[%s14958_s20 + $0x439] sm:$0xff] }
 0x34a   : >> { %v7735_v37 = vpop.f32.mrf.mxu1  ;;  %v12480_v63 = vld [vmem:[%s14958_s20 + $0x42a] sm:$0xff]  ;;  %v12481_v54 = vld [vmem:[%s14958_s20 + $0x43a] sm:$0xff] }
 0x34b   : >> { %v18576_v52 = vadd.f32 %v14440_v32, %v7871_v57  ;;  %v7870_v20 = vadd.f32 %v7735_v37, %v18350_v30  ;;  %v14443_v31 = vpop.f32.mrf.mxu0  ;;  %14742 = vmatmul.mubr.msk.f32.gmra.mxu0 %vm273_vm0, %v12476_v42 }
 0x34c   : >> { %v14393_v25 = vpop.f32.mrf.mxu1  ;;  %14692 = vmatmul.mubr.msk.f32.gmra.mxu1 %vm273_vm0, %v12411_v1  ;;  %14744 = vmatprep.mubr.msk.f32.mxu0 %vm273_vm0, %v12477_v13 }
 0x34d   : >> { %v18581_v59 = vadd.f32 %v8122_v33, %v7870_v20  ;;  %v7873_v47 = vadd.f32 %v14393_v25, %v18358_v19  ;;  %14694 = vmatprep.mubr.msk.f32.mxu1 %vm273_vm0, %v12412_v7  ;;  %v8132_v30 = vpop.f32.mrf.mxu0  ;;  %v12417_v33 = vld [vmem:[%s14958_s20 + $0x441] sm:$0xff]  ;;  %v12418_v20 = vld [vmem:[%s14958_s20 + $0x451] sm:$0xff] }
 0x34e   : >> { %v7745_v51 = vpop.f32.mrf.mxu1  ;;  %v12482_v7 = vld [vmem:[%s14958_s20 + $0x442] sm:$0xff]  ;;  %v12483_v25 = vld [vmem:[%s14958_s20 + $0x452] sm:$0xff] }
 0x34f   : >> { %v18590_v24 = vadd.f32 %v14443_v31, %v7873_v47  ;;  %v7872_v36 = vadd.f32 %v7745_v51, %v18364_v58  ;;  %v14446_v19 = vpop.f32.mrf.mxu0  ;;  %14745 = vmatmul.mubr.msk.f32.gmra.mxu0 %vm273_vm0, %v12478_v45 }
 0x350   : >> { %v14396_v62 = vpop.f32.mrf.mxu1  ;;  %14695 = vmatmul.mubr.msk.f32.gmra.mxu1 %vm273_vm0, %v12413_v14  ;;  %14747 = vmatprep.mubr.msk.f32.mxu0 %vm273_vm0, %v12479_v49 }
 0x351   : >> { %v18595_v2 = vadd.f32 %v8132_v30, %v7872_v36  ;;  %v7875_v8 = vadd.f32 %v14396_v62, %v18372_v39  ;;  %14697 = vmatprep.mubr.msk.f32.mxu1 %vm273_vm0, %v12414_v16  ;;  %v8142_v58 = vpop.f32.mrf.mxu0  ;;  %v12419_v30 = vld [vmem:[%s14958_s20 + $0x459] sm:$0xff]  ;;  %v12420_v36 = vld [vmem:[%s14958_s20 + $0x469] sm:$0xff] }
 0x352   : >> { %v7755_v50 = vpop.f32.mrf.mxu1  ;;  %v12484_v16 = vld [vmem:[%s14958_s20 + $0x45a] sm:$0xff]  ;;  %v12485_v62 = vld [vmem:[%s14958_s20 + $0x46a] sm:$0xff] }
 0x353   : >> { %v18604_v32 = vadd.f32 %v14446_v19, %v7875_v8  ;;  %v7874_v57 = vadd.f32 %v7755_v50, %v18378_v53  ;;  %v14449_v39 = vpop.f32.mrf.mxu0  ;;  %14748 = vmatmul.mubr.msk.f32.gmra.mxu0 %vm273_vm0, %v12480_v63 }
 0x354   : >> { %v14399_v1 = vpop.f32.mrf.mxu1  ;;  %14698 = vmatmul.mubr.msk.f32.gmra.mxu1 %vm273_vm0, %v12415_v4  ;;  %14750 = vmatprep.mubr.msk.f32.mxu0 %vm273_vm0, %v12481_v54 }
 0x355   : >> { %v18609_v42 = vadd.f32 %v8142_v58, %v7874_v57  ;;  %v7877_v37 = vadd.f32 %v14399_v1, %v18386_v0  ;;  %14700 = vmatprep.mubr.msk.f32.mxu1 %vm273_vm0, %v12416_v21  ;;  %v8152_v53 = vpop.f32.mrf.mxu0  ;;  %v12421_v58 = vld [vmem:[%s14958_s20 + $0x471] sm:$0xff]  ;;  %v12422_v57 = vld [vmem:[%s14958_s20 + $0x481] sm:$0xff] }
 0x356   : >> { %v7765_v13 = vpop.f32.mrf.mxu1  ;;  %v12486_v21 = vld [vmem:[%s14958_s20 + $0x472] sm:$0xff]  ;;  %v12487_v1 = vld [vmem:[%s14958_s20 + $0x482] sm:$0xff] }
 0x357   : >> { %v18618_v31 = vadd.f32 %v14449_v39, %v7877_v37  ;;  %v7876_v47 = vadd.f32 %v7765_v13, %v18392_v48  ;;  %v14452_v0 = vpop.f32.mrf.mxu0  ;;  %14751 = vmatmul.mubr.msk.f32.gmra.mxu0 %vm273_vm0, %v12482_v7 }
 0x358   : >> { %v14402_v14 = vpop.f32.mrf.mxu1  ;;  %14701 = vmatmul.mubr.msk.f32.gmra.mxu1 %vm273_vm0, %v12417_v33  ;;  %14753 = vmatprep.mubr.msk.f32.mxu0 %vm273_vm0, %v12483_v25 }
 0x359   : >> { %v18623_v45 = vadd.f32 %v8152_v53, %v7876_v47  ;;  %v7879_v51 = vadd.f32 %v14402_v14, %v18400_v29  ;;  %14703 = vmatprep.mubr.msk.f32.mxu1 %vm273_vm0, %v12418_v20  ;;  %v8162_v48 = vpop.f32.mrf.mxu0  ;;  %v12423_v53 = vld [vmem:[%s14958_s20 + $0x489] sm:$0xff]  ;;  %v12424_v47 = vld [vmem:[%s14958_s20 + $0x499] sm:$0xff] }
 0x35a   : >> { %v7775_v49 = vpop.f32.mrf.mxu1  ;;  %v12488_v20 = vld [vmem:[%s14958_s20 + $0x48a] sm:$0xff]  ;;  %v12489_v14 = vld [vmem:[%s14958_s20 + $0x49a] sm:$0xff] }
 0x35b   : >> { %v18632_v19 = vadd.f32 %v14452_v0, %v7879_v51  ;;  %v7878_v8 = vadd.f32 %v7775_v49, %v18406_v40  ;;  %v14455_v29 = vpop.f32.mrf.mxu0  ;;  %14754 = vmatmul.mubr.msk.f32.gmra.mxu0 %vm273_vm0, %v12484_v16 }
 0x35c   : >> { %v14405_v4 = vpop.f32.mrf.mxu1  ;;  %14704 = vmatmul.mubr.msk.f32.gmra.mxu1 %vm273_vm0, %v12419_v30  ;;  %14756 = vmatprep.mubr.msk.f32.mxu0 %vm273_vm0, %v12485_v62 }
 0x35d   : >> { %v18637_v63 = vadd.f32 %v8162_v48, %v7878_v8  ;;  %v7881_v50 = vadd.f32 %v14405_v4, %v18414_v41  ;;  %14706 = vmatprep.mubr.msk.f32.mxu1 %vm273_vm0, %v12420_v36  ;;  %v8172_v40 = vpop.f32.mrf.mxu0  ;;  %v12425_v48 = vld [vmem:[%s14958_s20 + $0x4a1] sm:$0xff]  ;;  %v12426_v8 = vld [vmem:[%s14958_s20 + $0x4b1] sm:$0xff] }
 0x35e   : >> { %v7785_v54 = vpop.f32.mrf.mxu1  ;;  %v12490_v36 = vld [vmem:[%s14958_s20 + $0x4a2] sm:$0xff]  ;;  %v12491_v4 = vld [vmem:[%s14958_s20 + $0x4b2] sm:$0xff] }
 0x35f   : >> { %v18646_v39 = vadd.f32 %v14455_v29, %v7881_v50  ;;  %v7880_v37 = vadd.f32 %v7785_v54, %v18420_v44  ;;  %v14458_v41 = vpop.f32.mrf.mxu0  ;;  %14757 = vmatmul.mubr.msk.f32.gmra.mxu0 %vm273_vm0, %v12486_v21 }
 0x360   : >> { %v14408_v33 = vpop.f32.mrf.mxu1  ;;  %14707 = vmatmul.mubr.msk.f32.gmra.mxu1 %vm273_vm0, %v12421_v58  ;;  %14759 = vmatprep.mubr.msk.f32.mxu0 %vm273_vm0, %v12487_v1 }
 0x361   : >> { %v18651_v7 = vadd.f32 %v8172_v40, %v7880_v37  ;;  %v7883_v13 = vadd.f32 %v14408_v33, %v18428_v61  ;;  %14709 = vmatprep.mubr.msk.f32.mxu1 %vm273_vm0, %v12422_v57  ;;  %v8182_v44 = vpop.f32.mrf.mxu0  ;;  %v12427_v40 = vld [vmem:[%s14958_s20 + $0x4b9] sm:$0xff]  ;;  %v12428_v37 = vld [vmem:[%s14958_s20 + $0x4c9] sm:$0xff] }
 0x362   : >> { %v7795_v25 = vpop.f32.mrf.mxu1  ;;  %v12492_v57 = vld [vmem:[%s14958_s20 + $0x4ba] sm:$0xff]  ;;  %v12493_v33 = vld [vmem:[%s14958_s20 + $0x4ca] sm:$0xff] }
 0x363   : >> { %v18660_v0 = vadd.f32 %v14458_v41, %v7883_v13  ;;  %v7882_v51 = vadd.f32 %v7795_v25, %v18434_v28  ;;  %v14461_v61 = vpop.f32.mrf.mxu0  ;;  %14760 = vmatmul.mubr.msk.f32.gmra.mxu0 %vm273_vm0, %v12488_v20 }
 0x364   : >> { %v14411_v30 = vpop.f32.mrf.mxu1  ;;  %14710 = vmatmul.mubr.msk.f32.gmra.mxu1 %vm273_vm0, %v12423_v53  ;;  %14762 = vmatprep.mubr.msk.f32.mxu0 %vm273_vm0, %v12489_v14 }
 0x365   : >> { %v18665_v16 = vadd.f32 %v8182_v44, %v7882_v51  ;;  %v7885_v49 = vadd.f32 %v14411_v30, %v18442_v27  ;;  %14712 = vmatprep.mubr.msk.f32.mxu1 %vm273_vm0, %v12424_v47  ;;  %v8192_v28 = vpop.f32.mrf.mxu0  ;;  %v12429_v44 = vld [vmem:[%s14958_s20 + $0x4d1] sm:$0xff] }
 0x366   : >> { %v7805_v62 = vpop.f32.mrf.mxu1  ;;  %v12494_v47 = vld [vmem:[%s14958_s20 + $0x4d2] sm:$0xff] }
 0x367   : >> { %v18674_v29 = vadd.f32 %v14461_v61, %v7885_v49  ;;  %v7884_v50 = vadd.f32 %v7805_v62, %v18448_v38  ;;  %v14464_v27 = vpop.f32.mrf.mxu0  ;;  %14763 = vmatmul.mubr.msk.f32.gmra.mxu0 %vm273_vm0, %v12490_v36  ;;  %v12432_v62 = vld [vmem:[%s14958_s20 + $0x4f9] sm:$0xff] }
 0x368   : >> { %v14414_v58 = vpop.f32.mrf.mxu1  ;;  %14713 = vmatmul.mubr.msk.f32.gmra.mxu1 %vm273_vm0, %v12425_v48  ;;  %14765 = vmatprep.mubr.msk.f32.mxu0 %vm273_vm0, %v12491_v4 }
 0x369   : >> { %v18679_v21 = vadd.f32 %v8192_v28, %v7884_v50  ;;  %v7887_v54 = vadd.f32 %v14414_v58, %v18456_v55  ;;  %14715 = vmatprep.mubr.msk.f32.mxu1 %vm273_vm0, %v12426_v8  ;;  %v8202_v38 = vpop.f32.mrf.mxu0  ;;  %v12497_v28 = vld [vmem:[%s14958_s20 + $0x4fa] sm:$0xff] }
 0x36a   : >> { %v7815_v1 = vpop.f32.mrf.mxu1 }
 0x36b   : >> { %v18688_v41 = vadd.f32 %v14464_v27, %v7887_v54  ;;  %v7886_v13 = vadd.f32 %v7815_v1, %v18462_v6  ;;  %v14467_v20 = vpop.f32.mrf.mxu0  ;;  %14766 = vmatmul.mubr.msk.f32.gmra.mxu0 %vm273_vm0, %v12492_v57  ;;  %v12498_v27 = vld [vmem:[%s14958_s20 + $0x502] sm:$0xff] }
 0x36c   : >> { %v14417_v53 = vpop.f32.mrf.mxu1  ;;  %14716 = vmatmul.mubr.msk.f32.gmra.mxu1 %vm273_vm0, %v12427_v40  ;;  %14768 = vmatprep.mubr.msk.f32.mxu0 %vm273_vm0, %v12493_v33 }
 0x36d   : >> { %v18693_v55 = vadd.f32 %v8202_v38, %v7886_v13  ;;  %v7889_v25 = vadd.f32 %v14417_v53, %v18469_v22  ;;  %14718 = vmatprep.mubr.msk.f32.mxu1 %vm273_vm0, %v12428_v37  ;;  %v8212_v6 = vpop.f32.mrf.mxu0 }
 0x36e   : >> { %v7825_v14 = vpop.f32.mrf.mxu1 }
 0x36f   : >> { %v18700_v51 = vadd.f32 %v14467_v20, %v7889_v25  ;;  %v7888_v30 = vadd.f32 %v7825_v14, %v18475_v5  ;;  %v14470_v49 = vpop.f32.mrf.mxu0  ;;  %14769 = vmatmul.mubr.msk.f32.gmra.mxu0 %vm273_vm0, %v12494_v47 }
 0x370   : >> { %v14420_v61 = vpop.f32.mrf.mxu1  ;;  %14719 = vmatmul.mubr.msk.f32.gmra.mxu1 %vm273_vm0, %v12429_v44  ;;  %14771 = vmatprep.mubr.msk.f32.mxu0 %vm273_vm0, %v18483_v11 }
 0x371   : >> { %v18705_v22 = vadd.f32 %v8212_v6, %v7888_v30  ;;  %v7891_v48 = vadd.f32 %v14420_v61, %v18486_v43  ;;  %14721 = vmatprep.mubr.msk.f32.mxu1 %vm273_vm0, %v18248_v23  ;;  %v8222_v5 = vpop.f32.mrf.mxu0  ;;  %v12433_v43 = vld [vmem:[%s14958_s20 + $0x501] sm:$0xff] }
 0x372   : >> { %v7835_v36 = vpop.f32.mrf.mxu1 }
 0x373   : >> { %v18714_v8 = vadd.f32 %v14470_v49, %v7891_v48  ;;  %v7890_v4 = vadd.f32 %v7835_v36, %v18493_v12  ;;  %v14473_v58 = vpop.f32.mrf.mxu0  ;;  %14772 = vmatmul.mubr.msk.f32.gmra.mxu0 %vm273_vm0, %v18500_v56 }
 0x374   : >> { %v14423_v50 = vpop.f32.mrf.mxu1  ;;  %14722 = vmatmul.mubr.msk.f32.gmra.mxu1 %vm273_vm0, %v18268_v46  ;;  %14774 = vmatprep.mubr.msk.f32.mxu0 %vm273_vm0, %v12497_v28 }
 0x375   : >> { %v18721_v23 = vadd.f32 %v8222_v5, %v7890_v4  ;;  %v7893_v11 = vadd.f32 %v14423_v50, %v18505_v18  ;;  %14724 = vmatprep.mubr.msk.f32.mxu1 %vm273_vm0, %v12432_v62  ;;  %v8232_v12 = vpop.f32.mrf.mxu0 }
 0x376   : >> { %v7845_v54 = vpop.f32.mrf.mxu1 }
 0x377   : >> { %v18728_v40 = vadd.f32 %v14473_v58, %v7893_v11  ;;  %v7892_v57 = vadd.f32 %v7845_v54, %v18511_v34  ;;  %v14476_v1 = vpop.f32.mrf.mxu0  ;;  %14775 = vmatmul.mubr.msk.f32.gmra.mxu0 %vm273_vm0, %v12498_v27 }
 0x378   : >> { %v14426_v46 = vpop.f32.mrf.mxu1  ;;  %14725 = vmatmul.mubr.msk.f32.gmra.mxu1 %vm273_vm0, %v12433_v43 }
 0x379   : >> { %v18733_v56 = vadd.f32 %v8232_v12, %v7892_v57  ;;  %v7895_v18 = vadd.f32 %v14426_v46, %v18520_v26  ;;  %v8242_v37 = vpop.f32.mrf.mxu0 }
 0x37a   : >> { %v7855_v38 = vpop.f32.mrf.mxu1 }
 0x37b   : >> { %v18736_v33 = vadd.f32 %v14476_v1, %v7895_v18  ;;  %v7894_v13 = vadd.f32 %v7855_v38, %v18525_v17  ;;  %v14531_v20 = vpop.f32.mrf.mxu0 }
 0x37c   : >> { %v14481_v53 = vpop.f32.mrf.mxu1 }
 0x37d   : >> { %v18739_v25 = vadd.f32 %v8242_v37, %v7894_v13  ;;  %v8641_v34 = vadd.f32 %v14481_v53, %v18534_v60  ;;  %v8868_v47 = vpop.f32.mrf.mxu0 }
 0x37e   : >> { %v8481_v44 = vpop.f32.mrf.mxu1 }
 0x37f   : >> { %v18742_v14 = vadd.f32 %v14531_v20, %v8641_v34  ;;  %v8640_v6 = vadd.f32 %v8481_v44, %v18539_v3  ;;  %v14534_v26 = vpop.f32.mrf.mxu0 }
 0x380   : >> { %v14484_v30 = vpop.f32.mrf.mxu1 }
 0x381   : >> { %v18745_v61 = vadd.f32 %v8868_v47, %v8640_v6  ;;  %v8643_v49 = vadd.f32 %v14484_v30, %v18548_v35  ;;  %v8878_v17 = vpop.f32.mrf.mxu0 }
 0x382   : >> { %v8491_v48 = vpop.f32.mrf.mxu1 }
 0x383   : >> { %v18748_v36 = vadd.f32 %v14534_v26, %v8643_v49  ;;  %v8642_v5 = vadd.f32 %v8491_v48, %v18553_v10  ;;  %v14537_v60 = vpop.f32.mrf.mxu0 }
 0x384   : >> { %v14487_v62 = vpop.f32.mrf.mxu1 }
 0x385   : >> { %v18751_v28 = vadd.f32 %v8878_v17, %v8642_v5  ;;  %v8645_v4 = vadd.f32 %v14487_v62, %v18562_v15  ;;  %v8888_v3 = vpop.f32.mrf.mxu0 }
 0x386   : >> { %v8501_v50 = vpop.f32.mrf.mxu1 }
 0x387   : >> { %v18754_v58 = vadd.f32 %v14537_v60, %v8645_v4  ;;  %v8644_v11 = vadd.f32 %v8501_v50, %v18567_v9  ;;  %v14540_v35 = vpop.f32.mrf.mxu0 }
 0x388   : >> { %v14490_v43 = vpop.f32.mrf.mxu1 }
 0x389   : >> { %v18757_v27 = vadd.f32 %v8888_v3, %v8644_v11  ;;  %v8647_v54 = vadd.f32 %v14490_v43, %v18576_v52  ;;  %v8898_v10 = vpop.f32.mrf.mxu0 }
 0x38a   : >> { %v8511_v12 = vpop.f32.mrf.mxu1 }
 0x38b   : >> { %v18760_v57 = vadd.f32 %v14540_v35, %v8647_v54  ;;  %v8646_v46 = vadd.f32 %v8511_v12, %v18581_v59  ;;  %v14543_v15 = vpop.f32.mrf.mxu0 }
 0x38c   : >> { %v14493_v1 = vpop.f32.mrf.mxu1 }
 0x38d   : >> { %v18763_v18 = vadd.f32 %v8898_v10, %v8646_v46  ;;  %v8649_v38 = vadd.f32 %v14493_v1, %v18590_v24  ;;  %v8908_v9 = vpop.f32.mrf.mxu0 }
 0x38e   : >> { %v8521_v37 = vpop.f32.mrf.mxu1 }
 0x38f   : >> { %v18766_v13 = vadd.f32 %v14543_v15, %v8649_v38  ;;  %v8648_v53 = vadd.f32 %v8521_v37, %v18595_v2  ;;  %v14546_v52 = vpop.f32.mrf.mxu0 }
 0x390   : >> { %v14496_v20 = vpop.f32.mrf.mxu1 }
 0x391   : >> { %v18769_v34 = vadd.f32 %v8908_v9, %v8648_v53  ;;  %v8651_v44 = vadd.f32 %v14496_v20, %v18604_v32  ;;  %v8918_v59 = vpop.f32.mrf.mxu0 }
 0x392   : >> { %v8531_v47 = vpop.f32.mrf.mxu1 }
 0x393   : >> { %v18772_v6 = vadd.f32 %v14546_v52, %v8651_v44  ;;  %v8650_v30 = vadd.f32 %v8531_v47, %v18609_v42  ;;  %v14549_v24 = vpop.f32.mrf.mxu0 }
 0x394   : >> { %v14499_v26 = vpop.f32.mrf.mxu1 }
 0x395   : >> { %v18775_v49 = vadd.f32 %v8918_v59, %v8650_v30  ;;  %v8653_v48 = vadd.f32 %v14499_v26, %v18618_v31  ;;  %v8928_v2 = vpop.f32.mrf.mxu0 }
 0x396   : >> { %v8541_v17 = vpop.f32.mrf.mxu1 }
 0x397   : >> { %v18778_v5 = vadd.f32 %v14549_v24, %v8653_v48  ;;  %v8652_v62 = vadd.f32 %v8541_v17, %v18623_v45  ;;  %v14552_v32 = vpop.f32.mrf.mxu0 }
 0x398   : >> { %v14502_v60 = vpop.f32.mrf.mxu1 }
 0x399   : >> { %v18781_v4 = vadd.f32 %v8928_v2, %v8652_v62  ;;  %v8655_v50 = vadd.f32 %v14502_v60, %v18632_v19  ;;  %v8938_v42 = vpop.f32.mrf.mxu0 }
 0x39a   : >> { %v8551_v3 = vpop.f32.mrf.mxu1 }
 0x39b   : >> { %v18784_v11 = vadd.f32 %v14552_v32, %v8655_v50  ;;  %v8654_v43 = vadd.f32 %v8551_v3, %v18637_v63  ;;  %v14555_v31 = vpop.f32.mrf.mxu0 }
 0x39c   : >> { %v14505_v35 = vpop.f32.mrf.mxu1 }
 0x39d   : >> { %v18787_v54 = vadd.f32 %v8938_v42, %v8654_v43  ;;  %v8657_v12 = vadd.f32 %v14505_v35, %v18646_v39  ;;  %v8948_v45 = vpop.f32.mrf.mxu0 }
 0x39e   : >> { %v8561_v10 = vpop.f32.mrf.mxu1 }
 0x39f   : >> { %v18790_v46 = vadd.f32 %v14555_v31, %v8657_v12  ;;  %v8656_v1 = vadd.f32 %v8561_v10, %v18651_v7  ;;  %v14558_v19 = vpop.f32.mrf.mxu0 }
 0x3a0   : >> { %v14508_v15 = vpop.f32.mrf.mxu1 }
 0x3a1   : >> { %v18793_v38 = vadd.f32 %v8948_v45, %v8656_v1  ;;  %v8659_v37 = vadd.f32 %v14508_v15, %v18660_v0  ;;  %v8958_v63 = vpop.f32.mrf.mxu0 }
 0x3a2   : >> { %v8571_v9 = vpop.f32.mrf.mxu1 }
 0x3a3   : >> { %v18796_v53 = vadd.f32 %v14558_v19, %v8659_v37  ;;  %v8658_v20 = vadd.f32 %v8571_v9, %v18665_v16  ;;  %v14561_v39 = vpop.f32.mrf.mxu0 }
 0x3a4   : >> { %v14511_v52 = vpop.f32.mrf.mxu1 }
 0x3a5   : >> { %19661 = vst [vmem:[#allocation8_spill] sm:$0xff] %v18796_v53  ;;  %v18799_v44 = vadd.f32 %v8958_v63, %v8658_v20  ;;  %v8661_v47 = vadd.f32 %v14511_v52, %v18674_v29  ;;  %v8968_v7 = vpop.f32.mrf.mxu0 }
 0x3a6   : >> { %v8581_v59 = vpop.f32.mrf.mxu1 }
 0x3a7   : >> { %19662 = vst [vmem:[#allocation11_spill] sm:$0xff] %v18799_v44  ;;  %v18802_v30 = vadd.f32 %v14561_v39, %v8661_v47  ;;  %v8660_v26 = vadd.f32 %v8581_v59, %v18679_v21  ;;  %v14564_v0 = vpop.f32.mrf.mxu0 }
 0x3a8   : >> { %v14514_v24 = vpop.f32.mrf.mxu1 }
 0x3a9   : >> { %19663 = vst [vmem:[#allocation37_spill] sm:$0xff] %v18802_v30  ;;  %v18805_v48 = vadd.f32 %v8968_v7, %v8660_v26  ;;  %v8663_v17 = vadd.f32 %v14514_v24, %v18688_v41  ;;  %v8978_v16 = vpop.f32.mrf.mxu0 }
 0x3aa   : >> { %v8591_v2 = vpop.f32.mrf.mxu1 }
 0x3ab   : >> { %19664 = vst [vmem:[#allocation12_spill] sm:$0xff] %v18805_v48  ;;  %v18808_v62 = vadd.f32 %v14564_v0, %v8663_v17  ;;  %v8662_v60 = vadd.f32 %v8591_v2, %v18693_v55  ;;  %v14567_v29 = vpop.f32.mrf.mxu0 }
 0x3ac   : >> { %v14517_v32 = vpop.f32.mrf.mxu1 }
 0x3ad   : >> { %19665 = vst [vmem:[#allocation36_spill] sm:$0xff] %v18808_v62  ;;  %v18811_v50 = vadd.f32 %v8978_v16, %v8662_v60  ;;  %v8665_v3 = vadd.f32 %v14517_v32, %v18700_v51  ;;  %v8988_v21 = vpop.f32.mrf.mxu0 }
 0x3ae   : >> { %v8601_v42 = vpop.f32.mrf.mxu1 }
 0x3af   : >> { %19666 = vst [vmem:[#allocation13_spill] sm:$0xff] %v18811_v50  ;;  %v18814_v43 = vadd.f32 %v14567_v29, %v8665_v3  ;;  %v8664_v35 = vadd.f32 %v8601_v42, %v18705_v22  ;;  %v14570_v41 = vpop.f32.mrf.mxu0 }
 0x3b0   : >> { %v14520_v31 = vpop.f32.mrf.mxu1 }
 0x3b1   : >> { %19667 = vst [vmem:[#allocation39_spill] sm:$0xff] %v18814_v43  ;;  %v18817_v12 = vadd.f32 %v8988_v21, %v8664_v35  ;;  %v8667_v10 = vadd.f32 %v14520_v31, %v18714_v8  ;;  %v8998_v55 = vpop.f32.mrf.mxu0 }
 0x3b2   : >> { %v8611_v45 = vpop.f32.mrf.mxu1 }
 0x3b3   : >> { %19668 = vst [vmem:[#allocation14_spill] sm:$0xff] %v18817_v12  ;;  %v18820_v1 = vadd.f32 %v14570_v41, %v8667_v10  ;;  %v8666_v15 = vadd.f32 %v8611_v45, %v18721_v23  ;;  %v14573_v51 = vpop.f32.mrf.mxu0 }
 0x3b4   : >> { %v14523_v19 = vpop.f32.mrf.mxu1 }
 0x3b5   : >> { %19669 = vst [vmem:[#allocation45_spill] sm:$0xff] %v18820_v1  ;;  %v18823_v37 = vadd.f32 %v8998_v55, %v8666_v15  ;;  %v8669_v9 = vadd.f32 %v14523_v19, %v18728_v40  ;;  %v9008_v22 = vpop.f32.mrf.mxu0 }
 0x3b6   : >> { %v8621_v63 = vpop.f32.mrf.mxu1 }
 0x3b7   : >> { %19670 = vst [vmem:[#allocation15_spill] sm:$0xff] %v18823_v37  ;;  %v18826_v20 = vadd.f32 %v14573_v51, %v8669_v9  ;;  %v8668_v52 = vadd.f32 %v8621_v63, %v18733_v56  ;;  %v14576_v8 = vpop.f32.mrf.mxu0 }
 0x3b8   : >> { %v14526_v39 = vpop.f32.mrf.mxu1 }
 0x3b9   : >> { %19671 = vst [vmem:[#allocation43_spill] sm:$0xff] %v18826_v20  ;;  %v18829_v47 = vadd.f32 %v9008_v22, %v8668_v52  ;;  %v8671_v59 = vadd.f32 %v14526_v39, %v18736_v33  ;;  %v9018_v23 = vpop.f32.mrf.mxu0 }
 0x3ba   : >> { %v8631_v7 = vpop.f32.mrf.mxu1 }
 0x3bb   : >> { %19672 = vst [vmem:[#allocation16_spill] sm:$0xff] %v18829_v47  ;;  %v18832_v26 = vadd.f32 %v14576_v8, %v8671_v59  ;;  %v8670_v24 = vadd.f32 %v8631_v7, %v18739_v25  ;;  %v18835_v40 = vpop.f32.mrf.mxu0 }
 0x3bc   : >> { %v14581_v0 = vpop.f32.mrf.mxu1 }
 0x3bd   : >> { %19673 = vst [vmem:[#allocation44_spill] sm:$0xff] %v18832_v26  ;;  %v18837_v17 = vadd.f32 %v9018_v23, %v8670_v24  ;;  %v18839_v16 = vpop.f32.mrf.mxu0 }
 0x3be   : >> { %v9255_v2 = vpop.f32.mrf.mxu1 }
 0x3bf   : >> { %19674 = vst [vmem:[#allocation17_spill] sm:$0xff] %v18837_v17  ;;  %v18843_v60 = vpop.f32.mrf.mxu0 }
 0x3c0   : >> { %v18841_v56 = vpop.f32.mrf.mxu1 }
 0x3c1   : >> { %v18847_v33 = vpop.f32.mrf.mxu0 }
 0x3c2   : >> { %v18845_v32 = vpop.f32.mrf.mxu1 }
 0x3c3   : >> { %v18851_v3 = vpop.f32.mrf.mxu0 }
 0x3c4   : >> { %v18849_v29 = vpop.f32.mrf.mxu1 }
 0x3c5   : >> { %v18855_v42 = vpop.f32.mrf.mxu0 }
 0x3c6   : >> { %v18853_v25 = vpop.f32.mrf.mxu1 }
 0x3c7   : >> { %v18859_v35 = vpop.f32.mrf.mxu0 }
 0x3c8   : >> { %v18857_v21 = vpop.f32.mrf.mxu1 }
 0x3c9   : >> { %v18863_v41 = vpop.f32.mrf.mxu0 }
 0x3ca   : >> { %v18861_v31 = vpop.f32.mrf.mxu1 }
 0x3cb   : >> { %v18867_v45 = vpop.f32.mrf.mxu0 }
 0x3cc   : >> { %v18865_v10 = vpop.f32.mrf.mxu1 }
 0x3cd   : >> { %v18871_v15 = vpop.f32.mrf.mxu0 }
 0x3ce   : >> { %v18869_v55 = vpop.f32.mrf.mxu1 }
 0x3cf   : >> { %v18875_v51 = vpop.f32.mrf.mxu0 }
 0x3d0   : >> { %v18873_v19 = vpop.f32.mrf.mxu1 }
 0x3d1   : >> { %v18879_v63 = vpop.f32.mrf.mxu0 }
 0x3d2   : >> { %v18877_v9 = vpop.f32.mrf.mxu1 }
 0x3d3   : >> { %v18883_v52 = vpop.f32.mrf.mxu0 }
 0x3d4   : >> { %v18881_v22 = vpop.f32.mrf.mxu1 }
 0x3d5   : >> { %v18887_v8 = vpop.f32.mrf.mxu0 }
 0x3d6   : >> { %v18885_v39 = vpop.f32.mrf.mxu1 }
 0x3d7   : >> { %v18891_v7 = vpop.f32.mrf.mxu0 }
 0x3d8   : >> { %v18889_v59 = vpop.f32.mrf.mxu1 }
 0x3d9   : >> { %v18895_v24 = vpop.f32.mrf.mxu0 }
 0x3da   : >> { %v18893_v23 = vpop.f32.mrf.mxu1 }
 0x3db   : >> { %v18899_v26 = vpop.f32.mrf.mxu0 }
 0x3dc   : >> { %v18897_v17 = vpop.f32.mrf.mxu1 }
 0x3dd   : >> { %v18903_v20 = vpop.f32.mrf.mxu0 }
 0x3de   : >> { %v18901_v47 = vpop.f32.mrf.mxu1  ;;  %19675 = vst [vmem:[#allocation47_spill] sm:$0xff] %v18903_v20 }
 0x3df   : >> { %v18907_v1 = vpop.f32.mrf.mxu0 }
 0x3e0   : >> { %v18905_v37 = vpop.f32.mrf.mxu1  ;;  %19677 = vst [vmem:[#allocation48_spill] sm:$0xff] %v18907_v1 }
 0x3e1   : >> { %19676 = vst [vmem:[#allocation18_spill] sm:$0xff] %v18905_v37  ;;  %v18911_v43 = vpop.f32.mrf.mxu0 }
 0x3e2   : >> { %v18909_v12 = vpop.f32.mrf.mxu1  ;;  %19679 = vst [vmem:[#allocation51_spill] sm:$0xff] %v18911_v43 }
 0x3e3   : >> { %19678 = vst [vmem:[#allocation19_spill] sm:$0xff] %v18909_v12  ;;  %v18915_v62 = vpop.f32.mrf.mxu0 }
 0x3e4   : >> { %v18913_v50 = vpop.f32.mrf.mxu1  ;;  %19681 = vst [vmem:[#allocation52_spill] sm:$0xff] %v18915_v62 }
 0x3e5   : >> { %19680 = vst [vmem:[#allocation20_spill] sm:$0xff] %v18913_v50  ;;  %v18919_v30 = vpop.f32.mrf.mxu0 }
 0x3e6   : >> { %v18917_v48 = vpop.f32.mrf.mxu1  ;;  %19683 = vst [vmem:[#allocation55_spill] sm:$0xff] %v18919_v30 }
 0x3e7   : >> { %19682 = vst [vmem:[#allocation21_spill] sm:$0xff] %v18917_v48  ;;  %v18923_v53 = vpop.f32.mrf.mxu0 }
 0x3e8   : >> { %v18921_v44 = vpop.f32.mrf.mxu1  ;;  %19685 = vst [vmem:[#allocation56_spill] sm:$0xff] %v18923_v53 }
 0x3e9   : >> { %19684 = vst [vmem:[#allocation22_spill] sm:$0xff] %v18921_v44  ;;  %v18927_v37 = vpop.f32.mrf.mxu0 }
 0x3ea   : >> { %v18925_v20 = vpop.f32.mrf.mxu1  ;;  %19687 = vst [vmem:[#allocation59_spill] sm:$0xff] %v18927_v37 }
 0x3eb   : >> { %19686 = vst [vmem:[#allocation23_spill] sm:$0xff] %v18925_v20  ;;  %v18931_v12 = vpop.f32.mrf.mxu0 }
 0x3ec   : >> { %v18929_v1 = vpop.f32.mrf.mxu1  ;;  %19689 = vst [vmem:[#allocation60_spill] sm:$0xff] %v18931_v12  ;;  %v9415_v12 = vadd.f32 %v14581_v0, %v18742_v14  ;;  %v9416_v0 = vadd.f32 %v18845_v32, %v18751_v28  ;;  %v9418_v28 = vadd.f32 %v18853_v25, %v18757_v27 }
 0x3ed   : >> { %19688 = vst [vmem:[#allocation24_spill] sm:$0xff] %v18929_v1  ;;  %v18935_v50 = vpop.f32.mrf.mxu0 }
 0x3ee   : >> { %v18933_v43 = vpop.f32.mrf.mxu1  ;;  %19691 = vst [vmem:[#allocation63_spill] sm:$0xff] %v18935_v50  ;;  %v9807_v25 = vadd.f32 %v18855_v42, %v9418_v28 }
 0x3ef   : >> { %19690 = vst [vmem:[#allocation25_spill] sm:$0xff] %v18933_v43  ;;  %v18939_v48 = vpop.f32.mrf.mxu0 }
 0x3f0   : >> { %v18937_v62 = vpop.f32.mrf.mxu1  ;;  %19692 = vst [vmem:[#allocation26_spill] sm:$0xff] %v18939_v48  ;;  %v9414_v48 = vadd.f32 %v9255_v2, %v18745_v61  ;;  %v9419_v61 = vadd.f32 %v18849_v29, %v18754_v58  ;;  %v18974_v2 = vld [vmem:[%s19180_s2] ss:$0 sm:$0xff]  ;;  %v9805_v58 = vadd.f32 %v18847_v33, %v9416_v0 }
 0x3f1   : >> { %v18943_v44 = vpop.f32.mrf.mxu0 }
 0x3f2   : >> { %v18941_v30 = vpop.f32.mrf.mxu1  ;;  %19694 = vst [vmem:[#allocation27_spill] sm:$0xff] %v18943_v44  ;;  %v9803_v14 = vadd.f32 %v18839_v16, %v9414_v48 }
 0x3f3   : >> { %19693 = vst [vmem:[#allocation64_spill] sm:$0xff] %v18941_v30  ;;  %v18947_v20 = vpop.f32.mrf.mxu0 }
 0x3f4   : >> { %v18945_v53 = vpop.f32.mrf.mxu1  ;;  %19696 = vst [vmem:[#allocation28_spill] sm:$0xff] %v18947_v20  ;;  %v9417_v20 = vadd.f32 %v18841_v56, %v18748_v36 }
 0x3f5   : >> { %19695 = vst [vmem:[#allocation67_spill] sm:$0xff] %v18945_v53  ;;  %v18951_v1 = vpop.f32.mrf.mxu0  ;;  %v9804_v53 = vadd.f32 %v18835_v40, %v9415_v12 }
 0x3f6   : >> { %v18949_v37 = vpop.f32.mrf.mxu1  ;;  %19698 = vst [vmem:[#allocation29_spill] sm:$0xff] %v18951_v1  ;;  %v9806_v36 = vadd.f32 %v18843_v60, %v9417_v20 }
 0x3f7   : >> { %19697 = vst [vmem:[#allocation68_spill] sm:$0xff] %v18949_v37  ;;  %v18956_v50 = vpop.f32.mrf.mxu0 }
 0x3f8   : >> { %v18954_v43 = vpop.f32.mrf.mxu1  ;;  %19699 = vst [vmem:[#allocation71_spill] sm:$0xff] %v18956_v50 }
 0x3f9   : >> { %v18961_v44 = vpop.f32.mrf.mxu0 }
 0x3fa   : >> { %v18959_v30 = vpop.f32.mrf.mxu1  ;;  %19701 = vst [vmem:[#allocation3_spill] sm:$0xff] %v18961_v44  ;;  %v9808_v44 = vadd.f32 %v18851_v3, %v9419_v61 }
 0x3fb   : >> { %19700 = vst [vmem:[#allocation30_spill] sm:$0xff] %v18959_v30  ;;  %v14731_v1 = vpop.f32.mrf.mxu0  ;;  %v9421_v30 = vadd.f32 %v18857_v21, %v18760_v57 }
 0x3fc   : >> { %v14681_v37 = vpop.f32.mrf.mxu1 }
 0x3fd   : >> { %v10191_v50 = vadd.f32 %v14681_v37, %v9804_v53  ;;  %v10418_v40 = vpop.f32.mrf.mxu0 }
 0x3fe   : >> { %v10031_v12 = vpop.f32.mrf.mxu1 }
 0x3ff   : >> { %v10578_v56 = vadd.f32 %v14731_v1, %v10191_v50  ;;  %v10190_v48 = vadd.f32 %v10031_v12, %v9803_v14  ;;  %v14734_v37 = vpop.f32.mrf.mxu0  ;;  %v9420_v14 = vadd.f32 %v18861_v31, %v18763_v18 }
 0x400   : >> { %v14684_v53 = vpop.f32.mrf.mxu1 }
 0x401   : >> { %v10617_v16 = vadd.f32 %v18974_v2, %v10578_v56  ;;  %v10577_v32 = vadd.f32 %v10418_v40, %v10190_v48  ;;  %v10193_v29 = vadd.f32 %v14684_v53, %v9806_v36  ;;  %v10428_v1 = vpop.f32.mrf.mxu0  ;;  %v9810_v40 = vadd.f32 %v18859_v35, %v9421_v30 }
 0x402   : >> { %v10041_v50 = vpop.f32.mrf.mxu1  ;;  %v9423_v36 = vadd.f32 %v18865_v10, %v18766_v13  ;;  %v9809_v53 = vadd.f32 %v18863_v41, %v9420_v14 }
 0x403   : >> { %v10649_v20 = vmax.f32 %v10617_v16, 0.0  ;;  %v10616_v27 = vadd.f32 %v18974_v2, %v10577_v32  ;;  %v10580_v60 = vadd.f32 %v14734_v37, %v10193_v29  ;;  %v10192_v33 = vadd.f32 %v10041_v50, %v9805_v58  ;;  %v14737_v0 = vpop.f32.mrf.mxu0 }
 0x404   : >> { %v14687_v3 = vpop.f32.mrf.mxu1  ;;  %v9812_v16 = vadd.f32 %v18867_v45, %v9423_v36  ;;  %v9425_v32 = vadd.f32 %v18873_v19, %v18772_v6 }
 0x405   : >> { %10683 = vst.msk [vmem:[%s18986_s13 + $0x8] sm:$0xff] %vm273_vm0, %v10649_v20  ;;  %v10648_v57 = vmax.f32 %v10616_v27, 0.0  ;;  %v10619_v21 = vadd.f32 %v18974_v2, %v10580_v60  ;;  %v10579_v61 = vadd.f32 %v10428_v1, %v10192_v33  ;;  %v10195_v12 = vadd.f32 %v14687_v3, %v9808_v44  ;;  %v10438_v42 = vpop.f32.mrf.mxu0 }
 0x406   : >> { %v10051_v56 = vpop.f32.mrf.mxu1  ;;  %v9422_v44 = vadd.f32 %v18869_v55, %v18769_v34  ;;  %v9424_v27 = vadd.f32 %v18877_v9, %v18775_v49  ;;  %v9814_v14 = vadd.f32 %v18875_v51, %v9425_v32  ;;  %v9427_v3 = vadd.f32 %v18881_v22, %v18778_v5 }
 0x407   : >> { %10682 = vst.msk [vmem:[%s18986_s13] sm:$0xff] %vm273_vm0, %v10648_v57  ;;  %v10651_v18 = vmax.f32 %v10619_v21, 0.0  ;;  %v10618_v31 = vadd.f32 %v18974_v2, %v10579_v61  ;;  %v10582_v48 = vadd.f32 %v14737_v0, %v10195_v12  ;;  %v10194_v28 = vadd.f32 %v10051_v56, %v9807_v25  ;;  %v14740_v30 = vpop.f32.mrf.mxu0 }
 0x408   : >> { %v14690_v37 = vpop.f32.mrf.mxu1  ;;  %v9811_v20 = vadd.f32 %v18871_v15, %v9422_v44  ;;  %v9813_v61 = vadd.f32 %v18879_v63, %v9424_v27  ;;  %v9426_v12 = vadd.f32 %v18885_v39, %v18781_v4  ;;  %v9428_v44 = vadd.f32 %v18893_v23, %v18787_v54  ;;  %v19703_v27 = vld [vmem:[#allocation18_spill] sm:$0xff] }
 0x409   : >> { %10685 = vst.msk [vmem:[%s18986_s13 + $0x18] sm:$0xff] %vm273_vm0, %v10651_v18  ;;  %v10650_v13 = vmax.f32 %v10618_v31, 0.0  ;;  %v10621_v35 = vadd.f32 %v18974_v2, %v10582_v48  ;;  %v10581_v10 = vadd.f32 %v10438_v42, %v10194_v28  ;;  %v10197_v58 = vadd.f32 %v14690_v37, %v9810_v40  ;;  %v10448_v41 = vpop.f32.mrf.mxu0 }
 0x40a   : >> { %v10061_v29 = vpop.f32.mrf.mxu1  ;;  %v9816_v42 = vadd.f32 %v18883_v52, %v9427_v3  ;;  %v9429_v18 = vadd.f32 %v18889_v59, %v18784_v11  ;;  %v19706_v3 = vld [vmem:[#allocation19_spill] sm:$0xff] }
 0x40b   : >> { %10684 = vst.msk [vmem:[%s18986_s13 + $0x10] sm:$0xff] %vm273_vm0, %v10650_v13  ;;  %v10653_v34 = vmax.f32 %v10621_v35, 0.0  ;;  %v10620_v55 = vadd.f32 %v18974_v2, %v10581_v10  ;;  %v10584_v50 = vadd.f32 %v14740_v30, %v10197_v58  ;;  %v10196_v1 = vadd.f32 %v10061_v29, %v9809_v53  ;;  %v14743_v45 = vpop.f32.mrf.mxu0 }
 0x40c   : >> { %v14693_v60 = vpop.f32.mrf.mxu1  ;;  %v9815_v53 = vadd.f32 %v18887_v8, %v9426_v12  ;;  %v9818_v35 = vadd.f32 %v18891_v7, %v9429_v18  ;;  %v9431_v10 = vadd.f32 %v18897_v17, %v18790_v46  ;;  %v9817_v29 = vadd.f32 %v18895_v24, %v9428_v44 }
 0x40d   : >> { %10687 = vst.msk [vmem:[%s18986_s13 + $0x28] sm:$0xff] %vm273_vm0, %v10653_v34  ;;  %v10652_v6 = vmax.f32 %v10620_v55, 0.0  ;;  %v10623_v19 = vadd.f32 %v18974_v2, %v10584_v50  ;;  %v10583_v33 = vadd.f32 %v10448_v41, %v10196_v1  ;;  %v10199_v25 = vadd.f32 %v14693_v60, %v9812_v16  ;;  %v10458_v15 = vpop.f32.mrf.mxu0 }
 0x40e   : >> { %v10071_v0 = vpop.f32.mrf.mxu1  ;;  %v9430_v41 = vadd.f32 %v18901_v47, %v18793_v38  ;;  %v9820_v1 = vadd.f32 %v18899_v26, %v9431_v10  ;;  %v19715_v10 = vld [vmem:[#allocation22_spill] sm:$0xff] }
 0x40f   : >> { %10686 = vst.msk [vmem:[%s18986_s13 + $0x20] sm:$0xff] %vm273_vm0, %v10652_v6  ;;  %v10655_v49 = vmax.f32 %v10623_v19, 0.0  ;;  %v10622_v9 = vadd.f32 %v18974_v2, %v10583_v33  ;;  %v10586_v57 = vadd.f32 %v14743_v45, %v10199_v25  ;;  %v10198_v21 = vadd.f32 %v10071_v0, %v9811_v20  ;;  %v14746_v51 = vpop.f32.mrf.mxu0  ;;  %v19702_v20 = vld [vmem:[#allocation8_spill] sm:$0xff]  ;;  %v19704_v33 = vld [vmem:[#allocation47_spill] sm:$0xff] }
 0x410   : >> { %v14696_v40 = vpop.f32.mrf.mxu1  ;;  %v9433_v60 = vadd.f32 %v19703_v27, %v19702_v20  ;;  %v9819_v25 = vadd.f32 %v19704_v33, %v9430_v41  ;;  %v19716_v41 = vld [vmem:[#allocation55_spill] sm:$0xff] }
 0x411   : >> { %10689 = vst.msk [vmem:[%s18986_s13 + $0x38] sm:$0xff] %vm273_vm0, %v10655_v49  ;;  %v10654_v5 = vmax.f32 %v10622_v9, 0.0  ;;  %v10625_v22 = vadd.f32 %v18974_v2, %v10586_v57  ;;  %v10585_v36 = vadd.f32 %v10458_v15, %v10198_v21  ;;  %v10201_v56 = vadd.f32 %v14696_v40, %v9814_v14  ;;  %v10468_v63 = vpop.f32.mrf.mxu0  ;;  %v19705_v14 = vld [vmem:[#allocation11_spill] sm:$0xff]  ;;  %v19708_v40 = vld [vmem:[#allocation37_spill] sm:$0xff] }
 0x412   : >> { %v10081_v31 = vpop.f32.mrf.mxu1  ;;  %v9432_v0 = vadd.f32 %v19706_v3, %v19705_v14 }
 0x413   : >> { %10688 = vst.msk [vmem:[%s18986_s13 + $0x30] sm:$0xff] %vm273_vm0, %v10654_v5  ;;  %v10657_v4 = vmax.f32 %v10625_v22, 0.0  ;;  %v10624_v39 = vadd.f32 %v18974_v2, %v10585_v36  ;;  %v10588_v48 = vadd.f32 %v14746_v51, %v10201_v56  ;;  %v10200_v28 = vadd.f32 %v10081_v31, %v9813_v61  ;;  %v14749_v52 = vpop.f32.mrf.mxu0  ;;  %v19707_v61 = vld [vmem:[#allocation48_spill] sm:$0xff] }
 0x414   : >> { %v14699_v37 = vpop.f32.mrf.mxu1  ;;  %v9822_v12 = vadd.f32 %v19707_v61, %v9433_v60  ;;  %v19709_v51 = vld [vmem:[#allocation20_spill] sm:$0xff] }
 0x415   : >> { %10691 = vst.msk [vmem:[%s18986_s13 + $0x48] sm:$0xff] %vm273_vm0, %v10657_v4  ;;  %v10656_v11 = vmax.f32 %v10624_v39, 0.0  ;;  %v10627_v59 = vadd.f32 %v18974_v2, %v10588_v48  ;;  %v10587_v30 = vadd.f32 %v10468_v63, %v10200_v28  ;;  %v10203_v13 = vadd.f32 %v14699_v37, %v9816_v42  ;;  %v10478_v8 = vpop.f32.mrf.mxu0  ;;  %v19710_v63 = vld [vmem:[#allocation51_spill] sm:$0xff]  ;;  %v19711_v39 = vld [vmem:[#allocation12_spill] sm:$0xff]  ;;  %v19712_v48 = vld [vmem:[#allocation21_spill] sm:$0xff] }
 0x416   : >> { %v10091_v58 = vpop.f32.mrf.mxu1  ;;  %v9435_v5 = vadd.f32 %v19709_v51, %v19708_v40  ;;  %v9821_v4 = vadd.f32 %v19710_v63, %v9432_v0  ;;  %v9434_v28 = vadd.f32 %v19712_v48, %v19711_v39 }
 0x417   : >> { %10690 = vst.msk [vmem:[%s18986_s13 + $0x40] sm:$0xff] %vm273_vm0, %v10656_v11  ;;  %v10659_v54 = vmax.f32 %v10627_v59, 0.0  ;;  %v10626_v23 = vadd.f32 %v18974_v2, %v10587_v30  ;;  %v10590_v16 = vadd.f32 %v14749_v52, %v10203_v13  ;;  %v10202_v32 = vadd.f32 %v10091_v58, %v9815_v53  ;;  %v14752_v7 = vpop.f32.mrf.mxu0  ;;  %v19713_v30 = vld [vmem:[#allocation52_spill] sm:$0xff] }
 0x418   : >> { %v14702_v34 = vpop.f32.mrf.mxu1  ;;  %v9824_v13 = vadd.f32 %v19713_v30, %v9435_v5 }
 0x419   : >> { %10693 = vst.msk [vmem:[%s18986_s13 + $0x58] sm:$0xff] %vm273_vm0, %v10659_v54  ;;  %v10658_v46 = vmax.f32 %v10626_v23, 0.0  ;;  %v10629_v17 = vadd.f32 %v18974_v2, %v10590_v16  ;;  %v10589_v55 = vadd.f32 %v10478_v8, %v10202_v32  ;;  %v10205_v50 = vadd.f32 %v14702_v34, %v9818_v35  ;;  %v10488_v24 = vpop.f32.mrf.mxu0  ;;  %v19714_v35 = vld [vmem:[#allocation36_spill] sm:$0xff] }
 0x41a   : >> { %v10101_v45 = vpop.f32.mrf.mxu1  ;;  %v9437_v58 = vadd.f32 %v19715_v10, %v19714_v35  ;;  %v9823_v34 = vadd.f32 %v19716_v41, %v9434_v28  ;;  %v19727_v28 = vld [vmem:[#allocation63_spill] sm:$0xff]  ;;  %v19730_v10 = vld [vmem:[#allocation26_spill] sm:$0xff] }
 0x41b   : >> { %10692 = vst.msk [vmem:[%s18986_s13 + $0x50] sm:$0xff] %vm273_vm0, %v10658_v46  ;;  %v10661_v38 = vmax.f32 %v10629_v17, 0.0  ;;  %v10628_v47 = vadd.f32 %v18974_v2, %v10589_v55  ;;  %v10592_v6 = vadd.f32 %v14752_v7, %v10205_v50  ;;  %v10204_v19 = vadd.f32 %v10101_v45, %v9817_v29  ;;  %v14755_v26 = vpop.f32.mrf.mxu0  ;;  %v19717_v7 = vld [vmem:[#allocation13_spill] sm:$0xff]  ;;  %v19718_v46 = vld [vmem:[#allocation23_spill] sm:$0xff]  ;;  %v19719_v45 = vld [vmem:[#allocation56_spill] sm:$0xff] }
 0x41c   : >> { %v14705_v15 = vpop.f32.mrf.mxu1  ;;  %v9436_v17 = vadd.f32 %v19718_v46, %v19717_v7  ;;  %v19733_v46 = vld [vmem:[#allocation27_spill] sm:$0xff] }
 0x41d   : >> { %10695 = vst.msk [vmem:[%s18986_s13 + $0x68] sm:$0xff] %vm273_vm0, %v10661_v38  ;;  %v10660_v49 = vmax.f32 %v10628_v47, 0.0  ;;  %v10631_v9 = vadd.f32 %v18974_v2, %v10592_v6  ;;  %v10591_v57 = vadd.f32 %v10488_v24, %v10204_v19  ;;  %v10207_v21 = vadd.f32 %v14705_v15, %v9820_v1  ;;  %v10498_v36 = vpop.f32.mrf.mxu0  ;;  %v19720_v38 = vld [vmem:[#allocation39_spill] sm:$0xff]  ;;  %v19721_v47 = vld [vmem:[#allocation24_spill] sm:$0xff] }
 0x41e   : >> { %v10111_v22 = vpop.f32.mrf.mxu1  ;;  %v9826_v24 = vadd.f32 %v19719_v45, %v9437_v58  ;;  %v9439_v6 = vadd.f32 %v19721_v47, %v19720_v38  ;;  %v19722_v15 = vld [vmem:[#allocation59_spill] sm:$0xff]  ;;  %v19736_v47 = vld [vmem:[#allocation28_spill] sm:$0xff] }
 0x41f   : >> { %10694 = vst.msk [vmem:[%s18986_s13 + $0x60] sm:$0xff] %vm273_vm0, %v10660_v49  ;;  %v10663_v56 = vmax.f32 %v10631_v9, 0.0  ;;  %v10630_v42 = vadd.f32 %v18974_v2, %v10591_v57  ;;  %v10594_v18 = vadd.f32 %v14755_v26, %v10207_v21  ;;  %v10206_v31 = vadd.f32 %v10111_v22, %v9819_v25  ;;  %v14758_v44 = vpop.f32.mrf.mxu0  ;;  %v19723_v49 = vld [vmem:[#allocation14_spill] sm:$0xff]  ;;  %v19724_v9 = vld [vmem:[#allocation25_spill] sm:$0xff]  ;;  %v19725_v22 = vld [vmem:[#allocation60_spill] sm:$0xff] }
 0x420   : >> { %v14708_v53 = vpop.f32.mrf.mxu1  ;;  %v9825_v26 = vadd.f32 %v19722_v15, %v9436_v17  ;;  %v9438_v57 = vadd.f32 %v19724_v9, %v19723_v49  ;;  %v19738_v49 = vld [vmem:[#allocation29_spill] sm:$0xff] }
 0x421   : >> { %10697 = vst.msk [vmem:[%s18986_s13 + $0x78] sm:$0xff] %vm273_vm0, %v10663_v56  ;;  %v10662_v37 = vmax.f32 %v10630_v42, 0.0  ;;  %v10633_v52 = vadd.f32 %v18974_v2, %v10594_v18  ;;  %v10593_v11 = vadd.f32 %v10498_v36, %v10206_v31  ;;  %v10209_v59 = vadd.f32 %v14708_v53, %v9822_v12  ;;  %v10508_v54 = vpop.f32.mrf.mxu0  ;;  %v19726_v56 = vld [vmem:[#allocation45_spill] sm:$0xff] }
 0x422   : >> { %v10121_v8 = vpop.f32.mrf.mxu1  ;;  %v9828_v36 = vadd.f32 %v19725_v22, %v9439_v6  ;;  %v9441_v42 = vadd.f32 %v18937_v62, %v19726_v56  ;;  %v9827_v53 = vadd.f32 %v19727_v28, %v9438_v57  ;;  %v19739_v57 = vld [vmem:[#allocation17_spill] sm:$0xff] }
 0x423   : >> { %10696 = vst.msk [vmem:[%s18986_s13 + $0x70] sm:$0xff] %vm273_vm0, %v10662_v37  ;;  %v10665_v23 = vmax.f32 %v10633_v52, 0.0  ;;  %v10632_v16 = vadd.f32 %v18974_v2, %v10593_v11  ;;  %v10596_v32 = vadd.f32 %v14758_v44, %v10209_v59  ;;  %v10208_v29 = vadd.f32 %v10121_v8, %v9821_v4  ;;  %v14761_v50 = vpop.f32.mrf.mxu0  ;;  %v19728_v44 = vld [vmem:[#allocation15_spill] sm:$0xff]  ;;  %v19729_v37 = vld [vmem:[#allocation64_spill] sm:$0xff] }
 0x424   : >> { %v14711_v55 = vpop.f32.mrf.mxu1  ;;  %v9440_v52 = vadd.f32 %v19729_v37, %v19728_v44  ;;  %v9830_v58 = vadd.f32 %v19730_v10, %v9441_v42  ;;  %v19731_v8 = vld [vmem:[#allocation43_spill] sm:$0xff] }
 0x425   : >> { %10699 = vst.msk [vmem:[%s18986_s13 + $0x88] sm:$0xff] %vm273_vm0, %v10665_v23  ;;  %v10664_v1 = vmax.f32 %v10632_v16, 0.0  ;;  %v10635_v20 = vadd.f32 %v18974_v2, %v10596_v32  ;;  %v10595_v27 = vadd.f32 %v10508_v54, %v10208_v29  ;;  %v10211_v60 = vadd.f32 %v14711_v55, %v9824_v13  ;;  %v10518_v33 = vpop.f32.mrf.mxu0  ;;  %v19732_v54 = vld [vmem:[#allocation67_spill] sm:$0xff]  ;;  %v19734_v55 = vld [vmem:[#allocation16_spill] sm:$0xff] }
 0x426   : >> { %v10131_v19 = vpop.f32.mrf.mxu1  ;;  %v9443_v23 = vadd.f32 %v19732_v54, %v19731_v8  ;;  %v9829_v17 = vadd.f32 %v19733_v46, %v9440_v52 }
 0x427   : >> { %10698 = vst.msk [vmem:[%s18986_s13 + $0x80] sm:$0xff] %vm273_vm0, %v10664_v1  ;;  %v10667_v25 = vmax.f32 %v10635_v20, 0.0  ;;  %v10634_v14 = vadd.f32 %v18974_v2, %v10595_v27  ;;  %v10598_v3 = vadd.f32 %v14761_v50, %v10211_v60  ;;  %v10210_v0 = vadd.f32 %v10131_v19, %v9823_v34  ;;  %v14764_v61 = vpop.f32.mrf.mxu0  ;;  %v19735_v50 = vld [vmem:[#allocation68_spill] sm:$0xff] }
 0x428   : >> { %v14714_v21 = vpop.f32.mrf.mxu1  ;;  %v9442_v1 = vadd.f32 %v19735_v50, %v19734_v55  ;;  %v9832_v6 = vadd.f32 %v19736_v47, %v9443_v23  ;;  %v19737_v19 = vld [vmem:[#allocation44_spill] sm:$0xff] }
 0x429   : >> { %10701 = vst.msk [vmem:[%s18986_s13 + $0x98] sm:$0xff] %vm273_vm0, %v10667_v25  ;;  %v10666_v12 = vmax.f32 %v10634_v14, 0.0  ;;  %v10637_v40 = vadd.f32 %v18974_v2, %v10598_v3  ;;  %v10597_v51 = vadd.f32 %v10518_v33, %v10210_v0  ;;  %v10213_v5 = vadd.f32 %v14714_v21, %v9826_v24  ;;  %v10528_v31 = vpop.f32.mrf.mxu0  ;;  %v19740_v21 = vld [vmem:[#allocation30_spill] sm:$0xff] }
 0x42a   : >> { %v10141_v18 = vpop.f32.mrf.mxu1  ;;  %v9445_v33 = vadd.f32 %v18954_v43, %v19737_v19  ;;  %v9831_v9 = vadd.f32 %v19738_v49, %v9442_v1 }
 0x42b   : >> { %10700 = vst.msk [vmem:[%s18986_s13 + $0x90] sm:$0xff] %vm273_vm0, %v10666_v12  ;;  %v10669_v63 = vmax.f32 %v10637_v40, 0.0  ;;  %v10636_v4 = vadd.f32 %v18974_v2, %v10597_v51  ;;  %v10600_v39 = vadd.f32 %v14764_v61, %v10213_v5  ;;  %v10212_v48 = vadd.f32 %v10141_v18, %v9825_v26  ;;  %v14767_v59 = vpop.f32.mrf.mxu0 }
 0x42c   : >> { %v14717_v11 = vpop.f32.mrf.mxu1  ;;  %v9444_v61 = vadd.f32 %v19740_v21, %v19739_v57 }
 0x42d   : >> { %10703 = vst.msk [vmem:[%s18986_s13 + $0xa8] sm:$0xff] %vm273_vm0, %v10669_v63  ;;  %v10668_v62 = vmax.f32 %v10636_v4, 0.0  ;;  %v10639_v30 = vadd.f32 %v18974_v2, %v10600_v39  ;;  %v10599_v13 = vadd.f32 %v10528_v31, %v10212_v48  ;;  %v10215_v35 = vadd.f32 %v14717_v11, %v9828_v36  ;;  %v10538_v32 = vpop.f32.mrf.mxu0  ;;  %v19741_v36 = vld [vmem:[#allocation71_spill] sm:$0xff] }
 0x42e   : >> { %v10151_v16 = vpop.f32.mrf.mxu1  ;;  %v9834_v56 = vadd.f32 %v19741_v36, %v9445_v33  ;;  %v19742_v48 = vld [vmem:[#allocation3_spill] sm:$0xff] }
 0x42f   : >> { %10702 = vst.msk [vmem:[%s18986_s13 + $0xa0] sm:$0xff] %vm273_vm0, %v10668_v62  ;;  %v10671_v29 = vmax.f32 %v10639_v30, 0.0  ;;  %v10638_v41 = vadd.f32 %v18974_v2, %v10599_v13  ;;  %v10602_v34 = vadd.f32 %v14767_v59, %v10215_v35  ;;  %v10214_v7 = vadd.f32 %v10151_v16, %v9827_v53  ;;  %v14770_v27 = vpop.f32.mrf.mxu0 }
 0x430   : >> { %v14720_v20 = vpop.f32.mrf.mxu1  ;;  %v9833_v28 = vadd.f32 %v19742_v48, %v9444_v61 }
 0x431   : >> { %10705 = vst.msk [vmem:[%s18986_s13 + $0xb8] sm:$0xff] %vm273_vm0, %v10671_v29  ;;  %v10670_v60 = vmax.f32 %v10638_v41, 0.0  ;;  %v10641_v45 = vadd.f32 %v18974_v2, %v10602_v34  ;;  %v10601_v24 = vadd.f32 %v10538_v32, %v10214_v7  ;;  %v10217_v38 = vadd.f32 %v14720_v20, %v9830_v58  ;;  %v10548_v14 = vpop.f32.mrf.mxu0 }
 0x432   : >> { %v10161_v25 = vpop.f32.mrf.mxu1 }
 0x433   : >> { %10704 = vst.msk [vmem:[%s18986_s13 + $0xb0] sm:$0xff] %vm273_vm0, %v10670_v60  ;;  %v10673_v3 = vmax.f32 %v10641_v45, 0.0  ;;  %v10640_v0 = vadd.f32 %v18974_v2, %v10601_v24  ;;  %v10604_v15 = vadd.f32 %v14770_v27, %v10217_v38  ;;  %v10216_v26 = vadd.f32 %v10161_v25, %v9829_v17  ;;  %v14773_v40 = vpop.f32.mrf.mxu0 }
 0x434   : >> { %v14723_v12 = vpop.f32.mrf.mxu1 }
 0x435   : >> { %10707 = vst.msk [vmem:[%s18986_s13 + $0xc8] sm:$0xff] %vm273_vm0, %v10673_v3  ;;  %v10672_v43 = vmax.f32 %v10640_v0, 0.0  ;;  %v10643_v51 = vadd.f32 %v18974_v2, %v10604_v15  ;;  %v10603_v5 = vadd.f32 %v10548_v14, %v10216_v26  ;;  %v10219_v22 = vadd.f32 %v14723_v12, %v9832_v6  ;;  %v10558_v18 = vpop.f32.mrf.mxu0 }
 0x436   : >> { %v10171_v42 = vpop.f32.mrf.mxu1 }
 0x437   : >> { %10706 = vst.msk [vmem:[%s18986_s13 + $0xc0] sm:$0xff] %vm273_vm0, %v10672_v43  ;;  %v10675_v31 = vmax.f32 %v10643_v51, 0.0  ;;  %v10642_v63 = vadd.f32 %v18974_v2, %v10603_v5  ;;  %v10606_v4 = vadd.f32 %v14773_v40, %v10219_v22  ;;  %v10218_v39 = vadd.f32 %v10171_v42, %v9831_v9  ;;  %v14776_v44 = vpop.f32.mrf.mxu0 }
 0x438   : >> { %v14726_v53 = vpop.f32.mrf.mxu1 }
 0x439   : >> { %10709 = vst.msk [vmem:[%s18986_s13 + $0xd8] sm:$0xff] %vm273_vm0, %v10675_v31  ;;  %v10674_v37 = vmax.f32 %v10642_v63, 0.0  ;;  %v10645_v52 = vadd.f32 %v18974_v2, %v10606_v4  ;;  %v10605_v11 = vadd.f32 %v10558_v18, %v10218_v39  ;;  %v10221_v59 = vadd.f32 %v14726_v53, %v9834_v56  ;;  %v10568_v58 = vpop.f32.mrf.mxu0 }
 0x43a   : >> { %v10181_v62 = vpop.f32.mrf.mxu1 }
 0x43b   : >> { %10708 = vst.msk [vmem:[%s18986_s13 + $0xd0] sm:$0xff] %vm273_vm0, %v10674_v37  ;;  %v10677_v30 = vmax.f32 %v10645_v52, 0.0  ;;  %v10644_v13 = vadd.f32 %v18974_v2, %v10605_v11  ;;  %v10608_v35 = vadd.f32 %v14776_v44, %v10221_v59  ;;  %v10220_v10 = vadd.f32 %v10181_v62, %v9833_v28 }
 0x43d   : >> { %10711 = vst.msk [vmem:[%s18986_s13 + $0xe8] sm:$0xff] %vm273_vm0, %v10677_v30  ;;  %v10676_v8 = vmax.f32 %v10644_v13, 0.0  ;;  %v10647_v54 = vadd.f32 %v18974_v2, %v10608_v35  ;;  %v10607_v23 = vadd.f32 %v10568_v58, %v10220_v10 }
 0x43f   : >> { %10710 = vst.msk [vmem:[%s18986_s13 + $0xe0] sm:$0xff] %vm273_vm0, %v10676_v8  ;;  %v10679_v16 = vmax.f32 %v10647_v54, 0.0  ;;  %v10646_v32 = vadd.f32 %v18974_v2, %v10607_v23  ;;  %200 = sbr.rel (!%p198_p7) target bundleno = 21 (0x15), region = 105 }
 0x441   : >> { %10713 = vst.msk [vmem:[%s18986_s13 + $0xf8] sm:$0xff] %vm273_vm0, %v10679_v16  ;;  %v10678_v29 = vmax.f32 %v10646_v32, 0.0 }
 0x443   : >> { %10712 = vst.msk [vmem:[%s18986_s13 + $0xf0] sm:$0xff] %vm273_vm0, %v10678_v29 }
 0x444 PF: > { %s13_s16 = sadd.s32 1, %s14871_s16   ;;  %s19743_s12 = smov %s14863_s14 }
 0x445   : > { %p10_p8 = scmp.ge.s32.totalorder %s13_s16, 6   ;;  %s19744_s13 = smov %s14867_s15 }
 0x446   : > { %s19745_s14 = smov %s19748_s17  ;;  %s19746_s15 = smov %s19752_s18 }
 0x447   :  { %12 = sbr.rel (!%p10_p8) target bundleno = 3 (0x3), region = 116 }

</bundles_post_ra>
